<compile_context>
chip_gen: v5e
topology: v5e:2x2
jax: 0.10.0
libtpu: 0.0.40
codegen_flags: <defaults>
</compile_context>

<pallas_src>
import functools

import numpy as np

import jax
import jax.numpy as jnp
from jax.experimental import pallas as pl
from jax.experimental.pallas import tpu as pltpu


# --------------------------------------------------------------------------
# Fused kernel: whole FFNv2 forward for one batch element.
# --------------------------------------------------------------------------
def _ffn_fused_kernel(x_ref, w1, b1, w2, b2, w3, b3, w4, b4,
                      o_ref, p2, p3, p4, *, D, H, W, guard_lo):
    HP = H + 2                      # padded H extent
    M = D * HP                      # accumulator rows (valid rows + H-halo)
    R = x_ref.shape[0]              # padded row extent (same for scratch)
    row0 = guard_lo + HP            # stored row of acc row m = 0 (16-aligned)

    def conv3x3x3(p_in, w_ref, b_ref, act):
        # p_in : (R, W*Cin) zero-padded activation rows (compute dtype)
        # w_ref: (9, W*Cin, W*Cout) banded weights (kw taps + W padding folded)
        # b_ref: (1, W*Cout) bias tiled across W (f32)
        lout = w_ref.shape[-1]
        acc = jnp.zeros((M, lout), jnp.float32)
        # TODO(synk): if the Mosaic lowering pops each tap's MXU result and
        # vadds it, switch to explicit MXU-side accumulation
        # (pltpu.matmul_push_rhs / matmul_acc_lhs / matmul_pop) - measure first.
        for t in range(9):                          # static unroll over (kd, kh)
            kd, kh = divmod(t, 3)
            start = guard_lo - 1 + kd * HP + kh     # contiguous row window
            slab = p_in[start:start + M, :]         # (M, W*Cin), compute dtype
            acc = acc + jnp.dot(slab, w_ref[t],
                                preferred_element_type=jnp.float32)
        acc = acc + b_ref[...]                      # f32 epilogue (v5e-friendly)
        if act == "relu":
            # Zero the H-halo rows: they become the zero padding of the next
            # layer.  hp index generated in-kernel (no mask input, no int mod).
            hp_idx = jax.lax.broadcasted_iota(
                jnp.int32, (D, HP, lout), 1).reshape(M, lout)
            valid = (hp_idx >= 1) & (hp_idx <= H)
            acc = jnp.where(valid, jnp.maximum(acc, 0.0), 0.0)
        else:
            # Final layer: halo rows / padded channels are sliced off by the
            # wrapper, so no mask needed after the sigmoid.
            acc = jax.nn.sigmoid(acc)
        return acc

    # Re-zero only the guard + depth-padding rows each grid step (22 of R
    # rows); interior rows are fully overwritten below.  Re-doing it every
    # step keeps megacore splitting of the batch axis safe.
    for p in (p2, p3, p4):
        lanes = p.shape[1]
        p[0:row0, :] = jnp.zeros((row0, lanes), p.dtype)
        p[row0 + M:R, :] = jnp.zeros((R - row0 - M, lanes), p.dtype)

    a = conv3x3x3(x_ref, w1, b1, "relu")            # (M, 16*W)
    p2[row0:row0 + M, :] = a.astype(p2.dtype)       # single cast at the store
    a = conv3x3x3(p2, w2, b2, "relu")               # (M, 32*W)
    p3[row0:row0 + M, :] = a.astype(p3.dtype)
    a = conv3x3x3(p3, w3, b3, "relu")               # (M, 16*W)
    p4[row0:row0 + M, :] = a.astype(p4.dtype)
    o_ref[...] = conv3x3x3(p4, w4, b4, "sigmoid")   # (M, 16*W) lane-dense f32


# --------------------------------------------------------------------------
# Host-side (numpy) weight re-layout, done ONCE per parameter update:
#   B[kd*3+kh, wp*Cin+ci, w*Cout+co] = W[co, ci, kd, kh, wp-w+1]  (band only)
# i.e. the kw tap and the W-axis zero padding are folded into a banded matrix
# per (kd, kh), so each layer is 9 deep-K matmuls.
# --------------------------------------------------------------------------
def _expand_conv_weights(w_oidhw, W):
    w = np.asarray(w_oidhw, np.float32)
    Cout, Cin = w.shape[:2]
    wt = np.transpose(w, (2, 3, 4, 1, 0))           # (kd, kh, kw, Cin, Cout)
    B = np.zeros((3, 3, W, Cin, W, Cout), np.float32)
    for wo in range(W):
        for kw in range(3):
            wp = wo + kw - 1
            if 0 <= wp < W:
                B[:, :, wp, :, wo, :] = wt[:, :, kw]
    return B.reshape(9, W * Cin, W * Cout)


def prepare_params(params, W, *, use_bf16=True, cout4_pad=16):
    """Banded weights + tiled biases (hoisted out of the jitted forward)."""
    cdt = jnp.bfloat16 if use_bf16 else jnp.float32
    prepped = []
    for i in range(1, 5):
        w = np.asarray(params[f"w{i}"], np.float32)
        b = np.asarray(params[f"b{i}"], np.float32)
        if i == 4 and cout4_pad > w.shape[0]:
            # Lane-dense final store: zero-pad Cout 1 -> 16 (zero filters and
            # zero bias); wrapper slices channel 0 back out.
            pad = cout4_pad - w.shape[0]
            w = np.pad(w, ((0, pad), (0, 0), (0, 0), (0, 0), (0, 0)))
            b = np.pad(b, (0, pad))
        Cout = w.shape[0]
        prepped.append(jnp.asarray(_expand_conv_weights(w, W), cdt))
        prepped.append(jnp.asarray(np.tile(b, W).reshape(1, W * Cout),
                                   jnp.float32))
    return tuple(prepped)


def ffn_v2_forward(x_ncdhw, prepped, *, use_bf16=True):
    """FFNv2 forward. x: (N, 1, D, H, W) f32 -> (N, 1, D, H, W) f32.

    `prepped` must come from prepare_params(..., use_bf16=use_bf16).
    """
    N, C0, D, H, W = x_ncdhw.shape
    assert C0 == 1, "FFNv2 expects a single input channel"
    cdt = jnp.bfloat16 if use_bf16 else jnp.float32

    HP = H + 2
    M = D * HP
    # Leading guard rows chosen so the activation-store offset row0 = guard_lo
    # + HP is a multiple of the 16-row bf16 VMEM tile; >= 1 row is required.
    guard_lo = ((-HP) % 16) or 16
    R = guard_lo + (D + 2) * HP + 2          # + trailing guard rows

    # Present the input already padded into the (R, W) row layout: D/H zero
    # halo + guard rows pre-interleaved by XLA (tiny pad/reshape), so the
    # kernel needs no scatter prologue and no p1 scratch at all.
    x4 = x_ncdhw.reshape(N, D, H, W)
    xp = jnp.pad(x4, ((0, 0), (1, 1), (1, 1), (0, 0)))
    xp = xp.reshape(N, (D + 2) * HP, W)
    xp = jnp.pad(xp, ((0, 0), (guard_lo, 2), (0, 0))).astype(cdt)   # (N, R, W)

    lout4 = prepped[6].shape[-1]             # W * 16 after Cout padding

    in_specs = [pl.BlockSpec((None, R, W), lambda n: (n, 0, 0))]
    for a in prepped:
        if a.ndim == 3:                      # banded weights (full block)
            in_specs.append(pl.BlockSpec(a.shape, lambda n: (0, 0, 0)))
        else:                                # tiled bias (full block)
            in_specs.append(pl.BlockSpec(a.shape, lambda n: (0, 0)))

    out = pl.pallas_call(
        functools.partial(_ffn_fused_kernel, D=D, H=H, W=W, guard_lo=guard_lo),
        out_shape=jax.ShapeDtypeStruct((N, M, lout4), jnp.float32),
        grid_spec=pltpu.PrefetchScalarGridSpec(
            num_scalar_prefetch=0,
            grid=(N,),                       # one batch element per grid step
            in_specs=in_specs,
            out_specs=pl.BlockSpec((None, M, lout4), lambda n: (n, 0, 0)),
            scratch_shapes=[                 # padded activations, VMEM-resident
                pltpu.VMEM((R, 16 * W), cdt),
                pltpu.VMEM((R, 32 * W), cdt),
                pltpu.VMEM((R, 16 * W), cdt),
            ],
        ),
        compiler_params=pltpu.CompilerParams(
            dimension_semantics=("parallel",)),   # v7x: batch across both TCs
    )(xp, *prepped)

    # (N, M, W*16): drop H-halo rows, keep channel 0 only, back to NCDHW.
    y = out.reshape(N, D, HP, W, lout4 // W)[:, :, 1:H + 1, :, 0]
    return y.reshape(N, 1, D, H, W)


# --------------------------------------------------------------------------
# Params + pure-JAX reference (silent correctness check)
# --------------------------------------------------------------------------
def init_params(key):
    """Deterministic init mimicking PyTorch Conv3d defaults (U(+-1/sqrt(fan_in)))."""
    shapes = [
        (16, 1, 3, 3, 3),
        (32, 16, 3, 3, 3),
        (16, 32, 3, 3, 3),
        (1, 16, 3, 3, 3),
    ]
    params = {}
    for i, shp in enumerate(shapes, start=1):
        key, kw, kb = jax.random.split(key, 3)
        fan_in = shp[1] * shp[2] * shp[3] * shp[4]
        bound = 1.0 / float(np.sqrt(fan_in))
        params[f"w{i}"] = jax.random.uniform(kw, shp, jnp.float32, -bound, bound)
        params[f"b{i}"] = jax.random.uniform(kb, (shp[0],), jnp.float32, -bound, bound)
    return params


def ffn_v2_ref(x, params):
    def conv(x, w, b):
        y = jax.lax.conv_general_dilated(
            x, w, window_strides=(1, 1, 1), padding=[(1, 1)] * 3,
            dimension_numbers=("NCDHW", "OIDHW", "NCDHW"))
        return y + b.reshape(1, -1, 1, 1, 1)

    x = jax.nn.relu(conv(x, params["w1"], params["b1"]))
    x = jax.nn.relu(conv(x, params["w2"], params["b2"]))
    x = jax.nn.relu(conv(x, params["w3"], params["b3"]))
    x = jax.nn.sigmoid(conv(x, params["w4"], params["b4"]))
    return x


if __name__ == "__main__":
    key = jax.random.PRNGKey(0)
    key, kx = jax.random.split(key)
    # NCDHW, single input channel as Conv3d(1, 16, ...) requires.
    x = jax.random.normal(kx, (2, 1, 8, 8, 8), jnp.float32)
    params = init_params(key)

    ref = ffn_v2_ref(x, params)

    # Exact-semantics path (f32 MXU operands, f32 scratch) and fast path
    # (bf16 MXU operands + bf16 activation scratch, f32 accumulation).
    for use_bf16, tol in ((False, 1e-4), (True, 2e-2)):
        prepped = prepare_params(params, W=x.shape[-1], use_bf16=use_bf16)
        fwd = jax.jit(functools.partial(ffn_v2_forward, use_bf16=use_bf16))
        out = jax.block_until_ready(fwd(x, prepped))
        assert out.shape == (2, 1, 8, 8, 8)
        assert jnp.allclose(out, ref, rtol=tol, atol=tol), (
            f"use_bf16={use_bf16} max err "
            f"{float(jnp.max(jnp.abs(out - ref)))}")

    print("KERNEL_OK")
</pallas_src>

<mosaic_0001>
module attributes {stable_mosaic.version = 11 : i64} {
  func.func @_ffn_fused_kernel(%arg0: i32, %arg1: memref<1x108x8xf32, #tpu.memory_space<vmem>>, %arg2: memref<9x8x128xf32, #tpu.memory_space<vmem>>, %arg3: memref<1x128xf32, #tpu.memory_space<vmem>>, %arg4: memref<9x128x256xf32, #tpu.memory_space<vmem>>, %arg5: memref<1x256xf32, #tpu.memory_space<vmem>>, %arg6: memref<9x256x128xf32, #tpu.memory_space<vmem>>, %arg7: memref<1x128xf32, #tpu.memory_space<vmem>>, %arg8: memref<9x128x128xf32, #tpu.memory_space<vmem>>, %arg9: memref<1x128xf32, #tpu.memory_space<vmem>>, %arg10: memref<1x80x128xf32, #tpu.memory_space<vmem>>, %arg11: memref<108x128xf32, #tpu.memory_space<vmem>>, %arg12: memref<108x256xf32, #tpu.memory_space<vmem>>, %arg13: memref<108x128xf32, #tpu.memory_space<vmem>>) attributes {dimension_semantics = [#tpu.dimension_semantics<parallel>], iteration_bounds = array<i64: 2>, scalar_prefetch = 0 : i64, scratch_operands = 3 : i64, tpu.core_type = #tpu.core_type<tc>, window_params = [{transform_indices = @transform_0, window_bounds = array<i64: 1, 108, 8>}, {pipeline_mode = #tpu.pipeline_mode<synchronous>, transform_indices = @transform_1, window_bounds = array<i64: 9, 8, 128>}, {pipeline_mode = #tpu.pipeline_mode<synchronous>, transform_indices = @transform_2, window_bounds = array<i64: 1, 128>}, {pipeline_mode = #tpu.pipeline_mode<synchronous>, transform_indices = @transform_3, window_bounds = array<i64: 9, 128, 256>}, {pipeline_mode = #tpu.pipeline_mode<synchronous>, transform_indices = @transform_4, window_bounds = array<i64: 1, 256>}, {pipeline_mode = #tpu.pipeline_mode<synchronous>, transform_indices = @transform_5, window_bounds = array<i64: 9, 256, 128>}, {pipeline_mode = #tpu.pipeline_mode<synchronous>, transform_indices = @transform_6, window_bounds = array<i64: 1, 128>}, {pipeline_mode = #tpu.pipeline_mode<synchronous>, transform_indices = @transform_7, window_bounds = array<i64: 9, 128, 128>}, {pipeline_mode = #tpu.pipeline_mode<synchronous>, transform_indices = @transform_8, window_bounds = array<i64: 1, 128>}, {transform_indices = @transform_9, window_bounds = array<i64: 1, 80, 128>}]} {
    %cst = arith.constant 0.000000e+00 : f32
    %0 = vector.broadcast %cst : f32 to vector<16x128xf32>
    %c0 = arith.constant 0 : index
    %c0_0 = arith.constant 0 : index
    %1 = vector.load %arg11[%c0, %c0_0] : memref<108x128xf32, #tpu.memory_space<vmem>>, vector<16x128xf32>
    tpu.vector_store %arg11[%c0, %c0_0], %0 {strides = array<i32>} : memref<108x128xf32, #tpu.memory_space<vmem>>, vector<16x128xf32>,
    %cst_1 = arith.constant 0.000000e+00 : f32
    %2 = vector.broadcast %cst_1 : f32 to vector<12x128xf32>
    %c96 = arith.constant 96 : index
    %c0_2 = arith.constant 0 : index
    %3 = vector.load %arg11[%c96, %c0_2] : memref<108x128xf32, #tpu.memory_space<vmem>>, vector<12x128xf32>
    tpu.vector_store %arg11[%c96, %c0_2], %2 {strides = array<i32>} : memref<108x128xf32, #tpu.memory_space<vmem>>, vector<12x128xf32>,
    %cst_3 = arith.constant 0.000000e+00 : f32
    %4 = vector.broadcast %cst_3 : f32 to vector<16x256xf32>
    %c0_4 = arith.constant 0 : index
    %c0_5 = arith.constant 0 : index
    %5 = vector.load %arg12[%c0_4, %c0_5] : memref<108x256xf32, #tpu.memory_space<vmem>>, vector<16x256xf32>
    tpu.vector_store %arg12[%c0_4, %c0_5], %4 {strides = array<i32>} : memref<108x256xf32, #tpu.memory_space<vmem>>, vector<16x256xf32>,
    %cst_6 = arith.constant 0.000000e+00 : f32
    %6 = vector.broadcast %cst_6 : f32 to vector<12x256xf32>
    %c96_7 = arith.constant 96 : index
    %c0_8 = arith.constant 0 : index
    %7 = vector.load %arg12[%c96_7, %c0_8] : memref<108x256xf32, #tpu.memory_space<vmem>>, vector<12x256xf32>
    tpu.vector_store %arg12[%c96_7, %c0_8], %6 {strides = array<i32>} : memref<108x256xf32, #tpu.memory_space<vmem>>, vector<12x256xf32>,
    %cst_9 = arith.constant 0.000000e+00 : f32
    %8 = vector.broadcast %cst_9 : f32 to vector<16x128xf32>
    %c0_10 = arith.constant 0 : index
    %c0_11 = arith.constant 0 : index
    %9 = vector.load %arg13[%c0_10, %c0_11] : memref<108x128xf32, #tpu.memory_space<vmem>>, vector<16x128xf32>
    tpu.vector_store %arg13[%c0_10, %c0_11], %8 {strides = array<i32>} : memref<108x128xf32, #tpu.memory_space<vmem>>, vector<16x128xf32>,
    %cst_12 = arith.constant 0.000000e+00 : f32
    %10 = vector.broadcast %cst_12 : f32 to vector<12x128xf32>
    %c96_13 = arith.constant 96 : index
    %c0_14 = arith.constant 0 : index
    %11 = vector.load %arg13[%c96_13, %c0_14] : memref<108x128xf32, #tpu.memory_space<vmem>>, vector<12x128xf32>
    tpu.vector_store %arg13[%c96_13, %c0_14], %10 {strides = array<i32>} : memref<108x128xf32, #tpu.memory_space<vmem>>, vector<12x128xf32>,
    %cst_15 = arith.constant 0.000000e+00 : f32
    %12 = vector.broadcast %cst_15 : f32 to vector<80x128xf32>
    %c0_16 = arith.constant 0 : index
    %c5 = arith.constant 5 : index
    %c0_17 = arith.constant 0 : index
    %13 = vector.load %arg1[%c0_16, %c5, %c0_17] : memref<1x108x8xf32, #tpu.memory_space<vmem>>, vector<1x80x8xf32>
    %14 = vector.shape_cast %13 : vector<1x80x8xf32> to vector<80x8xf32>
    %c0_18 = arith.constant 0 : index
    %c0_19 = arith.constant 0 : index
    %c0_20 = arith.constant 0 : index
    %15 = vector.load %arg2[%c0_18, %c0_19, %c0_20] : memref<9x8x128xf32, #tpu.memory_space<vmem>>, vector<1x8x128xf32>
    %16 = vector.shape_cast %15 : vector<1x8x128xf32> to vector<8x128xf32>
    %cst_21 = arith.constant dense<0.000000e+00> : vector<80x128xf32>
    %17 = tpu.matmul %14, %16, %cst_21 {dimension_numbers = #tpu.dot_dimension_numbers<[1], [0], [0], [1], [0, 0, 1, 1], [], []>} : vector<80x8xf32>, vector<8x128xf32>, vector<80x128xf32> -> vector<80x128xf32>
    %18 = arith.addf %12, %17 : vector<80x128xf32>
    %c0_22 = arith.constant 0 : index
    %c6 = arith.constant 6 : index
    %c0_23 = arith.constant 0 : index
    %19 = vector.load %arg1[%c0_22, %c6, %c0_23] : memref<1x108x8xf32, #tpu.memory_space<vmem>>, vector<1x80x8xf32>
    %20 = vector.shape_cast %19 : vector<1x80x8xf32> to vector<80x8xf32>
    %c1 = arith.constant 1 : index
    %c0_24 = arith.constant 0 : index
    %c0_25 = arith.constant 0 : index
    %21 = vector.load %arg2[%c1, %c0_24, %c0_25] : memref<9x8x128xf32, #tpu.memory_space<vmem>>, vector<1x8x128xf32>
    %22 = vector.shape_cast %21 : vector<1x8x128xf32> to vector<8x128xf32>
    %cst_26 = arith.constant dense<0.000000e+00> : vector<80x128xf32>
    %23 = tpu.matmul %20, %22, %cst_26 {dimension_numbers = #tpu.dot_dimension_numbers<[1], [0], [0], [1], [0, 0, 1, 1], [], []>} : vector<80x8xf32>, vector<8x128xf32>, vector<80x128xf32> -> vector<80x128xf32>
    %24 = arith.addf %18, %23 : vector<80x128xf32>
    %c0_27 = arith.constant 0 : index
    %c7 = arith.constant 7 : index
    %c0_28 = arith.constant 0 : index
    %25 = vector.load %arg1[%c0_27, %c7, %c0_28] : memref<1x108x8xf32, #tpu.memory_space<vmem>>, vector<1x80x8xf32>
    %26 = vector.shape_cast %25 : vector<1x80x8xf32> to vector<80x8xf32>
    %c2 = arith.constant 2 : index
    %c0_29 = arith.constant 0 : index
    %c0_30 = arith.constant 0 : index
    %27 = vector.load %arg2[%c2, %c0_29, %c0_30] : memref<9x8x128xf32, #tpu.memory_space<vmem>>, vector<1x8x128xf32>
    %28 = vector.shape_cast %27 : vector<1x8x128xf32> to vector<8x128xf32>
    %cst_31 = arith.constant dense<0.000000e+00> : vector<80x128xf32>
    %29 = tpu.matmul %26, %28, %cst_31 {dimension_numbers = #tpu.dot_dimension_numbers<[1], [0], [0], [1], [0, 0, 1, 1], [], []>} : vector<80x8xf32>, vector<8x128xf32>, vector<80x128xf32> -> vector<80x128xf32>
    %30 = arith.addf %24, %29 : vector<80x128xf32>
    %c0_32 = arith.constant 0 : index
    %c15 = arith.constant 15 : index
    %c0_33 = arith.constant 0 : index
    %31 = vector.load %arg1[%c0_32, %c15, %c0_33] : memref<1x108x8xf32, #tpu.memory_space<vmem>>, vector<1x80x8xf32>
    %32 = vector.shape_cast %31 : vector<1x80x8xf32> to vector<80x8xf32>
    %c3 = arith.constant 3 : index
    %c0_34 = arith.constant 0 : index
    %c0_35 = arith.constant 0 : index
    %33 = vector.load %arg2[%c3, %c0_34, %c0_35] : memref<9x8x128xf32, #tpu.memory_space<vmem>>, vector<1x8x128xf32>
    %34 = vector.shape_cast %33 : vector<1x8x128xf32> to vector<8x128xf32>
    %cst_36 = arith.constant dense<0.000000e+00> : vector<80x128xf32>
    %35 = tpu.matmul %32, %34, %cst_36 {dimension_numbers = #tpu.dot_dimension_numbers<[1], [0], [0], [1], [0, 0, 1, 1], [], []>} : vector<80x8xf32>, vector<8x128xf32>, vector<80x128xf32> -> vector<80x128xf32>
    %36 = arith.addf %30, %35 : vector<80x128xf32>
    %c0_37 = arith.constant 0 : index
    %c16 = arith.constant 16 : index
    %c0_38 = arith.constant 0 : index
    %37 = vector.load %arg1[%c0_37, %c16, %c0_38] : memref<1x108x8xf32, #tpu.memory_space<vmem>>, vector<1x80x8xf32>
    %38 = vector.shape_cast %37 : vector<1x80x8xf32> to vector<80x8xf32>
    %c4 = arith.constant 4 : index
    %c0_39 = arith.constant 0 : index
    %c0_40 = arith.constant 0 : index
    %39 = vector.load %arg2[%c4, %c0_39, %c0_40] : memref<9x8x128xf32, #tpu.memory_space<vmem>>, vector<1x8x128xf32>
    %40 = vector.shape_cast %39 : vector<1x8x128xf32> to vector<8x128xf32>
    %cst_41 = arith.constant dense<0.000000e+00> : vector<80x128xf32>
    %41 = tpu.matmul %38, %40, %cst_41 {dimension_numbers = #tpu.dot_dimension_numbers<[1], [0], [0], [1], [0, 0, 1, 1], [], []>} : vector<80x8xf32>, vector<8x128xf32>, vector<80x128xf32> -> vector<80x128xf32>
    %42 = arith.addf %36, %41 : vector<80x128xf32>
    %c0_42 = arith.constant 0 : index
    %c17 = arith.constant 17 : index
    %c0_43 = arith.constant 0 : index
    %43 = vector.load %arg1[%c0_42, %c17, %c0_43] : memref<1x108x8xf32, #tpu.memory_space<vmem>>, vector<1x80x8xf32>
    %44 = vector.shape_cast %43 : vector<1x80x8xf32> to vector<80x8xf32>
    %c5_44 = arith.constant 5 : index
    %c0_45 = arith.constant 0 : index
    %c0_46 = arith.constant 0 : index
    %45 = vector.load %arg2[%c5_44, %c0_45, %c0_46] : memref<9x8x128xf32, #tpu.memory_space<vmem>>, vector<1x8x128xf32>
    %46 = vector.shape_cast %45 : vector<1x8x128xf32> to vector<8x128xf32>
    %cst_47 = arith.constant dense<0.000000e+00> : vector<80x128xf32>
    %47 = tpu.matmul %44, %46, %cst_47 {dimension_numbers = #tpu.dot_dimension_numbers<[1], [0], [0], [1], [0, 0, 1, 1], [], []>} : vector<80x8xf32>, vector<8x128xf32>, vector<80x128xf32> -> vector<80x128xf32>
    %48 = arith.addf %42, %47 : vector<80x128xf32>
    %c0_48 = arith.constant 0 : index
    %c25 = arith.constant 25 : index
    %c0_49 = arith.constant 0 : index
    %49 = vector.load %arg1[%c0_48, %c25, %c0_49] : memref<1x108x8xf32, #tpu.memory_space<vmem>>, vector<1x80x8xf32>
    %50 = vector.shape_cast %49 : vector<1x80x8xf32> to vector<80x8xf32>
    %c6_50 = arith.constant 6 : index
    %c0_51 = arith.constant 0 : index
    %c0_52 = arith.constant 0 : index
    %51 = vector.load %arg2[%c6_50, %c0_51, %c0_52] : memref<9x8x128xf32, #tpu.memory_space<vmem>>, vector<1x8x128xf32>
    %52 = vector.shape_cast %51 : vector<1x8x128xf32> to vector<8x128xf32>
    %cst_53 = arith.constant dense<0.000000e+00> : vector<80x128xf32>
    %53 = tpu.matmul %50, %52, %cst_53 {dimension_numbers = #tpu.dot_dimension_numbers<[1], [0], [0], [1], [0, 0, 1, 1], [], []>} : vector<80x8xf32>, vector<8x128xf32>, vector<80x128xf32> -> vector<80x128xf32>
    %54 = arith.addf %48, %53 : vector<80x128xf32>
    %c0_54 = arith.constant 0 : index
    %c26 = arith.constant 26 : index
    %c0_55 = arith.constant 0 : index
    %55 = vector.load %arg1[%c0_54, %c26, %c0_55] : memref<1x108x8xf32, #tpu.memory_space<vmem>>, vector<1x80x8xf32>
    %56 = vector.shape_cast %55 : vector<1x80x8xf32> to vector<80x8xf32>
    %c7_56 = arith.constant 7 : index
    %c0_57 = arith.constant 0 : index
    %c0_58 = arith.constant 0 : index
    %57 = vector.load %arg2[%c7_56, %c0_57, %c0_58] : memref<9x8x128xf32, #tpu.memory_space<vmem>>, vector<1x8x128xf32>
    %58 = vector.shape_cast %57 : vector<1x8x128xf32> to vector<8x128xf32>
    %cst_59 = arith.constant dense<0.000000e+00> : vector<80x128xf32>
    %59 = tpu.matmul %56, %58, %cst_59 {dimension_numbers = #tpu.dot_dimension_numbers<[1], [0], [0], [1], [0, 0, 1, 1], [], []>} : vector<80x8xf32>, vector<8x128xf32>, vector<80x128xf32> -> vector<80x128xf32>
    %60 = arith.addf %54, %59 : vector<80x128xf32>
    %c0_60 = arith.constant 0 : index
    %c27 = arith.constant 27 : index
    %c0_61 = arith.constant 0 : index
    %61 = vector.load %arg1[%c0_60, %c27, %c0_61] : memref<1x108x8xf32, #tpu.memory_space<vmem>>, vector<1x80x8xf32>
    %62 = vector.shape_cast %61 : vector<1x80x8xf32> to vector<80x8xf32>
    %c8 = arith.constant 8 : index
    %c0_62 = arith.constant 0 : index
    %c0_63 = arith.constant 0 : index
    %63 = vector.load %arg2[%c8, %c0_62, %c0_63] : memref<9x8x128xf32, #tpu.memory_space<vmem>>, vector<1x8x128xf32>
    %64 = vector.shape_cast %63 : vector<1x8x128xf32> to vector<8x128xf32>
    %cst_64 = arith.constant dense<0.000000e+00> : vector<80x128xf32>
    %65 = tpu.matmul %62, %64, %cst_64 {dimension_numbers = #tpu.dot_dimension_numbers<[1], [0], [0], [1], [0, 0, 1, 1], [], []>} : vector<80x8xf32>, vector<8x128xf32>, vector<80x128xf32> -> vector<80x128xf32>
    %66 = arith.addf %60, %65 : vector<80x128xf32>
    %c0_65 = arith.constant 0 : index
    %c0_66 = arith.constant 0 : index
    %67 = vector.load %arg3[%c0_65, %c0_66] : memref<1x128xf32, #tpu.memory_space<vmem>>, vector<1x128xf32>
    %68 = vector.broadcast %67 : vector<1x128xf32> to vector<80x128xf32>
    %69 = arith.addf %66, %68 : vector<80x128xf32>
    %70 = tpu.iota {dimensions = array<i32: 1>} : vector<8x10x128xi32>
    %71 = vector.shape_cast %70 : vector<8x10x128xi32> to vector<80x128xi32>
    %c1_i32 = arith.constant 1 : i32
    %72 = vector.broadcast %c1_i32 : i32 to vector<80x128xi32>
    %73 = arith.cmpi sge, %71, %72 : vector<80x128xi32>
    %c8_i32 = arith.constant 8 : i32
    %74 = vector.broadcast %c8_i32 : i32 to vector<80x128xi32>
    %75 = arith.cmpi sle, %71, %74 : vector<80x128xi32>
    %76 = arith.andi %73, %75 : vector<80x128xi1>
    %cst_67 = arith.constant 0.000000e+00 : f32
    %77 = vector.broadcast %cst_67 : f32 to vector<80x128xf32>
    %78 = arith.maximumf %69, %77 : vector<80x128xf32>
    %cst_68 = arith.constant 0.000000e+00 : f32
    %79 = vector.broadcast %cst_68 : f32 to vector<80x128xf32>
    %80 = arith.select %76, %78, %79 : vector<80x128xi1>, vector<80x128xf32>
    %c16_69 = arith.constant 16 : index
    %c0_70 = arith.constant 0 : index
    %81 = vector.load %arg11[%c16_69, %c0_70] : memref<108x128xf32, #tpu.memory_space<vmem>>, vector<80x128xf32>
    tpu.vector_store %arg11[%c16_69, %c0_70], %80 {strides = array<i32>} : memref<108x128xf32, #tpu.memory_space<vmem>>, vector<80x128xf32>,
    %cst_71 = arith.constant 0.000000e+00 : f32
    %82 = vector.broadcast %cst_71 : f32 to vector<80x256xf32>
    %c5_72 = arith.constant 5 : index
    %c0_73 = arith.constant 0 : index
    %83 = vector.load %arg11[%c5_72, %c0_73] : memref<108x128xf32, #tpu.memory_space<vmem>>, vector<80x128xf32>
    %c0_74 = arith.constant 0 : index
    %c0_75 = arith.constant 0 : index
    %c0_76 = arith.constant 0 : index
    %84 = vector.load %arg4[%c0_74, %c0_75, %c0_76] : memref<9x128x256xf32, #tpu.memory_space<vmem>>, vector<1x128x256xf32>
    %85 = vector.shape_cast %84 : vector<1x128x256xf32> to vector<128x256xf32>
    %cst_77 = arith.constant dense<0.000000e+00> : vector<80x256xf32>
    %86 = tpu.matmul %83, %85, %cst_77 {dimension_numbers = #tpu.dot_dimension_numbers<[1], [0], [0], [1], [0, 0, 1, 1], [], []>} : vector<80x128xf32>, vector<128x256xf32>, vector<80x256xf32> -> vector<80x256xf32>
    %87 = arith.addf %82, %86 : vector<80x256xf32>
    %c6_78 = arith.constant 6 : index
    %c0_79 = arith.constant 0 : index
    %88 = vector.load %arg11[%c6_78, %c0_79] : memref<108x128xf32, #tpu.memory_space<vmem>>, vector<80x128xf32>
    %c1_80 = arith.constant 1 : index
    %c0_81 = arith.constant 0 : index
    %c0_82 = arith.constant 0 : index
    %89 = vector.load %arg4[%c1_80, %c0_81, %c0_82] : memref<9x128x256xf32, #tpu.memory_space<vmem>>, vector<1x128x256xf32>
    %90 = vector.shape_cast %89 : vector<1x128x256xf32> to vector<128x256xf32>
    %cst_83 = arith.constant dense<0.000000e+00> : vector<80x256xf32>
    %91 = tpu.matmul %88, %90, %cst_83 {dimension_numbers = #tpu.dot_dimension_numbers<[1], [0], [0], [1], [0, 0, 1, 1], [], []>} : vector<80x128xf32>, vector<128x256xf32>, vector<80x256xf32> -> vector<80x256xf32>
    %92 = arith.addf %87, %91 : vector<80x256xf32>
    %c7_84 = arith.constant 7 : index
    %c0_85 = arith.constant 0 : index
    %93 = vector.load %arg11[%c7_84, %c0_85] : memref<108x128xf32, #tpu.memory_space<vmem>>, vector<80x128xf32>
    %c2_86 = arith.constant 2 : index
    %c0_87 = arith.constant 0 : index
    %c0_88 = arith.constant 0 : index
    %94 = vector.load %arg4[%c2_86, %c0_87, %c0_88] : memref<9x128x256xf32, #tpu.memory_space<vmem>>, vector<1x128x256xf32>
    %95 = vector.shape_cast %94 : vector<1x128x256xf32> to vector<128x256xf32>
    %cst_89 = arith.constant dense<0.000000e+00> : vector<80x256xf32>
    %96 = tpu.matmul %93, %95, %cst_89 {dimension_numbers = #tpu.dot_dimension_numbers<[1], [0], [0], [1], [0, 0, 1, 1], [], []>} : vector<80x128xf32>, vector<128x256xf32>, vector<80x256xf32> -> vector<80x256xf32>
    %97 = arith.addf %92, %96 : vector<80x256xf32>
    %c15_90 = arith.constant 15 : index
    %c0_91 = arith.constant 0 : index
    %98 = vector.load %arg11[%c15_90, %c0_91] : memref<108x128xf32, #tpu.memory_space<vmem>>, vector<80x128xf32>
    %c3_92 = arith.constant 3 : index
    %c0_93 = arith.constant 0 : index
    %c0_94 = arith.constant 0 : index
    %99 = vector.load %arg4[%c3_92, %c0_93, %c0_94] : memref<9x128x256xf32, #tpu.memory_space<vmem>>, vector<1x128x256xf32>
    %100 = vector.shape_cast %99 : vector<1x128x256xf32> to vector<128x256xf32>
    %cst_95 = arith.constant dense<0.000000e+00> : vector<80x256xf32>
    %101 = tpu.matmul %98, %100, %cst_95 {dimension_numbers = #tpu.dot_dimension_numbers<[1], [0], [0], [1], [0, 0, 1, 1], [], []>} : vector<80x128xf32>, vector<128x256xf32>, vector<80x256xf32> -> vector<80x256xf32>
    %102 = arith.addf %97, %101 : vector<80x256xf32>
    %c16_96 = arith.constant 16 : index
    %c0_97 = arith.constant 0 : index
    %103 = vector.load %arg11[%c16_96, %c0_97] : memref<108x128xf32, #tpu.memory_space<vmem>>, vector<80x128xf32>
    %c4_98 = arith.constant 4 : index
    %c0_99 = arith.constant 0 : index
    %c0_100 = arith.constant 0 : index
    %104 = vector.load %arg4[%c4_98, %c0_99, %c0_100] : memref<9x128x256xf32, #tpu.memory_space<vmem>>, vector<1x128x256xf32>
    %105 = vector.shape_cast %104 : vector<1x128x256xf32> to vector<128x256xf32>
    %cst_101 = arith.constant dense<0.000000e+00> : vector<80x256xf32>
    %106 = tpu.matmul %103, %105, %cst_101 {dimension_numbers = #tpu.dot_dimension_numbers<[1], [0], [0], [1], [0, 0, 1, 1], [], []>} : vector<80x128xf32>, vector<128x256xf32>, vector<80x256xf32> -> vector<80x256xf32>
    %107 = arith.addf %102, %106 : vector<80x256xf32>
    %c17_102 = arith.constant 17 : index
    %c0_103 = arith.constant 0 : index
    %108 = vector.load %arg11[%c17_102, %c0_103] : memref<108x128xf32, #tpu.memory_space<vmem>>, vector<80x128xf32>
    %c5_104 = arith.constant 5 : index
    %c0_105 = arith.constant 0 : index
    %c0_106 = arith.constant 0 : index
    %109 = vector.load %arg4[%c5_104, %c0_105, %c0_106] : memref<9x128x256xf32, #tpu.memory_space<vmem>>, vector<1x128x256xf32>
    %110 = vector.shape_cast %109 : vector<1x128x256xf32> to vector<128x256xf32>
    %cst_107 = arith.constant dense<0.000000e+00> : vector<80x256xf32>
    %111 = tpu.matmul %108, %110, %cst_107 {dimension_numbers = #tpu.dot_dimension_numbers<[1], [0], [0], [1], [0, 0, 1, 1], [], []>} : vector<80x128xf32>, vector<128x256xf32>, vector<80x256xf32> -> vector<80x256xf32>
    %112 = arith.addf %107, %111 : vector<80x256xf32>
    %c25_108 = arith.constant 25 : index
    %c0_109 = arith.constant 0 : index
    %113 = vector.load %arg11[%c25_108, %c0_109] : memref<108x128xf32, #tpu.memory_space<vmem>>, vector<80x128xf32>
    %c6_110 = arith.constant 6 : index
    %c0_111 = arith.constant 0 : index
    %c0_112 = arith.constant 0 : index
    %114 = vector.load %arg4[%c6_110, %c0_111, %c0_112] : memref<9x128x256xf32, #tpu.memory_space<vmem>>, vector<1x128x256xf32>
    %115 = vector.shape_cast %114 : vector<1x128x256xf32> to vector<128x256xf32>
    %cst_113 = arith.constant dense<0.000000e+00> : vector<80x256xf32>
    %116 = tpu.matmul %113, %115, %cst_113 {dimension_numbers = #tpu.dot_dimension_numbers<[1], [0], [0], [1], [0, 0, 1, 1], [], []>} : vector<80x128xf32>, vector<128x256xf32>, vector<80x256xf32> -> vector<80x256xf32>
    %117 = arith.addf %112, %116 : vector<80x256xf32>
    %c26_114 = arith.constant 26 : index
    %c0_115 = arith.constant 0 : index
    %118 = vector.load %arg11[%c26_114, %c0_115] : memref<108x128xf32, #tpu.memory_space<vmem>>, vector<80x128xf32>
    %c7_116 = arith.constant 7 : index
    %c0_117 = arith.constant 0 : index
    %c0_118 = arith.constant 0 : index
    %119 = vector.load %arg4[%c7_116, %c0_117, %c0_118] : memref<9x128x256xf32, #tpu.memory_space<vmem>>, vector<1x128x256xf32>
    %120 = vector.shape_cast %119 : vector<1x128x256xf32> to vector<128x256xf32>
    %cst_119 = arith.constant dense<0.000000e+00> : vector<80x256xf32>
    %121 = tpu.matmul %118, %120, %cst_119 {dimension_numbers = #tpu.dot_dimension_numbers<[1], [0], [0], [1], [0, 0, 1, 1], [], []>} : vector<80x128xf32>, vector<128x256xf32>, vector<80x256xf32> -> vector<80x256xf32>
    %122 = arith.addf %117, %121 : vector<80x256xf32>
    %c27_120 = arith.constant 27 : index
    %c0_121 = arith.constant 0 : index
    %123 = vector.load %arg11[%c27_120, %c0_121] : memref<108x128xf32, #tpu.memory_space<vmem>>, vector<80x128xf32>
    %c8_122 = arith.constant 8 : index
    %c0_123 = arith.constant 0 : index
    %c0_124 = arith.constant 0 : index
    %124 = vector.load %arg4[%c8_122, %c0_123, %c0_124] : memref<9x128x256xf32, #tpu.memory_space<vmem>>, vector<1x128x256xf32>
    %125 = vector.shape_cast %124 : vector<1x128x256xf32> to vector<128x256xf32>
    %cst_125 = arith.constant dense<0.000000e+00> : vector<80x256xf32>
    %126 = tpu.matmul %123, %125, %cst_125 {dimension_numbers = #tpu.dot_dimension_numbers<[1], [0], [0], [1], [0, 0, 1, 1], [], []>} : vector<80x128xf32>, vector<128x256xf32>, vector<80x256xf32> -> vector<80x256xf32>
    %127 = arith.addf %122, %126 : vector<80x256xf32>
    %c0_126 = arith.constant 0 : index
    %c0_127 = arith.constant 0 : index
    %128 = vector.load %arg5[%c0_126, %c0_127] : memref<1x256xf32, #tpu.memory_space<vmem>>, vector<1x256xf32>
    %129 = vector.broadcast %128 : vector<1x256xf32> to vector<80x256xf32>
    %130 = arith.addf %127, %129 : vector<80x256xf32>
    %131 = tpu.iota {dimensions = array<i32: 1>} : vector<8x10x256xi32>
    %132 = vector.shape_cast %131 : vector<8x10x256xi32> to vector<80x256xi32>
    %c1_i32_128 = arith.constant 1 : i32
    %133 = vector.broadcast %c1_i32_128 : i32 to vector<80x256xi32>
    %134 = arith.cmpi sge, %132, %133 : vector<80x256xi32>
    %c8_i32_129 = arith.constant 8 : i32
    %135 = vector.broadcast %c8_i32_129 : i32 to vector<80x256xi32>
    %136 = arith.cmpi sle, %132, %135 : vector<80x256xi32>
    %137 = arith.andi %134, %136 : vector<80x256xi1>
    %cst_130 = arith.constant 0.000000e+00 : f32
    %138 = vector.broadcast %cst_130 : f32 to vector<80x256xf32>
    %139 = arith.maximumf %130, %138 : vector<80x256xf32>
    %cst_131 = arith.constant 0.000000e+00 : f32
    %140 = vector.broadcast %cst_131 : f32 to vector<80x256xf32>
    %141 = arith.select %137, %139, %140 : vector<80x256xi1>, vector<80x256xf32>
    %c16_132 = arith.constant 16 : index
    %c0_133 = arith.constant 0 : index
    %142 = vector.load %arg12[%c16_132, %c0_133] : memref<108x256xf32, #tpu.memory_space<vmem>>, vector<80x256xf32>
    tpu.vector_store %arg12[%c16_132, %c0_133], %141 {strides = array<i32>} : memref<108x256xf32, #tpu.memory_space<vmem>>, vector<80x256xf32>,
    %cst_134 = arith.constant 0.000000e+00 : f32
    %143 = vector.broadcast %cst_134 : f32 to vector<80x128xf32>
    %c5_135 = arith.constant 5 : index
    %c0_136 = arith.constant 0 : index
    %144 = vector.load %arg12[%c5_135, %c0_136] : memref<108x256xf32, #tpu.memory_space<vmem>>, vector<80x256xf32>
    %c0_137 = arith.constant 0 : index
    %c0_138 = arith.constant 0 : index
    %c0_139 = arith.constant 0 : index
    %145 = vector.load %arg6[%c0_137, %c0_138, %c0_139] : memref<9x256x128xf32, #tpu.memory_space<vmem>>, vector<1x256x128xf32>
    %146 = vector.shape_cast %145 : vector<1x256x128xf32> to vector<256x128xf32>
    %cst_140 = arith.constant dense<0.000000e+00> : vector<80x128xf32>
    %147 = tpu.matmul %144, %146, %cst_140 {dimension_numbers = #tpu.dot_dimension_numbers<[1], [0], [0], [1], [0, 0, 1, 1], [], []>} : vector<80x256xf32>, vector<256x128xf32>, vector<80x128xf32> -> vector<80x128xf32>
    %148 = arith.addf %143, %147 : vector<80x128xf32>
    %c6_141 = arith.constant 6 : index
    %c0_142 = arith.constant 0 : index
    %149 = vector.load %arg12[%c6_141, %c0_142] : memref<108x256xf32, #tpu.memory_space<vmem>>, vector<80x256xf32>
    %c1_143 = arith.constant 1 : index
    %c0_144 = arith.constant 0 : index
    %c0_145 = arith.constant 0 : index
    %150 = vector.load %arg6[%c1_143, %c0_144, %c0_145] : memref<9x256x128xf32, #tpu.memory_space<vmem>>, vector<1x256x128xf32>
    %151 = vector.shape_cast %150 : vector<1x256x128xf32> to vector<256x128xf32>
    %cst_146 = arith.constant dense<0.000000e+00> : vector<80x128xf32>
    %152 = tpu.matmul %149, %151, %cst_146 {dimension_numbers = #tpu.dot_dimension_numbers<[1], [0], [0], [1], [0, 0, 1, 1], [], []>} : vector<80x256xf32>, vector<256x128xf32>, vector<80x128xf32> -> vector<80x128xf32>
    %153 = arith.addf %148, %152 : vector<80x128xf32>
    %c7_147 = arith.constant 7 : index
    %c0_148 = arith.constant 0 : index
    %154 = vector.load %arg12[%c7_147, %c0_148] : memref<108x256xf32, #tpu.memory_space<vmem>>, vector<80x256xf32>
    %c2_149 = arith.constant 2 : index
    %c0_150 = arith.constant 0 : index
    %c0_151 = arith.constant 0 : index
    %155 = vector.load %arg6[%c2_149, %c0_150, %c0_151] : memref<9x256x128xf32, #tpu.memory_space<vmem>>, vector<1x256x128xf32>
    %156 = vector.shape_cast %155 : vector<1x256x128xf32> to vector<256x128xf32>
    %cst_152 = arith.constant dense<0.000000e+00> : vector<80x128xf32>
    %157 = tpu.matmul %154, %156, %cst_152 {dimension_numbers = #tpu.dot_dimension_numbers<[1], [0], [0], [1], [0, 0, 1, 1], [], []>} : vector<80x256xf32>, vector<256x128xf32>, vector<80x128xf32> -> vector<80x128xf32>
    %158 = arith.addf %153, %157 : vector<80x128xf32>
    %c15_153 = arith.constant 15 : index
    %c0_154 = arith.constant 0 : index
    %159 = vector.load %arg12[%c15_153, %c0_154] : memref<108x256xf32, #tpu.memory_space<vmem>>, vector<80x256xf32>
    %c3_155 = arith.constant 3 : index
    %c0_156 = arith.constant 0 : index
    %c0_157 = arith.constant 0 : index
    %160 = vector.load %arg6[%c3_155, %c0_156, %c0_157] : memref<9x256x128xf32, #tpu.memory_space<vmem>>, vector<1x256x128xf32>
    %161 = vector.shape_cast %160 : vector<1x256x128xf32> to vector<256x128xf32>
    %cst_158 = arith.constant dense<0.000000e+00> : vector<80x128xf32>
    %162 = tpu.matmul %159, %161, %cst_158 {dimension_numbers = #tpu.dot_dimension_numbers<[1], [0], [0], [1], [0, 0, 1, 1], [], []>} : vector<80x256xf32>, vector<256x128xf32>, vector<80x128xf32> -> vector<80x128xf32>
    %163 = arith.addf %158, %162 : vector<80x128xf32>
    %c16_159 = arith.constant 16 : index
    %c0_160 = arith.constant 0 : index
    %164 = vector.load %arg12[%c16_159, %c0_160] : memref<108x256xf32, #tpu.memory_space<vmem>>, vector<80x256xf32>
    %c4_161 = arith.constant 4 : index
    %c0_162 = arith.constant 0 : index
    %c0_163 = arith.constant 0 : index
    %165 = vector.load %arg6[%c4_161, %c0_162, %c0_163] : memref<9x256x128xf32, #tpu.memory_space<vmem>>, vector<1x256x128xf32>
    %166 = vector.shape_cast %165 : vector<1x256x128xf32> to vector<256x128xf32>
    %cst_164 = arith.constant dense<0.000000e+00> : vector<80x128xf32>
    %167 = tpu.matmul %164, %166, %cst_164 {dimension_numbers = #tpu.dot_dimension_numbers<[1], [0], [0], [1], [0, 0, 1, 1], [], []>} : vector<80x256xf32>, vector<256x128xf32>, vector<80x128xf32> -> vector<80x128xf32>
    %168 = arith.addf %163, %167 : vector<80x128xf32>
    %c17_165 = arith.constant 17 : index
    %c0_166 = arith.constant 0 : index
    %169 = vector.load %arg12[%c17_165, %c0_166] : memref<108x256xf32, #tpu.memory_space<vmem>>, vector<80x256xf32>
    %c5_167 = arith.constant 5 : index
    %c0_168 = arith.constant 0 : index
    %c0_169 = arith.constant 0 : index
    %170 = vector.load %arg6[%c5_167, %c0_168, %c0_169] : memref<9x256x128xf32, #tpu.memory_space<vmem>>, vector<1x256x128xf32>
    %171 = vector.shape_cast %170 : vector<1x256x128xf32> to vector<256x128xf32>
    %cst_170 = arith.constant dense<0.000000e+00> : vector<80x128xf32>
    %172 = tpu.matmul %169, %171, %cst_170 {dimension_numbers = #tpu.dot_dimension_numbers<[1], [0], [0], [1], [0, 0, 1, 1], [], []>} : vector<80x256xf32>, vector<256x128xf32>, vector<80x128xf32> -> vector<80x128xf32>
    %173 = arith.addf %168, %172 : vector<80x128xf32>
    %c25_171 = arith.constant 25 : index
    %c0_172 = arith.constant 0 : index
    %174 = vector.load %arg12[%c25_171, %c0_172] : memref<108x256xf32, #tpu.memory_space<vmem>>, vector<80x256xf32>
    %c6_173 = arith.constant 6 : index
    %c0_174 = arith.constant 0 : index
    %c0_175 = arith.constant 0 : index
    %175 = vector.load %arg6[%c6_173, %c0_174, %c0_175] : memref<9x256x128xf32, #tpu.memory_space<vmem>>, vector<1x256x128xf32>
    %176 = vector.shape_cast %175 : vector<1x256x128xf32> to vector<256x128xf32>
    %cst_176 = arith.constant dense<0.000000e+00> : vector<80x128xf32>
    %177 = tpu.matmul %174, %176, %cst_176 {dimension_numbers = #tpu.dot_dimension_numbers<[1], [0], [0], [1], [0, 0, 1, 1], [], []>} : vector<80x256xf32>, vector<256x128xf32>, vector<80x128xf32> -> vector<80x128xf32>
    %178 = arith.addf %173, %177 : vector<80x128xf32>
    %c26_177 = arith.constant 26 : index
    %c0_178 = arith.constant 0 : index
    %179 = vector.load %arg12[%c26_177, %c0_178] : memref<108x256xf32, #tpu.memory_space<vmem>>, vector<80x256xf32>
    %c7_179 = arith.constant 7 : index
    %c0_180 = arith.constant 0 : index
    %c0_181 = arith.constant 0 : index
    %180 = vector.load %arg6[%c7_179, %c0_180, %c0_181] : memref<9x256x128xf32, #tpu.memory_space<vmem>>, vector<1x256x128xf32>
    %181 = vector.shape_cast %180 : vector<1x256x128xf32> to vector<256x128xf32>
    %cst_182 = arith.constant dense<0.000000e+00> : vector<80x128xf32>
    %182 = tpu.matmul %179, %181, %cst_182 {dimension_numbers = #tpu.dot_dimension_numbers<[1], [0], [0], [1], [0, 0, 1, 1], [], []>} : vector<80x256xf32>, vector<256x128xf32>, vector<80x128xf32> -> vector<80x128xf32>
    %183 = arith.addf %178, %182 : vector<80x128xf32>
    %c27_183 = arith.constant 27 : index
    %c0_184 = arith.constant 0 : index
    %184 = vector.load %arg12[%c27_183, %c0_184] : memref<108x256xf32, #tpu.memory_space<vmem>>, vector<80x256xf32>
    %c8_185 = arith.constant 8 : index
    %c0_186 = arith.constant 0 : index
    %c0_187 = arith.constant 0 : index
    %185 = vector.load %arg6[%c8_185, %c0_186, %c0_187] : memref<9x256x128xf32, #tpu.memory_space<vmem>>, vector<1x256x128xf32>
    %186 = vector.shape_cast %185 : vector<1x256x128xf32> to vector<256x128xf32>
    %cst_188 = arith.constant dense<0.000000e+00> : vector<80x128xf32>
    %187 = tpu.matmul %184, %186, %cst_188 {dimension_numbers = #tpu.dot_dimension_numbers<[1], [0], [0], [1], [0, 0, 1, 1], [], []>} : vector<80x256xf32>, vector<256x128xf32>, vector<80x128xf32> -> vector<80x128xf32>
    %188 = arith.addf %183, %187 : vector<80x128xf32>
    %c0_189 = arith.constant 0 : index
    %c0_190 = arith.constant 0 : index
    %189 = vector.load %arg7[%c0_189, %c0_190] : memref<1x128xf32, #tpu.memory_space<vmem>>, vector<1x128xf32>
    %190 = vector.broadcast %189 : vector<1x128xf32> to vector<80x128xf32>
    %191 = arith.addf %188, %190 : vector<80x128xf32>
    %192 = tpu.iota {dimensions = array<i32: 1>} : vector<8x10x128xi32>
    %193 = vector.shape_cast %192 : vector<8x10x128xi32> to vector<80x128xi32>
    %c1_i32_191 = arith.constant 1 : i32
    %194 = vector.broadcast %c1_i32_191 : i32 to vector<80x128xi32>
    %195 = arith.cmpi sge, %193, %194 : vector<80x128xi32>
    %c8_i32_192 = arith.constant 8 : i32
    %196 = vector.broadcast %c8_i32_192 : i32 to vector<80x128xi32>
    %197 = arith.cmpi sle, %193, %196 : vector<80x128xi32>
    %198 = arith.andi %195, %197 : vector<80x128xi1>
    %cst_193 = arith.constant 0.000000e+00 : f32
    %199 = vector.broadcast %cst_193 : f32 to vector<80x128xf32>
    %200 = arith.maximumf %191, %199 : vector<80x128xf32>
    %cst_194 = arith.constant 0.000000e+00 : f32
    %201 = vector.broadcast %cst_194 : f32 to vector<80x128xf32>
    %202 = arith.select %198, %200, %201 : vector<80x128xi1>, vector<80x128xf32>
    %c16_195 = arith.constant 16 : index
    %c0_196 = arith.constant 0 : index
    %203 = vector.load %arg13[%c16_195, %c0_196] : memref<108x128xf32, #tpu.memory_space<vmem>>, vector<80x128xf32>
    tpu.vector_store %arg13[%c16_195, %c0_196], %202 {strides = array<i32>} : memref<108x128xf32, #tpu.memory_space<vmem>>, vector<80x128xf32>,
    %cst_197 = arith.constant 0.000000e+00 : f32
    %204 = vector.broadcast %cst_197 : f32 to vector<80x128xf32>
    %c5_198 = arith.constant 5 : index
    %c0_199 = arith.constant 0 : index
    %205 = vector.load %arg13[%c5_198, %c0_199] : memref<108x128xf32, #tpu.memory_space<vmem>>, vector<80x128xf32>
    %c0_200 = arith.constant 0 : index
    %c0_201 = arith.constant 0 : index
    %c0_202 = arith.constant 0 : index
    %206 = vector.load %arg8[%c0_200, %c0_201, %c0_202] : memref<9x128x128xf32, #tpu.memory_space<vmem>>, vector<1x128x128xf32>
    %207 = vector.shape_cast %206 : vector<1x128x128xf32> to vector<128x128xf32>
    %cst_203 = arith.constant dense<0.000000e+00> : vector<80x128xf32>
    %208 = tpu.matmul %205, %207, %cst_203 {dimension_numbers = #tpu.dot_dimension_numbers<[1], [0], [0], [1], [0, 0, 1, 1], [], []>} : vector<80x128xf32>, vector<128x128xf32>, vector<80x128xf32> -> vector<80x128xf32>
    %209 = arith.addf %204, %208 : vector<80x128xf32>
    %c6_204 = arith.constant 6 : index
    %c0_205 = arith.constant 0 : index
    %210 = vector.load %arg13[%c6_204, %c0_205] : memref<108x128xf32, #tpu.memory_space<vmem>>, vector<80x128xf32>
    %c1_206 = arith.constant 1 : index
    %c0_207 = arith.constant 0 : index
    %c0_208 = arith.constant 0 : index
    %211 = vector.load %arg8[%c1_206, %c0_207, %c0_208] : memref<9x128x128xf32, #tpu.memory_space<vmem>>, vector<1x128x128xf32>
    %212 = vector.shape_cast %211 : vector<1x128x128xf32> to vector<128x128xf32>
    %cst_209 = arith.constant dense<0.000000e+00> : vector<80x128xf32>
    %213 = tpu.matmul %210, %212, %cst_209 {dimension_numbers = #tpu.dot_dimension_numbers<[1], [0], [0], [1], [0, 0, 1, 1], [], []>} : vector<80x128xf32>, vector<128x128xf32>, vector<80x128xf32> -> vector<80x128xf32>
    %214 = arith.addf %209, %213 : vector<80x128xf32>
    %c7_210 = arith.constant 7 : index
    %c0_211 = arith.constant 0 : index
    %215 = vector.load %arg13[%c7_210, %c0_211] : memref<108x128xf32, #tpu.memory_space<vmem>>, vector<80x128xf32>
    %c2_212 = arith.constant 2 : index
    %c0_213 = arith.constant 0 : index
    %c0_214 = arith.constant 0 : index
    %216 = vector.load %arg8[%c2_212, %c0_213, %c0_214] : memref<9x128x128xf32, #tpu.memory_space<vmem>>, vector<1x128x128xf32>
    %217 = vector.shape_cast %216 : vector<1x128x128xf32> to vector<128x128xf32>
    %cst_215 = arith.constant dense<0.000000e+00> : vector<80x128xf32>
    %218 = tpu.matmul %215, %217, %cst_215 {dimension_numbers = #tpu.dot_dimension_numbers<[1], [0], [0], [1], [0, 0, 1, 1], [], []>} : vector<80x128xf32>, vector<128x128xf32>, vector<80x128xf32> -> vector<80x128xf32>
    %219 = arith.addf %214, %218 : vector<80x128xf32>
    %c15_216 = arith.constant 15 : index
    %c0_217 = arith.constant 0 : index
    %220 = vector.load %arg13[%c15_216, %c0_217] : memref<108x128xf32, #tpu.memory_space<vmem>>, vector<80x128xf32>
    %c3_218 = arith.constant 3 : index
    %c0_219 = arith.constant 0 : index
    %c0_220 = arith.constant 0 : index
    %221 = vector.load %arg8[%c3_218, %c0_219, %c0_220] : memref<9x128x128xf32, #tpu.memory_space<vmem>>, vector<1x128x128xf32>
    %222 = vector.shape_cast %221 : vector<1x128x128xf32> to vector<128x128xf32>
    %cst_221 = arith.constant dense<0.000000e+00> : vector<80x128xf32>
    %223 = tpu.matmul %220, %222, %cst_221 {dimension_numbers = #tpu.dot_dimension_numbers<[1], [0], [0], [1], [0, 0, 1, 1], [], []>} : vector<80x128xf32>, vector<128x128xf32>, vector<80x128xf32> -> vector<80x128xf32>
    %224 = arith.addf %219, %223 : vector<80x128xf32>
    %c16_222 = arith.constant 16 : index
    %c0_223 = arith.constant 0 : index
    %225 = vector.load %arg13[%c16_222, %c0_223] : memref<108x128xf32, #tpu.memory_space<vmem>>, vector<80x128xf32>
    %c4_224 = arith.constant 4 : index
    %c0_225 = arith.constant 0 : index
    %c0_226 = arith.constant 0 : index
    %226 = vector.load %arg8[%c4_224, %c0_225, %c0_226] : memref<9x128x128xf32, #tpu.memory_space<vmem>>, vector<1x128x128xf32>
    %227 = vector.shape_cast %226 : vector<1x128x128xf32> to vector<128x128xf32>
    %cst_227 = arith.constant dense<0.000000e+00> : vector<80x128xf32>
    %228 = tpu.matmul %225, %227, %cst_227 {dimension_numbers = #tpu.dot_dimension_numbers<[1], [0], [0], [1], [0, 0, 1, 1], [], []>} : vector<80x128xf32>, vector<128x128xf32>, vector<80x128xf32> -> vector<80x128xf32>
    %229 = arith.addf %224, %228 : vector<80x128xf32>
    %c17_228 = arith.constant 17 : index
    %c0_229 = arith.constant 0 : index
    %230 = vector.load %arg13[%c17_228, %c0_229] : memref<108x128xf32, #tpu.memory_space<vmem>>, vector<80x128xf32>
    %c5_230 = arith.constant 5 : index
    %c0_231 = arith.constant 0 : index
    %c0_232 = arith.constant 0 : index
    %231 = vector.load %arg8[%c5_230, %c0_231, %c0_232] : memref<9x128x128xf32, #tpu.memory_space<vmem>>, vector<1x128x128xf32>
    %232 = vector.shape_cast %231 : vector<1x128x128xf32> to vector<128x128xf32>
    %cst_233 = arith.constant dense<0.000000e+00> : vector<80x128xf32>
    %233 = tpu.matmul %230, %232, %cst_233 {dimension_numbers = #tpu.dot_dimension_numbers<[1], [0], [0], [1], [0, 0, 1, 1], [], []>} : vector<80x128xf32>, vector<128x128xf32>, vector<80x128xf32> -> vector<80x128xf32>
    %234 = arith.addf %229, %233 : vector<80x128xf32>
    %c25_234 = arith.constant 25 : index
    %c0_235 = arith.constant 0 : index
    %235 = vector.load %arg13[%c25_234, %c0_235] : memref<108x128xf32, #tpu.memory_space<vmem>>, vector<80x128xf32>
    %c6_236 = arith.constant 6 : index
    %c0_237 = arith.constant 0 : index
    %c0_238 = arith.constant 0 : index
    %236 = vector.load %arg8[%c6_236, %c0_237, %c0_238] : memref<9x128x128xf32, #tpu.memory_space<vmem>>, vector<1x128x128xf32>
    %237 = vector.shape_cast %236 : vector<1x128x128xf32> to vector<128x128xf32>
    %cst_239 = arith.constant dense<0.000000e+00> : vector<80x128xf32>
    %238 = tpu.matmul %235, %237, %cst_239 {dimension_numbers = #tpu.dot_dimension_numbers<[1], [0], [0], [1], [0, 0, 1, 1], [], []>} : vector<80x128xf32>, vector<128x128xf32>, vector<80x128xf32> -> vector<80x128xf32>
    %239 = arith.addf %234, %238 : vector<80x128xf32>
    %c26_240 = arith.constant 26 : index
    %c0_241 = arith.constant 0 : index
    %240 = vector.load %arg13[%c26_240, %c0_241] : memref<108x128xf32, #tpu.memory_space<vmem>>, vector<80x128xf32>
    %c7_242 = arith.constant 7 : index
    %c0_243 = arith.constant 0 : index
    %c0_244 = arith.constant 0 : index
    %241 = vector.load %arg8[%c7_242, %c0_243, %c0_244] : memref<9x128x128xf32, #tpu.memory_space<vmem>>, vector<1x128x128xf32>
    %242 = vector.shape_cast %241 : vector<1x128x128xf32> to vector<128x128xf32>
    %cst_245 = arith.constant dense<0.000000e+00> : vector<80x128xf32>
    %243 = tpu.matmul %240, %242, %cst_245 {dimension_numbers = #tpu.dot_dimension_numbers<[1], [0], [0], [1], [0, 0, 1, 1], [], []>} : vector<80x128xf32>, vector<128x128xf32>, vector<80x128xf32> -> vector<80x128xf32>
    %244 = arith.addf %239, %243 : vector<80x128xf32>
    %c27_246 = arith.constant 27 : index
    %c0_247 = arith.constant 0 : index
    %245 = vector.load %arg13[%c27_246, %c0_247] : memref<108x128xf32, #tpu.memory_space<vmem>>, vector<80x128xf32>
    %c8_248 = arith.constant 8 : index
    %c0_249 = arith.constant 0 : index
    %c0_250 = arith.constant 0 : index
    %246 = vector.load %arg8[%c8_248, %c0_249, %c0_250] : memref<9x128x128xf32, #tpu.memory_space<vmem>>, vector<1x128x128xf32>
    %247 = vector.shape_cast %246 : vector<1x128x128xf32> to vector<128x128xf32>
    %cst_251 = arith.constant dense<0.000000e+00> : vector<80x128xf32>
    %248 = tpu.matmul %245, %247, %cst_251 {dimension_numbers = #tpu.dot_dimension_numbers<[1], [0], [0], [1], [0, 0, 1, 1], [], []>} : vector<80x128xf32>, vector<128x128xf32>, vector<80x128xf32> -> vector<80x128xf32>
    %249 = arith.addf %244, %248 : vector<80x128xf32>
    %c0_252 = arith.constant 0 : index
    %c0_253 = arith.constant 0 : index
    %250 = vector.load %arg9[%c0_252, %c0_253] : memref<1x128xf32, #tpu.memory_space<vmem>>, vector<1x128xf32>
    %251 = vector.broadcast %250 : vector<1x128xf32> to vector<80x128xf32>
    %252 = arith.addf %249, %251 : vector<80x128xf32>
    %253 = arith.negf %252 : vector<80x128xf32>
    %254 = math.exp %253 : vector<80x128xf32>
    %cst_254 = arith.constant 1.000000e+00 : f32
    %255 = vector.broadcast %cst_254 : f32 to vector<80x128xf32>
    %256 = arith.addf %255, %254 : vector<80x128xf32>
    %257 = arith.divf %255, %256 : vector<80x128xf32>
    %c0_255 = arith.constant 0 : index
    %c0_256 = arith.constant 0 : index
    %c0_257 = arith.constant 0 : index
    %258 = vector.load %arg10[%c0_255, %c0_256, %c0_257] : memref<1x80x128xf32, #tpu.memory_space<vmem>>, vector<1x80x128xf32>
    %259 = vector.shape_cast %258 : vector<1x80x128xf32> to vector<80x128xf32>
    %260 = vector.shape_cast %257 : vector<80x128xf32> to vector<1x80x128xf32>
    tpu.vector_store %arg10[%c0_255, %c0_256, %c0_257], %260 {strides = array<i32>} : memref<1x80x128xf32, #tpu.memory_space<vmem>>, vector<1x80x128xf32>,
    return
  }
  func.func @transform_0(%arg0: i32) -> (i32, i32, i32) {
    %c0_i32 = arith.constant 0 : i32
    %c0_i32_0 = arith.constant 0 : i32
    %c0_i32_1 = arith.constant 0 : i32
    return %arg0, %c0_i32, %c0_i32_0 : i32, i32, i32
  }
  func.func @transform_1(%arg0: i32) -> (i32, i32, i32) {
    %c0_i32 = arith.constant 0 : i32
    %c0_i32_0 = arith.constant 0 : i32
    %c0_i32_1 = arith.constant 0 : i32
    %c0_i32_2 = arith.constant 0 : i32
    return %c0_i32, %c0_i32_0, %c0_i32_1 : i32, i32, i32
  }
  func.func @transform_2(%arg0: i32) -> (i32, i32) {
    %c0_i32 = arith.constant 0 : i32
    %c0_i32_0 = arith.constant 0 : i32
    %c0_i32_1 = arith.constant 0 : i32
    return %c0_i32, %c0_i32_0 : i32, i32
  }
  func.func @transform_3(%arg0: i32) -> (i32, i32, i32) {
    %c0_i32 = arith.constant 0 : i32
    %c0_i32_0 = arith.constant 0 : i32
    %c0_i32_1 = arith.constant 0 : i32
    %c0_i32_2 = arith.constant 0 : i32
    return %c0_i32, %c0_i32_0, %c0_i32_1 : i32, i32, i32
  }
  func.func @transform_4(%arg0: i32) -> (i32, i32) {
    %c0_i32 = arith.constant 0 : i32
    %c0_i32_0 = arith.constant 0 : i32
    %c0_i32_1 = arith.constant 0 : i32
    return %c0_i32, %c0_i32_0 : i32, i32
  }
  func.func @transform_5(%arg0: i32) -> (i32, i32, i32) {
    %c0_i32 = arith.constant 0 : i32
    %c0_i32_0 = arith.constant 0 : i32
    %c0_i32_1 = arith.constant 0 : i32
    %c0_i32_2 = arith.constant 0 : i32
    return %c0_i32, %c0_i32_0, %c0_i32_1 : i32, i32, i32
  }
  func.func @transform_6(%arg0: i32) -> (i32, i32) {
    %c0_i32 = arith.constant 0 : i32
    %c0_i32_0 = arith.constant 0 : i32
    %c0_i32_1 = arith.constant 0 : i32
    return %c0_i32, %c0_i32_0 : i32, i32
  }
  func.func @transform_7(%arg0: i32) -> (i32, i32, i32) {
    %c0_i32 = arith.constant 0 : i32
    %c0_i32_0 = arith.constant 0 : i32
    %c0_i32_1 = arith.constant 0 : i32
    %c0_i32_2 = arith.constant 0 : i32
    return %c0_i32, %c0_i32_0, %c0_i32_1 : i32, i32, i32
  }
  func.func @transform_8(%arg0: i32) -> (i32, i32) {
    %c0_i32 = arith.constant 0 : i32
    %c0_i32_0 = arith.constant 0 : i32
    %c0_i32_1 = arith.constant 0 : i32
    return %c0_i32, %c0_i32_0 : i32, i32
  }
  func.func @transform_9(%arg0: i32) -> (i32, i32, i32) {
    %c0_i32 = arith.constant 0 : i32
    %c0_i32_0 = arith.constant 0 : i32
    %c0_i32_1 = arith.constant 0 : i32
    return %arg0, %c0_i32, %c0_i32_0 : i32, i32, i32
  }
}

</mosaic_0001>

<bundles_post_ra>
// kernel: ffn_v2_forward.1
= control target key start
LH: loop header
LB: loop body
LE: loop exit
PB: predicated region body
PF: predicated region fallthrough
CT: control target
= control target key end

     0   :  { %14 = vsyncpa [#allocation6], 0  ;;  %s9589_s0 = inlined_call_operand.vmem [shape: f32[2,108,8], index: 0, kind: input, shape index: {}]   ;;  %s9590_s1 = inlined_call_operand.hbm [shape: f32[9,8,128], index: 1, kind: input, shape index: {}]   ;;  %s9591_s2 = inlined_call_operand.hbm [shape: f32[1,128], index: 2, kind: input, shape index: {}]   ;;  %s9592_s3 = inlined_call_operand.hbm [shape: f32[9,128,256], index: 3, kind: input, shape index: {}]   ;;  %s9593_s4 = inlined_call_operand.hbm [shape: f32[1,256], index: 4, kind: input, shape index: {}]   ;;  %s9594_s5 = inlined_call_operand.hbm [shape: f32[9,256,128], index: 5, kind: input, shape index: {}]   ;;  %s9595_s6 = inlined_call_operand.hbm [shape: f32[1,128], index: 6, kind: input, shape index: {}]   ;;  %s9596_s7 = inlined_call_operand.hbm [shape: f32[9,128,128], index: 7, kind: input, shape index: {}]   ;;  %s9597_s8 = inlined_call_operand.hbm [shape: f32[1,128], index: 8, kind: input, shape index: {}]   ;;  %s9598_s9 = inlined_call_operand.vmem [shape: f32[2,80,128], index: 9, kind: output, shape index: {}]  }
   0x1   :  { %15 = vsyncpa [#allocation8], 0 }
   0x2   :  { %16 = vsyncpa [#allocation11], 0 }
   0x3   :  { %17 = vsyncpa [#allocation14], 0 }
   0x4   :  { %18 = vsyncpa [#allocation17], 0  ;;  %s7267_s30 = smov 0  }
   0x5 LB: > { %s275_s12 = sshll.u32 %s9591_s2, 4  ;;  %s7276_s13 = sadd.s32 4294967295, %s7198_s30   ;;  %s7198_s30 = sphi %s7267_s30, %s24_s30   ;;  %s276_s12 = int_to_ptr.hbm [resolvable:$true] %s275_s12 }
   0x6   : > { %p6641_p0 = scmp.ge.s32.totalorder %s7198_s30, 1  ;;  %p249_p1 = scmp.lt.s32.totalorder %s7198_s30, 3 }
   0x7   : > { %p6825_p2 = scmp.eq.s32.totalorder %s7276_s13, 0  ;;  %s7200_s15 = smov [#allocation7]  }
   0x8   : > { %p7281_p3 = pnand %p6641_p0, %p249_p1  ;;  %s277_s16 = sshll.u32 %s7200_s15, 4  ;;  %s278_s16 = int_to_ptr.vmem [resolvable:$true] %s277_s16 }
   0x9   : > { %s301_s19 = sshll.u32 %s9593_s4, 4  ;;  %s327_s22 = sshll.u32 %s9595_s6, 4  ;;  %s302_s19 = int_to_ptr.hbm [resolvable:$true] %s301_s19  ;;  %s328_s22 = int_to_ptr.hbm [resolvable:$true] %s327_s22 }
   0xa   : > { %p6800_p4 = pneg %p7281_p3  ;;  %s7201_s24 = smov [#allocation10]  }
   0xb   : > { %s303_s25 = sshll.u32 %s7201_s24, 4  ;;  %s7202_s26 = smov [#allocation13]   ;;  %s304_s25 = int_to_ptr.vmem [resolvable:$true] %s303_s25 }
   0xc   : > { %p7295_p5 = pnand %p6825_p2, %p6800_p4  ;;  %s329_s27 = sshll.u32 %s7202_s26, 4  ;;  %s330_s27 = int_to_ptr.vmem [resolvable:$true] %s329_s27 }
   0xd   : > { %s260_s10 = sshll.u32 %s9590_s1, 4  ;;  %s7203_s11 = smov [#allocation5]   ;;  %s261_s10 = int_to_ptr.hbm [resolvable:$true] %s260_s10 }
   0xe   : > { %6806 = dma.hbm_to_vmem [thread:$0]  (!%p7295_p5), %s276_s12, 16, %s278_s16, [#allocation8]  }
   0xf   : > { %6812 = dma.hbm_to_vmem [thread:$0]  (!%p7295_p5), %s302_s19, 32, %s304_s25, [#allocation11]  }
  0x10   : > { %6818 = dma.hbm_to_vmem [thread:$0]  (!%p7295_p5), %s328_s22, 16, %s330_s27, [#allocation14]  }
  0x11   : > { %s262_s15 = sshll.u32 %s7203_s11, 4  ;;  %s286_s12 = sshll.u32 %s9592_s3, 4  ;;  %s263_s15 = int_to_ptr.vmem [resolvable:$true] %s262_s15  ;;  %s287_s12 = int_to_ptr.hbm [resolvable:$true] %s286_s12 }
  0x12   : > { %s7204_s16 = smov 128   ;;  %s7205_s19 = smov 8  }
  0x13   : > { %6803 = dma.hbm_to_vmem [thread:$0]  (!%p7295_p5), %s261_s10, 1152, %s263_s15, [#allocation6], %s7204_s16, %s7204_s16, %s7205_s19  }
  0x14   : > { %s7206_s20 = smov [#allocation9]   ;;  %s7207_s24 = smov 256  }
  0x15   : > { %s288_s21 = sshll.u32 %s7206_s20, 4  ;;  %s7208_s25 = smov 16   ;;  %s289_s21 = int_to_ptr.vmem [resolvable:$true] %s288_s21 }
  0x16   : > { %6809 = dma.hbm_to_vmem [thread:$0]  (!%p7295_p5), %s287_s12, 36864, %s289_s21, [#allocation8], %s7207_s24, %s7207_s24, %s7208_s25  }
  0x17   : > { %s312_s27 = sshll.u32 %s9594_s5, 4  ;;  %s7209_s28 = smov [#allocation12]   ;;  %s313_s27 = int_to_ptr.hbm [resolvable:$true] %s312_s27 }
  0x18   : > { %s314_s29 = sshll.u32 %s7209_s28, 4  ;;  %s338_s15 = sshll.u32 %s9596_s7, 4  ;;  %s315_s29 = int_to_ptr.vmem [resolvable:$true] %s314_s29  ;;  %s339_s15 = int_to_ptr.hbm [resolvable:$true] %s338_s15 }
  0x19   : > { %6815 = dma.hbm_to_vmem [thread:$0]  (!%p7295_p5), %s313_s27, 36864, %s315_s29, [#allocation11], %s7204_s16, %s7204_s16, %s7205_s19  }
  0x1a   : > { %s7210_s17 = smov [#allocation15]   ;;  %s353_s21 = sshll.u32 %s9597_s8, 4  ;;  %s354_s21 = int_to_ptr.hbm [resolvable:$true] %s353_s21 }
  0x1b   : > { %s340_s18 = sshll.u32 %s7210_s17, 4  ;;  %s7211_s24 = smov [#allocation16]   ;;  %s341_s18 = int_to_ptr.vmem [resolvable:$true] %s340_s18 }
  0x1c   : > { %6821 = dma.hbm_to_vmem [thread:$0]  (!%p7295_p5), %s339_s15, 18432, %s341_s18, [#allocation14], %s7204_s16, %s7204_s16, %s7205_s19  }
  0x1d   : > { %s355_s25 = sshll.u32 %s7211_s24, 4  ;;  %376 = sbr.rel (%p7281_p3) target bundleno = 1673 (0x689), region = 56  ;;  %s356_s25 = int_to_ptr.vmem [resolvable:$true] %s355_s25 }
  0x1e   : > { %6824 = dma.hbm_to_vmem [thread:$0]  (!%p7295_p5), %s354_s21, 16, %s356_s25, [#allocation17]  }
  0x22   : > { %7177 = dma.done.wait (%p6825_p2), [#allocation6], 1152  }
  0x23   : > { %7179 = vsyncadd (%p6825_p2), [#allocation6], 4294966144 }
  0x24   : > { %7181 = dma.done.wait (%p6825_p2), [#allocation8], 36880  }
  0x25   : > { %7183 = vsyncadd (%p6825_p2), [#allocation8], 4294930416 }
  0x26   : > { %7185 = dma.done.wait (%p6825_p2), [#allocation11], 36896  }
  0x27   : > { %7187 = vsyncadd (%p6825_p2), [#allocation11], 4294930400 }
  0x28   : > { %7189 = dma.done.wait (%p6825_p2), [#allocation14], 18448  }
  0x29   : > { %7191 = vsyncadd (%p6825_p2), [#allocation14], 4294948848 }
  0x2a   : > { %7193 = dma.done.wait (%p6825_p2), [#allocation17], 16  }
  0x2b   : > { %7195 = vsyncadd (%p6825_p2), [#allocation17], 4294967280  ;;  %p448_p6 = scmp.lt.s32.totalorder %s7276_s13, 1  ;;  %vm497_vm0 = vcmask 64512   ;;  %v496_v0 = vld [vmem:[#allocation5 + $0x8] sm:$0xff]  ;;  %v484_v1 = vld [vmem:[#allocation5] sm:$0xff] }
  0x2c   : > { %6764 = vmatpush.msra.mxu2 %v496_v0  ;;  %6765 = vmatpush.msra.mxu3 %v484_v1  ;;  %v663_v4 = vld [vmem:[#allocation5 + $0x10] sm:$0xff]  ;;  %v762_v5 = vld [vmem:[#allocation5 + $0x18] sm:$0xff]  ;;  %v861_v8 = vld [vmem:[#allocation5 + $0x20] sm:$0xff] }
  0x2d   : > { %s9817_s13 = smov (!%p448_p6, %s7276_s13), 1  ;;  %543 = vmatpush.msra.mxu0 %v496_v0  ;;  %620 = vmatpush.msra.mxu1 %v484_v1  ;;  %v1059_v13 = vld [vmem:[#allocation5 + $0x30] sm:$0xff]  ;;  %v1158_v14 = vld [vmem:[#allocation5 + $0x38] sm:$0xff]  ;;  %v1257_v19 = vld [vmem:[#allocation5 + $0x40] sm:$0xff] }
  0x2e   : > { %s6766_s14 = smul.u32 112, %s9817_s13  ;;  %709 = vmatpush.msrb.mxu2 %v663_v4  ;;  %808 = vmatpush.msrb.mxu3 %v762_v5  ;;  %v960_v20 = vld [vmem:[#allocation5 + $0x28] sm:$0xff] }
  0x2f   : > { %907 = vmatpush.msrb.mxu0 %v861_v8  ;;  %1006 = vmatpush.msrb.mxu1 %v960_v20  ;;  %s6767_s22 = smul.u32 80, %s9817_s13 }
  0x30   : > { %s7360_s19 = scalar_lea.vmem %s9589_s0, %s6766_s14 }
  0x31   : > { %v490_v2 = vld [vmem:[%s7360_s19 + $0x2e] sm:$0xff]  ;;  %v485_v6 = vld [vmem:[%s7360_s19 + $0x6] sm:$0xff]  ;;  %v491_v9 = vld [vmem:[%s7360_s19 + $0x36] sm:$0xff]  ;;  %s9564_s13 = scalar_lea.vmem %s9598_s9, %s6767_s22 }
  0x32   : > { %v479_v3 = vld [vmem:[%s7360_s19 + $0x2d] sm:$0xff]  ;;  %6667 = vmatmul.msk.f32.vlgmr.msra.gmra.mxu2 %vm497_vm0, %v490_v2  ;;  %v474_v7 = vld [vmem:[%s7360_s19 + $0x5] sm:$0xff]  ;;  %6662 = vmatmul.msk.f32.vlgmr.msra.gmra.mxu0 %vm497_vm0, %v485_v6  ;;  %v480_v10 = vld [vmem:[%s7360_s19 + $0x35] sm:$0xff] }
  0x33   : > { %6677 = vmatmul.msk.f32.vlgmr.msra.gmra.mxu3 %vm497_vm0, %v479_v3  ;;  %6672 = vmatmul.msk.f32.vlgmr.msra.gmra.mxu1 %vm497_vm0, %v474_v7  ;;  %v486_v11 = vld [vmem:[%s7360_s19 + $0xe] sm:$0xff]  ;;  %v492_v15 = vld [vmem:[%s7360_s19 + $0x3e] sm:$0xff]  ;;  %v487_v17 = vld [vmem:[%s7360_s19 + $0x16] sm:$0xff] }
  0x34   : > { %v475_v12 = vld [vmem:[%s7360_s19 + $0xd] sm:$0xff]  ;;  %1105 = vmatpush.msra.mxu2 %v1059_v13  ;;  %1204 = vmatpush.msra.mxu3 %v1158_v14  ;;  %v481_v16 = vld [vmem:[%s7360_s19 + $0x3d] sm:$0xff]  ;;  %v476_v18 = vld [vmem:[%s7360_s19 + $0x15] sm:$0xff] }
  0x35   : > { %1303 = vmatpush.msra.mxu0 %v1257_v19  ;;  %v493_v21 = vld [vmem:[%s7360_s19 + $0x46] sm:$0xff]  ;;  %v488_v23 = vld [vmem:[%s7360_s19 + $0x1e] sm:$0xff]  ;;  %v494_v25 = vld [vmem:[%s7360_s19 + $0x4e] sm:$0xff] }
  0x36   : > { %v482_v22 = vld [vmem:[%s7360_s19 + $0x45] sm:$0xff]  ;;  %v477_v24 = vld [vmem:[%s7360_s19 + $0x1d] sm:$0xff]  ;;  %v483_v26 = vld [vmem:[%s7360_s19 + $0x4d] sm:$0xff] }
  0x37   : > { %v489_v27 = vld [vmem:[%s7360_s19 + $0x26] sm:$0xff]  ;;  %v751_v30 = vld [vmem:[%s7360_s19 + $0xf] sm:$0xff]  ;;  %v752_v33 = vld [vmem:[%s7360_s19 + $0x17] sm:$0xff] }
  0x38   : > { %v478_v28 = vld [vmem:[%s7360_s19 + $0x25] sm:$0xff]  ;;  %v850_v31 = vld [vmem:[%s7360_s19 + $0x10] sm:$0xff]  ;;  %v851_v34 = vld [vmem:[%s7360_s19 + $0x18] sm:$0xff] }
  0x39   : > { %v652_v29 = vld [vmem:[%s7360_s19 + $0x7] sm:$0xff]  ;;  %v949_v32 = vld [vmem:[%s7360_s19 + $0x11] sm:$0xff]  ;;  %v950_v35 = vld [vmem:[%s7360_s19 + $0x19] sm:$0xff] }
  0x3a   : > { %6668 = vmatmul.msk.f32.gmra.mxu2 %vm497_vm0, %v491_v9  ;;  %6663 = vmatmul.msk.f32.gmra.mxu0 %vm497_vm0, %v486_v11  ;;  %v753_v36 = vld [vmem:[%s7360_s19 + $0x1f] sm:$0xff]  ;;  %v754_v39 = vld [vmem:[%s7360_s19 + $0x27] sm:$0xff]  ;;  %v755_v42 = vld [vmem:[%s7360_s19 + $0x2f] sm:$0xff] }
  0x3b   : > { %6678 = vmatmul.msk.f32.gmra.mxu3 %vm497_vm0, %v480_v10  ;;  %6673 = vmatmul.msk.f32.gmra.mxu1 %vm497_vm0, %v475_v12  ;;  %v852_v37 = vld [vmem:[%s7360_s19 + $0x20] sm:$0xff]  ;;  %v853_v40 = vld [vmem:[%s7360_s19 + $0x28] sm:$0xff]  ;;  %v854_v43 = vld [vmem:[%s7360_s19 + $0x30] sm:$0xff] }
  0x3c   : > { %v951_v38 = vld [vmem:[%s7360_s19 + $0x21] sm:$0xff]  ;;  %v952_v41 = vld [vmem:[%s7360_s19 + $0x29] sm:$0xff]  ;;  %v953_v44 = vld [vmem:[%s7360_s19 + $0x31] sm:$0xff] }
  0x3d   : > { %v756_v45 = vld [vmem:[%s7360_s19 + $0x37] sm:$0xff]  ;;  %v757_v48 = vld [vmem:[%s7360_s19 + $0x3f] sm:$0xff]  ;;  %v758_v51 = vld [vmem:[%s7360_s19 + $0x47] sm:$0xff] }
  0x3e   : > { %v855_v46 = vld [vmem:[%s7360_s19 + $0x38] sm:$0xff]  ;;  %v856_v49 = vld [vmem:[%s7360_s19 + $0x40] sm:$0xff]  ;;  %v857_v52 = vld [vmem:[%s7360_s19 + $0x48] sm:$0xff] }
  0x3f   : > { %v954_v47 = vld [vmem:[%s7360_s19 + $0x39] sm:$0xff]  ;;  %v7450_v50 = vld [vmem:[%s7360_s19 + $0x41] sm:$0xff]  ;;  %v7460_v53 = vld [vmem:[%s7360_s19 + $0x49] sm:$0xff] }
  0x40   : > { %v759_v54 = vld [vmem:[%s7360_s19 + $0x4f] sm:$0xff]  ;;  %v760_v57 = vld [vmem:[%s7360_s19 + $0x57] sm:$0xff]  ;;  %v1148_v62 = vld [vmem:[%s7360_s19 + $0x22] sm:$0xff] }
  0x41   : > { %v858_v55 = vld [vmem:[%s7360_s19 + $0x50] sm:$0xff]  ;;  %v859_v58 = vld [vmem:[%s7360_s19 + $0x58] sm:$0xff]  ;;  %v1247_v0 = vld [vmem:[%s7360_s19 + $0x23] sm:$0xff] }
  0x42   : > { %6669 = vmatmul.msk.f32.gmra.mxu2 %vm497_vm0, %v492_v15  ;;  %6664 = vmatmul.msk.f32.gmra.mxu0 %vm497_vm0, %v487_v17  ;;  %v7470_v56 = vld [vmem:[%s7360_s19 + $0x51] sm:$0xff]  ;;  %v7480_v59 = vld [vmem:[%s7360_s19 + $0x59] sm:$0xff]  ;;  %v1152_v19 = vld [vmem:[%s7360_s19 + $0x42] sm:$0xff] }
  0x43   : > { %6679 = vmatmul.msk.f32.gmra.mxu3 %vm497_vm0, %v481_v16  ;;  %6674 = vmatmul.msk.f32.gmra.mxu1 %vm497_vm0, %v476_v18  ;;  %v1147_v60 = vld [vmem:[%s7360_s19 + $0x1a] sm:$0xff]  ;;  %v1149_v4 = vld [vmem:[%s7360_s19 + $0x2a] sm:$0xff]  ;;  %v1150_v9 = vld [vmem:[%s7360_s19 + $0x32] sm:$0xff] }
  0x44   : > { %v1246_v61 = vld [vmem:[%s7360_s19 + $0x1b] sm:$0xff]  ;;  %v1248_v6 = vld [vmem:[%s7360_s19 + $0x2b] sm:$0xff]  ;;  %v1249_v11 = vld [vmem:[%s7360_s19 + $0x33] sm:$0xff] }
  0x45   : > { %v1151_v14 = vld [vmem:[%s7360_s19 + $0x3a] sm:$0xff] }
  0x46   : > { %v1250_v16 = vld [vmem:[%s7360_s19 + $0x3b] sm:$0xff] }
  0x4a   : > { %6670 = vmatmul.msk.f32.gmra.mxu2 %vm497_vm0, %v493_v21  ;;  %6665 = vmatmul.msk.f32.gmra.mxu0 %vm497_vm0, %v488_v23  ;;  %v1251_v21 = vld [vmem:[%s7360_s19 + $0x43] sm:$0xff] }
  0x4b   : > { %6680 = vmatmul.msk.f32.gmra.mxu3 %vm497_vm0, %v482_v22  ;;  %6675 = vmatmul.msk.f32.gmra.mxu1 %vm497_vm0, %v477_v24  ;;  %v1718_v22 = vld [vmem:[#allocation9 + $0x1f8] sm:$0xff] }
  0x52   : > { %6671 = vmatmul.msk.f32.gmra.mxu2 %vm497_vm0, %v494_v25  ;;  %6666 = vmatmul.msk.f32.gmra.mxu0 %vm497_vm0, %v489_v27  ;;  %v1153_v25 = vld [vmem:[%s7360_s19 + $0x4a] sm:$0xff] }
  0x53   : > { %6681 = vmatmul.msk.f32.gmra.mxu3 %vm497_vm0, %v483_v26  ;;  %6676 = vmatmul.msk.f32.gmra.mxu1 %vm497_vm0, %v478_v28  ;;  %v1716_v26 = vld [vmem:[#allocation9 + $0x1e8] sm:$0xff]  ;;  %v1252_v28 = vld [vmem:[%s7360_s19 + $0x4b] sm:$0xff] }
  0x5a   : > { %6682 = vmatmul.msk.f32.vlgmr.msrb.gmra.mxu2 %vm497_vm0, %v652_v29  ;;  %6702 = vmatmul.msk.f32.vlgmr.msrb.gmra.mxu0 %vm497_vm0, %v850_v31  ;;  %v1717_v29 = vld [vmem:[#allocation9 + $0x1f0] sm:$0xff] }
  0x5b   : > { %6692 = vmatmul.msk.f32.vlgmr.msrb.gmra.mxu3 %vm497_vm0, %v751_v30  ;;  %6712 = vmatmul.msk.f32.vlgmr.msrb.gmra.mxu1 %vm497_vm0, %v949_v32  ;;  %v1714_v32 = vld [vmem:[#allocation9 + $0x1d8] sm:$0xff] }
  0x5c   : > { %1766 = vmatpush.msrb.mxu2 %v1718_v22  ;;  %1719 = vmatpush.msra.mxu1 %v1717_v29  ;;  %v1698_v29 = vld [vmem:[#allocation9 + $0x158] sm:$0xff] }
  0x5e   : > { %1767 = vmatpush.msrb.mxu2 %v1716_v26  ;;  %v1672_v26 = vld [vmem:[#allocation9 + $0xe0] sm:$0xff] }
  0x60   : > { %1768 = vmatpush.msrb.mxu2 %v1714_v32  ;;  %v1670_v32 = vld [vmem:[#allocation9 + $0xd0] sm:$0xff] }
  0x62   : > { %6683 = vmatmul.msk.f32.gmra.mxu2 %vm497_vm0, %v751_v30  ;;  %6703 = vmatmul.msk.f32.gmra.mxu0 %vm497_vm0, %v851_v34  ;;  %v1715_v34 = vld [vmem:[#allocation9 + $0x1e0] sm:$0xff] }
  0x63   : > { %6693 = vmatmul.msk.f32.gmra.mxu3 %vm497_vm0, %v752_v33  ;;  %6713 = vmatmul.msk.f32.gmra.mxu1 %vm497_vm0, %v950_v35 }
  0x64   : > { %1720 = vmatpush.msra.mxu1 %v1715_v34  ;;  %v1699_v34 = vld [vmem:[#allocation9 + $0x160] sm:$0xff] }
  0x6a   : > { %6684 = vmatmul.msk.f32.gmra.mxu2 %vm497_vm0, %v752_v33  ;;  %6704 = vmatmul.msk.f32.gmra.mxu0 %vm497_vm0, %v852_v37  ;;  %v1154_v33 = vld [vmem:[%s7360_s19 + $0x52] sm:$0xff]  ;;  %v1712_v37 = vld [vmem:[#allocation9 + $0x1c8] sm:$0xff] }
  0x6b   : > { %6694 = vmatmul.msk.f32.gmra.mxu3 %vm497_vm0, %v753_v36  ;;  %6714 = vmatmul.msk.f32.gmra.mxu1 %vm497_vm0, %v951_v38 }
  0x6c   : > { %1769 = vmatpush.msrb.mxu2 %v1712_v37  ;;  %v1669_v37 = vld [vmem:[#allocation9 + $0xc8] sm:$0xff] }
  0x72   : > { %6685 = vmatmul.msk.f32.gmra.mxu2 %vm497_vm0, %v753_v36  ;;  %6705 = vmatmul.msk.f32.gmra.mxu0 %vm497_vm0, %v853_v40  ;;  %v1253_v36 = vld [vmem:[%s7360_s19 + $0x53] sm:$0xff] }
  0x73   : > { %6695 = vmatmul.msk.f32.gmra.mxu3 %vm497_vm0, %v754_v39  ;;  %6715 = vmatmul.msk.f32.gmra.mxu1 %vm497_vm0, %v952_v41 }
  0x7a   : > { %6686 = vmatmul.msk.f32.gmra.mxu2 %vm497_vm0, %v754_v39  ;;  %6706 = vmatmul.msk.f32.gmra.mxu0 %vm497_vm0, %v854_v43  ;;  %v1710_v43 = vld [vmem:[#allocation9 + $0x1b8] sm:$0xff] }
  0x7b   : > { %6696 = vmatmul.msk.f32.gmra.mxu3 %vm497_vm0, %v755_v42  ;;  %6716 = vmatmul.msk.f32.gmra.mxu1 %vm497_vm0, %v953_v44 }
  0x7c   : > { %1770 = vmatpush.msrb.mxu2 %v1710_v43  ;;  %v1666_v43 = vld [vmem:[#allocation9 + $0xb0] sm:$0xff] }
  0x82   : > { %6687 = vmatmul.msk.f32.gmra.mxu2 %vm497_vm0, %v755_v42  ;;  %6707 = vmatmul.msk.f32.gmra.mxu0 %vm497_vm0, %v855_v46  ;;  %v1155_v42 = vld [vmem:[%s7360_s19 + $0x5a] sm:$0xff]  ;;  %v1711_v46 = vld [vmem:[#allocation9 + $0x1c0] sm:$0xff] }
  0x83   : > { %6697 = vmatmul.msk.f32.gmra.mxu3 %vm497_vm0, %v756_v45  ;;  %6717 = vmatmul.msk.f32.gmra.mxu1 %vm497_vm0, %v954_v47 }
  0x8a   : > { %6688 = vmatmul.msk.f32.gmra.mxu2 %vm497_vm0, %v756_v45  ;;  %6708 = vmatmul.msk.f32.gmra.mxu0 %vm497_vm0, %v856_v49  ;;  %v1254_v45 = vld [vmem:[%s7360_s19 + $0x5b] sm:$0xff] }
  0x8b   : > { %6698 = vmatmul.msk.f32.gmra.mxu3 %vm497_vm0, %v757_v48  ;;  %6718 = vmatmul.msk.f32.gmra.mxu1 %vm497_vm0, %v7450_v50 }
  0x92   : > { %6689 = vmatmul.msk.f32.gmra.mxu2 %vm497_vm0, %v757_v48  ;;  %6709 = vmatmul.msk.f32.gmra.mxu0 %vm497_vm0, %v857_v52 }
  0x93   : > { %6699 = vmatmul.msk.f32.gmra.mxu3 %vm497_vm0, %v758_v51  ;;  %6719 = vmatmul.msk.f32.gmra.mxu1 %vm497_vm0, %v7460_v53 }
  0x9a   : > { %6690 = vmatmul.msk.f32.gmra.mxu2 %vm497_vm0, %v758_v51  ;;  %6710 = vmatmul.msk.f32.gmra.mxu0 %vm497_vm0, %v858_v55  ;;  %v1156_v51 = vld [vmem:[%s7360_s19 + $0x62] sm:$0xff] }
  0x9b   : > { %6700 = vmatmul.msk.f32.gmra.mxu3 %vm497_vm0, %v759_v54  ;;  %6720 = vmatmul.msk.f32.gmra.mxu1 %vm497_vm0, %v7470_v56  ;;  %v1255_v55 = vld [vmem:[%s7360_s19 + $0x63] sm:$0xff] }
  0xa2   : > { %6691 = vmatmul.msk.f32.gmra.mxu2 %vm497_vm0, %v759_v54  ;;  %6711 = vmatmul.msk.f32.gmra.mxu0 %vm497_vm0, %v859_v58 }
  0xa3   : > { %6701 = vmatmul.msk.f32.gmra.mxu3 %vm497_vm0, %v760_v57  ;;  %6721 = vmatmul.msk.f32.gmra.mxu1 %vm497_vm0, %v7480_v59  ;;  %v1707_v57 = vld [vmem:[#allocation9 + $0x1a0] sm:$0xff] }
  0xaa   : > { %6722 = vmatmul.msk.f32.vlgmr.msra.gmra.mxu2 %vm497_vm0, %v950_v35  ;;  %6742 = vmatmul.msk.f32.vlgmr.msra.gmra.mxu0 %vm497_vm0, %v1246_v61 }
  0xab   : > { %6732 = vmatmul.msk.f32.vlgmr.msra.gmra.mxu3 %vm497_vm0, %v1147_v60  ;;  %v1704_v60 = vld [vmem:[#allocation9 + $0x188] sm:$0xff] }
  0xaf   : > { %v7493_v63 = vpop.f32.mrf.mxu0 }
  0xb0   : > { %v7568_v40 = vpop.f32.mrf.mxu1 }
  0xb2   : > { %6723 = vmatmul.msk.f32.gmra.mxu2 %vm497_vm0, %v951_v38  ;;  %6743 = vmatmul.msk.f32.gmra.mxu0 %vm497_vm0, %v1247_v0  ;;  %v1705_v0 = vld [vmem:[#allocation9 + $0x190] sm:$0xff] }
  0xb3   : > { %6733 = vmatmul.msk.f32.gmra.mxu3 %vm497_vm0, %v1148_v62 }
  0xb5   : > { %v560_v1 = vpop.f32.mrf.mxu2 }
  0xb6   : > { %v637_v2 = vpop.f32.mrf.mxu3 }
  0xb7   : > { %v7497_v3 = vadd.f32 %v637_v2, %v560_v1  ;;  %v7502_v5 = vpop.f32.mrf.mxu0  ;;  %v1702_v1 = vld [vmem:[#allocation9 + $0x178] sm:$0xff] }
  0xb8   : > { %v7584_v52 = vpop.f32.mrf.mxu1 }
  0xba   : > { %6724 = vmatmul.msk.f32.gmra.mxu2 %vm497_vm0, %v952_v41  ;;  %6744 = vmatmul.msk.f32.gmra.mxu0 %vm497_vm0, %v1248_v6  ;;  %v1713_v41 = vld [vmem:[#allocation9 + $0x1d0] sm:$0xff]  ;;  %v1703_v6 = vld [vmem:[#allocation9 + $0x180] sm:$0xff] }
  0xbb   : > { %6734 = vmatmul.msk.f32.gmra.mxu3 %vm497_vm0, %v1149_v4  ;;  %1721 = vmatpush.msra.mxu1 %v1713_v41 }
  0xbd   : > { %v7505_v7 = vpop.f32.mrf.mxu2  ;;  %1722 = vmatpush.msra.mxu1 %v1711_v46 }
  0xbe   : > { %v7507_v8 = vpop.f32.mrf.mxu3 }
  0xbf   : > { %v7513_v10 = vpop.f32.mrf.mxu0 }
  0xc0   : > { %v7596_v61 = vpop.f32.mrf.mxu1 }
  0xc2   : > { %6725 = vmatmul.msk.f32.gmra.mxu2 %vm497_vm0, %v953_v44  ;;  %6745 = vmatmul.msk.f32.gmra.mxu0 %vm497_vm0, %v1249_v11 }
  0xc3   : > { %6735 = vmatmul.msk.f32.gmra.mxu3 %vm497_vm0, %v1150_v9  ;;  %v1700_v9 = vld [vmem:[#allocation9 + $0x168] sm:$0xff] }
  0xc5   : > { %v7516_v12 = vpop.f32.mrf.mxu2 }
  0xc6   : > { %v7518_v13 = vpop.f32.mrf.mxu3 }
  0xc7   : > { %v7524_v15 = vpop.f32.mrf.mxu0 }
  0xca   : > { %6726 = vmatmul.msk.f32.gmra.mxu2 %vm497_vm0, %v954_v47  ;;  %6746 = vmatmul.msk.f32.gmra.mxu0 %vm497_vm0, %v1250_v16  ;;  %v1708_v47 = vld [vmem:[#allocation9 + $0x1a8] sm:$0xff]  ;;  %v1675_v16 = vld [vmem:[#allocation9 + $0xf8] sm:$0xff] }
  0xcb   : > { %6736 = vmatmul.msk.f32.gmra.mxu3 %vm497_vm0, %v1151_v14  ;;  %1771 = vmatpush.msrb.mxu2 %v1708_v47  ;;  %v1674_v14 = vld [vmem:[#allocation9 + $0xf0] sm:$0xff] }
  0xcc   : > { %1813 = vmatpush.msrb.mxu3 %v1674_v14  ;;  %1860 = vmatpush.msrb.mxu0 %v1675_v16  ;;  %v1658_v16 = vld [vmem:[#allocation9 + $0x70] sm:$0xff] }
  0xcd   : > { %v7527_v17 = vpop.f32.mrf.mxu2 }
  0xce   : > { %v7529_v18 = vpop.f32.mrf.mxu3  ;;  %1814 = vmatpush.msrb.mxu3 %v1672_v26 }
  0xcf   : > { %v7536_v20 = vpop.f32.mrf.mxu0 }
  0xd0   : > { %1815 = vmatpush.msrb.mxu3 %v1670_v32  ;;  %v1654_v32 = vld [vmem:[#allocation9 + $0x50] sm:$0xff] }
  0xd2   : > { %6727 = vmatmul.msk.f32.gmra.mxu2 %vm497_vm0, %v7450_v50  ;;  %6747 = vmatmul.msk.f32.gmra.mxu0 %vm497_vm0, %v1251_v21  ;;  %v1057_v50 = vld [vmem:[%s7360_s19 + $0x61] sm:$0xff] }
  0xd3   : > { %6737 = vmatmul.msk.f32.gmra.mxu3 %vm497_vm0, %v1152_v19  ;;  %v7606_v19 = vpop.f32.mrf.mxu1  ;;  %v1701_v21 = vld [vmem:[#allocation9 + $0x170] sm:$0xff] }
  0xd5   : > { %v7539_v23 = vpop.f32.mrf.mxu2 }
  0xd6   : > { %v7541_v24 = vpop.f32.mrf.mxu3 }
  0xd7   : > { %v7548_v27 = vpop.f32.mrf.mxu0 }
  0xda   : > { %6728 = vmatmul.msk.f32.gmra.mxu2 %vm497_vm0, %v7460_v53  ;;  %6748 = vmatmul.msk.f32.gmra.mxu0 %vm497_vm0, %v1252_v28  ;;  %v1709_v53 = vld [vmem:[#allocation9 + $0x1b0] sm:$0xff]  ;;  %v1673_v28 = vld [vmem:[#allocation9 + $0xe8] sm:$0xff] }
  0xdb   : > { %6738 = vmatmul.msk.f32.gmra.mxu3 %vm497_vm0, %v1153_v25  ;;  %1723 = vmatpush.msra.mxu1 %v1709_v53  ;;  %v7618_v53 = vpop.f32.mrf.mxu1 }
  0xdc   : > { %1861 = vmatpush.msrb.mxu0 %v1673_v28  ;;  %v1656_v28 = vld [vmem:[#allocation9 + $0x60] sm:$0xff] }
  0xdd   : > { %v7551_v30 = vpop.f32.mrf.mxu2  ;;  %1724 = vmatpush.msra.mxu1 %v1707_v57  ;;  %v1663_v57 = vld [vmem:[#allocation9 + $0x98] sm:$0xff] }
  0xde   : > { %v7553_v31 = vpop.f32.mrf.mxu3 }
  0xdf   : > { %v7560_v35 = vpop.f32.mrf.mxu0  ;;  %1725 = vmatpush.msra.mxu1 %v1705_v0 }
  0xe1   : > { %1726 = vmatpush.msra.mxu1 %v1703_v6  ;;  %v1661_v6 = vld [vmem:[#allocation9 + $0x88] sm:$0xff] }
  0xe2   : > { %6729 = vmatmul.msk.f32.gmra.mxu2 %vm497_vm0, %v7470_v56  ;;  %6749 = vmatmul.msk.f32.gmra.mxu0 %vm497_vm0, %v1253_v36  ;;  %v1706_v56 = vld [vmem:[#allocation9 + $0x198] sm:$0xff]  ;;  %v1668_v36 = vld [vmem:[#allocation9 + $0xc0] sm:$0xff] }
  0xe3   : > { %6739 = vmatmul.msk.f32.gmra.mxu3 %vm497_vm0, %v1154_v33  ;;  %1772 = vmatpush.msrb.mxu2 %v1706_v56  ;;  %v1671_v33 = vld [vmem:[#allocation9 + $0xd8] sm:$0xff]  ;;  %v1662_v56 = vld [vmem:[#allocation9 + $0x90] sm:$0xff]  ;;  %v7626_v26 = vpop.f32.mrf.mxu1 }
  0xe4   : > { %1727 = vmatpush.msra.mxu1 %v1701_v21  ;;  %1862 = vmatpush.msrb.mxu0 %v1671_v33  ;;  %v1659_v21 = vld [vmem:[#allocation9 + $0x78] sm:$0xff] }
  0xe5   : > { %v7563_v38 = vpop.f32.mrf.mxu2  ;;  %1773 = vmatpush.msrb.mxu2 %v1704_v60  ;;  %1816 = vmatpush.msrb.mxu3 %v1668_v36  ;;  %v1694_v60 = vld [vmem:[#allocation9 + $0x138] sm:$0xff]  ;;  %v1695_v36 = vld [vmem:[#allocation9 + $0x140] sm:$0xff] }
  0xe6   : > { %v7565_v39 = vpop.f32.mrf.mxu3  ;;  %1728 = vmatpush.msra.mxu1 %v1699_v34  ;;  %1863 = vmatpush.msrb.mxu0 %v1669_v37  ;;  %v1655_v33 = vld [vmem:[#allocation9 + $0x58] sm:$0xff] }
  0xe7   : > { %v7574_v44 = vpop.f32.mrf.mxu0  ;;  %1774 = vmatpush.msrb.mxu2 %v1702_v1  ;;  %1817 = vmatpush.msrb.mxu3 %v1666_v43  ;;  %v1660_v1 = vld [vmem:[#allocation9 + $0x80] sm:$0xff]  ;;  %v1693_v43 = vld [vmem:[#allocation9 + $0x130] sm:$0xff] }
  0xe9   : > { %1775 = vmatpush.msrb.mxu2 %v1700_v9 }
  0xea   : > { %6730 = vmatmul.msk.f32.gmra.mxu2 %vm497_vm0, %v7480_v59  ;;  %6750 = vmatmul.msk.f32.gmra.mxu0 %vm497_vm0, %v1254_v45  ;;  %v1667_v45 = vld [vmem:[#allocation9 + $0xb8] sm:$0xff] }
  0xeb   : > { %6740 = vmatmul.msk.f32.gmra.mxu3 %vm497_vm0, %v1155_v42  ;;  %1776 = vmatpush.msrb.mxu2 %v1698_v29  ;;  %v1696_v42 = vld [vmem:[#allocation9 + $0x148] sm:$0xff] }
  0xec   : > { %1864 = vmatpush.msrb.mxu0 %v1667_v45  ;;  %v1657_v29 = vld [vmem:[#allocation9 + $0x68] sm:$0xff]  ;;  %v1652_v45 = vld [vmem:[#allocation9 + $0x40] sm:$0xff] }
  0xed   : > { %v7577_v48 = vpop.f32.mrf.mxu2  ;;  %1777 = vmatpush.msrb.mxu2 %v1696_v42 }
  0xee   : > { %v7579_v49 = vpop.f32.mrf.mxu3 }
  0xef   : > { %v7588_v54 = vpop.f32.mrf.mxu0  ;;  %1778 = vmatpush.msrb.mxu2 %v1694_v60  ;;  %v7212_v60 = vmov 0.0  }
  0xf0   : > { %458 = vst [vmem:[#allocation2] sm:$0xff] %v7212_v60 }
  0xf1   : > { %459 = vst [vmem:[#allocation2 + $0x8] sm:$0xff] %v7212_v60 }
  0xf2   : > { %6731 = vmatmul.msk.f32.gmra.mxu2 %vm497_vm0, %v1057_v50  ;;  %6751 = vmatmul.msk.f32.gmra.mxu0 %vm497_vm0, %v1255_v55  ;;  %v1664_v50 = vld [vmem:[#allocation9 + $0xa0] sm:$0xff]  ;;  %v1697_v55 = vld [vmem:[#allocation9 + $0x150] sm:$0xff]  ;;  %460 = vst [vmem:[#allocation2 + $0x60] sm:$0xff] %v7212_v60 }
  0xf3   : > { %6741 = vmatmul.msk.f32.gmra.mxu3 %vm497_vm0, %v1156_v51  ;;  %v1665_v51 = vld [vmem:[#allocation9 + $0xa8] sm:$0xff]  ;;  %1729 = vmatpush.msra.mxu1 %v1697_v55  ;;  %461 = vst [vmem:[#allocation2 + $0x68] sm:$0xf] %v7212_v60  ;;  %vm3082_vm0 = vcmask 1041408  }
  0xf4   : > { %1818 = vmatpush.msrb.mxu3 %v1664_v50  ;;  %1865 = vmatpush.msrb.mxu0 %v1665_v51  ;;  %v1653_v50 = vld [vmem:[#allocation9 + $0x48] sm:$0xff]  ;;  %v623_v51 = vadd.f32 %v7568_v40, %v7493_v63  ;;  %v1648_v63 = vld [vmem:[#allocation9 + $0x20] sm:$0xff]  ;;  %462 = vst [vmem:[#allocation3 + $0x90] sm:$0xff] %v7212_v60 }
  0xf5   : > { %v7591_v58 = vpop.f32.mrf.mxu2  ;;  %1730 = vmatpush.msra.mxu1 %v1695_v36  ;;  %v1692_v55 = vld [vmem:[#allocation9 + $0x128] sm:$0xff]  ;;  %463 = vst [vmem:[#allocation3] sm:$0xff] %v7212_v60 }
  0xf6   : > { %v7593_v59 = vpop.f32.mrf.mxu3  ;;  %1819 = vmatpush.msrb.mxu3 %v1662_v56  ;;  %1866 = vmatpush.msrb.mxu0 %v1663_v57  ;;  %v1650_v56 = vld [vmem:[#allocation9 + $0x30] sm:$0xff]  ;;  %v1651_v57 = vld [vmem:[#allocation9 + $0x38] sm:$0xff]  ;;  %464 = vst [vmem:[#allocation3 + $0xb8] sm:$0xff] %v7212_v60 }
  0xf7   : > { %v7598_v62 = vpop.f32.mrf.mxu0  ;;  %1731 = vmatpush.msra.mxu1 %v1693_v43  ;;  %1779 = vmatpush.msrb.mxu2 %v1692_v55  ;;  %v1688_v55 = vld [vmem:[#allocation9 + $0x108] sm:$0xff]  ;;  %465 = vst [vmem:[#allocation3 + $0x18] sm:$0xff] %v7212_v60 }
  0xf8   : > { %1820 = vmatpush.msrb.mxu3 %v1660_v1  ;;  %1867 = vmatpush.msrb.mxu0 %v1661_v6  ;;  %v741_v1 = vadd.f32 %v7551_v30, %v623_v51  ;;  %v7638_v6 = vpop.f32.mrf.mxu1  ;;  %v1689_v30 = vld [vmem:[#allocation9 + $0x110] sm:$0xff]  ;;  %466 = vst [vmem:[#allocation3 + $0x30] sm:$0xff] %v7212_v60 }
  0xf9   : > { %467 = vst [vmem:[#allocation3 + $0x48] sm:$0xff] %v7212_v60 }
  0xfa   : > { %1821 = vmatpush.msrb.mxu3 %v1658_v16  ;;  %1868 = vmatpush.msrb.mxu0 %v1659_v21  ;;  %v1691_v16 = vld [vmem:[#allocation9 + $0x120] sm:$0xff]  ;;  %v1649_v21 = vld [vmem:[#allocation9 + $0x28] sm:$0xff]  ;;  %468 = vst [vmem:[#allocation3 + $0xd0] sm:$0xf] %v7212_v60 }
  0xfb   : > { %1732 = vmatpush.msra.mxu1 %v1691_v16  ;;  %469 = vst [vmem:[#allocation3 + $0x28] sm:$0xf] %v7212_v60 }
  0xfc   : > { %1822 = vmatpush.msrb.mxu3 %v1656_v28  ;;  %1869 = vmatpush.msrb.mxu0 %v1657_v29  ;;  %v1690_v28 = vld [vmem:[#allocation9 + $0x118] sm:$0xff]  ;;  %v1646_v29 = vld [vmem:[#allocation9 + $0x10] sm:$0xff]  ;;  %470 = vst [vmem:[#allocation4] sm:$0xff] %v7212_v60 }
  0xfd   : > { %v7600_v2 = vpop.f32.mrf.mxu2  ;;  %1780 = vmatpush.msrb.mxu2 %v1690_v28  ;;  %1733 = vmatpush.msra.mxu1 %v1689_v30  ;;  %v1676_v30 = vld [vmem:[#allocation2 + $0x6] sm:$0xff]  ;;  %471 = vst [vmem:[#allocation4 + $0x8] sm:$0xff] %v7212_v60 }
  0xfe   : > { %v7602_v4 = vpop.f32.mrf.mxu3  ;;  %1823 = vmatpush.msrb.mxu3 %v1654_v32  ;;  %1870 = vmatpush.msrb.mxu0 %v1655_v33  ;;  %v840_v32 = vadd.f32 %v7553_v31, %v741_v1  ;;  %v1647_v33 = vld [vmem:[#allocation9 + $0x18] sm:$0xff]  ;;  %v626_v31 = vadd.f32 %v7584_v52, %v7502_v5  ;;  %v7214_v1 = vmov 842150450   ;;  %v7216_v5 = vmov 1987475062   ;;  %472 = vst [vmem:[#allocation4 + $0x60] sm:$0xff] %v7212_v60 }
  0xff   : > { %v7604_v11 = vpop.f32.mrf.mxu0  ;;  %v1367_v16 = vunpack.c.l.s4 %v7214_v1  ;;  %1781 = vmatpush.msrb.mxu2 %v1688_v55  ;;  %v1375_v52 = vunpack.c.l.s4 %v7216_v5  ;;  %473 = vst [vmem:[#allocation4 + $0x68] sm:$0xf] %v7212_v60 }
 0x100   : > { %1824 = vmatpush.msrb.mxu3 %v1652_v45  ;;  %1871 = vmatpush.msrb.mxu0 %v1653_v50  ;;  %v1359_v45 = vlaneseq  ;;  %v7213_v50 = vmov 269488144  }
 0x101   : > { %v7652_v51 = vunpack.c.l.s4 %v7213_v50  ;;  %v742_v50 = vadd.f32 %v7563_v38, %v626_v31  ;;  %1782 = vmatmul.f32.vlgmr.msrb.gmra.mxu2 %v1676_v30 }
 0x102   : > { %1825 = vmatpush.msrb.mxu3 %v1650_v56  ;;  %1872 = vmatpush.msrb.mxu0 %v1651_v57  ;;  %v1687_v56 = vld [vmem:[#allocation9 + $0x100] sm:$0xff]  ;;  %v1360_v55 = vshrl.u32 %v1359_v45, 7  ;;  %v1376_v45 = vunpack.c.0.s8 %v1375_v52 }
 0x103   : > { %v1644_v57 = vld [vmem:[#allocation9] sm:$0xff]  ;;  %1734 = vmatpush.msra.mxu1 %v1687_v56  ;;  %v1364_v56 = vunpack.c.0.s8 %v7652_v51  ;;  %v629_v51 = vadd.f32 %v7596_v61, %v7513_v10 }
 0x104   : > { %1826 = vmatpush.msrb.mxu3 %v1648_v63  ;;  %1873 = vmatpush.msrb.mxu0 %v1649_v21  ;;  %v1645_v63 = vld [vmem:[#allocation9 + $0x8] sm:$0xff]  ;;  %v7215_v21 = vmov 1414812756   ;;  %v1377_v5 = vperm.slane %v1360_v55, %v1376_v45  ;;  %v1361_v60 = vadd.s32 8, %v1360_v55  ;;  %v9632_v45 = vmov 0 }
 0x105   : > { %v7608_v22 = vpop.f32.mrf.mxu2  ;;  %v1371_v28 = vunpack.c.l.s4 %v7215_v21  ;;  %1735 = vmatmul.f32.vlgmr.msra.gmra.mxu1 %v1676_v30  ;;  %v1365_v30 = vperm.slane %v1360_v55, %v1364_v56 }
 0x106   : > { %v7610_v25 = vpop.f32.mrf.mxu3  ;;  %1827 = vmatpush.msrb.mxu3 %v1646_v29  ;;  %1874 = vmatpush.msrb.mxu0 %v1647_v33  ;;  %v1634_v29 = vld [vmem:[#allocation2 + $0x5] sm:$0xff]  ;;  %v939_v33 = vadd.f32 %v7548_v27, %v840_v32  ;;  %v841_v32 = vadd.f32 %v7565_v39, %v742_v50  ;;  %vm1385_vm7 = vcmp.ge.s32.totalorder %v1377_v5, 1  ;;  %vm1390_vm8 = vcmp.le.s32.totalorder %v1377_v5, 8 }
 0x107   : > { %v7612_v41 = vpop.f32.mrf.mxu0  ;;  %v1372_v27 = vunpack.c.0.s8 %v1371_v28  ;;  %v743_v28 = vadd.f32 %v7577_v48, %v629_v51  ;;  %v7677_v50 = vld [vmem:[#allocation7] ss:$0 sm:$0xff]  ;;  %vm1382_vm1 = vcmp.ge.s32.totalorder %v1365_v30, 1  ;;  %vm1387_vm2 = vcmp.le.s32.totalorder %v1365_v30, 8  ;;  %vm7703_vm12 = vmand %vm1385_vm7, %vm1390_vm8 }
 0x108   : > { %1828 = vmatpush.msrb.mxu3 %v1644_v57  ;;  %1875 = vmatpush.msrb.mxu0 %v1645_v63  ;;  %v7664_v57 = vpop.f32.mrf.mxu1  ;;  %v1368_v63 = vunpack.c.0.s8 %v1367_v16  ;;  %v1038_v38 = vadd.f32 %v7626_v26, %v939_v33  ;;  %v940_v39 = vadd.f32 %v7560_v35, %v841_v32  ;;  %vm7685_vm9 = vmand %vm1382_vm1, %vm1387_vm2  ;;  %v1947_v32 = vld [vmem:[#allocation9 + $0x2e8] sm:$0xff]  ;;  %v1381_v30 = vperm.slane %v1361_v60, %v1364_v56 }
 0x109   : > { %1829 = vmatmul.f32.vlgmr.msrb.gmra.mxu3 %v1634_v29  ;;  %1876 = vmatmul.f32.vlgmr.msrb.gmra.mxu0 %v1634_v29  ;;  %v1373_v26 = vperm.slane %v1360_v55, %v1372_v27  ;;  %v842_v52 = vadd.f32 %v7579_v49, %v743_v28  ;;  %v9626_v27 = vmov 0  ;;  %v9629_v49 = vmov 0 }
 0x10a   : > { %v1369_v29 = vperm.slane %v1360_v55, %v1368_v63  ;;  %v1039_v48 = vadd.f32 %v7638_v6, %v940_v39  ;;  %v9627_v27 = vsel %vm7685_vm9, 4294967295, %v9626_v27  ;;  %vm1386_vm13 = vcmp.ge.s32.totalorder %v1381_v30, 1 }
 0x10b   : > { %vm1384_vm5 = vcmp.ge.s32.totalorder %v1373_v26, 1  ;;  %vm1389_vm6 = vcmp.le.s32.totalorder %v1373_v26, 8  ;;  %9628 = vst [vmem:[#allocation23_spill] sm:$0xff] %v9627_v27  ;;  %vm1391_vm14 = vcmp.le.s32.totalorder %v1381_v30, 8  ;;  %v635_v60 = vadd.f32 %v7618_v53, %v7536_v20 }
 0x10c   : > { %vm1383_vm3 = vcmp.ge.s32.totalorder %v1369_v29, 1  ;;  %vm1388_vm4 = vcmp.le.s32.totalorder %v1369_v29, 8  ;;  %vm7696_vm11 = vmand %vm1384_vm5, %vm1389_vm6  ;;  %vm3656_vm1 = vcmask 1042432   ;;  %vm3084_vm2 = vcmask 1043458  }
 0x10d   : > { %v7614_v46 = vpop.f32.mrf.mxu2  ;;  %vm7691_vm10 = vmand %vm1383_vm3, %vm1388_vm4  ;;  %v9633_v45 = vsel %vm7696_vm11, 4294967295, %v9632_v45  ;;  %vm3087_vm3 = vcmask 1045508   ;;  %vm3090_vm4 = vcmask 1045504   ;;  %vm3854_vm5 = vcmask 1040384  }
 0x10e   : > { %v7616_v47 = vpop.f32.mrf.mxu3  ;;  %v9630_v49 = vsel %vm7691_vm10, 4294967295, %v9629_v49  ;;  %9634 = vst [vmem:[#allocation25_spill] sm:$0xff] %v9633_v45  ;;  %vm7720_vm15 = vmand %vm1386_vm13, %vm1391_vm14  ;;  %vm5138_vm6 = vcmask 1044480   ;;  %vm4480_vm7 = vcmask 1046528  }
 0x10f   : > { %v7620_v0 = vpop.f32.mrf.mxu0  ;;  %9631 = vst [vmem:[#allocation24_spill] sm:$0xff] %v9630_v49 }
 0x110   : > { %v7681_v63 = vpop.f32.mrf.mxu1 }
 0x115   : > { %v7622_v9 = vpop.f32.mrf.mxu2 }
 0x116   : > { %v7624_v14 = vpop.f32.mrf.mxu3 }
 0x117   : > { %v7628_v34 = vpop.f32.mrf.mxu0 }
 0x11d   : > { %v7630_v37 = vpop.f32.mrf.mxu2 }
 0x11e   : > { %v7632_v42 = vpop.f32.mrf.mxu3 }
 0x11f   : > { %v7642_v40 = vpop.f32.mrf.mxu0 }
 0x125   : > { %v7648_v36 = vpop.f32.mrf.mxu2 }
 0x126   : > { %v7650_v43 = vpop.f32.mrf.mxu3 }
 0x127   : > { %v1305_v1 = vpop.f32.mrf.mxu0 }
 0x12d   : > { %v1107_v31 = vpop.f32.mrf.mxu2 }
 0x12e   : > { %v1206_v21 = vpop.f32.mrf.mxu3  ;;  %v1137_v16 = vadd.f32 %v1107_v31, %v1038_v38  ;;  %v1949_v38 = vld [vmem:[#allocation9 + $0x2f8] sm:$0xff] }
 0x12f   : > { %v1308_v61 = vpop.f32.mrf.mxu0  ;;  %1997 = vmatpush.msra.mxu2 %v1949_v38  ;;  %v745_v38 = vadd.f32 %v7600_v2, %v635_v60 }
 0x130   : > { %v1236_v33 = vadd.f32 %v1206_v21, %v1137_v16  ;;  %v941_v21 = vadd.f32 %v7574_v44, %v842_v52 }
 0x131   : > { %1998 = vmatpush.msra.mxu2 %v1947_v32  ;;  %v1948_v32 = vld [vmem:[#allocation9 + $0x2f0] sm:$0xff]  ;;  %v844_v2 = vadd.f32 %v7602_v4, %v745_v38 }
 0x132   : > { %v1335_v10 = vadd.f32 %v1305_v1, %v1236_v33  ;;  %v632_v1 = vadd.f32 %v7606_v19, %v7524_v15  ;;  %v9635_v19 = vmov 0  ;;  %1950 = vmatpush.msrb.mxu1 %v1948_v32  ;;  %v1944_v4 = vld [vmem:[#allocation9 + $0x2d0] sm:$0xff] }
 0x133   : > { %v9636_v19 = vsel %vm7703_vm12, 4294967295, %v9635_v19 }
 0x134   : > { %v1349_v35 = vadd.f32 %v7677_v50, %v1335_v10  ;;  %v744_v15 = vadd.f32 %v7591_v58, %v632_v1  ;;  %9637 = vst [vmem:[#allocation26_spill] sm:$0xff] %v9636_v19  ;;  %v1040_v10 = vadd.f32 %v7664_v57, %v941_v21 }
 0x135   : > { %v1110_v55 = vpop.f32.mrf.mxu2 }
 0x136   : > { %v1209_v6 = vpop.f32.mrf.mxu3  ;;  %v1397_v51 = vmax.f32 %v1349_v35, 0.0  ;;  %v1138_v31 = vadd.f32 %v1110_v55, %v1039_v48  ;;  %v843_v52 = vadd.f32 %v7593_v59, %v744_v15  ;;  %v1020_v55 = vpop.f32.mrf.mxu1  ;;  %v1945_v59 = vld [vmem:[#allocation9 + $0x2d8] sm:$0xff] }
 0x137   : > { %v1311_v5 = vpop.f32.mrf.mxu0  ;;  %1999 = vmatpush.msra.mxu2 %v1945_v59 }
 0x138   : > { %v1417_v16 = vrot.slane %v1397_v51, 2  ;;  %v1418_v29 = vrot.slane %v1397_v51, 4  ;;  %v1419_v28 = vrot.slane %v1397_v51, 6  ;;  %v1477_v26 = vsel %vm7685_vm9, %v1397_v51, 0.0  ;;  %v1946_v51 = vld [vmem:[#allocation9 + $0x2e0] sm:$0xff] }
 0x139   : > { %1557 = vst [vmem:[#allocation1] ss:$4 sm:$0xff] %v1477_v26  ;;  %v1237_v39 = vadd.f32 %v1209_v6, %v1138_v31  ;;  %v9638_v6 = vmov 0  ;;  %v942_v31 = vadd.f32 %v7588_v54, %v843_v52  ;;  %1951 = vmatpush.msrb.mxu1 %v1946_v51 }
 0x13a   : > { %v1478_v44 = vsel %vm7691_vm10, %v1417_v16, 0.0  ;;  %v1479_v58 = vsel %vm7696_vm11, %v1418_v29, 0.0  ;;  %v1480_v33 = vsel %vm7703_vm12, %v1419_v28, 0.0  ;;  %v9639_v6 = vsel %vm7720_vm15, 4294967295, %v9638_v6 }
 0x13b   : > { %1559 = vst [vmem:[#allocation1 + $0x1] ss:$4 sm:$0xff] %v1478_v44  ;;  %v1336_v56 = vadd.f32 %v1308_v61, %v1237_v39  ;;  %v1041_v26 = vadd.f32 %v7681_v63, %v942_v31  ;;  %1952 = vmatpush.msrb.mxu1 %v1944_v4  ;;  %v943_v63 = vadd.f32 %v7598_v62, %v844_v2 }
 0x13c   : > { %1561 = vst [vmem:[#allocation1 + $0x2] ss:$4 sm:$0xff] %v1479_v58 }
 0x13d   : > { %1563 = vst [vmem:[#allocation1 + $0x3] ss:$4 sm:$0xff] %v1480_v33  ;;  %v1350_v48 = vadd.f32 %v7677_v50, %v1336_v56  ;;  %v1113_v35 = vpop.f32.mrf.mxu2  ;;  %v1943_v56 = vld [vmem:[#allocation9 + $0x2c8] sm:$0xff]  ;;  %v1042_v31 = vadd.f32 %v1020_v55, %v943_v63 }
 0x13e   : > { %v1212_v1 = vpop.f32.mrf.mxu3  ;;  %9640 = vst [vmem:[#allocation27_spill] sm:$0xff] %v9639_v6  ;;  %v1139_v61 = vadd.f32 %v1113_v35, %v1040_v10  ;;  %v1941_v10 = vld [vmem:[#allocation9 + $0x2b8] sm:$0xff]  ;;  %2000 = vmatpush.msra.mxu2 %v1943_v56  ;;  %v1023_v35 = vpop.f32.mrf.mxu1 }
 0x13f   : > { %v1398_v57 = vmax.f32 %v1350_v48, 0.0  ;;  %v1314_v29 = vpop.f32.mrf.mxu0  ;;  %v746_v48 = vadd.f32 %v7608_v22, %v7497_v3  ;;  %v3457_v6 = vld [vmem:[#allocation12 + $0x178] sm:$0xff] }
 0x140   : > { %v1238_v20 = vadd.f32 %v1212_v1, %v1139_v61  ;;  %2001 = vmatpush.msra.mxu2 %v1941_v10 }
 0x141   : > { %v1420_v53 = vrot.slane %v1398_v57, 2  ;;  %v1421_v21 = vrot.slane %v1398_v57, 4  ;;  %v1422_v15 = vrot.slane %v1398_v57, 6  ;;  %v1481_v30 = vsel %vm7720_vm15, %v1398_v57, 0.0 }
 0x142   : > { %1565 = vst [vmem:[#allocation1 + $0x20] ss:$4 sm:$0xff] %v1481_v30  ;;  %v1337_v16 = vadd.f32 %v1311_v5, %v1238_v20  ;;  %v845_v20 = vadd.f32 %v7610_v25, %v746_v48 }
 0x143   : > { %v1482_v28 = vsel %vm7685_vm9, %v1420_v53, 0.0  ;;  %v1483_v54 = vsel %vm7691_vm10, %v1421_v21, 0.0  ;;  %v1484_v44 = vsel %vm7696_vm11, %v1422_v15, 0.0  ;;  %v641_v15 = vadd.f32 %v7507_v8, %v7505_v7 }
 0x144   : > { %v1572_v39 = vld.sshfl [vmem:[#allocation1] sm:$0xff pattern:$0x73625140]  ;;  %1567 = vst [vmem:[#allocation1 + $0x21] ss:$4 sm:$0xff] %v1482_v28  ;;  %v1351_v58 = vadd.f32 %v7677_v50, %v1337_v16  ;;  %v944_v7 = vadd.f32 %v7604_v11, %v845_v20 }
 0x145   : > { %1624 = vst [vmem:[#allocation2 + $0x10] sm:$0xff] %v1572_v39  ;;  %v1116_v33 = vpop.f32.mrf.mxu2  ;;  %v747_v55 = vadd.f32 %v7614_v46, %v641_v15  ;;  %v1940_v39 = vld [vmem:[#allocation9 + $0x2b0] sm:$0xff]  ;;  %v2106_v15 = vld [vmem:[#allocation9 + $0x3f8] sm:$0xff] }
 0x146   : > { %v1215_v5 = vpop.f32.mrf.mxu3  ;;  %1569 = vst [vmem:[#allocation1 + $0x22] ss:$4 sm:$0xff] %v1483_v54  ;;  %v1399_v52 = vmax.f32 %v1351_v58, 0.0  ;;  %v1140_v60 = vadd.f32 %v1116_v33, %v1041_v26  ;;  %v1942_v54 = vld [vmem:[#allocation9 + $0x2c0] sm:$0xff]  ;;  %v1939_v26 = vld [vmem:[#allocation9 + $0x2a8] sm:$0xff]  ;;  %v1026_v56 = vpop.f32.mrf.mxu1  ;;  %2154 = vmatpush.msra.mxu0 %v2106_v15 }
 0x147   : > { %1571 = vst [vmem:[#allocation1 + $0x23] ss:$4 sm:$0xff] %v1484_v44  ;;  %v1317_v22 = vpop.f32.mrf.mxu0  ;;  %1953 = vmatpush.msrb.mxu1 %v1942_v54  ;;  %2002 = vmatpush.msra.mxu2 %v1939_v26  ;;  %v846_v10 = vadd.f32 %v7616_v47, %v747_v55  ;;  %v2095_v15 = vld [vmem:[#allocation9 + $0x3a0] sm:$0xff] }
 0x148   : > { %v1423_v1 = vrot.slane %v1399_v52, 2  ;;  %v1424_v61 = vrot.slane %v1399_v52, 4  ;;  %v1425_v38 = vrot.slane %v1399_v52, 6  ;;  %v1485_v57 = vsel %vm7703_vm12, %v1399_v52, 0.0 }
 0x149   : > { %1574 = vst [vmem:[#allocation1] ss:$4 sm:$0xff] %v1485_v57  ;;  %v1239_v32 = vadd.f32 %v1215_v5, %v1140_v60  ;;  %1954 = vmatpush.msrb.mxu1 %v1940_v39  ;;  %v1043_v60 = vadd.f32 %v1023_v35, %v944_v7  ;;  %v1937_v57 = vld [vmem:[#allocation9 + $0x298] sm:$0xff]  ;;  %v2101_v7 = vld [vmem:[#allocation9 + $0x3d0] sm:$0xff] }
 0x14a   : > { %v1486_v59 = vsel %vm7720_vm15, %v1423_v1, 0.0  ;;  %v1487_v62 = vsel %vm7685_vm9, %v1424_v61, 0.0  ;;  %v1488_v3 = vsel %vm7691_vm10, %v1425_v38, 0.0  ;;  %v644_v61 = vadd.f32 %v7518_v13, %v7516_v12  ;;  %2003 = vmatpush.msra.mxu2 %v1937_v57  ;;  %v2097_v57 = vld [vmem:[#allocation9 + $0x3b0] sm:$0xff] }
 0x14b   : > { %1575 = vst [vmem:[#allocation1 + $0x1] ss:$4 sm:$0xff] %v1486_v59  ;;  %v1338_v51 = vadd.f32 %v1314_v29, %v1239_v32  ;;  %v1938_v32 = vld [vmem:[#allocation9 + $0x2a0] sm:$0xff] }
 0x14c   : > { %1576 = vst [vmem:[#allocation1 + $0x2] ss:$4 sm:$0xff] %v1487_v62  ;;  %v1677_v53 = vld [vmem:[#allocation2 + $0xe] sm:$0xff]  ;;  %1955 = vmatpush.msrb.mxu1 %v1938_v32  ;;  %v2098_v32 = vld [vmem:[#allocation9 + $0x3b8] sm:$0xff] }
 0x14d   : > { %v1635_v21 = vld [vmem:[#allocation2 + $0xd] sm:$0xff]  ;;  %1577 = vst [vmem:[#allocation1 + $0x3] ss:$4 sm:$0xff] %v1488_v3  ;;  %v1352_v30 = vadd.f32 %v7677_v50, %v1338_v51  ;;  %1738 = vmatmul.f32.gmra.mxu1 %v1677_v53  ;;  %1785 = vmatmul.f32.gmra.mxu2 %v1677_v53  ;;  %v1119_v16 = vpop.f32.mrf.mxu2  ;;  %v945_v51 = vadd.f32 %v7612_v41, %v846_v10 }
 0x14e   : > { %v1218_v2 = vpop.f32.mrf.mxu3  ;;  %v1573_v28 = vld.sshfl [vmem:[#allocation1 + $0x20] sm:$0xff pattern:$0x73625140]  ;;  %1832 = vmatmul.f32.gmra.mxu3 %v1635_v21  ;;  %1879 = vmatmul.f32.gmra.mxu0 %v1635_v21  ;;  %v1141_v29 = vadd.f32 %v1119_v16, %v1042_v31  ;;  %v748_v31 = vadd.f32 %v7622_v9, %v644_v61  ;;  %v1029_v26 = vpop.f32.mrf.mxu1 }
 0x14f   : > { %1625 = vst [vmem:[#allocation2 + $0x18] sm:$0xff] %v1573_v28  ;;  %v1400_v25 = vmax.f32 %v1352_v30, 0.0  ;;  %v1320_v46 = vpop.f32.mrf.mxu0  ;;  %v2105_v21 = vld [vmem:[#allocation9 + $0x3f0] sm:$0xff]  ;;  %v2103_v28 = vld [vmem:[#allocation9 + $0x3e0] sm:$0xff] }
 0x150   : > { %v1240_v8 = vadd.f32 %v1218_v2, %v1141_v29  ;;  %2107 = vmatpush.msra.mxu3 %v2105_v21  ;;  %v2104_v29 = vld [vmem:[#allocation9 + $0x3e8] sm:$0xff]  ;;  %v847_v54 = vadd.f32 %v7624_v14, %v748_v31  ;;  %v2099_v14 = vld [vmem:[#allocation9 + $0x3c0] sm:$0xff]  ;;  %v1929_v21 = vld [vmem:[#allocation9 + $0x258] sm:$0xff] }
 0x151   : > { %v1426_v44 = vrot.slane %v1400_v25, 2  ;;  %v1427_v58 = vrot.slane %v1400_v25, 4  ;;  %v1428_v33 = vrot.slane %v1400_v25, 6  ;;  %v1489_v5 = vsel %vm7696_vm11, %v1400_v25, 0.0  ;;  %2155 = vmatpush.msra.mxu0 %v2104_v29 }
 0x152   : > { %1578 = vst [vmem:[#allocation1 + $0x20] ss:$4 sm:$0xff] %v1489_v5  ;;  %v1339_v4 = vadd.f32 %v1317_v22, %v1240_v8  ;;  %v1935_v22 = vld [vmem:[#allocation9 + $0x288] sm:$0xff]  ;;  %2108 = vmatpush.msra.mxu3 %v2103_v28  ;;  %v1044_v25 = vadd.f32 %v1026_v56, %v945_v51  ;;  %v647_v8 = vadd.f32 %v7529_v18, %v7527_v17  ;;  %v1933_v17 = vld [vmem:[#allocation9 + $0x278] sm:$0xff] }
 0x153   : > { %v1490_v52 = vsel %vm7703_vm12, %v1426_v44, 0.0  ;;  %v1491_v11 = vsel %vm7720_vm15, %v1427_v58, 0.0  ;;  %v1492_v48 = vsel %vm7685_vm9, %v1428_v33, 0.0  ;;  %2004 = vmatpush.msra.mxu2 %v1935_v22  ;;  %v2100_v18 = vld [vmem:[#allocation9 + $0x3c8] sm:$0xff] }
 0x154   : > { %v1582_v63 = vld.sshfl [vmem:[#allocation1] sm:$0xff pattern:$0x73625140]  ;;  %1579 = vst [vmem:[#allocation1 + $0x21] ss:$4 sm:$0xff] %v1490_v52  ;;  %v1353_v1 = vadd.f32 %v7677_v50, %v1339_v4  ;;  %2109 = vmatpush.msra.mxu3 %v2101_v7  ;;  %v2102_v4 = vld [vmem:[#allocation9 + $0x3d8] sm:$0xff]  ;;  %v749_v10 = vadd.f32 %v7630_v37, %v647_v8 }
 0x155   : > { %1626 = vst [vmem:[#allocation2 + $0x20] sm:$0xff] %v1582_v63  ;;  %v1122_v38 = vpop.f32.mrf.mxu2  ;;  %2156 = vmatpush.msra.mxu0 %v2102_v4  ;;  %2005 = vmatpush.msra.mxu2 %v1933_v17 }
 0x156   : > { %v1221_v47 = vpop.f32.mrf.mxu3  ;;  %1580 = vst [vmem:[#allocation1 + $0x22] ss:$4 sm:$0xff] %v1491_v11  ;;  %v1401_v59 = vmax.f32 %v1353_v1, 0.0  ;;  %v1678_v62 = vld [vmem:[#allocation2 + $0x16] sm:$0xff]  ;;  %v1142_v35 = vadd.f32 %v1122_v38, %v1043_v60  ;;  %v946_v60 = vadd.f32 %v7620_v0, %v847_v54  ;;  %2110 = vmatpush.msra.mxu3 %v2099_v14  ;;  %v848_v0 = vadd.f32 %v7632_v42, %v749_v10  ;;  %v1032_v29 = vpop.f32.mrf.mxu1 }
 0x157   : > { %v1636_v3 = vld [vmem:[#allocation2 + $0x15] sm:$0xff]  ;;  %1581 = vst [vmem:[#allocation1 + $0x23] ss:$4 sm:$0xff] %v1492_v48  ;;  %1741 = vmatmul.f32.gmra.mxu1 %v1678_v62  ;;  %1788 = vmatmul.f32.gmra.mxu2 %v1678_v62  ;;  %v1323_v2 = vpop.f32.mrf.mxu0  ;;  %v1934_v48 = vld [vmem:[#allocation9 + $0x280] sm:$0xff]  ;;  %v650_v42 = vadd.f32 %v7541_v24, %v7539_v23 }
 0x158   : > { %v1429_v12 = vrot.slane %v1401_v59, 2  ;;  %v1430_v13 = vrot.slane %v1401_v59, 4  ;;  %v1431_v20 = vrot.slane %v1401_v59, 6  ;;  %v1493_v53 = vsel %vm7691_vm10, %v1401_v59, 0.0  ;;  %1835 = vmatmul.f32.gmra.mxu3 %v1636_v3  ;;  %1882 = vmatmul.f32.gmra.mxu0 %v1636_v3  ;;  %v1936_v11 = vld [vmem:[#allocation9 + $0x290] sm:$0xff]  ;;  %v1931_v1 = vld [vmem:[#allocation9 + $0x268] sm:$0xff] }
 0x159   : > { %1584 = vst [vmem:[#allocation1] ss:$4 sm:$0xff] %v1493_v53  ;;  %v1241_v30 = vadd.f32 %v1221_v47, %v1142_v35  ;;  %1956 = vmatpush.msrb.mxu1 %v1936_v11  ;;  %2157 = vmatpush.msra.mxu0 %v2100_v18  ;;  %v1045_v35 = vadd.f32 %v1029_v26, %v946_v60  ;;  %v1932_v53 = vld [vmem:[#allocation9 + $0x270] sm:$0xff]  ;;  %v2096_v23 = vld [vmem:[#allocation9 + $0x3a8] sm:$0xff] }
 0x15a   : > { %v1494_v41 = vsel %vm7696_vm11, %v1429_v12, 0.0  ;;  %v1495_v9 = vsel %vm7703_vm12, %v1430_v13, 0.0  ;;  %v1496_v16 = vsel %vm7720_vm15, %v1431_v20, 0.0  ;;  %2006 = vmatpush.msra.mxu2 %v1931_v1  ;;  %2111 = vmatpush.msra.mxu3 %v2097_v57  ;;  %v947_v28 = vadd.f32 %v7628_v34, %v848_v0  ;;  %v2094_v34 = vld [vmem:[#allocation9 + $0x398] sm:$0xff]  ;;  %v1928_v14 = vld [vmem:[#allocation9 + $0x250] sm:$0xff]  ;;  %v1926_v1 = vld [vmem:[#allocation9 + $0x240] sm:$0xff] }
 0x15b   : > { %1585 = vst [vmem:[#allocation1 + $0x1] ss:$4 sm:$0xff] %v1494_v41  ;;  %v1340_v55 = vadd.f32 %v1320_v46, %v1241_v30  ;;  %1957 = vmatpush.msrb.mxu1 %v1934_v48  ;;  %2158 = vmatpush.msra.mxu0 %v2098_v32  ;;  %v1927_v48 = vld [vmem:[#allocation9 + $0x248] sm:$0xff]  ;;  %v1925_v57 = vld [vmem:[#allocation9 + $0x238] sm:$0xff]  ;;  %v1924_v32 = vld [vmem:[#allocation9 + $0x230] sm:$0xff] }
 0x15c   : > { %1586 = vst [vmem:[#allocation1 + $0x2] ss:$4 sm:$0xff] %v1495_v9  ;;  %v1679_v39 = vld [vmem:[#allocation2 + $0x1e] sm:$0xff]  ;;  %2007 = vmatpush.msra.mxu2 %v1929_v21  ;;  %2112 = vmatpush.msra.mxu3 %v2095_v15  ;;  %v1046_v4 = vadd.f32 %v1032_v29, %v947_v28 }
 0x15d   : > { %1587 = vst [vmem:[#allocation1 + $0x3] ss:$4 sm:$0xff] %v1496_v16  ;;  %v1354_v44 = vadd.f32 %v7677_v50, %v1340_v55  ;;  %v1637_v58 = vld [vmem:[#allocation2 + $0x1d] sm:$0xff]  ;;  %v1125_v33 = vpop.f32.mrf.mxu2  ;;  %1958 = vmatpush.msrb.mxu1 %v1932_v53  ;;  %v750_v55 = vadd.f32 %v7648_v36, %v650_v42  ;;  %2159 = vmatpush.msra.mxu0 %v2096_v23 }
 0x15e   : > { %v1224_v5 = vpop.f32.mrf.mxu3  ;;  %v1583_v46 = vld.sshfl [vmem:[#allocation1 + $0x20] sm:$0xff pattern:$0x73625140]  ;;  %v1143_v56 = vadd.f32 %v1125_v33, %v1044_v25  ;;  %2008 = vmatpush.msra.mxu2 %v1927_v48  ;;  %v2086_v53 = vld [vmem:[#allocation9 + $0x358] sm:$0xff] }
 0x15f   : > { %1627 = vst [vmem:[#allocation2 + $0x28] sm:$0xff] %v1583_v46  ;;  %v1402_v52 = vmax.f32 %v1354_v44, 0.0  ;;  %1744 = vmatmul.f32.gmra.mxu1 %v1679_v39  ;;  %1791 = vmatmul.f32.gmra.mxu2 %v1679_v39  ;;  %v1326_v12 = vpop.f32.mrf.mxu0  ;;  %v2093_v39 = vld [vmem:[#allocation9 + $0x390] sm:$0xff]  ;;  %v849_v46 = vadd.f32 %v7650_v43, %v750_v55 }
 0x160   : > { %1838 = vmatmul.f32.gmra.mxu3 %v1637_v58  ;;  %1885 = vmatmul.f32.gmra.mxu0 %v1637_v58  ;;  %v1242_v63 = vadd.f32 %v1224_v5, %v1143_v56  ;;  %v2091_v58 = vld [vmem:[#allocation9 + $0x380] sm:$0xff]  ;;  %v2092_v5 = vld [vmem:[#allocation9 + $0x388] sm:$0xff]  ;;  %v2077_v48 = vld [vmem:[#allocation9 + $0x310] sm:$0xff] }
 0x161   : > { %v1432_v61 = vrot.slane %v1402_v52, 2  ;;  %v1433_v38 = vrot.slane %v1402_v52, 4  ;;  %v1434_v47 = vrot.slane %v1402_v52, 6  ;;  %v1497_v37 = vsel %vm7685_vm9, %v1402_v52, 0.0  ;;  %2113 = vmatpush.msra.mxu3 %v2093_v39  ;;  %2160 = vmatpush.msra.mxu0 %v2094_v34 }
 0x162   : > { %1588 = vst [vmem:[#allocation1 + $0x20] ss:$4 sm:$0xff] %v1497_v37  ;;  %v1341_v59 = vadd.f32 %v1323_v2, %v1242_v63  ;;  %v1930_v2 = vld [vmem:[#allocation9 + $0x260] sm:$0xff]  ;;  %2009 = vmatpush.msra.mxu2 %v1925_v57 }
 0x163   : > { %v1498_v62 = vsel %vm7691_vm10, %v1432_v61, 0.0  ;;  %v1499_v3 = vsel %vm7696_vm11, %v1433_v38, 0.0  ;;  %v1500_v51 = vsel %vm7703_vm12, %v1434_v47, 0.0  ;;  %1959 = vmatpush.msrb.mxu1 %v1930_v2  ;;  %2114 = vmatpush.msra.mxu3 %v2091_v58  ;;  %v2089_v61 = vld [vmem:[#allocation9 + $0x370] sm:$0xff]  ;;  %v2090_v38 = vld [vmem:[#allocation9 + $0x378] sm:$0xff]  ;;  %v948_v47 = vadd.f32 %v7642_v40, %v849_v46  ;;  %v1922_v40 = vld [vmem:[#allocation9 + $0x220] sm:$0xff] }
 0x164   : > { %v1592_v22 = vld.sshfl [vmem:[#allocation1] sm:$0xff pattern:$0x73625140]  ;;  %1589 = vst [vmem:[#allocation1 + $0x21] ss:$4 sm:$0xff] %v1498_v62  ;;  %v1355_v31 = vadd.f32 %v7677_v50, %v1341_v59  ;;  %2161 = vmatpush.msra.mxu0 %v2092_v5  ;;  %v1035_v59 = vpop.f32.mrf.mxu1  ;;  %v1918_v5 = vld [vmem:[#allocation9 + $0x200] sm:$0xff] }
 0x165   : > { %1628 = vst [vmem:[#allocation2 + $0x30] sm:$0xff] %v1592_v22  ;;  %v1128_v13 = vpop.f32.mrf.mxu2  ;;  %1960 = vmatpush.msrb.mxu1 %v1928_v14  ;;  %v2087_v22 = vld [vmem:[#allocation9 + $0x360] sm:$0xff]  ;;  %2115 = vmatpush.msra.mxu3 %v2089_v61  ;;  %v1047_v21 = vadd.f32 %v1035_v59, %v948_v47  ;;  %v2261_v61 = vld [vmem:[#allocation9 + $0x4e8] sm:$0xff] }
 0x166   : > { %v1227_v20 = vpop.f32.mrf.mxu3  ;;  %1590 = vst [vmem:[#allocation1 + $0x22] ss:$4 sm:$0xff] %v1499_v3  ;;  %v1403_v30 = vmax.f32 %v1355_v31, 0.0  ;;  %v1680_v41 = vld [vmem:[#allocation2 + $0x26] sm:$0xff]  ;;  %v1144_v16 = vadd.f32 %v1128_v13, %v1045_v35  ;;  %2162 = vmatpush.msra.mxu0 %v2090_v38  ;;  %v2076_v47 = vld [vmem:[#allocation9 + $0x308] sm:$0xff] }
 0x167   : > { %v1638_v9 = vld [vmem:[#allocation2 + $0x25] sm:$0xff]  ;;  %1591 = vst [vmem:[#allocation1 + $0x23] ss:$4 sm:$0xff] %v1500_v51  ;;  %1747 = vmatmul.f32.gmra.mxu1 %v1680_v41  ;;  %1794 = vmatmul.f32.gmra.mxu2 %v1680_v41  ;;  %v1329_v63 = vpop.f32.mrf.mxu0  ;;  %v2088_v51 = vld [vmem:[#allocation9 + $0x368] sm:$0xff] }
 0x168   : > { %v1435_v24 = vrot.slane %v1403_v30, 2  ;;  %v1436_v25 = vrot.slane %v1403_v30, 4  ;;  %v1437_v54 = vrot.slane %v1403_v30, 6  ;;  %v1501_v26 = vsel %vm7720_vm15, %v1403_v30, 0.0  ;;  %1841 = vmatmul.f32.gmra.mxu3 %v1638_v9  ;;  %1888 = vmatmul.f32.gmra.mxu0 %v1638_v9  ;;  %v2079_v14 = vld [vmem:[#allocation9 + $0x320] sm:$0xff] }
 0x169   : > { %1594 = vst [vmem:[#allocation1] ss:$4 sm:$0xff] %v1501_v26  ;;  %v1243_v7 = vadd.f32 %v1227_v20, %v1144_v16  ;;  %1961 = vmatpush.msrb.mxu1 %v1926_v1  ;;  %v2085_v20 = vld [vmem:[#allocation9 + $0x350] sm:$0xff]  ;;  %2116 = vmatpush.msra.mxu3 %v2087_v22  ;;  %v1921_v16 = vld [vmem:[#allocation9 + $0x218] sm:$0xff]  ;;  %v2075_v38 = vld [vmem:[#allocation9 + $0x300] sm:$0xff] }
 0x16a   : > { %v1502_v36 = vsel %vm7685_vm9, %v1435_v24, 0.0  ;;  %v1503_v8 = vsel %vm7691_vm10, %v1436_v25, 0.0  ;;  %v1504_v44 = vsel %vm7696_vm11, %v1437_v54, 0.0  ;;  %2163 = vmatpush.msra.mxu0 %v2088_v51  ;;  %v2083_v24 = vld [vmem:[#allocation9 + $0x340] sm:$0xff]  ;;  %v2084_v25 = vld [vmem:[#allocation9 + $0x348] sm:$0xff]  ;;  %v1920_v54 = vld [vmem:[#allocation9 + $0x210] sm:$0xff] }
 0x16b   : > { %1595 = vst [vmem:[#allocation1 + $0x1] ss:$4 sm:$0xff] %v1502_v36  ;;  %v1342_v33 = vadd.f32 %v1326_v12, %v1243_v7  ;;  %v1923_v12 = vld [vmem:[#allocation9 + $0x228] sm:$0xff]  ;;  %1962 = vmatpush.msrb.mxu1 %v1924_v32  ;;  %2117 = vmatpush.msra.mxu3 %v2085_v20  ;;  %v2078_v1 = vld [vmem:[#allocation9 + $0x318] sm:$0xff]  ;;  %v2256_v20 = vld [vmem:[#allocation9 + $0x4c0] sm:$0xff] }
 0x16c   : > { %1596 = vst [vmem:[#allocation1 + $0x2] ss:$4 sm:$0xff] %v1503_v8  ;;  %v1681_v56 = vld [vmem:[#allocation2 + $0x2e] sm:$0xff]  ;;  %2010 = vmatpush.msra.mxu2 %v1923_v12  ;;  %2164 = vmatpush.msra.mxu0 %v2086_v53  ;;  %v2081_v8 = vld [vmem:[#allocation9 + $0x330] sm:$0xff] }
 0x16d   : > { %1597 = vst [vmem:[#allocation1 + $0x3] ss:$4 sm:$0xff] %v1504_v44  ;;  %v1356_v10 = vadd.f32 %v7677_v50, %v1342_v33  ;;  %v1639_v52 = vld [vmem:[#allocation2 + $0x2d] sm:$0xff]  ;;  %v1131_v11 = vpop.f32.mrf.mxu2  ;;  %1963 = vmatpush.msrb.mxu1 %v1922_v40  ;;  %2118 = vmatpush.msra.mxu3 %v2083_v24  ;;  %v2082_v33 = vld [vmem:[#allocation9 + $0x338] sm:$0xff] }
 0x16e   : > { %v1230_v17 = vpop.f32.mrf.mxu3  ;;  %v1593_v18 = vld.sshfl [vmem:[#allocation1 + $0x20] sm:$0xff pattern:$0x73625140]  ;;  %v1145_v60 = vadd.f32 %v1131_v11, %v1046_v4  ;;  %2011 = vmatpush.msra.mxu2 %v1921_v16  ;;  %2165 = vmatpush.msra.mxu0 %v2084_v25  ;;  %v1907_v16 = vld [vmem:[#allocation2 + $0x7] sm:$0xff] }
 0x16f   : > { %1629 = vst [vmem:[#allocation2 + $0x38] sm:$0xff] %v1593_v18  ;;  %v1404_v43 = vmax.f32 %v1356_v10, 0.0  ;;  %1750 = vmatmul.f32.gmra.mxu1 %v1681_v56  ;;  %1797 = vmatmul.f32.gmra.mxu2 %v1681_v56  ;;  %v1332_v36 = vpop.f32.mrf.mxu0  ;;  %v1919_v44 = vld [vmem:[#allocation9 + $0x208] sm:$0xff]  ;;  %v2263_v10 = vld [vmem:[#allocation9 + $0x4f8] sm:$0xff]  ;;  %v2248_v25 = vld [vmem:[#allocation9 + $0x480] sm:$0xff] }
 0x170   : > { %1844 = vmatmul.f32.gmra.mxu3 %v1639_v52  ;;  %1891 = vmatmul.f32.gmra.mxu0 %v1639_v52  ;;  %v1244_v37 = vadd.f32 %v1230_v17, %v1145_v60  ;;  %v2080_v11 = vld [vmem:[#allocation9 + $0x328] sm:$0xff]  ;;  %v2247_v24 = vld [vmem:[#allocation9 + $0x478] sm:$0xff] }
 0x171   : > { %v1438_v0 = vrot.slane %v1404_v43, 2  ;;  %v1439_v62 = vrot.slane %v1404_v43, 4  ;;  %v1440_v3 = vrot.slane %v1404_v43, 6  ;;  %v1505_v35 = vsel %vm7703_vm12, %v1404_v43, 0.0  ;;  %1964 = vmatpush.msrb.mxu1 %v1920_v54  ;;  %2119 = vmatpush.msra.mxu3 %v2081_v8  ;;  %v2257_v22 = vld [vmem:[#allocation9 + $0x4c8] sm:$0xff]  ;;  %v2417_v8 = vld [vmem:[#allocation9 + $0x5e0] sm:$0xff] }
 0x172   : > { %1598 = vst [vmem:[#allocation1 + $0x20] ss:$4 sm:$0xff] %v1505_v35  ;;  %v1343_v31 = vadd.f32 %v1329_v63, %v1244_v37  ;;  %2012 = vmatpush.msra.mxu2 %v1919_v44  ;;  %2166 = vmatpush.msra.mxu0 %v2082_v33  ;;  %v2262_v37 = vld [vmem:[#allocation9 + $0x4f0] sm:$0xff]  ;;  %v2245_v54 = vld [vmem:[#allocation9 + $0x468] sm:$0xff] }
 0x173   : > { %v1506_v42 = vsel %vm7720_vm15, %v1438_v0, 0.0  ;;  %v1507_v13 = vsel %vm7685_vm9, %v1439_v62, 0.0  ;;  %v1508_v30 = vsel %vm7691_vm10, %v1440_v3, 0.0  ;;  %1965 = vmatpush.msrb.mxu1 %v1918_v5  ;;  %2120 = vmatpush.msra.mxu3 %v2079_v14  ;;  %v2259_v0 = vld [vmem:[#allocation9 + $0x4d8] sm:$0xff]  ;;  %v2260_v62 = vld [vmem:[#allocation9 + $0x4e0] sm:$0xff]  ;;  %v2418_v44 = vld [vmem:[#allocation9 + $0x5e8] sm:$0xff] }
 0x174   : > { %v1602_v15 = vld.sshfl [vmem:[#allocation1] sm:$0xff pattern:$0x73625140]  ;;  %1599 = vst [vmem:[#allocation1 + $0x21] ss:$4 sm:$0xff] %v1506_v42  ;;  %v1357_v41 = vadd.f32 %v7677_v50, %v1343_v31  ;;  %2311 = vmatpush.msrb.mxu2 %v2263_v10  ;;  %2167 = vmatpush.msra.mxu0 %v2080_v11  ;;  %v2416_v5 = vld [vmem:[#allocation9 + $0x5d8] sm:$0xff] }
 0x175   : > { %1630 = vst [vmem:[#allocation2 + $0x40] sm:$0xff] %v1602_v15  ;;  %v1134_v9 = vpop.f32.mrf.mxu2  ;;  %2121 = vmatpush.msra.mxu3 %v2077_v48  ;;  %2264 = vmatpush.msra.mxu1 %v2262_v37  ;;  %v2258_v42 = vld [vmem:[#allocation9 + $0x4d0] sm:$0xff]  ;;  %v2067_v14 = vld [vmem:[#allocation2 + $0x27] sm:$0xff] }
 0x176   : > { %1600 = vst [vmem:[#allocation1 + $0x22] ss:$4 sm:$0xff] %v1507_v13  ;;  %v1405_v2 = vmax.f32 %v1357_v41, 0.0  ;;  %v1682_v28 = vld [vmem:[#allocation2 + $0x36] sm:$0xff]  ;;  %v1146_v55 = vadd.f32 %v1134_v9, %v1047_v21  ;;  %v1233_v23 = vpop.f32.mrf.mxu3  ;;  %2168 = vmatpush.msra.mxu0 %v2078_v1  ;;  %2312 = vmatpush.msrb.mxu2 %v2261_v61  ;;  %v2255_v13 = vld [vmem:[#allocation9 + $0x4b8] sm:$0xff]  ;;  %v2405_v61 = vld [vmem:[#allocation9 + $0x580] sm:$0xff] }
 0x177   : > { %v1640_v29 = vld [vmem:[#allocation2 + $0x35] sm:$0xff]  ;;  %1601 = vst [vmem:[#allocation1 + $0x23] ss:$4 sm:$0xff] %v1508_v30  ;;  %1753 = vmatmul.f32.gmra.mxu1 %v1682_v28  ;;  %1800 = vmatmul.f32.gmra.mxu2 %v1682_v28  ;;  %v2251_v9 = vld [vmem:[#allocation9 + $0x498] sm:$0xff]  ;;  %v2252_v28 = vld [vmem:[#allocation9 + $0x4a0] sm:$0xff] }
 0x178   : > { %v1441_v26 = vrot.slane %v1405_v2, 2  ;;  %v1442_v39 = vrot.slane %v1405_v2, 4  ;;  %v1443_v7 = vrot.slane %v1405_v2, 6  ;;  %v1509_v34 = vsel %vm7696_vm11, %v1405_v2, 0.0  ;;  %1847 = vmatmul.f32.gmra.mxu3 %v1640_v29  ;;  %1894 = vmatmul.f32.gmra.mxu0 %v1640_v29  ;;  %v2253_v30 = vld [vmem:[#allocation9 + $0x4a8] sm:$0xff]  ;;  %v2254_v41 = vld [vmem:[#allocation9 + $0x4b0] sm:$0xff] }
 0x179   : > { %1604 = vst [vmem:[#allocation1] ss:$4 sm:$0xff] %v1509_v34  ;;  %v1245_v58 = vadd.f32 %v1233_v23, %v1146_v55  ;;  %2122 = vmatpush.msra.mxu3 %v2075_v38  ;;  %2169 = vmatpush.msra.mxu0 %v2076_v47  ;;  %v2064_v2 = vld [vmem:[#allocation2 + $0xf] sm:$0xff]  ;;  %v2250_v55 = vld [vmem:[#allocation9 + $0x490] sm:$0xff]  ;;  %v2420_v34 = vld [vmem:[#allocation9 + $0x5f8] sm:$0xff] }
 0x17a   : > { %v1510_v4 = vsel %vm7703_vm12, %v1441_v26, 0.0  ;;  %v1511_v46 = vsel %vm7720_vm15, %v1442_v39, 0.0  ;;  %v1512_v56 = vsel %vm7685_vm9, %v1443_v7, 0.0  ;;  %2313 = vmatpush.msrb.mxu2 %v2259_v0  ;;  %2265 = vmatpush.msra.mxu1 %v2260_v62  ;;  %v2249_v29 = vld [vmem:[#allocation9 + $0x488] sm:$0xff]  ;;  %v2066_v26 = vld [vmem:[#allocation2 + $0x1f] sm:$0xff] }
 0x17b   : > { %1605 = vst [vmem:[#allocation1 + $0x1] ss:$4 sm:$0xff] %v1510_v4  ;;  %v1344_v52 = vadd.f32 %v1332_v36, %v1245_v58  ;;  %v2065_v23 = vld [vmem:[#allocation2 + $0x17] sm:$0xff]  ;;  %v2243_v36 = vld [vmem:[#allocation9 + $0x458] sm:$0xff]  ;;  %2468 = vmatpush.msrb.mxu0 %v2420_v34  ;;  %v2244_v58 = vld [vmem:[#allocation9 + $0x460] sm:$0xff] }
 0x17c   : > { %1606 = vst [vmem:[#allocation1 + $0x2] ss:$4 sm:$0xff] %v1511_v46  ;;  %v1683_v17 = vld [vmem:[#allocation2 + $0x3e] sm:$0xff]  ;;  %2314 = vmatpush.msrb.mxu2 %v2257_v22  ;;  %2266 = vmatpush.msra.mxu1 %v2258_v42  ;;  %v2241_v4 = vld [vmem:[#allocation9 + $0x448] sm:$0xff]  ;;  %v2413_v46 = vld [vmem:[#allocation9 + $0x5c0] sm:$0xff] }
 0x17d   : > { %1607 = vst [vmem:[#allocation1 + $0x3] ss:$4 sm:$0xff] %v1512_v56  ;;  %v1358_v18 = vadd.f32 %v7677_v50, %v1344_v52  ;;  %v1641_v60 = vld [vmem:[#allocation2 + $0x3d] sm:$0xff]  ;;  %2469 = vmatpush.msrb.mxu0 %v2418_v44  ;;  %v2414_v56 = vld [vmem:[#allocation9 + $0x5c8] sm:$0xff] }
 0x17e   : > { %v1603_v63 = vld.sshfl [vmem:[#allocation1 + $0x20] sm:$0xff pattern:$0x73625140]  ;;  %2315 = vmatpush.msrb.mxu2 %v2255_v13  ;;  %2267 = vmatpush.msra.mxu1 %v2256_v20  ;;  %v2412_v52 = vld [vmem:[#allocation9 + $0x5b8] sm:$0xff] }
 0x17f   : > { %1631 = vst [vmem:[#allocation2 + $0x48] sm:$0xff] %v1603_v63  ;;  %v1406_v43 = vmax.f32 %v1358_v18, 0.0  ;;  %1756 = vmatmul.f32.gmra.mxu1 %v1683_v17  ;;  %1803 = vmatmul.f32.gmra.mxu2 %v1683_v17  ;;  %v2246_v39 = vld [vmem:[#allocation9 + $0x470] sm:$0xff]  ;;  %v2409_v17 = vld [vmem:[#allocation9 + $0x5a0] sm:$0xff]  ;;  %v2410_v18 = vld [vmem:[#allocation9 + $0x5a8] sm:$0xff] }
 0x180   : > { %1850 = vmatmul.f32.gmra.mxu3 %v1641_v60  ;;  %1897 = vmatmul.f32.gmra.mxu0 %v1641_v60  ;;  %v2419_v7 = vld [vmem:[#allocation9 + $0x5f0] sm:$0xff]  ;;  %v2239_v60 = vld [vmem:[#allocation9 + $0x438] sm:$0xff]  ;;  %v2240_v63 = vld [vmem:[#allocation9 + $0x440] sm:$0xff] }
 0x181   : > { %v1444_v57 = vrot.slane %v1406_v43, 2  ;;  %v1445_v32 = vrot.slane %v1406_v43, 4  ;;  %v1446_v50 = vrot.slane %v1406_v43, 6  ;;  %v1513_v59 = vsel %vm7691_vm10, %v1406_v43, 0.0  ;;  %2316 = vmatpush.msrb.mxu2 %v2253_v30  ;;  %2268 = vmatpush.msra.mxu1 %v2254_v41  ;;  %v2415_v33 = vld [vmem:[#allocation9 + $0x5d0] sm:$0xff]  ;;  %v2408_v1 = vld [vmem:[#allocation9 + $0x598] sm:$0xff] }
 0x182   : > { %1608 = vst [vmem:[#allocation1 + $0x20] ss:$4 sm:$0xff] %v1513_v59  ;;  %2421 = vmatpush.msrb.mxu3 %v2419_v7  ;;  %2470 = vmatpush.msrb.mxu0 %v2416_v5  ;;  %v2411_v10 = vld [vmem:[#allocation9 + $0x5b0] sm:$0xff]  ;;  %v2068_v43 = vld [vmem:[#allocation2 + $0x2f] sm:$0xff]  ;;  %v2400_v22 = vld [vmem:[#allocation9 + $0x558] sm:$0xff] }
 0x183   : > { %v1514_v3 = vsel %vm7696_vm11, %v1444_v57, 0.0  ;;  %v1515_v35 = vsel %vm7703_vm12, %v1445_v32, 0.0  ;;  %v1516_v31 = vsel %vm7720_vm15, %v1446_v50, 0.0  ;;  %2317 = vmatpush.msrb.mxu2 %v2251_v9  ;;  %2269 = vmatpush.msra.mxu1 %v2252_v28  ;;  %v2242_v11 = vld [vmem:[#allocation9 + $0x450] sm:$0xff]  ;;  %v2406_v38 = vld [vmem:[#allocation9 + $0x588] sm:$0xff]  ;;  %v2404_v57 = vld [vmem:[#allocation9 + $0x578] sm:$0xff] }
 0x184   : > { %v1612_v51 = vld.sshfl [vmem:[#allocation1] sm:$0xff pattern:$0x73625140]  ;;  %1609 = vst [vmem:[#allocation1 + $0x21] ss:$4 sm:$0xff] %v1514_v3  ;;  %2422 = vmatpush.msrb.mxu3 %v2417_v8  ;;  %2471 = vmatpush.msrb.mxu0 %v2414_v56  ;;  %v2235_v50 = vld [vmem:[#allocation9 + $0x418] sm:$0xff]  ;;  %v7833_v3 = vpop.f32.mrf.mxu1  ;;  %v7837_v20 = vpop.f32.mrf.mxu2 }
 0x185   : > { %1632 = vst [vmem:[#allocation2 + $0x50] sm:$0xff] %v1612_v51  ;;  %2318 = vmatpush.msrb.mxu2 %v2249_v29  ;;  %2270 = vmatpush.msra.mxu1 %v2250_v55  ;;  %v2407_v48 = vld [vmem:[#allocation9 + $0x590] sm:$0xff]  ;;  %v2237_v47 = vld [vmem:[#allocation9 + $0x428] sm:$0xff]  ;;  %v2401_v59 = vld [vmem:[#allocation9 + $0x560] sm:$0xff] }
 0x186   : > { %1610 = vst [vmem:[#allocation1 + $0x22] ss:$4 sm:$0xff] %v1515_v35  ;;  %v1684_v12 = vld [vmem:[#allocation2 + $0x46] sm:$0xff]  ;;  %2423 = vmatpush.msrb.mxu3 %v2415_v33  ;;  %2472 = vmatpush.msrb.mxu0 %v2412_v52  ;;  %v2403_v37 = vld [vmem:[#allocation9 + $0x570] sm:$0xff]  ;;  %v2402_v0 = vld [vmem:[#allocation9 + $0x568] sm:$0xff] }
 0x187   : > { %v1642_v40 = vld [vmem:[#allocation2 + $0x45] sm:$0xff]  ;;  %1611 = vst [vmem:[#allocation1 + $0x23] ss:$4 sm:$0xff] %v1516_v31  ;;  %1759 = vmatmul.f32.gmra.mxu1 %v1684_v12  ;;  %1806 = vmatmul.f32.gmra.mxu2 %v1684_v12  ;;  %v2238_v32 = vld [vmem:[#allocation9 + $0x430] sm:$0xff]  ;;  %v7835_v31 = vpop.f32.mrf.mxu0  ;;  %v2233_v42 = vld [vmem:[#allocation9 + $0x408] sm:$0xff] }
 0x188   : > { %1853 = vmatmul.f32.gmra.mxu3 %v1642_v40  ;;  %1900 = vmatmul.f32.gmra.mxu0 %v1642_v40  ;;  %v2069_v62 = vld [vmem:[#allocation2 + $0x37] sm:$0xff]  ;;  %v2236_v51 = vld [vmem:[#allocation9 + $0x420] sm:$0xff]  ;;  %v2392_v55 = vld [vmem:[#allocation9 + $0x518] sm:$0xff] }
 0x189   : > { %2319 = vmatpush.msrb.mxu2 %v2247_v24  ;;  %2271 = vmatpush.msra.mxu1 %v2248_v25  ;;  %v2399_v35 = vld [vmem:[#allocation9 + $0x550] sm:$0xff]  ;;  %v2397_v12 = vld [vmem:[#allocation9 + $0x540] sm:$0xff]  ;;  %v2398_v40 = vld [vmem:[#allocation9 + $0x548] sm:$0xff] }
 0x18a   : > { %2424 = vmatpush.msrb.mxu3 %v2413_v46  ;;  %2473 = vmatpush.msrb.mxu0 %v2410_v18  ;;  %v2234_v13 = vld [vmem:[#allocation9 + $0x410] sm:$0xff]  ;;  %v2232_v41 = vld [vmem:[#allocation9 + $0x400] sm:$0xff]  ;;  %v2575_v24 = vld [vmem:[#allocation9 + $0x6e8] sm:$0xff] }
 0x18b   : > { %2320 = vmatpush.msrb.mxu2 %v2245_v54  ;;  %2272 = vmatpush.msra.mxu1 %v2246_v39  ;;  %v2393_v9 = vld [vmem:[#allocation9 + $0x520] sm:$0xff]  ;;  %v2391_v29 = vld [vmem:[#allocation9 + $0x510] sm:$0xff]  ;;  %v2390_v54 = vld [vmem:[#allocation9 + $0x508] sm:$0xff] }
 0x18c   : > { %v1685_v53 = vld [vmem:[#allocation2 + $0x4e] sm:$0xff]  ;;  %2425 = vmatpush.msrb.mxu3 %v2411_v10  ;;  %2474 = vmatpush.msrb.mxu0 %v2408_v1  ;;  %v7839_v30 = vpop.f32.mrf.mxu3  ;;  %v2576_v7 = vld [vmem:[#allocation9 + $0x6f0] sm:$0xff]  ;;  %v2573_v34 = vld [vmem:[#allocation9 + $0x6d8] sm:$0xff] }
 0x18d   : > { %v1643_v21 = vld [vmem:[#allocation2 + $0x4d] sm:$0xff]  ;;  %2321 = vmatpush.msrb.mxu2 %v2243_v36  ;;  %2273 = vmatpush.msra.mxu1 %v2244_v58  ;;  %v2572_v56 = vld [vmem:[#allocation9 + $0x6d0] sm:$0xff]  ;;  %v2569_v18 = vld [vmem:[#allocation9 + $0x6b8] sm:$0xff]  ;;  %v1831_v19 = vadd.f32 %v7839_v30, %v7833_v3 }
 0x18e   : > { %v1613_v15 = vld.sshfl [vmem:[#allocation1 + $0x20] sm:$0xff pattern:$0x73625140]  ;;  %2426 = vmatpush.msrb.mxu3 %v2409_v17  ;;  %2475 = vmatpush.msrb.mxu0 %v2406_v38  ;;  %v2389_v25 = vld [vmem:[#allocation9 + $0x500] sm:$0xff] }
 0x18f   : > { %1633 = vst [vmem:[#allocation2 + $0x58] sm:$0xff] %v1613_v15  ;;  %1762 = vmatmul.f32.gmra.mxu1 %v1685_v53  ;;  %1809 = vmatmul.f32.gmra.mxu2 %v1685_v53  ;;  %v2395_v53 = vld [vmem:[#allocation9 + $0x530] sm:$0xff]  ;;  %v2574_v5 = vld [vmem:[#allocation9 + $0x6e0] sm:$0xff]  ;;  %v2567_v1 = vld [vmem:[#allocation9 + $0x6a8] sm:$0xff] }
 0x190   : > { %1856 = vmatmul.f32.gmra.mxu3 %v1643_v21  ;;  %1903 = vmatmul.f32.gmra.mxu0 %v1643_v21  ;;  %v2396_v21 = vld [vmem:[#allocation9 + $0x538] sm:$0xff]  ;;  %v2072_v46 = vld [vmem:[#allocation2 + $0x4f] sm:$0xff] }
 0x191   : > { %2322 = vmatpush.msrb.mxu2 %v2241_v4  ;;  %2274 = vmatpush.msra.mxu1 %v2242_v11  ;;  %v2070_v15 = vld [vmem:[#allocation2 + $0x3f] sm:$0xff]  ;;  %v2571_v4 = vld [vmem:[#allocation9 + $0x6c8] sm:$0xff] }
 0x192   : > { %2427 = vmatpush.msrb.mxu3 %v2407_v48  ;;  %2476 = vmatpush.msrb.mxu0 %v2404_v57  ;;  %v2568_v57 = vld [vmem:[#allocation9 + $0x6b0] sm:$0xff]  ;;  %v3424_v3 = vld [vmem:[#allocation12 + $0x98] sm:$0xff] }
 0x193   : > { %2323 = vmatpush.msrb.mxu2 %v2239_v60  ;;  %2275 = vmatpush.msra.mxu1 %v2240_v63  ;;  %v2570_v63 = vld [vmem:[#allocation9 + $0x6c0] sm:$0xff]  ;;  %v3444_v30 = vld [vmem:[#allocation12 + $0x110] sm:$0xff] }
 0x194   : > { %2428 = vmatpush.msrb.mxu3 %v2405_v61  ;;  %2477 = vmatpush.msrb.mxu0 %v2402_v0  ;;  %v2378_v0 = vld [vmem:[#allocation2 + $0x11] sm:$0xff] }
 0x195   : > { %2324 = vmatpush.msrb.mxu2 %v2237_v47  ;;  %2276 = vmatpush.msra.mxu1 %v2238_v32 }
 0x196   : > { %2429 = vmatpush.msrb.mxu3 %v2403_v37  ;;  %2478 = vmatpush.msrb.mxu0 %v2400_v22  ;;  %v2073_v48 = vld [vmem:[#allocation2 + $0x57] sm:$0xff] }
 0x197   : > { %1966 = vmatmul.f32.vlgmr.msrb.gmra.mxu1 %v1907_v16  ;;  %2013 = vmatmul.f32.vlgmr.msra.gmra.mxu2 %v1907_v16  ;;  %v2394_v16 = vld [vmem:[#allocation9 + $0x528] sm:$0xff] }
 0x198   : > { %2123 = vmatmul.f32.vlgmr.msra.gmra.mxu3 %v2064_v2  ;;  %2170 = vmatmul.f32.vlgmr.msra.gmra.mxu0 %v2064_v2 }
 0x199   : > { %2325 = vmatpush.msrb.mxu2 %v2235_v50  ;;  %2430 = vmatpush.msrb.mxu3 %v2401_v59  ;;  %v2565_v50 = vld [vmem:[#allocation9 + $0x698] sm:$0xff]  ;;  %v2221_v59 = vld [vmem:[#allocation2 + $0x10] sm:$0xff] }
 0x19a   : > { %2277 = vmatpush.msra.mxu1 %v2236_v51  ;;  %2479 = vmatpush.msrb.mxu0 %v2398_v40 }
 0x19b   : > { %2431 = vmatpush.msrb.mxu3 %v2399_v35  ;;  %2326 = vmatpush.msrb.mxu2 %v2233_v42  ;;  %v2563_v42 = vld [vmem:[#allocation9 + $0x688] sm:$0xff] }
 0x19c   : > { %2278 = vmatpush.msra.mxu1 %v2234_v13  ;;  %2480 = vmatpush.msrb.mxu0 %v2396_v21  ;;  %v2222_v21 = vld [vmem:[#allocation2 + $0x18] sm:$0xff] }
 0x19d   : > { %2432 = vmatpush.msrb.mxu3 %v2397_v12 }
 0x19e   : > { %2279 = vmatpush.msra.mxu1 %v2232_v41  ;;  %2481 = vmatpush.msrb.mxu0 %v2394_v16  ;;  %v2561_v41 = vld [vmem:[#allocation9 + $0x678] sm:$0xff] }
 0x19f   : > { %1969 = vmatmul.f32.gmra.mxu1 %v2064_v2  ;;  %2016 = vmatmul.f32.gmra.mxu2 %v2064_v2  ;;  %v2577_v2 = vld [vmem:[#allocation9 + $0x6f8] sm:$0xff] }
 0x1a0   : > { %2126 = vmatmul.f32.gmra.mxu3 %v2065_v23  ;;  %2173 = vmatmul.f32.gmra.mxu0 %v2065_v23 }
 0x1a1   : > { %2433 = vmatpush.msrb.mxu3 %v2395_v53  ;;  %2625 = vmatpush.msra.mxu2 %v2577_v2  ;;  %v2564_v53 = vld [vmem:[#allocation9 + $0x690] sm:$0xff] }
 0x1a2   : > { %2482 = vmatpush.msrb.mxu0 %v2392_v55  ;;  %2578 = vmatpush.msrb.mxu1 %v2576_v7  ;;  %v2562_v55 = vld [vmem:[#allocation9 + $0x680] sm:$0xff]  ;;  %v2734_v7 = vld [vmem:[#allocation9 + $0x7f8] sm:$0xff] }
 0x1a3   : > { %2434 = vmatpush.msrb.mxu3 %v2393_v9  ;;  %2626 = vmatpush.msra.mxu2 %v2575_v24  ;;  %v2559_v24 = vld [vmem:[#allocation9 + $0x668] sm:$0xff] }
 0x1a4   : > { %2483 = vmatpush.msrb.mxu0 %v2390_v54  ;;  %2579 = vmatpush.msrb.mxu1 %v2574_v5  ;;  %v7865_v54 = vld [vmem:[#allocation2 + $0x21] sm:$0xff] }
 0x1a5   : > { %2435 = vmatpush.msrb.mxu3 %v2391_v29  ;;  %2627 = vmatpush.msra.mxu2 %v2573_v34  ;;  %v2557_v34 = vld [vmem:[#allocation9 + $0x658] sm:$0xff] }
 0x1a6   : > { %2580 = vmatpush.msrb.mxu1 %v2572_v56  ;;  %2782 = vmatpush.msra.mxu0 %v2734_v7  ;;  %v2732_v56 = vld [vmem:[#allocation9 + $0x7e8] sm:$0xff]  ;;  %v2552_v7 = vld [vmem:[#allocation9 + $0x630] sm:$0xff] }
 0x1a7   : > { %1972 = vmatmul.f32.gmra.mxu1 %v2065_v23  ;;  %2019 = vmatmul.f32.gmra.mxu2 %v2065_v23 }
 0x1a8   : > { %2129 = vmatmul.f32.gmra.mxu3 %v2066_v26  ;;  %2176 = vmatmul.f32.gmra.mxu0 %v2066_v26 }
 0x1a9   : > { %2436 = vmatpush.msrb.mxu3 %v2389_v25  ;;  %2628 = vmatpush.msra.mxu2 %v2571_v4  ;;  %v2223_v25 = vld [vmem:[#allocation2 + $0x20] sm:$0xff] }
 0x1aa   : > { %2581 = vmatpush.msrb.mxu1 %v2570_v63  ;;  %2783 = vmatpush.msra.mxu0 %v2732_v56  ;;  %v7873_v63 = vld [vmem:[#allocation2 + $0x29] sm:$0xff]  ;;  %v7889_v56 = vld [vmem:[#allocation2 + $0x39] sm:$0xff] }
 0x1ab   : > { %2629 = vmatpush.msra.mxu2 %v2569_v18  ;;  %v2729_v18 = vld [vmem:[#allocation9 + $0x7d0] sm:$0xff] }
 0x1ac   : > { %2582 = vmatpush.msrb.mxu1 %v2568_v57  ;;  %v2725_v57 = vld [vmem:[#allocation9 + $0x7b0] sm:$0xff] }
 0x1ad   : > { %2630 = vmatpush.msra.mxu2 %v2567_v1  ;;  %v2727_v1 = vld [vmem:[#allocation9 + $0x7c0] sm:$0xff] }
 0x1af   : > { %1975 = vmatmul.f32.gmra.mxu1 %v2066_v26  ;;  %2022 = vmatmul.f32.gmra.mxu2 %v2066_v26  ;;  %v2071_v26 = vld [vmem:[#allocation2 + $0x47] sm:$0xff] }
 0x1b0   : > { %2132 = vmatmul.f32.gmra.mxu3 %v2067_v14  ;;  %2179 = vmatmul.f32.gmra.mxu0 %v2067_v14 }
 0x1b1   : > { %2631 = vmatpush.msra.mxu2 %v2565_v50 }
 0x1b3   : > { %2632 = vmatpush.msra.mxu2 %v2563_v42  ;;  %v2225_v42 = vld [vmem:[#allocation2 + $0x30] sm:$0xff] }
 0x1b5   : > { %2633 = vmatpush.msra.mxu2 %v2561_v41  ;;  %v2721_v41 = vld [vmem:[#allocation9 + $0x790] sm:$0xff] }
 0x1b7   : > { %1978 = vmatmul.f32.gmra.mxu1 %v2067_v14  ;;  %2025 = vmatmul.f32.gmra.mxu2 %v2067_v14 }
 0x1b8   : > { %2135 = vmatmul.f32.gmra.mxu3 %v2068_v43  ;;  %2182 = vmatmul.f32.gmra.mxu0 %v2068_v43 }
 0x1b9   : > { %2634 = vmatpush.msra.mxu2 %v2559_v24 }
 0x1bb   : > { %2635 = vmatpush.msra.mxu2 %v2557_v34 }
 0x1bf   : > { %1981 = vmatmul.f32.gmra.mxu1 %v2068_v43  ;;  %2028 = vmatmul.f32.gmra.mxu2 %v2068_v43 }
 0x1c0   : > { %2138 = vmatmul.f32.gmra.mxu3 %v2069_v62  ;;  %2185 = vmatmul.f32.gmra.mxu0 %v2069_v62 }
 0x1c7   : > { %1984 = vmatmul.f32.gmra.mxu1 %v2069_v62  ;;  %2031 = vmatmul.f32.gmra.mxu2 %v2069_v62  ;;  %v2566_v62 = vld [vmem:[#allocation9 + $0x6a0] sm:$0xff] }
 0x1c8   : > { %2141 = vmatmul.f32.gmra.mxu3 %v2070_v15  ;;  %2188 = vmatmul.f32.gmra.mxu0 %v2070_v15 }
 0x1c9   : > { %2583 = vmatpush.msrb.mxu1 %v2566_v62 }
 0x1ca   : > { %v1739_v28 = vpop.f32.mrf.mxu1 }
 0x1cb   : > { %v1880_v23 = vpop.f32.mrf.mxu0  ;;  %2584 = vmatpush.msrb.mxu1 %v2564_v53  ;;  %v2724_v53 = vld [vmem:[#allocation9 + $0x7a8] sm:$0xff] }
 0x1cd   : > { %2585 = vmatpush.msrb.mxu1 %v2562_v55  ;;  %v2719_v55 = vld [vmem:[#allocation9 + $0x780] sm:$0xff] }
 0x1cf   : > { %1987 = vmatmul.f32.gmra.mxu1 %v2070_v15  ;;  %2034 = vmatmul.f32.gmra.mxu2 %v2070_v15  ;;  %v7857_v15 = vld [vmem:[#allocation2 + $0x19] sm:$0xff] }
 0x1d0   : > { %2144 = vmatmul.f32.gmra.mxu3 %v2071_v26  ;;  %2191 = vmatmul.f32.gmra.mxu0 %v2071_v26  ;;  %v1786_v39 = vpop.f32.mrf.mxu2 }
 0x1d1   : > { %v7841_v36 = vadd.f32 %v1880_v23, %v1786_v39  ;;  %v1833_v8 = vpop.f32.mrf.mxu3  ;;  %v2733_v39 = vld [vmem:[#allocation9 + $0x7f0] sm:$0xff] }
 0x1d2   : > { %v7843_v44 = vadd.f32 %v1833_v8, %v1739_v28  ;;  %2735 = vmatpush.msra.mxu3 %v2733_v39 }
 0x1d4   : > { %v1742_v58 = vpop.f32.mrf.mxu1 }
 0x1d5   : > { %v1883_v33 = vpop.f32.mrf.mxu0 }
 0x1d7   : > { %1990 = vmatmul.f32.gmra.mxu1 %v2071_v26  ;;  %2037 = vmatmul.f32.gmra.mxu2 %v2071_v26  ;;  %v2560_v26 = vld [vmem:[#allocation9 + $0x670] sm:$0xff] }
 0x1d8   : > { %2147 = vmatmul.f32.gmra.mxu3 %v2072_v46  ;;  %2194 = vmatmul.f32.gmra.mxu0 %v2072_v46 }
 0x1d9   : > { %2586 = vmatpush.msrb.mxu1 %v2560_v26 }
 0x1da   : > { %v1789_v14 = vpop.f32.mrf.mxu2 }
 0x1db   : > { %v7845_v10 = vadd.f32 %v1883_v33, %v1789_v14  ;;  %v1836_v52 = vpop.f32.mrf.mxu3 }
 0x1dc   : > { %v7847_v11 = vadd.f32 %v1836_v52, %v1742_v58  ;;  %v1745_v17 = vpop.f32.mrf.mxu1  ;;  %v2558_v52 = vld [vmem:[#allocation9 + $0x660] sm:$0xff] }
 0x1dd   : > { %v1886_v60 = vpop.f32.mrf.mxu0  ;;  %2587 = vmatpush.msrb.mxu1 %v2558_v52  ;;  %v2716_v52 = vld [vmem:[#allocation9 + $0x768] sm:$0xff] }
 0x1df   : > { %1993 = vmatmul.f32.gmra.mxu1 %v2072_v46  ;;  %2040 = vmatmul.f32.gmra.mxu2 %v2072_v46  ;;  %v2731_v46 = vld [vmem:[#allocation9 + $0x7e0] sm:$0xff] }
 0x1e0   : > { %2150 = vmatmul.f32.gmra.mxu3 %v2073_v48  ;;  %2197 = vmatmul.f32.gmra.mxu0 %v2073_v48  ;;  %v2555_v48 = vld [vmem:[#allocation9 + $0x648] sm:$0xff] }
 0x1e1   : > { %2736 = vmatpush.msra.mxu3 %v2731_v46  ;;  %2636 = vmatpush.msra.mxu2 %v2555_v48  ;;  %v2718_v46 = vld [vmem:[#allocation9 + $0x778] sm:$0xff] }
 0x1e2   : > { %v1792_v43 = vpop.f32.mrf.mxu2  ;;  %v2714_v48 = vld [vmem:[#allocation9 + $0x758] sm:$0xff] }
 0x1e3   : > { %v7849_v61 = vadd.f32 %v1886_v60, %v1792_v43  ;;  %v1839_v38 = vpop.f32.mrf.mxu3  ;;  %v2730_v60 = vld [vmem:[#allocation9 + $0x7d8] sm:$0xff]  ;;  %v2728_v43 = vld [vmem:[#allocation9 + $0x7c8] sm:$0xff]  ;;  %2737 = vmatpush.msra.mxu3 %v2729_v18 }
 0x1e4   : > { %v7851_v47 = vadd.f32 %v1839_v38, %v1745_v17  ;;  %v1748_v37 = vpop.f32.mrf.mxu1  ;;  %v2224_v17 = vld [vmem:[#allocation2 + $0x28] sm:$0xff]  ;;  %v2556_v38 = vld [vmem:[#allocation9 + $0x650] sm:$0xff]  ;;  %2784 = vmatpush.msra.mxu0 %v2730_v60 }
 0x1e5   : > { %v1889_v32 = vpop.f32.mrf.mxu0  ;;  %2588 = vmatpush.msrb.mxu1 %v2556_v38  ;;  %2738 = vmatpush.msra.mxu3 %v2727_v1  ;;  %v2713_v60 = vld [vmem:[#allocation9 + $0x750] sm:$0xff] }
 0x1e6   : > { %2785 = vmatpush.msra.mxu0 %v2728_v43 }
 0x1e7   : > { %2280 = vmatmul.f32.vlgmr.msra.gmra.mxu1 %v2221_v59  ;;  %2327 = vmatmul.f32.vlgmr.msrb.gmra.mxu2 %v2221_v59 }
 0x1e8   : > { %2437 = vmatmul.f32.vlgmr.msrb.gmra.mxu3 %v2378_v0  ;;  %2484 = vmatmul.f32.vlgmr.msrb.gmra.mxu0 %v2378_v0 }
 0x1e9   : > { %2739 = vmatpush.msra.mxu3 %v2725_v57  ;;  %v2547_v57 = vld [vmem:[#allocation9 + $0x608] sm:$0xff] }
 0x1ea   : > { %v1795_v35 = vpop.f32.mrf.mxu2 }
 0x1eb   : > { %v7853_v22 = vadd.f32 %v1889_v32, %v1795_v35  ;;  %v1842_v51 = vpop.f32.mrf.mxu3  ;;  %v2726_v32 = vld [vmem:[#allocation9 + $0x7b8] sm:$0xff] }
 0x1ec   : > { %v7855_v12 = vadd.f32 %v1842_v51, %v1748_v37  ;;  %v1751_v40 = vpop.f32.mrf.mxu1  ;;  %v2553_v35 = vld [vmem:[#allocation9 + $0x638] sm:$0xff]  ;;  %2786 = vmatpush.msra.mxu0 %v2726_v32 }
 0x1ed   : > { %v1892_v13 = vpop.f32.mrf.mxu0  ;;  %2637 = vmatpush.msra.mxu2 %v2553_v35  ;;  %v2711_v35 = vld [vmem:[#allocation9 + $0x740] sm:$0xff] }
 0x1ee   : > { %2787 = vmatpush.msra.mxu0 %v2724_v53  ;;  %v2710_v53 = vld [vmem:[#allocation9 + $0x738] sm:$0xff] }
 0x1ef   : > { %2283 = vmatmul.f32.gmra.mxu1 %v2222_v21  ;;  %2330 = vmatmul.f32.gmra.mxu2 %v2222_v21  ;;  %v7881_v21 = vld [vmem:[#allocation2 + $0x31] sm:$0xff] }
 0x1f0   : > { %2440 = vmatmul.f32.gmra.mxu3 %v7857_v15  ;;  %2487 = vmatmul.f32.gmra.mxu0 %v7857_v15 }
 0x1f2   : > { %v1798_v9 = vpop.f32.mrf.mxu2 }
 0x1f3   : > { %v7861_v16 = vadd.f32 %v1892_v13, %v1798_v9  ;;  %v1845_v2 = vpop.f32.mrf.mxu3  ;;  %v2723_v13 = vld [vmem:[#allocation9 + $0x7a0] sm:$0xff]  ;;  %v2722_v9 = vld [vmem:[#allocation9 + $0x798] sm:$0xff] }
 0x1f4   : > { %v7863_v28 = vadd.f32 %v1845_v2, %v1751_v40  ;;  %v1754_v29 = vpop.f32.mrf.mxu1  ;;  %v2554_v40 = vld [vmem:[#allocation9 + $0x640] sm:$0xff]  ;;  %v2551_v2 = vld [vmem:[#allocation9 + $0x628] sm:$0xff]  ;;  %2740 = vmatpush.msra.mxu3 %v2723_v13  ;;  %2788 = vmatpush.msra.mxu0 %v2722_v9  ;;  %v2709_v13 = vld [vmem:[#allocation9 + $0x730] sm:$0xff]  ;;  %v1878_v9 = vadd.f32 %v7835_v31, %v7837_v20 }
 0x1f5   : > { %v1895_v23 = vpop.f32.mrf.mxu0  ;;  %2589 = vmatpush.msrb.mxu1 %v2554_v40  ;;  %2638 = vmatpush.msra.mxu2 %v2551_v2  ;;  %v7899_v40 = vld [vmem:[#allocation2 + $0x41] sm:$0xff] }
 0x1f6   : > { %2741 = vmatpush.msra.mxu3 %v2721_v41  ;;  %v2891_v41 = vld [vmem:[#allocation9 + $0x8f8] sm:$0xff]  ;;  %v2705_v20 = vld [vmem:[#allocation9 + $0x710] sm:$0xff] }
 0x1f7   : > { %2286 = vmatmul.f32.gmra.mxu1 %v2223_v25  ;;  %2333 = vmatmul.f32.gmra.mxu2 %v2223_v25  ;;  %v2228_v31 = vld [vmem:[#allocation2 + $0x48] sm:$0xff] }
 0x1f8   : > { %2443 = vmatmul.f32.gmra.mxu3 %v7865_v54  ;;  %2490 = vmatmul.f32.gmra.mxu0 %v7865_v54 }
 0x1f9   : > { %2742 = vmatpush.msra.mxu3 %v2719_v55  ;;  %2590 = vmatpush.msrb.mxu1 %v2552_v7  ;;  %v2708_v55 = vld [vmem:[#allocation9 + $0x728] sm:$0xff] }
 0x1fa   : > { %v1801_v8 = vpop.f32.mrf.mxu2 }
 0x1fb   : > { %v7869_v58 = vadd.f32 %v1895_v23, %v1801_v8  ;;  %v1848_v33 = vpop.f32.mrf.mxu3  ;;  %v2720_v23 = vld [vmem:[#allocation9 + $0x788] sm:$0xff]  ;;  %v2549_v8 = vld [vmem:[#allocation9 + $0x618] sm:$0xff] }
 0x1fc   : > { %v7871_v5 = vadd.f32 %v1848_v33, %v1754_v29  ;;  %v1757_v4 = vpop.f32.mrf.mxu1  ;;  %2789 = vmatpush.msra.mxu0 %v2720_v23  ;;  %v2226_v33 = vld [vmem:[#allocation2 + $0x38] sm:$0xff]  ;;  %2639 = vmatpush.msra.mxu2 %v2549_v8 }
 0x1fd   : > { %v1898_v14 = vpop.f32.mrf.mxu0 }
 0x1fe   : > { %2790 = vmatpush.msra.mxu0 %v2718_v46  ;;  %2640 = vmatpush.msra.mxu2 %v2547_v57  ;;  %v2703_v46 = vld [vmem:[#allocation9 + $0x700] sm:$0xff] }
 0x1ff   : > { %2289 = vmatmul.f32.gmra.mxu1 %v2224_v17  ;;  %2336 = vmatmul.f32.gmra.mxu2 %v2224_v17  ;;  %v2550_v17 = vld [vmem:[#allocation9 + $0x620] sm:$0xff] }
 0x200   : > { %2446 = vmatmul.f32.gmra.mxu3 %v7873_v63  ;;  %2493 = vmatmul.f32.gmra.mxu0 %v7873_v63 }
 0x201   : > { %2591 = vmatpush.msrb.mxu1 %v2550_v17  ;;  %2791 = vmatpush.msra.mxu0 %v2716_v52  ;;  %v2890_v52 = vld [vmem:[#allocation9 + $0x8f0] sm:$0xff]  ;;  %v2887_v17 = vld [vmem:[#allocation9 + $0x8d8] sm:$0xff] }
 0x202   : > { %v1804_v37 = vpop.f32.mrf.mxu2  ;;  %2939 = vmatpush.msrb.mxu2 %v2891_v41 }
 0x203   : > { %v7877_v50 = vadd.f32 %v1898_v14, %v1804_v37  ;;  %v1851_v59 = vpop.f32.mrf.mxu3  ;;  %v2715_v14 = vld [vmem:[#allocation9 + $0x760] sm:$0xff]  ;;  %2792 = vmatpush.msra.mxu0 %v2714_v48 }
 0x204   : > { %v7879_v0 = vadd.f32 %v1851_v59, %v1757_v4  ;;  %v1760_v62 = vpop.f32.mrf.mxu1  ;;  %v2717_v4 = vld [vmem:[#allocation9 + $0x770] sm:$0xff] }
 0x205   : > { %v1901_v51 = vpop.f32.mrf.mxu0  ;;  %2743 = vmatpush.msra.mxu3 %v2717_v4  ;;  %v2548_v59 = vld [vmem:[#allocation9 + $0x610] sm:$0xff]  ;;  %v7909_v4 = vld [vmem:[#allocation2 + $0x49] sm:$0xff] }
 0x206   : > { %2592 = vmatpush.msrb.mxu1 %v2548_v59  ;;  %v2888_v59 = vld [vmem:[#allocation9 + $0x8e0] sm:$0xff] }
 0x207   : > { %2292 = vmatmul.f32.gmra.mxu1 %v2225_v42  ;;  %2339 = vmatmul.f32.gmra.mxu2 %v2225_v42  ;;  %v2546_v42 = vld [vmem:[#allocation9 + $0x600] sm:$0xff] }
 0x208   : > { %2449 = vmatmul.f32.gmra.mxu3 %v7881_v21  ;;  %2496 = vmatmul.f32.gmra.mxu0 %v7881_v21 }
 0x209   : > { %2744 = vmatpush.msra.mxu3 %v2715_v14  ;;  %2593 = vmatpush.msrb.mxu1 %v2546_v42  ;;  %v2704_v14 = vld [vmem:[#allocation9 + $0x708] sm:$0xff] }
 0x20a   : > { %v1807_v29 = vpop.f32.mrf.mxu2  ;;  %v2229_v42 = vld [vmem:[#allocation2 + $0x50] sm:$0xff] }
 0x20b   : > { %v7885_v24 = vadd.f32 %v1901_v51, %v1807_v29  ;;  %v1854_v25 = vpop.f32.mrf.mxu3  ;;  %2745 = vmatpush.msra.mxu3 %v2713_v60  ;;  %v2712_v51 = vld [vmem:[#allocation9 + $0x748] sm:$0xff]  ;;  %v2707_v29 = vld [vmem:[#allocation9 + $0x720] sm:$0xff]  ;;  %2892 = vmatpush.msra.mxu1 %v2890_v52 }
 0x20c   : > { %v7887_v26 = vadd.f32 %v1854_v25, %v1760_v62  ;;  %v1763_v39 = vpop.f32.mrf.mxu1  ;;  %v2227_v62 = vld [vmem:[#allocation2 + $0x40] sm:$0xff]  ;;  %2793 = vmatpush.msra.mxu0 %v2712_v51 }
 0x20d   : > { %v1904_v34 = vpop.f32.mrf.mxu0  ;;  %2746 = vmatpush.msra.mxu3 %v2711_v35  ;;  %2893 = vmatpush.msra.mxu1 %v2888_v59 }
 0x20e   : > { %2794 = vmatpush.msra.mxu0 %v2710_v53 }
 0x20f   : > { %2295 = vmatmul.f32.gmra.mxu1 %v2226_v33  ;;  %2342 = vmatmul.f32.gmra.mxu2 %v2226_v33  ;;  %v2706_v33 = vld [vmem:[#allocation9 + $0x718] sm:$0xff] }
 0x210   : > { %2452 = vmatmul.f32.gmra.mxu3 %v7889_v56  ;;  %2499 = vmatmul.f32.gmra.mxu0 %v7889_v56 }
 0x211   : > { %2747 = vmatpush.msra.mxu3 %v2709_v13  ;;  %2795 = vmatpush.msra.mxu0 %v2708_v55  ;;  %v2883_v55 = vld [vmem:[#allocation9 + $0x8b8] sm:$0xff] }
 0x212   : > { %v1810_v18 = vpop.f32.mrf.mxu2 }
 0x213   : > { %v7893_v1 = vadd.f32 %v1904_v34, %v1810_v18  ;;  %v1857_v43 = vpop.f32.mrf.mxu3  ;;  %2748 = vmatpush.msra.mxu3 %v2707_v29  ;;  %v2889_v34 = vld [vmem:[#allocation9 + $0x8e8] sm:$0xff]  ;;  %2796 = vmatpush.msra.mxu0 %v2706_v33 }
 0x214   : > { %v7895_v38 = vadd.f32 %v1857_v43, %v1763_v39  ;;  %v7897_v37 = vpop.f32.mrf.mxu1  ;;  %2940 = vmatpush.msrb.mxu2 %v2889_v34  ;;  %v7929_v34 = vld [vmem:[#allocation2 + $0x59] sm:$0xff] }
 0x215   : > { %v2171_v32 = vpop.f32.mrf.mxu0  ;;  %2749 = vmatpush.msra.mxu3 %v2705_v20  ;;  %2797 = vmatpush.msra.mxu0 %v2704_v14  ;;  %v2044_v45 = vadd.f32 %v7897_v37, %v1831_v19  ;;  %v3423_v37 = vld [vmem:[#allocation12 + $0x90] sm:$0xff] }
 0x216   : > { %2941 = vmatpush.msrb.mxu2 %v2887_v17  ;;  %v2882_v17 = vld [vmem:[#allocation9 + $0x8b0] sm:$0xff] }
 0x217   : > { %2298 = vmatmul.f32.gmra.mxu1 %v2227_v62  ;;  %2345 = vmatmul.f32.gmra.mxu2 %v2227_v62  ;;  %v2885_v62 = vld [vmem:[#allocation9 + $0x8c8] sm:$0xff] }
 0x218   : > { %2455 = vmatmul.f32.gmra.mxu3 %v7899_v40  ;;  %2502 = vmatmul.f32.gmra.mxu0 %v7899_v40 }
 0x219   : > { %2750 = vmatpush.msra.mxu3 %v2703_v46  ;;  %2942 = vmatpush.msrb.mxu2 %v2885_v62 }
 0x21a   : > { %v2014_v2 = vpop.f32.mrf.mxu2 }
 0x21b   : > { %v2045_v23 = vadd.f32 %v2014_v2, %v1878_v9  ;;  %v7905_v25 = vpop.f32.mrf.mxu3  ;;  %2943 = vmatpush.msrb.mxu2 %v2883_v55  ;;  %3558 = vmatpush.msrb.mxu3 %v3457_v6 }
 0x21c   : > { %v1970_v39 = vpop.f32.mrf.mxu1  ;;  %v2201_v49 = vadd.f32 %v7905_v25, %v2044_v45  ;;  %v3459_v45 = vld [vmem:[#allocation12 + $0x188] sm:$0xff] }
 0x21d   : > { %v2174_v7 = vpop.f32.mrf.mxu0  ;;  %v7907_v8 = vadd.f32 %v2171_v32, %v2045_v23  ;;  %v2046_v18 = vadd.f32 %v1970_v39, %v7843_v44  ;;  %v7919_v44 = vld [vmem:[#allocation2 + $0x51] sm:$0xff] }
 0x21e   : > { %v2884_v23 = vld [vmem:[#allocation9 + $0x8c0] sm:$0xff]  ;;  %v3406_v25 = vld [vmem:[#allocation12 + $0x8] sm:$0xff] }
 0x21f   : > { %2301 = vmatmul.f32.gmra.mxu1 %v2228_v31  ;;  %2348 = vmatmul.f32.gmra.mxu2 %v2228_v31 }
 0x220   : > { %2458 = vmatmul.f32.gmra.mxu3 %v7909_v4  ;;  %2505 = vmatmul.f32.gmra.mxu0 %v7909_v4 }
 0x222   : > { %v2017_v60 = vpop.f32.mrf.mxu2 }
 0x223   : > { %v2047_v48 = vadd.f32 %v2017_v60, %v7841_v36  ;;  %v2127_v43 = vpop.f32.mrf.mxu3  ;;  %v2886_v36 = vld [vmem:[#allocation9 + $0x8d0] sm:$0xff] }
 0x224   : > { %v7915_v57 = vadd.f32 %v2127_v43, %v2046_v18  ;;  %v1973_v32 = vpop.f32.mrf.mxu1  ;;  %2894 = vmatpush.msra.mxu1 %v2886_v36  ;;  %v2879_v18 = vld [vmem:[#allocation9 + $0x898] sm:$0xff]  ;;  %v2877_v36 = vld [vmem:[#allocation9 + $0x888] sm:$0xff] }
 0x225   : > { %v7917_v35 = vadd.f32 %v2174_v7, %v2047_v48  ;;  %v2177_v51 = vpop.f32.mrf.mxu0  ;;  %v2048_v13 = vadd.f32 %v1973_v32, %v7847_v11  ;;  %v2230_v7 = vld [vmem:[#allocation2 + $0x58] sm:$0xff] }
 0x226   : > { %2895 = vmatpush.msra.mxu1 %v2884_v23  ;;  %v2692_v48 = vld [vmem:[#allocation2 + $0x1a] sm:$0xff] }
 0x227   : > { %2304 = vmatmul.f32.gmra.mxu1 %v2229_v42  ;;  %2351 = vmatmul.f32.gmra.mxu2 %v2229_v42 }
 0x228   : > { %2461 = vmatmul.f32.gmra.mxu3 %v7919_v44  ;;  %2508 = vmatmul.f32.gmra.mxu0 %v7919_v44 }
 0x229   : > { %2896 = vmatpush.msra.mxu1 %v2882_v17  ;;  %v2869_v17 = vld [vmem:[#allocation9 + $0x848] sm:$0xff] }
 0x22a   : > { %v2020_v53 = vpop.f32.mrf.mxu2 }
 0x22b   : > { %v2049_v41 = vadd.f32 %v2020_v53, %v7845_v10  ;;  %v2130_v9 = vpop.f32.mrf.mxu3  ;;  %v2881_v10 = vld [vmem:[#allocation9 + $0x8a8] sm:$0xff] }
 0x22c   : > { %v7925_v2 = vadd.f32 %v2130_v9, %v2048_v13  ;;  %v1976_v29 = vpop.f32.mrf.mxu1  ;;  %2944 = vmatpush.msrb.mxu2 %v2881_v10  ;;  %v2878_v13 = vld [vmem:[#allocation9 + $0x890] sm:$0xff]  ;;  %v2873_v10 = vld [vmem:[#allocation9 + $0x868] sm:$0xff] }
 0x22d   : > { %v7927_v39 = vadd.f32 %v2177_v51, %v2049_v41  ;;  %v2180_v31 = vpop.f32.mrf.mxu0  ;;  %v2050_v11 = vadd.f32 %v1976_v29, %v7851_v47  ;;  %v2880_v47 = vld [vmem:[#allocation9 + $0x8a0] sm:$0xff] }
 0x22e   : > { %2945 = vmatpush.msrb.mxu2 %v2879_v18  ;;  %2897 = vmatpush.msra.mxu1 %v2880_v47  ;;  %v2870_v18 = vld [vmem:[#allocation9 + $0x850] sm:$0xff] }
 0x22f   : > { %2307 = vmatmul.f32.gmra.mxu1 %v2230_v7  ;;  %2354 = vmatmul.f32.gmra.mxu2 %v2230_v7 }
 0x230   : > { %2464 = vmatmul.f32.gmra.mxu3 %v7929_v34  ;;  %2511 = vmatmul.f32.gmra.mxu0 %v7929_v34 }
 0x231   : > { %2946 = vmatpush.msrb.mxu2 %v2877_v36  ;;  %2898 = vmatpush.msra.mxu1 %v2878_v13  ;;  %v2863_v36 = vld [vmem:[#allocation9 + $0x818] sm:$0xff]  ;;  %v2864_v13 = vld [vmem:[#allocation9 + $0x820] sm:$0xff] }
 0x232   : > { %v2023_v20 = vpop.f32.mrf.mxu2 }
 0x233   : > { %v2051_v33 = vadd.f32 %v2023_v20, %v7849_v61  ;;  %v2133_v46 = vpop.f32.mrf.mxu3 }
 0x234   : > { %v7935_v14 = vadd.f32 %v2133_v46, %v2050_v11  ;;  %v1979_v52 = vpop.f32.mrf.mxu1  ;;  %v2871_v11 = vld [vmem:[#allocation9 + $0x858] sm:$0xff] }
 0x235   : > { %v7937_v60 = vadd.f32 %v2180_v31, %v2051_v33  ;;  %v2052_v61 = vadd.f32 %v1979_v52, %v7855_v12  ;;  %v2183_v43 = vpop.f32.mrf.mxu0  ;;  %v2875_v12 = vld [vmem:[#allocation9 + $0x878] sm:$0xff]  ;;  %v2876_v31 = vld [vmem:[#allocation9 + $0x880] sm:$0xff] }
 0x236   : > { %2947 = vmatpush.msrb.mxu2 %v2875_v12  ;;  %2899 = vmatpush.msra.mxu1 %v2876_v31  ;;  %v2872_v52 = vld [vmem:[#allocation9 + $0x860] sm:$0xff] }
 0x237   : > { %2594 = vmatmul.f32.vlgmr.msrb.gmra.mxu1 %v7857_v15  ;;  %2641 = vmatmul.f32.vlgmr.msra.gmra.mxu2 %v7857_v15  ;;  %v2693_v15 = vld [vmem:[#allocation2 + $0x22] sm:$0xff] }
 0x238   : > { %2751 = vmatmul.f32.vlgmr.msra.gmra.mxu3 %v2692_v48  ;;  %2798 = vmatmul.f32.vlgmr.msra.gmra.mxu0 %v2692_v48 }
 0x239   : > { %2948 = vmatpush.msrb.mxu2 %v2873_v10 }
 0x23a   : > { %v2026_v32 = vpop.f32.mrf.mxu2 }
 0x23b   : > { %v2053_v59 = vadd.f32 %v2026_v32, %v7853_v22  ;;  %v2136_v62 = vpop.f32.mrf.mxu3  ;;  %2949 = vmatpush.msrb.mxu2 %v2871_v11  ;;  %v2865_v32 = vld [vmem:[#allocation9 + $0x828] sm:$0xff] }
 0x23c   : > { %v7943_v51 = vadd.f32 %v2136_v62, %v2052_v61  ;;  %v1982_v42 = vpop.f32.mrf.mxu1  ;;  %v2867_v61 = vld [vmem:[#allocation9 + $0x838] sm:$0xff] }
 0x23d   : > { %v7945_v53 = vadd.f32 %v2183_v43, %v2053_v59  ;;  %v2054_v22 = vadd.f32 %v1982_v42, %v7863_v28  ;;  %v2186_v55 = vpop.f32.mrf.mxu0  ;;  %v2694_v28 = vld [vmem:[#allocation2 + $0x2a] sm:$0xff]  ;;  %2950 = vmatpush.msrb.mxu2 %v2869_v17  ;;  %v2866_v42 = vld [vmem:[#allocation9 + $0x830] sm:$0xff] }
 0x23e   : > { %9641 = vst [vmem:[#allocation28_spill] sm:$0xff] %v7943_v51  ;;  %v2868_v43 = vld [vmem:[#allocation9 + $0x840] sm:$0xff]  ;;  %v2700_v17 = vld [vmem:[#allocation2 + $0x5a] sm:$0xff] }
 0x23f   : > { %2597 = vmatmul.f32.gmra.mxu1 %v7865_v54  ;;  %2644 = vmatmul.f32.gmra.mxu2 %v7865_v54 }
 0x240   : > { %2754 = vmatmul.f32.gmra.mxu3 %v2693_v15  ;;  %2801 = vmatmul.f32.gmra.mxu0 %v2693_v15 }
 0x241   : > { %2951 = vmatpush.msrb.mxu2 %v2867_v61  ;;  %v2701_v61 = vld [vmem:[#allocation2 + $0x62] sm:$0xff] }
 0x242   : > { %v2029_v41 = vpop.f32.mrf.mxu2 }
 0x243   : > { %v2055_v9 = vadd.f32 %v2029_v41, %v7861_v16  ;;  %v2139_v29 = vpop.f32.mrf.mxu3  ;;  %v2874_v16 = vld [vmem:[#allocation9 + $0x870] sm:$0xff]  ;;  %2952 = vmatpush.msrb.mxu2 %v2865_v32  ;;  %v2861_v41 = vld [vmem:[#allocation9 + $0x808] sm:$0xff] }
 0x244   : > { %v7951_v23 = vadd.f32 %v2139_v29, %v2054_v22  ;;  %v7953_v7 = vpop.f32.mrf.mxu1  ;;  %2900 = vmatpush.msra.mxu1 %v2874_v16  ;;  %v2860_v29 = vld [vmem:[#allocation9 + $0x800] sm:$0xff]  ;;  %v2699_v16 = vld [vmem:[#allocation2 + $0x52] sm:$0xff] }
 0x245   : > { %v7955_v54 = vadd.f32 %v2186_v55, %v2055_v9  ;;  %2953 = vmatpush.msrb.mxu2 %v2863_v36  ;;  %v2862_v9 = vld [vmem:[#allocation9 + $0x810] sm:$0xff]  ;;  %v7989_v55 = vpop.f32.mrf.mxu0 }
 0x246   : > { %9642 = vst [vmem:[#allocation29_spill] sm:$0xff] %v7951_v23  ;;  %2901 = vmatpush.msra.mxu1 %v2872_v52  ;;  %v3469_v23 = vld [vmem:[#allocation12 + $0x1d8] sm:$0xff] }
 0x247   : > { %2600 = vmatmul.f32.gmra.mxu1 %v7873_v63  ;;  %2647 = vmatmul.f32.gmra.mxu2 %v7873_v63  ;;  %v2695_v63 = vld [vmem:[#allocation2 + $0x32] sm:$0xff] }
 0x248   : > { %2757 = vmatmul.f32.gmra.mxu3 %v2694_v28  ;;  %2804 = vmatmul.f32.gmra.mxu0 %v2694_v28 }
 0x249   : > { %2902 = vmatpush.msra.mxu1 %v2870_v18  ;;  %2954 = vmatpush.msrb.mxu2 %v2861_v41 }
 0x24a   : > { %v2032_v20 = vpop.f32.mrf.mxu2 }
 0x24b   : > { %v7960_v33 = vadd.f32 %v2032_v20, %v7869_v58  ;;  %2903 = vmatpush.msra.mxu1 %v2868_v43  ;;  %v7980_v12 = vpop.f32.mrf.mxu3 }
 0x24c   : > { %v7962_v46 = vpop.f32.mrf.mxu1 }
 0x24d   : > { %2904 = vmatpush.msra.mxu1 %v2866_v42  ;;  %v8000_v11 = vpop.f32.mrf.mxu0 }
 0x24f   : > { %2603 = vmatmul.f32.gmra.mxu1 %v7881_v21  ;;  %2650 = vmatmul.f32.gmra.mxu2 %v7881_v21  ;;  %v2696_v21 = vld [vmem:[#allocation2 + $0x3a] sm:$0xff] }
 0x250   : > { %2760 = vmatmul.f32.gmra.mxu3 %v2695_v63  ;;  %2807 = vmatmul.f32.gmra.mxu0 %v2695_v63 }
 0x251   : > { %2905 = vmatpush.msra.mxu1 %v2864_v13 }
 0x252   : > { %v2035_v48 = vpop.f32.mrf.mxu2 }
 0x253   : > { %v7967_v47 = vadd.f32 %v2035_v48, %v7877_v50  ;;  %2906 = vmatpush.msra.mxu1 %v2862_v9  ;;  %v7996_v28 = vpop.f32.mrf.mxu3  ;;  %v2544_v48 = vld [vmem:[#allocation2 + $0x61] sm:$0xff] }
 0x254   : > { %v7969_v58 = vpop.f32.mrf.mxu1 }
 0x255   : > { %2907 = vmatpush.msra.mxu1 %v2860_v29 }
 0x257   : > { %2606 = vmatmul.f32.gmra.mxu1 %v7889_v56  ;;  %2653 = vmatmul.f32.gmra.mxu2 %v7889_v56  ;;  %v2697_v56 = vld [vmem:[#allocation2 + $0x42] sm:$0xff] }
 0x258   : > { %2763 = vmatmul.f32.gmra.mxu3 %v2696_v21  ;;  %2810 = vmatmul.f32.gmra.mxu0 %v2696_v21 }
 0x25a   : > { %v2038_v59 = vpop.f32.mrf.mxu2 }
 0x25b   : > { %v7974_v62 = vadd.f32 %v2038_v59, %v7885_v24 }
 0x25c   : > { %v7976_v50 = vpop.f32.mrf.mxu1 }
 0x25f   : > { %2609 = vmatmul.f32.gmra.mxu1 %v7899_v40  ;;  %2656 = vmatmul.f32.gmra.mxu2 %v7899_v40  ;;  %v2698_v40 = vld [vmem:[#allocation2 + $0x4a] sm:$0xff] }
 0x260   : > { %2766 = vmatmul.f32.gmra.mxu3 %v2697_v56  ;;  %2813 = vmatmul.f32.gmra.mxu0 %v2697_v56 }
 0x262   : > { %v2041_v15 = vpop.f32.mrf.mxu2 }
 0x263   : > { %v7983_v24 = vadd.f32 %v2041_v15, %v7893_v1  ;;  %v2850_v15 = vld [vmem:[#allocation2 + $0x23] sm:$0xff] }
 0x264   : > { %v7985_v22 = vpop.f32.mrf.mxu1 }
 0x265   : > { %v2358_v19 = vadd.f32 %v7985_v22, %v2201_v49  ;;  %v3422_v49 = vld [vmem:[#allocation12 + $0x88] sm:$0xff]  ;;  %v3437_v22 = vld [vmem:[#allocation3 + $0x90] sm:$0xc0] }
 0x267   : > { %2612 = vmatmul.f32.gmra.mxu1 %v7909_v4  ;;  %2659 = vmatmul.f32.gmra.mxu2 %v7909_v4 }
 0x268   : > { %2769 = vmatmul.f32.gmra.mxu3 %v2698_v40  ;;  %2816 = vmatmul.f32.gmra.mxu0 %v2698_v40 }
 0x26a   : > { %v2328_v31 = vpop.f32.mrf.mxu2 }
 0x26b   : > { %v7992_v1 = vadd.f32 %v2328_v31, %v7907_v8  ;;  %v8007_v8 = vpop.f32.mrf.mxu3  ;;  %v2851_v31 = vld [vmem:[#allocation2 + $0x2b] sm:$0xff] }
 0x26c   : > { %v7994_v10 = vpop.f32.mrf.mxu1 }
 0x26f   : > { %2615 = vmatmul.f32.gmra.mxu1 %v7919_v44  ;;  %2662 = vmatmul.f32.gmra.mxu2 %v7919_v44 }
 0x270   : > { %2772 = vmatmul.f32.gmra.mxu3 %v2699_v16  ;;  %2819 = vmatmul.f32.gmra.mxu0 %v2699_v16 }
 0x272   : > { %v2331_v4 = vpop.f32.mrf.mxu2 }
 0x273   : > { %v8003_v20 = vadd.f32 %v2331_v4, %v7917_v35  ;;  %v8016_v35 = vpop.f32.mrf.mxu0  ;;  %v8018_v43 = vpop.f32.mrf.mxu3 }
 0x274   : > { %v8005_v52 = vpop.f32.mrf.mxu1 }
 0x277   : > { %2618 = vmatmul.f32.gmra.mxu1 %v7929_v34  ;;  %2665 = vmatmul.f32.gmra.mxu2 %v7929_v34 }
 0x278   : > { %2775 = vmatmul.f32.gmra.mxu3 %v2700_v17  ;;  %2822 = vmatmul.f32.gmra.mxu0 %v2700_v17  ;;  %v2852_v17 = vld [vmem:[#allocation2 + $0x33] sm:$0xff] }
 0x27a   : > { %v2334_v44 = vpop.f32.mrf.mxu2 }
 0x27b   : > { %v8012_v63 = vadd.f32 %v2334_v44, %v7927_v39  ;;  %v2849_v39 = vld [vmem:[#allocation2 + $0x1b] sm:$0xff]  ;;  %v8025_v59 = vpop.f32.mrf.mxu0  ;;  %v8027_v36 = vpop.f32.mrf.mxu3 }
 0x27c   : > { %v8014_v18 = vpop.f32.mrf.mxu1 }
 0x27f   : > { %2621 = vmatmul.f32.gmra.mxu1 %v2544_v48  ;;  %2668 = vmatmul.f32.gmra.mxu2 %v2544_v48 }
 0x280   : > { %2778 = vmatmul.f32.gmra.mxu3 %v2701_v61  ;;  %2825 = vmatmul.f32.gmra.mxu0 %v2701_v61 }
 0x282   : > { %v2337_v34 = vpop.f32.mrf.mxu2 }
 0x283   : > { %v8021_v21 = vadd.f32 %v2337_v34, %v7937_v60  ;;  %v8034_v60 = vpop.f32.mrf.mxu0  ;;  %v8041_v40 = vpop.f32.mrf.mxu3  ;;  %v2853_v34 = vld [vmem:[#allocation2 + $0x3b] sm:$0xff] }
 0x284   : > { %v8023_v32 = vpop.f32.mrf.mxu1 }
 0x285   : > { %9643 = vst [vmem:[#allocation30_spill] sm:$0xff] %v8021_v21  ;;  %v2856_v21 = vld [vmem:[#allocation2 + $0x53] sm:$0xff] }
 0x286   : > { %9644 = vst [vmem:[#allocation31_spill] sm:$0xff] %v8023_v32 }
 0x287   : > { %2908 = vmatmul.f32.vlgmr.msra.gmra.mxu1 %v2849_v39  ;;  %2955 = vmatmul.f32.vlgmr.msrb.gmra.mxu2 %v2849_v39 }
 0x28a   : > { %v2340_v42 = vpop.f32.mrf.mxu2 }
 0x28b   : > { %v8030_v56 = vadd.f32 %v2340_v42, %v7945_v53  ;;  %v8045_v16 = vpop.f32.mrf.mxu0  ;;  %v8049_v44 = vpop.f32.mrf.mxu3 }
 0x28c   : > { %v8032_v13 = vpop.f32.mrf.mxu1 }
 0x28d   : > { %9645 = vst [vmem:[#allocation32_spill] sm:$0xff] %v8030_v56  ;;  %v3455_v56 = vld [vmem:[#allocation12 + $0x168] sm:$0xff] }
 0x28e   : > { %9646 = vst [vmem:[#allocation33_spill] sm:$0xff] %v8032_v13 }
 0x28f   : > { %2911 = vmatmul.f32.gmra.mxu1 %v2850_v15  ;;  %2958 = vmatmul.f32.gmra.mxu2 %v2850_v15 }
 0x292   : > { %v2343_v41 = vpop.f32.mrf.mxu2 }
 0x293   : > { %v8037_v9 = vadd.f32 %v2343_v41, %v7955_v54  ;;  %v8055_v61 = vpop.f32.mrf.mxu0  ;;  %v8057_v39 = vpop.f32.mrf.mxu3  ;;  %v2854_v41 = vld [vmem:[#allocation2 + $0x43] sm:$0xff] }
 0x294   : > { %v8039_v29 = vpop.f32.mrf.mxu1 }
 0x295   : > { %9647 = vst [vmem:[#allocation34_spill] sm:$0xff] %v8037_v9  ;;  %v3473_v9 = vld [vmem:[#allocation12 + $0x1f8] sm:$0xff] }
 0x296   : > { %9648 = vst [vmem:[#allocation35_spill] sm:$0xff] %v8039_v29  ;;  %3605 = vmatpush.msrb.mxu0 %v3473_v9  ;;  %v3470_v29 = vld [vmem:[#allocation12 + $0x1e0] sm:$0xff] }
 0x297   : > { %2914 = vmatmul.f32.gmra.mxu1 %v2851_v31  ;;  %2961 = vmatmul.f32.gmra.mxu2 %v2851_v31 }
 0x29a   : > { %v8043_v53 = vpop.f32.mrf.mxu2 }
 0x29b   : > { %9649 = vst [vmem:[#allocation36_spill] sm:$0xff] %v8043_v53  ;;  %v8063_v31 = vpop.f32.mrf.mxu0  ;;  %v3468_v53 = vld [vmem:[#allocation12 + $0x1d0] sm:$0xff] }
 0x29c   : > { %v8047_v4 = vpop.f32.mrf.mxu1  ;;  %9655 = vst [vmem:[#allocation42_spill] sm:$0xff] %v8063_v31  ;;  %v3454_v31 = vld [vmem:[#allocation12 + $0x160] sm:$0xff] }
 0x29d   : > { %9650 = vst [vmem:[#allocation37_spill] sm:$0xff] %v8047_v4  ;;  %v2855_v4 = vld [vmem:[#allocation2 + $0x4b] sm:$0xff] }
 0x29f   : > { %2917 = vmatmul.f32.gmra.mxu1 %v2852_v17  ;;  %2964 = vmatmul.f32.gmra.mxu2 %v2852_v17 }
 0x2a2   : > { %v8051_v54 = vpop.f32.mrf.mxu2 }
 0x2a3   : > { %9651 = vst [vmem:[#allocation38_spill] sm:$0xff] %v8051_v54  ;;  %v8067_v54 = vpop.f32.mrf.mxu3 }
 0x2a4   : > { %v8053_v48 = vpop.f32.mrf.mxu1  ;;  %9657 = vst [vmem:[#allocation44_spill] sm:$0xff] %v8067_v54  ;;  %v3472_v54 = vld [vmem:[#allocation12 + $0x1f0] sm:$0xff] }
 0x2a5   : > { %9652 = vst [vmem:[#allocation39_spill] sm:$0xff] %v8053_v48  ;;  %3606 = vmatpush.msrb.mxu0 %v3472_v54  ;;  %v2858_v54 = vld [vmem:[#allocation2 + $0x63] sm:$0xff] }
 0x2a7   : > { %2920 = vmatmul.f32.gmra.mxu1 %v2853_v34  ;;  %2967 = vmatmul.f32.gmra.mxu2 %v2853_v34  ;;  %v3456_v34 = vld [vmem:[#allocation12 + $0x170] sm:$0xff] }
 0x2a8   : > { %3559 = vmatpush.msrb.mxu3 %v3456_v34  ;;  %v3471_v34 = vld [vmem:[#allocation12 + $0x1e8] sm:$0xff] }
 0x2a9   : > { %3607 = vmatpush.msrb.mxu0 %v3471_v34  ;;  %v3451_v34 = vld [vmem:[#allocation12 + $0x148] sm:$0xff] }
 0x2aa   : > { %v8059_v42 = vpop.f32.mrf.mxu2  ;;  %3560 = vmatpush.msrb.mxu3 %v3455_v56 }
 0x2ab   : > { %9653 = vst [vmem:[#allocation40_spill] sm:$0xff] %v8059_v42  ;;  %3608 = vmatpush.msrb.mxu0 %v3470_v29 }
 0x2ac   : > { %v8061_v15 = vpop.f32.mrf.mxu1  ;;  %3561 = vmatpush.msrb.mxu3 %v3454_v31  ;;  %v3452_v31 = vld [vmem:[#allocation12 + $0x150] sm:$0xff] }
 0x2ad   : > { %9654 = vst [vmem:[#allocation41_spill] sm:$0xff] %v8061_v15  ;;  %v8071_v15 = vpop.f32.mrf.mxu0  ;;  %3609 = vmatpush.msrb.mxu0 %v3469_v23 }
 0x2ae   : > { %9658 = vst [vmem:[#allocation45_spill] sm:$0xff] %v8071_v15  ;;  %v3453_v15 = vld [vmem:[#allocation12 + $0x158] sm:$0xff] }
 0x2af   : > { %2923 = vmatmul.f32.gmra.mxu1 %v2854_v41  ;;  %2970 = vmatmul.f32.gmra.mxu2 %v2854_v41 }
 0x2b0   : > { %3562 = vmatpush.msrb.mxu3 %v3453_v15  ;;  %3610 = vmatpush.msrb.mxu0 %v3468_v53  ;;  %v3466_v53 = vld [vmem:[#allocation12 + $0x1c0] sm:$0xff] }
 0x2b2   : > { %v8065_v17 = vpop.f32.mrf.mxu2  ;;  %3563 = vmatpush.msrb.mxu3 %v3452_v31 }
 0x2b3   : > { %9656 = vst [vmem:[#allocation43_spill] sm:$0xff] %v8065_v17  ;;  %v8077_v17 = vpop.f32.mrf.mxu3 }
 0x2b4   : > { %v8069_v48 = vpop.f32.mrf.mxu1  ;;  %9659 = vst [vmem:[#allocation46_spill] sm:$0xff] %v8077_v17  ;;  %v2857_v17 = vld [vmem:[#allocation2 + $0x5b] sm:$0xff]  ;;  %3564 = vmatpush.msrb.mxu3 %v3451_v34 }
 0x2b5   : > { %v8081_v9 = vpop.f32.mrf.mxu0  ;;  %v3448_v34 = vld [vmem:[#allocation12 + $0x130] sm:$0xff] }
 0x2b6   : > { %9660 = vst [vmem:[#allocation47_spill] sm:$0xff] %v8081_v9 }
 0x2b7   : > { %2926 = vmatmul.f32.gmra.mxu1 %v2855_v4  ;;  %2973 = vmatmul.f32.gmra.mxu2 %v2855_v4 }
 0x2ba   : > { %v8073_v42 = vpop.f32.mrf.mxu2 }
 0x2bb   : > { %v8085_v13 = vpop.f32.mrf.mxu3 }
 0x2bc   : > { %v8075_v41 = vpop.f32.mrf.mxu1  ;;  %9661 = vst [vmem:[#allocation48_spill] sm:$0xff] %v8085_v13  ;;  %v3467_v13 = vld [vmem:[#allocation12 + $0x1c8] sm:$0xff] }
 0x2bd   : > { %v8091_v9 = vpop.f32.mrf.mxu0  ;;  %3611 = vmatpush.msrb.mxu0 %v3467_v13 }
 0x2be   : > { %9664 = vst [vmem:[#allocation51_spill] sm:$0xff] %v8091_v9 }
 0x2bf   : > { %2929 = vmatmul.f32.gmra.mxu1 %v2856_v21  ;;  %2976 = vmatmul.f32.gmra.mxu2 %v2856_v21 }
 0x2c0   : > { %3612 = vmatpush.msrb.mxu0 %v3466_v53  ;;  %v3464_v53 = vld [vmem:[#allocation12 + $0x1b0] sm:$0xff] }
 0x2c2   : > { %v8079_v6 = vpop.f32.mrf.mxu2 }
 0x2c3   : > { %v8093_v15 = vpop.f32.mrf.mxu3 }
 0x2c4   : > { %v8083_v4 = vpop.f32.mrf.mxu1  ;;  %9665 = vst [vmem:[#allocation52_spill] sm:$0xff] %v8093_v15  ;;  %v3465_v15 = vld [vmem:[#allocation12 + $0x1b8] sm:$0xff] }
 0x2c5   : > { %v8099_v9 = vpop.f32.mrf.mxu0  ;;  %3613 = vmatpush.msrb.mxu0 %v3465_v15 }
 0x2c6   : > { %9668 = vst [vmem:[#allocation55_spill] sm:$0xff] %v8099_v9  ;;  %v3420_v9 = vld [vmem:[#allocation12 + $0x78] sm:$0xff] }
 0x2c7   : > { %2932 = vmatmul.f32.gmra.mxu1 %v2857_v17  ;;  %2979 = vmatmul.f32.gmra.mxu2 %v2857_v17 }
 0x2c8   : > { %3719 = vmatpush.msrb.mxu1 %v3420_v9  ;;  %3614 = vmatpush.msrb.mxu0 %v3464_v53  ;;  %v3433_v9 = vld [vmem:[#allocation12 + $0xe0] sm:$0xff]  ;;  %v3431_v53 = vld [vmem:[#allocation12 + $0xd0] sm:$0xff] }
 0x2ca   : > { %v8087_v56 = vpop.f32.mrf.mxu2 }
 0x2cb   : > { %9662 = vst [vmem:[#allocation49_spill] sm:$0xff] %v8087_v56  ;;  %v8103_v32 = vpop.f32.mrf.mxu3 }
 0x2cc   : > { %v8089_v21 = vpop.f32.mrf.mxu1  ;;  %9670 = vst [vmem:[#allocation57_spill] sm:$0xff] %v8103_v32  ;;  %v3419_v32 = vld [vmem:[#allocation12 + $0x70] sm:$0xff] }
 0x2cd   : > { %9663 = vst [vmem:[#allocation50_spill] sm:$0xff] %v8089_v21  ;;  %v3450_v21 = vld [vmem:[#allocation12 + $0x140] sm:$0xff]  ;;  %3720 = vmatpush.msrb.mxu1 %v3419_v32  ;;  %v3416_v32 = vld [vmem:[#allocation12 + $0x58] sm:$0xff] }
 0x2ce   : > { %3565 = vmatpush.msrb.mxu3 %v3450_v21 }
 0x2cf   : > { %2935 = vmatmul.f32.gmra.mxu1 %v2858_v54  ;;  %2982 = vmatmul.f32.gmra.mxu2 %v2858_v54  ;;  %v3449_v54 = vld [vmem:[#allocation12 + $0x138] sm:$0xff] }
 0x2d0   : > { %3566 = vmatpush.msrb.mxu3 %v3449_v54  ;;  %v3447_v54 = vld [vmem:[#allocation12 + $0x128] sm:$0xff] }
 0x2d2   : > { %v8095_v29 = vpop.f32.mrf.mxu2  ;;  %3567 = vmatpush.msrb.mxu3 %v3448_v34  ;;  %v3418_v34 = vld [vmem:[#allocation12 + $0x68] sm:$0xff] }
 0x2d3   : > { %9666 = vst [vmem:[#allocation53_spill] sm:$0xff] %v8095_v29  ;;  %v8113_v29 = vpop.f32.mrf.mxu3  ;;  %3721 = vmatpush.msrb.mxu1 %v3418_v34  ;;  %v3414_v34 = vld [vmem:[#allocation12 + $0x48] sm:$0xff] }
 0x2d4   : > { %v8097_v17 = vpop.f32.mrf.mxu1  ;;  %9675 = vst [vmem:[#allocation62_spill] sm:$0xff] %v8113_v29  ;;  %3568 = vmatpush.msrb.mxu3 %v3447_v54  ;;  %v3415_v54 = vld [vmem:[#allocation12 + $0x50] sm:$0xff] }
 0x2d5   : > { %9667 = vst [vmem:[#allocation54_spill] sm:$0xff] %v8097_v17  ;;  %v8107_v17 = vpop.f32.mrf.mxu0 }
 0x2d6   : > { %9672 = vst [vmem:[#allocation59_spill] sm:$0xff] %v8107_v17  ;;  %v3434_v17 = vld [vmem:[#allocation12 + $0xe8] sm:$0xff] }
 0x2da   : > { %v8101_v31 = vpop.f32.mrf.mxu2 }
 0x2db   : > { %9669 = vst [vmem:[#allocation56_spill] sm:$0xff] %v8101_v31  ;;  %v3436_v31 = vld [vmem:[#allocation12 + $0xf8] sm:$0xff]  ;;  %v8121_v29 = vpop.f32.mrf.mxu3 }
 0x2dc   : > { %v8105_v23 = vpop.f32.mrf.mxu1  ;;  %3766 = vmatpush.msra.mxu2 %v3436_v31 }
 0x2dd   : > { %9671 = vst [vmem:[#allocation58_spill] sm:$0xff] %v8105_v23  ;;  %v3435_v23 = vld [vmem:[#allocation12 + $0xf0] sm:$0xff]  ;;  %v8117_v51 = vpop.f32.mrf.mxu0 }
 0x2de   : > { %3767 = vmatpush.msra.mxu2 %v3435_v23  ;;  %9677 = vst [vmem:[#allocation64_spill] sm:$0xff] %v8117_v51  ;;  %v3432_v23 = vld [vmem:[#allocation12 + $0xd8] sm:$0xff] }
 0x2e0   : > { %3768 = vmatpush.msra.mxu2 %v3434_v17  ;;  %v3430_v17 = vld [vmem:[#allocation12 + $0xc8] sm:$0xff] }
 0x2e2   : > { %v8109_v21 = vpop.f32.mrf.mxu2  ;;  %3769 = vmatpush.msra.mxu2 %v3433_v9 }
 0x2e3   : > { %9673 = vst [vmem:[#allocation60_spill] sm:$0xff] %v8109_v21  ;;  %v3446_v21 = vld [vmem:[#allocation12 + $0x120] sm:$0xff] }
 0x2e4   : > { %v8111_v13 = vpop.f32.mrf.mxu1  ;;  %3569 = vmatpush.msrb.mxu3 %v3446_v21  ;;  %3770 = vmatpush.msra.mxu2 %v3432_v23  ;;  %v3413_v21 = vld [vmem:[#allocation12 + $0x40] sm:$0xff]  ;;  %v3428_v23 = vld [vmem:[#allocation12 + $0xb8] sm:$0xff] }
 0x2e5   : > { %9674 = vst [vmem:[#allocation61_spill] sm:$0xff] %v8111_v13  ;;  %v3417_v13 = vld [vmem:[#allocation12 + $0x60] sm:$0xff]  ;;  %v8127_v9 = vpop.f32.mrf.mxu0 }
 0x2e6   : > { %3722 = vmatpush.msrb.mxu1 %v3417_v13  ;;  %3771 = vmatpush.msra.mxu2 %v3431_v53  ;;  %v3429_v13 = vld [vmem:[#allocation12 + $0xc0] sm:$0xff]  ;;  %v3427_v53 = vld [vmem:[#allocation12 + $0xb0] sm:$0xff] }
 0x2e8   : > { %3723 = vmatpush.msrb.mxu1 %v3416_v32  ;;  %3772 = vmatpush.msra.mxu2 %v3430_v17  ;;  %v3412_v32 = vld [vmem:[#allocation12 + $0x38] sm:$0xff]  ;;  %v3463_v17 = vld [vmem:[#allocation12 + $0x1a8] sm:$0xff] }
 0x2e9   : > { %3615 = vmatpush.msrb.mxu0 %v3463_v17 }
 0x2ea   : > { %v8115_v15 = vpop.f32.mrf.mxu2  ;;  %3724 = vmatpush.msrb.mxu1 %v3415_v54  ;;  %3773 = vmatpush.msra.mxu2 %v3429_v13  ;;  %v3411_v54 = vld [vmem:[#allocation12 + $0x30] sm:$0xff]  ;;  %v3462_v13 = vld [vmem:[#allocation12 + $0x1a0] sm:$0xff] }
 0x2eb   : > { %9676 = vst [vmem:[#allocation63_spill] sm:$0xff] %v8115_v15  ;;  %3616 = vmatpush.msrb.mxu0 %v3462_v13  ;;  %v3443_v13 = vld [vmem:[#allocation12 + $0x108] sm:$0xff] }
 0x2ec   : > { %v8119_v31 = vpop.f32.mrf.mxu1  ;;  %3725 = vmatpush.msrb.mxu1 %v3414_v34  ;;  %3774 = vmatpush.msra.mxu2 %v3428_v23  ;;  %v3425_v23 = vld [vmem:[#allocation12 + $0xa0] sm:$0xff] }
 0x2ed   : > { %9678 = vst [vmem:[#allocation65_spill] sm:$0xff] %v8119_v31  ;;  %v8129_v31 = vpop.f32.mrf.mxu3  ;;  %v8139_v56 = vpop.f32.mrf.mxu0 }
 0x2ee   : > { %3726 = vmatpush.msrb.mxu1 %v3413_v21  ;;  %3775 = vmatpush.msra.mxu2 %v3427_v53  ;;  %v3461_v53 = vld [vmem:[#allocation12 + $0x198] sm:$0xff] }
 0x2ef   : > { %3617 = vmatpush.msrb.mxu0 %v3461_v53 }
 0x2f0   : > { %3727 = vmatpush.msrb.mxu1 %v3412_v32  ;;  %v3409_v32 = vld [vmem:[#allocation12 + $0x20] sm:$0xff] }
 0x2f2   : > { %v8123_v15 = vpop.f32.mrf.mxu2  ;;  %3728 = vmatpush.msrb.mxu1 %v3411_v54  ;;  %v3445_v54 = vld [vmem:[#allocation12 + $0x118] sm:$0xff] }
 0x2f3   : > { %9679 = vst [vmem:[#allocation66_spill] sm:$0xff] %v8123_v15  ;;  %v3426_v15 = vld [vmem:[#allocation12 + $0xa8] sm:$0xff]  ;;  %3570 = vmatpush.msrb.mxu3 %v3445_v54  ;;  %v6909_v54 = vld [vmem:[#allocation2] sm:$0xff] }
 0x2f4   : > { %v8125_v51 = vpop.f32.mrf.mxu1  ;;  %3776 = vmatpush.msra.mxu2 %v3426_v15  ;;  %v3407_v15 = vld [vmem:[#allocation12 + $0x10] sm:$0xff]  ;;  %v8149_v53 = vrot.slane %v6909_v54, 6 }
 0x2f5   : > { %9680 = vst [vmem:[#allocation67_spill] sm:$0xff] %v8125_v51  ;;  %v3410_v51 = vld [vmem:[#allocation12 + $0x28] sm:$0xff]  ;;  %3571 = vmatpush.msrb.mxu3 %v3444_v30 }
 0x2f6   : > { %3729 = vmatpush.msrb.mxu1 %v3410_v51  ;;  %3777 = vmatpush.msra.mxu2 %v3425_v23  ;;  %v3460_v51 = vld [vmem:[#allocation12 + $0x190] sm:$0xff]  ;;  %v8147_v23 = vpop.f32.mrf.mxu3 }
 0x2f7   : > { %3618 = vmatpush.msrb.mxu0 %v3460_v51  ;;  %9684 = vst [vmem:[#allocation71_spill] sm:$0xff] %v8147_v23  ;;  %3572 = vmatpush.msrb.mxu3 %v3443_v13  ;;  %v3442_v51 = vld [vmem:[#allocation12 + $0x100] sm:$0xff]  ;;  %v3006_v23 = vld [vmem:[#allocation10] sm:$0x3] }
 0x2f8   : > { %3730 = vmatpush.msrb.mxu1 %v3409_v32  ;;  %3778 = vmatpush.msra.mxu2 %v3424_v3  ;;  %v2515_v32 = vadd.f32 %v8027_v36, %v2358_v19  ;;  %v3438_v3 = vld [vmem:[#allocation3] sm:$0xc0]  ;;  %v3496_v36 = vrot.slane %v3437_v22, 6  ;;  %v3421_v13 = vld [vmem:[#allocation12 + $0x80] sm:$0xff] }
 0x2f9   : > { %3619 = vmatpush.msrb.mxu0 %v3459_v45  ;;  %v3499_v19 = vrot.slane %v3438_v3, 6  ;;  %3573 = vmatpush.msrb.mxu3 %v3442_v51  ;;  %v3383_v45 = vld [vmem:[#allocation3 + $0x90] sm:$0xe0]  ;;  %v8166_v3 = vpop.f32.mrf.mxu0 }
 0x2fa   : > { %v8131_v34 = vpop.f32.mrf.mxu2  ;;  %3779 = vmatpush.msra.mxu2 %v3423_v37  ;;  %v3405_v37 = vld [vmem:[#allocation12] sm:$0xff]  ;;  %v3657_v22 = vrot.slane %v3383_v45, 5  ;;  %v8231_v45 = vadd.f32 %v8025_v59, %v7983_v24  ;;  %v9692_v24 = vld [vmem:[#allocation36_spill] sm:$0xff] }
 0x2fb   : > { %9681 = vst [vmem:[#allocation68_spill] sm:$0xff] %v8131_v34  ;;  %v3408_v34 = vld [vmem:[#allocation12 + $0x18] sm:$0xff] }
 0x2fc   : > { %v8135_v21 = vpop.f32.mrf.mxu1  ;;  %3731 = vmatpush.msrb.mxu1 %v3408_v34  ;;  %v2516_v34 = vadd.f32 %v8034_v60, %v7992_v1  ;;  %3780 = vmatpush.msra.mxu2 %v3422_v49  ;;  %v2672_v1 = vadd.f32 %v8069_v48, %v2515_v32  ;;  %v3501_v49 = vsel %vm3082_vm0, %v3499_v19, %v8149_v53 }
 0x2fd   : > { %9682 = vst [vmem:[#allocation69_spill] sm:$0xff] %v8135_v21  ;;  %v3384_v21 = vld [vmem:[#allocation3] sm:$0xe0]  ;;  %v2056_v32 = vadd.f32 %v7953_v7, %v7871_v5  ;;  %v2360_v5 = vadd.f32 %v7994_v10, %v7915_v57 }
 0x2fe   : > { %3732 = vmatpush.msrb.mxu1 %v3407_v15  ;;  %v3458_v15 = vld [vmem:[#allocation12 + $0x180] sm:$0xff]  ;;  %v2673_v60 = vadd.f32 %v8073_v42, %v2516_v34  ;;  %3781 = vmatpush.msra.mxu2 %v3421_v13  ;;  %v3660_v48 = vrot.slane %v3384_v21, 5  ;;  %v2829_v42 = vadd.f32 %v8121_v29, %v2672_v1 }
 0x2ff   : > { %3620 = vmatpush.msrb.mxu0 %v3458_v15  ;;  %v8168_v15 = vperm.slane %v3006_v23, 0  ;;  %v2213_v29 = vadd.f32 %v7980_v12, %v2056_v32  ;;  %v2517_v1 = vadd.f32 %v8041_v40, %v2360_v5  ;;  %v2362_v12 = vadd.f32 %v8005_v52, %v7925_v2  ;;  %v4440_v32 = vld [vmem:[#allocation12 + $0x570] sm:$0xff] }
 0x300   : > { %3733 = vmatpush.msrb.mxu1 %v3406_v25  ;;  %v3498_v25 = vsel %vm3082_vm0, %v3496_v36, %v8149_v53  ;;  %3621 = vmatmul.f32.vlgmr.msrb.gmra.mxu0 %v3501_v49  ;;  %v2830_v21 = vadd.f32 %v8127_v9, %v2673_v60  ;;  %v2058_v36 = vadd.f32 %v7962_v46, %v7879_v0  ;;  %v8190_v0 = vpop.f32.mrf.mxu3 }
 0x301   : > { %3574 = vmatmul.f32.vlgmr.msrb.gmra.mxu3 %v3498_v25  ;;  %v2214_v9 = vadd.f32 %v7989_v55, %v7960_v33  ;;  %v8199_v33 = vadd.f32 %v8000_v11, %v7967_v47  ;;  %v2674_v55 = vadd.f32 %v8075_v41, %v2517_v1  ;;  %v2062_v2 = vadd.f32 %v7976_v50, %v7895_v38  ;;  %v8220_v41 = vpop.f32.mrf.mxu0  ;;  %v9685_v25 = vld [vmem:[#allocation49_spill] sm:$0xff] }
 0x302   : > { %v8142_v17 = vpop.f32.mrf.mxu2  ;;  %3734 = vmatpush.msrb.mxu1 %v3405_v37  ;;  %v8171_v37 = vperm.slane %v3006_v23, 1  ;;  %v2518_v23 = vadd.f32 %v8045_v16, %v8003_v20  ;;  %v8186_v57 = vadd.f32 %v7996_v28, %v2058_v36  ;;  %v2519_v28 = vadd.f32 %v8049_v44, %v2362_v12 }
 0x303   : > { %9683 = vst [vmem:[#allocation70_spill] sm:$0xff] %v8142_v17  ;;  %v8153_v17 = vrot.slane %v6909_v54, 5  ;;  %v8208_v20 = vadd.f32 %v8016_v35, %v7974_v62  ;;  %v8212_v47 = vadd.f32 %v8018_v43, %v2062_v2  ;;  %v2364_v11 = vadd.f32 %v8014_v18, %v7935_v14 }
 0x304   : > { %v2909_v30 = vpop.f32.mrf.mxu1  ;;  %v2675_v10 = vadd.f32 %v8079_v6, %v2518_v23  ;;  %v2676_v50 = vadd.f32 %v8083_v4, %v2519_v28  ;;  %v2520_v62 = vadd.f32 %v8055_v61, %v8012_v63  ;;  %v2371_v59 = vadd.f32 %v9692_v24, %v2214_v9  ;;  %v9693_v23 = vld [vmem:[#allocation29_spill] sm:$0xff] }
 0x305   : > { %v3659_v34 = vsel %vm3656_vm1, %v3657_v22, %v8153_v17  ;;  %v3662_v54 = vsel %vm3656_vm1, %v3660_v48, %v8153_v17  ;;  %v2986_v51 = vadd.f32 %v2909_v30, %v2829_v42  ;;  %v2060_v30 = vadd.f32 %v7969_v58, %v7887_v26  ;;  %v9686_v48 = vld [vmem:[#allocation71_spill] sm:$0xff]  ;;  %v9700_v9 = vld [vmem:[#allocation45_spill] sm:$0xff] }
 0x306   : > { %3735 = vmatmul.f32.vlgmr.msrb.gmra.mxu1 %v3659_v34  ;;  %3782 = vmatmul.f32.vlgmr.msra.gmra.mxu2 %v3662_v54  ;;  %v2832_v16 = vadd.f32 %v8139_v56, %v2675_v10  ;;  %v2521_v56 = vadd.f32 %v8057_v39, %v2364_v11  ;;  %v2677_v49 = vadd.f32 %v9685_v25, %v2520_v62  ;;  %v9690_v39 = vld [vmem:[#allocation28_spill] sm:$0xff]  ;;  %v9697_v10 = vld [vmem:[#allocation42_spill] sm:$0xff] }
 0x307   : > { %v3012_v46 = vadd.f32 %v8168_v15, %v2986_v51  ;;  %v8195_v58 = vadd.f32 %v8007_v8, %v2060_v30  ;;  %v2831_v8 = vadd.f32 %v8129_v31, %v2674_v55  ;;  %v2833_v42 = vadd.f32 %v9686_v48, %v2676_v50  ;;  %v9696_v55 = vld [vmem:[#allocation30_spill] sm:$0xff]  ;;  %v9699_v11 = vld [vmem:[#allocation32_spill] sm:$0xff] }
 0x308   : > { %v2522_v2 = vadd.f32 %v9697_v10, %v9696_v55  ;;  %v2834_v50 = vadd.f32 %v8166_v3, %v2677_v49  ;;  %v9701_v62 = vld [vmem:[#allocation46_spill] sm:$0xff] }
 0x309   : > { %v3032_v40 = vmax.f32 %v3012_v46, 0.0  ;;  %v9695_v46 = vld [vmem:[#allocation35_spill] sm:$0xff]  ;;  %v9707_v25 = vld [vmem:[#allocation50_spill] sm:$0xff] }
 0x30a   : > { %v2956_v7 = vpop.f32.mrf.mxu2  ;;  %v2678_v49 = vadd.f32 %v9707_v25, %v2521_v56 }
 0x30b   : > { %v2987_v19 = vadd.f32 %v2956_v7, %v2830_v21  ;;  %v9691_v7 = vld [vmem:[#allocation31_spill] sm:$0xff] }
 0x30c   : > { %v2912_v60 = vpop.f32.mrf.mxu1  ;;  %v2366_v36 = vadd.f32 %v9691_v7, %v9690_v39  ;;  %v2835_v55 = vadd.f32 %v8190_v0, %v2678_v49 }
 0x30d   : > { %v3013_v26 = vadd.f32 %v8171_v37, %v2987_v19  ;;  %v2988_v35 = vadd.f32 %v2912_v60, %v2831_v8  ;;  %v2764_v19 = vpop.f32.mrf.mxu3  ;;  %v9694_v60 = vld [vmem:[#allocation33_spill] sm:$0xff] }
 0x30e   : > { %v2368_v12 = vadd.f32 %v9694_v60, %v9693_v23  ;;  %v9711_v60 = vld [vmem:[#allocation38_spill] sm:$0xff] }
 0x30f   : > { %v3033_v52 = vmax.f32 %v3013_v26, 0.0  ;;  %v3014_v30 = vadd.f32 %v8168_v15, %v2988_v35  ;;  %v2370_v26 = vadd.f32 %v9695_v46, %v2213_v29  ;;  %v9703_v29 = vld [vmem:[#allocation37_spill] sm:$0xff]  ;;  %v9712_v46 = vld [vmem:[#allocation39_spill] sm:$0xff] }
 0x310   : > { %v8256_v35 = vadd.f32 %v9701_v62, %v2368_v12  ;;  %v8284_v12 = vadd.f32 %v9711_v60, %v8199_v33 }
 0x311   : > { %v3072_v38 = vrot.slane %v3033_v52, 6  ;;  %v9698_v52 = vld [vmem:[#allocation44_spill] sm:$0xff] }
 0x312   : > { %v2959_v44 = vpop.f32.mrf.mxu2  ;;  %v2523_v8 = vadd.f32 %v9698_v52, %v2366_v36  ;;  %v3849_v52 = vld [vmem:[#allocation12 + $0x2f8] sm:$0xff] }
 0x313   : > { %v3083_v6 = vsel %vm3082_vm0, %v3032_v40, %v3072_v38  ;;  %v3085_v43 = vsel %vm3084_vm2, %v3032_v40, %v3072_v38  ;;  %v3088_v31 = vsel %vm3087_vm3, %v3032_v40, %v3072_v38  ;;  %v3091_v14 = vsel %vm3090_vm4, %v3072_v38, %v3032_v40  ;;  %3964 = vmatpush.msra.mxu0 %v3849_v52  ;;  %v9715_v52 = vld [vmem:[#allocation52_spill] sm:$0xff] }
 0x314   : > { %v3086_v18 = vrot.slane %v3085_v43, 2  ;;  %v3089_v13 = vrot.slane %v3088_v31, 4  ;;  %v3092_v4 = vrot.slane %v3091_v14, 6  ;;  %v3196_v63 = vsel %vm7685_vm9, %v3083_v6, 0.0  ;;  %v2915_v61 = vpop.f32.mrf.mxu1  ;;  %v9704_v43 = vld [vmem:[#allocation34_spill] sm:$0xff]  ;;  %v9705_v31 = vld [vmem:[#allocation47_spill] sm:$0xff] }
 0x315   : > { %3276 = vst [vmem:[#allocation1] ss:$4 sm:$0xff] %v3196_v63  ;;  %v2989_v22 = vadd.f32 %v2959_v44, %v2832_v16  ;;  %v2990_v28 = vadd.f32 %v2915_v61, %v2833_v42  ;;  %v2524_v40 = vadd.f32 %v9700_v9, %v9699_v11  ;;  %v9702_v16 = vld [vmem:[#allocation48_spill] sm:$0xff]  ;;  %v8263_v6 = vadd.f32 %v9703_v29, %v8186_v57  ;;  %v9709_v42 = vld [vmem:[#allocation54_spill] sm:$0xff] }
 0x316   : > { %v3197_v34 = vsel %vm7691_vm10, %v3086_v18, 0.0  ;;  %v3198_v51 = vsel %vm7696_vm11, %v3089_v13, 0.0  ;;  %v3199_v5 = vsel %vm7703_vm12, %v3092_v4, 0.0  ;;  %v8259_v44 = vadd.f32 %v9702_v16, %v2370_v26  ;;  %v9706_v13 = vld [vmem:[#allocation51_spill] sm:$0xff] }
 0x317   : > { %3278 = vst [vmem:[#allocation1 + $0x1] ss:$4 sm:$0xff] %v3197_v34  ;;  %v3015_v1 = vadd.f32 %v8171_v37, %v2989_v22  ;;  %v2526_v14 = vadd.f32 %v9705_v31, %v9704_v43  ;;  %v8268_v4 = vadd.f32 %v9706_v13, %v2371_v59  ;;  %v3034_v63 = vmax.f32 %v3014_v30, 0.0  ;;  %v9708_v22 = vld [vmem:[#allocation53_spill] sm:$0xff] }
 0x318   : > { %3280 = vst [vmem:[#allocation1 + $0x2] ss:$4 sm:$0xff] %v3198_v51  ;;  %v2679_v48 = vadd.f32 %v9708_v22, %v2522_v2  ;;  %v2680_v34 = vadd.f32 %v9709_v42, %v2523_v8  ;;  %v3016_v51 = vadd.f32 %v8168_v15, %v2990_v28  ;;  %v8288_v26 = vadd.f32 %v9712_v46, %v8195_v58  ;;  %v3833_v2 = vld [vmem:[#allocation12 + $0x278] sm:$0xff]  ;;  %v3832_v28 = vld [vmem:[#allocation12 + $0x270] sm:$0xff]  ;;  %v8298_v58 = vpop.f32.mrf.mxu3 }
 0x319   : > { %3282 = vst [vmem:[#allocation1 + $0x3] ss:$4 sm:$0xff] %v3199_v5  ;;  %v3035_v38 = vmax.f32 %v3015_v1, 0.0  ;;  %v8274_v5 = vpop.f32.mrf.mxu0  ;;  %v9713_v8 = vld [vmem:[#allocation56_spill] sm:$0xff]  ;;  %3917 = vmatpush.msra.mxu3 %v3833_v2 }
 0x31a   : > { %v2962_v18 = vpop.f32.mrf.mxu2  ;;  %v2681_v11 = vadd.f32 %v9713_v8, %v2524_v40  ;;  %v2837_v9 = vadd.f32 %v2764_v19, %v2680_v34  ;;  %v2836_v33 = vadd.f32 %v8220_v41, %v2679_v48  ;;  %v3036_v40 = vmax.f32 %v3016_v51, 0.0  ;;  %v3831_v34 = vld [vmem:[#allocation12 + $0x268] sm:$0xff] }
 0x31b   : > { %v3073_v61 = vrot.slane %v3035_v38, 6  ;;  %v2991_v3 = vadd.f32 %v2962_v18, %v2834_v50  ;;  %3918 = vmatpush.msra.mxu3 %v3832_v28  ;;  %v8345_v8 = vadd.f32 %v9715_v52, %v8263_v6  ;;  %v4272_v1 = vld [vmem:[#allocation12 + $0x428] sm:$0xff] }
 0x31c   : > { %v2918_v57 = vpop.f32.mrf.mxu1 }
 0x31d   : > { %v3093_v39 = vsel %vm3082_vm0, %v3034_v63, %v3073_v61  ;;  %v3094_v7 = vsel %vm3084_vm2, %v3034_v63, %v3073_v61  ;;  %v3096_v36 = vsel %vm3087_vm3, %v3034_v63, %v3073_v61  ;;  %v3098_v24 = vsel %vm3090_vm4, %v3073_v61, %v3034_v63  ;;  %3919 = vmatpush.msra.mxu3 %v3831_v34 }
 0x31e   : > { %v3095_v59 = vrot.slane %v3094_v7, 2  ;;  %v3097_v30 = vrot.slane %v3096_v36, 4  ;;  %v3099_v56 = vrot.slane %v3098_v24, 6  ;;  %v3200_v23 = vsel %vm7720_vm15, %v3093_v39, 0.0  ;;  %v3848_v7 = vld [vmem:[#allocation12 + $0x2f0] sm:$0xff] }
 0x31f   : > { %3284 = vst [vmem:[#allocation1 + $0x20] ss:$4 sm:$0xff] %v3200_v23  ;;  %v3017_v10 = vadd.f32 %v8171_v37, %v2991_v3  ;;  %v2992_v13 = vadd.f32 %v2918_v57, %v2835_v55  ;;  %v9714_v3 = vld [vmem:[#allocation60_spill] sm:$0xff]  ;;  %3965 = vmatpush.msra.mxu0 %v3848_v7 }
 0x320   : > { %v8293_v38 = vld.sshfl [vmem:[#allocation1] sm:$0xff pattern:$0x73625140]  ;;  %v8295_v50 = vld.sshfl [vmem:[#allocation1 + $0x8] sm:$0xff pattern:$0x73625140]  ;;  %v2683_v25 = vadd.f32 %v9714_v3, %v2526_v14 }
 0x321   : > { %3363 = vst [vmem:[#allocation3 + $0x60] sm:$0xff] %v8293_v38  ;;  %v3201_v0 = vsel %vm7685_vm9, %v3095_v59, 0.0  ;;  %v3202_v62 = vsel %vm7691_vm10, %v3097_v30, 0.0  ;;  %v3037_v19 = vmax.f32 %v3017_v10, 0.0  ;;  %v3203_v16 = vsel %vm7696_vm11, %v3099_v56, 0.0  ;;  %v3830_v30 = vld [vmem:[#allocation12 + $0x260] sm:$0xff]  ;;  %v2814_v56 = vpop.f32.mrf.mxu0 }
 0x322   : > { %3364 = vst [vmem:[#allocation3 + $0x68] sm:$0xff] %v8295_v50  ;;  %v2965_v41 = vpop.f32.mrf.mxu2  ;;  %v3502_v29 = vrot.slane %v8293_v38, 6  ;;  %v3504_v43 = vrot.slane %v8295_v50, 6  ;;  %v3663_v31 = vrot.slane %v8293_v38, 5  ;;  %v3665_v61 = vrot.slane %v8295_v50, 5  ;;  %3920 = vmatpush.msra.mxu3 %v3830_v30  ;;  %v3847_v30 = vld [vmem:[#allocation12 + $0x2e8] sm:$0xff] }
 0x323   : > { %3286 = vst [vmem:[#allocation1 + $0x21] ss:$4 sm:$0xff] %v3201_v0  ;;  %v3074_v18 = vrot.slane %v3037_v19, 6  ;;  %v2993_v63 = vadd.f32 %v2965_v41, %v2836_v33  ;;  %v3018_v23 = vadd.f32 %v8168_v15, %v2992_v13  ;;  %v9716_v33 = vld [vmem:[#allocation58_spill] sm:$0xff]  ;;  %v9719_v41 = vld [vmem:[#allocation41_spill] sm:$0xff]  ;;  %3966 = vmatpush.msra.mxu0 %v3847_v30 }
 0x324   : > { %3288 = vst [vmem:[#allocation1 + $0x22] ss:$4 sm:$0xff] %v3202_v62  ;;  %v2921_v49 = vpop.f32.mrf.mxu1  ;;  %v3503_v22 = vsel %vm3082_vm0, %v8149_v53, %v3502_v29  ;;  %v3505_v48 = vsel %vm3082_vm0, %v8149_v53, %v3504_v43  ;;  %v3664_v42 = vsel %vm3656_vm1, %v8153_v17, %v3663_v31  ;;  %v3666_v46 = vsel %vm3656_vm1, %v8153_v17, %v3665_v61 }
 0x325   : > { %3290 = vst [vmem:[#allocation1 + $0x23] ss:$4 sm:$0xff] %v3203_v16  ;;  %v3100_v14 = vsel %vm3082_vm0, %v3036_v40, %v3074_v18  ;;  %v3101_v51 = vsel %vm3084_vm2, %v3036_v40, %v3074_v18  ;;  %v3103_v57 = vsel %vm3087_vm3, %v3036_v40, %v3074_v18  ;;  %v3105_v39 = vsel %vm3090_vm4, %v3074_v18, %v3036_v40  ;;  %v9717_v40 = vld [vmem:[#allocation40_spill] sm:$0xff]  ;;  %v9720_v18 = vld [vmem:[#allocation55_spill] sm:$0xff] }
 0x326   : > { %v3102_v36 = vrot.slane %v3101_v51, 2  ;;  %v3104_v24 = vrot.slane %v3103_v57, 4  ;;  %v3106_v59 = vrot.slane %v3105_v39, 6  ;;  %v3204_v53 = vsel %vm7703_vm12, %v3100_v14, 0.0  ;;  %3577 = vmatmul.f32.gmra.mxu3 %v3503_v22  ;;  %3624 = vmatmul.f32.gmra.mxu0 %v3505_v48  ;;  %v9722_v22 = vld [vmem:[#allocation63_spill] sm:$0xff] }
 0x327   : > { %3295 = vst [vmem:[#allocation1] ss:$4 sm:$0xff] %v3204_v53  ;;  %v3019_v60 = vadd.f32 %v8171_v37, %v2993_v63  ;;  %3738 = vmatmul.f32.gmra.mxu1 %v3664_v42  ;;  %v2994_v28 = vadd.f32 %v2921_v49, %v2837_v9  ;;  %3785 = vmatmul.f32.gmra.mxu2 %v3666_v46  ;;  %v9718_v9 = vld [vmem:[#allocation57_spill] sm:$0xff]  ;;  %v3038_v63 = vmax.f32 %v3018_v23, 0.0 }
 0x328   : > { %v3205_v55 = vsel %vm7720_vm15, %v3102_v36, 0.0  ;;  %v3206_v10 = vsel %vm7685_vm9, %v3104_v24, 0.0  ;;  %v3207_v2 = vsel %vm7691_vm10, %v3106_v59, 0.0  ;;  %v2682_v17 = vadd.f32 %v9716_v33, %v8256_v35  ;;  %v9721_v49 = vld [vmem:[#allocation61_spill] sm:$0xff] }
 0x329   : > { %3296 = vst [vmem:[#allocation1 + $0x1] ss:$4 sm:$0xff] %v3205_v55  ;;  %v3039_v0 = vmax.f32 %v3019_v60, 0.0  ;;  %v2838_v62 = vadd.f32 %v8274_v5, %v2681_v11  ;;  %v8352_v19 = vadd.f32 %v9717_v40, %v8208_v20  ;;  %v8356_v16 = vadd.f32 %v9718_v9, %v8288_v26  ;;  %v2770_v11 = vpop.f32.mrf.mxu3 }
 0x32a   : > { %v8360_v6 = vadd.f32 %v9719_v41, %v8212_v47  ;;  %v2530_v35 = vadd.f32 %v9720_v18, %v8284_v12  ;;  %3297 = vst [vmem:[#allocation1 + $0x2] ss:$4 sm:$0xff] %v3206_v10  ;;  %v2968_v13 = vpop.f32.mrf.mxu2  ;;  %v2839_v5 = vadd.f32 %v8298_v58, %v2682_v17  ;;  %v2684_v26 = vadd.f32 %v9721_v49, %v8259_v44  ;;  %v3846_v10 = vld [vmem:[#allocation12 + $0x2e0] sm:$0xff] }
 0x32b   : > { %3298 = vst [vmem:[#allocation1 + $0x3] ss:$4 sm:$0xff] %v3207_v2  ;;  %v3075_v20 = vrot.slane %v3039_v0, 6  ;;  %v2995_v3 = vadd.f32 %v2968_v13, %v2838_v62  ;;  %v8369_v48 = vadd.f32 %v9722_v22, %v8268_v4  ;;  %v3020_v12 = vadd.f32 %v8168_v15, %v2994_v28  ;;  %v2817_v2 = vpop.f32.mrf.mxu0  ;;  %v9723_v62 = vld [vmem:[#allocation66_spill] sm:$0xff]  ;;  %3967 = vmatpush.msra.mxu0 %v3846_v10 }
 0x32c   : > { %v8371_v47 = vld.sshfl [vmem:[#allocation1 + $0x20] sm:$0xff pattern:$0x73625140]  ;;  %v8373_v42 = vld.sshfl [vmem:[#allocation1 + $0x28] sm:$0xff pattern:$0x73625140]  ;;  %v2924_v34 = vpop.f32.mrf.mxu1  ;;  %v2840_v58 = vadd.f32 %v2814_v56, %v2683_v25  ;;  %v2841_v0 = vadd.f32 %v2770_v11, %v2684_v26  ;;  %v8403_v40 = vadd.f32 %v9723_v62, %v2530_v35 }
 0x32d   : > { %3365 = vst [vmem:[#allocation3 + $0x8] sm:$0xff] %v8371_v47  ;;  %v3107_v14 = vsel %vm3082_vm0, %v3038_v63, %v3075_v20  ;;  %v3108_v51 = vsel %vm3084_vm2, %v3038_v63, %v3075_v20  ;;  %v3110_v44 = vsel %vm3087_vm3, %v3038_v63, %v3075_v20  ;;  %v3112_v57 = vsel %vm3090_vm4, %v3075_v20, %v3038_v63  ;;  %v3829_v56 = vld [vmem:[#allocation12 + $0x258] sm:$0xff] }
 0x32e   : > { %3366 = vst [vmem:[#allocation3 + $0x38] sm:$0xff] %v8373_v42  ;;  %v3109_v4 = vrot.slane %v3108_v51, 2  ;;  %v3111_v39 = vrot.slane %v3110_v44, 4  ;;  %v3113_v7 = vrot.slane %v3112_v57, 6  ;;  %v3208_v36 = vsel %vm7696_vm11, %v3107_v14, 0.0  ;;  %3921 = vmatpush.msra.mxu3 %v3829_v56  ;;  %v3827_v14 = vld [vmem:[#allocation12 + $0x248] sm:$0xff] }
 0x32f   : > { %3299 = vst [vmem:[#allocation1 + $0x20] ss:$4 sm:$0xff] %v3208_v36  ;;  %v3021_v25 = vadd.f32 %v8171_v37, %v2995_v3  ;;  %v2996_v24 = vadd.f32 %v2924_v34, %v2839_v5  ;;  %v3506_v59 = vrot.slane %v8371_v47, 6  ;;  %v3508_v53 = vrot.slane %v8373_v42, 6  ;;  %v3828_v3 = vld [vmem:[#allocation12 + $0x250] sm:$0xff] }
 0x330   : > { %v3209_v23 = vsel %vm7703_vm12, %v3109_v4, 0.0  ;;  %v3210_v60 = vsel %vm7720_vm15, %v3111_v39, 0.0  ;;  %v3040_v46 = vmax.f32 %v3020_v12, 0.0  ;;  %v3667_v55 = vrot.slane %v8371_v47, 5  ;;  %v3844_v51 = vld [vmem:[#allocation12 + $0x2d0] sm:$0xff]  ;;  %3922 = vmatpush.msra.mxu3 %v3828_v3 }
 0x331   : > { %v3211_v28 = vsel %vm7685_vm9, %v3113_v7, 0.0  ;;  %3300 = vst [vmem:[#allocation1 + $0x21] ss:$4 sm:$0xff] %v3209_v23  ;;  %v3041_v52 = vmax.f32 %v3021_v25, 0.0  ;;  %v3507_v33 = vsel %vm3082_vm0, %v3502_v29, %v3506_v59  ;;  %v3509_v17 = vsel %vm3082_vm0, %v3504_v43, %v3508_v53  ;;  %v2773_v49 = vpop.f32.mrf.mxu3 }
 0x332   : > { %v8405_v9 = vld.sshfl [vmem:[#allocation1] sm:$0xff pattern:$0x73625140]  ;;  %v8407_v41 = vld.sshfl [vmem:[#allocation1 + $0x8] sm:$0xff pattern:$0x73625140]  ;;  %v2971_v18 = vpop.f32.mrf.mxu2  ;;  %3580 = vmatmul.f32.gmra.mxu3 %v3507_v33  ;;  %3627 = vmatmul.f32.gmra.mxu0 %v3509_v17  ;;  %v3668_v29 = vsel %vm3656_vm1, %v3663_v31, %v3667_v55  ;;  %v3022_v13 = vadd.f32 %v8168_v15, %v2996_v24 }
 0x333   : > { %3367 = vst [vmem:[#allocation3 + $0xd8] sm:$0xff] %v8405_v9  ;;  %v3076_v43 = vrot.slane %v3041_v52, 6  ;;  %v2997_v35 = vadd.f32 %v2971_v18, %v2840_v58  ;;  %3741 = vmatmul.f32.gmra.mxu1 %v3668_v29  ;;  %v3669_v5 = vrot.slane %v8373_v42, 5  ;;  %v3510_v63 = vrot.slane %v8405_v9, 6  ;;  %v3845_v58 = vld [vmem:[#allocation12 + $0x2d8] sm:$0xff]  ;;  %3923 = vmatpush.msra.mxu3 %v3827_v14 }
 0x334   : > { %3368 = vst [vmem:[#allocation3 + $0x70] sm:$0xff] %v8407_v41  ;;  %v2927_v11 = vpop.f32.mrf.mxu1  ;;  %v3512_v20 = vrot.slane %v8407_v41, 6  ;;  %v3671_v38 = vrot.slane %v8405_v9, 5  ;;  %v3673_v31 = vrot.slane %v8407_v41, 5  ;;  %3968 = vmatpush.msra.mxu0 %v3845_v58 }
 0x335   : > { %3301 = vst [vmem:[#allocation1 + $0x22] ss:$4 sm:$0xff] %v3210_v60  ;;  %v3114_v26 = vsel %vm3082_vm0, %v3040_v46, %v3076_v43  ;;  %v3115_v22 = vsel %vm3084_vm2, %v3040_v46, %v3076_v43  ;;  %v3117_v12 = vsel %vm3087_vm3, %v3040_v46, %v3076_v43  ;;  %v3119_v34 = vsel %vm3090_vm4, %v3076_v43, %v3040_v46 }
 0x336   : > { %3302 = vst [vmem:[#allocation1 + $0x23] ss:$4 sm:$0xff] %v3211_v28  ;;  %v3116_v44 = vrot.slane %v3115_v22, 2  ;;  %v3118_v57 = vrot.slane %v3117_v12, 4  ;;  %v3120_v4 = vrot.slane %v3119_v34, 6  ;;  %v3212_v39 = vsel %vm7691_vm10, %v3114_v26, 0.0  ;;  %3969 = vmatpush.msra.mxu0 %v3844_v51 }
 0x337   : > { %3307 = vst [vmem:[#allocation1] ss:$4 sm:$0xff] %v3212_v39  ;;  %v3023_v7 = vadd.f32 %v8171_v37, %v2997_v35  ;;  %v3670_v36 = vsel %vm3656_vm1, %v3665_v61, %v3669_v5  ;;  %v2998_v25 = vadd.f32 %v2927_v11, %v2841_v0  ;;  %v3511_v24 = vsel %vm3082_vm0, %v3506_v59, %v3510_v63  ;;  %v9724_v61 = vld [vmem:[#allocation65_spill] sm:$0xff]  ;;  %v9725_v28 = vld [vmem:[#allocation43_spill] sm:$0xff] }
 0x338   : > { %v3213_v30 = vsel %vm7696_vm11, %v3116_v44, 0.0  ;;  %v3214_v56 = vsel %vm7703_vm12, %v3118_v57, 0.0  ;;  %v3215_v23 = vsel %vm7720_vm15, %v3120_v4, 0.0  ;;  %3788 = vmatmul.f32.gmra.mxu2 %v3670_v36  ;;  %v3513_v50 = vsel %vm3082_vm0, %v3508_v53, %v3512_v20  ;;  %v9726_v53 = vld [vmem:[#allocation62_spill] sm:$0xff]  ;;  %v3843_v44 = vld [vmem:[#allocation12 + $0x2c8] sm:$0xff] }
 0x339   : > { %v2686_v59 = vadd.f32 %v9724_v61, %v8345_v8  ;;  %3308 = vst [vmem:[#allocation1 + $0x1] ss:$4 sm:$0xff] %v3213_v30  ;;  %v3043_v60 = vmax.f32 %v3023_v7, 0.0  ;;  %v2842_v46 = vadd.f32 %v2817_v2, %v8369_v48  ;;  %v3672_v10 = vsel %vm3656_vm1, %v3667_v55, %v3671_v38  ;;  %v9727_v8 = vld [vmem:[#allocation59_spill] sm:$0xff]  ;;  %v2820_v2 = vpop.f32.mrf.mxu0  ;;  %v2776_v22 = vpop.f32.mrf.mxu3  ;;  %3970 = vmatpush.msra.mxu0 %v3843_v44 }
 0x33a   : > { %v8456_v42 = vadd.f32 %v9725_v28, %v8231_v45  ;;  %v8460_v52 = vadd.f32 %v9726_v53, %v8360_v6  ;;  %v2532_v33 = vadd.f32 %v9727_v8, %v8352_v19  ;;  %3309 = vst [vmem:[#allocation1 + $0x2] ss:$4 sm:$0xff] %v3214_v56  ;;  %v2974_v48 = vpop.f32.mrf.mxu2  ;;  %3583 = vmatmul.f32.gmra.mxu3 %v3511_v24  ;;  %v3042_v55 = vmax.f32 %v3022_v13, 0.0  ;;  %v9728_v45 = vld [vmem:[#allocation67_spill] sm:$0xff]  ;;  %v4059_v56 = vld [vmem:[#allocation12 + $0x378] sm:$0xff] }
 0x33b   : > { %3630 = vmatmul.f32.gmra.mxu0 %v3513_v50  ;;  %v2843_v47 = vadd.f32 %v2773_v49, %v2686_v59  ;;  %3310 = vst [vmem:[#allocation1 + $0x3] ss:$4 sm:$0xff] %v3215_v23  ;;  %v3077_v17 = vrot.slane %v3043_v60, 6  ;;  %v2999_v0 = vadd.f32 %v2974_v48, %v2842_v46  ;;  %3744 = vmatmul.f32.gmra.mxu1 %v3672_v10  ;;  %v3826_v51 = vld [vmem:[#allocation12 + $0x240] sm:$0xff]  ;;  %v4075_v23 = vld [vmem:[#allocation12 + $0x3f8] sm:$0xff]  ;;  %v9729_v50 = vld [vmem:[#allocation68_spill] sm:$0xff] }
 0x33c   : > { %v2688_v62 = vadd.f32 %v9728_v45, %v8356_v16  ;;  %v3024_v6 = vadd.f32 %v8168_v15, %v2998_v25  ;;  %v3674_v19 = vsel %vm3656_vm1, %v3669_v5, %v3673_v31  ;;  %v2930_v18 = vpop.f32.mrf.mxu1  ;;  %v2844_v29 = vadd.f32 %v2820_v2, %v8403_v40  ;;  %3924 = vmatpush.msra.mxu3 %v3826_v51  ;;  %v8849_v54 = vld [vmem:[#allocation3 + $0xd8] sm:$0xff]  ;;  %v6916_v27 = vld [vmem:[#allocation3 + $0x70] sm:$0xff] }
 0x33d   : > { %v8471_v43 = vld.sshfl [vmem:[#allocation1 + $0x20] sm:$0xff pattern:$0x73625140]  ;;  %v8473_v35 = vld.sshfl [vmem:[#allocation1 + $0x28] sm:$0xff pattern:$0x73625140]  ;;  %v3121_v13 = vsel %vm3082_vm0, %v3042_v55, %v3077_v17  ;;  %v3122_v11 = vsel %vm3084_vm2, %v3042_v55, %v3077_v17  ;;  %v3124_v3 = vsel %vm3087_vm3, %v3042_v55, %v3077_v17  ;;  %v3126_v16 = vsel %vm3090_vm4, %v3077_v17, %v3042_v55  ;;  %4207 = vmatpush.msrb.mxu2 %v4075_v23 }
 0x33e   : > { %3369 = vst [vmem:[#allocation3 + $0x58] sm:$0xff] %v8471_v43  ;;  %v3123_v49 = vrot.slane %v3122_v11, 2  ;;  %v3125_v26 = vrot.slane %v3124_v3, 4  ;;  %v3127_v5 = vrot.slane %v3126_v16, 6  ;;  %v3216_v40 = vsel %vm7685_vm9, %v3121_v13, 0.0  ;;  %4160 = vmatpush.msra.mxu1 %v4059_v56 }
 0x33f   : > { %3370 = vst [vmem:[#allocation3 + $0x98] sm:$0xff] %v8473_v35  ;;  %v3025_v12 = vadd.f32 %v8171_v37, %v2999_v0  ;;  %v3000_v34 = vadd.f32 %v2930_v18, %v2843_v47  ;;  %v3514_v58 = vrot.slane %v8471_v43, 6  ;;  %v3516_v14 = vrot.slane %v8473_v35, 6  ;;  %v3825_v47 = vld [vmem:[#allocation12 + $0x238] sm:$0xff] }
 0x340   : > { %v3217_v57 = vsel %vm7691_vm10, %v3123_v49, 0.0  ;;  %v3218_v4 = vsel %vm7696_vm11, %v3125_v26, 0.0  ;;  %3311 = vst [vmem:[#allocation1 + $0x20] ss:$4 sm:$0xff] %v3216_v40  ;;  %v3044_v39 = vmax.f32 %v3024_v6, 0.0  ;;  %3791 = vmatmul.f32.gmra.mxu2 %v3674_v19  ;;  %v3675_v7 = vrot.slane %v8471_v43, 5  ;;  %3925 = vmatpush.msra.mxu3 %v3825_v47 }
 0x341   : > { %v3219_v36 = vsel %vm7703_vm12, %v3127_v5, 0.0  ;;  %3312 = vst [vmem:[#allocation1 + $0x21] ss:$4 sm:$0xff] %v3217_v57  ;;  %v3045_v25 = vmax.f32 %v3025_v12, 0.0  ;;  %v3515_v24 = vsel %vm3082_vm0, %v3510_v63, %v3514_v58  ;;  %v3517_v30 = vsel %vm3082_vm0, %v3512_v20, %v3516_v14  ;;  %v2823_v55 = vpop.f32.mrf.mxu0  ;;  %v3842_v6 = vld [vmem:[#allocation12 + $0x2c0] sm:$0xff]  ;;  %v3824_v19 = vld [vmem:[#allocation12 + $0x230] sm:$0xff] }
 0x342   : > { %v2689_v61 = vadd.f32 %v9729_v50, %v2532_v33  ;;  %v2845_v59 = vadd.f32 %v2776_v22, %v2688_v62  ;;  %v8504_v60 = vld.sshfl [vmem:[#allocation1] sm:$0xff pattern:$0x73625140]  ;;  %v8506_v46 = vld.sshfl [vmem:[#allocation1 + $0x8] sm:$0xff pattern:$0x73625140]  ;;  %v2977_v10 = vpop.f32.mrf.mxu2  ;;  %3586 = vmatmul.f32.gmra.mxu3 %v3515_v24  ;;  %v3676_v63 = vsel %vm3656_vm1, %v3671_v38, %v3675_v7  ;;  %v3026_v28 = vadd.f32 %v8168_v15, %v3000_v34  ;;  %v2779_v34 = vpop.f32.mrf.mxu3 }
 0x343   : > { %3633 = vmatmul.f32.gmra.mxu0 %v3517_v30  ;;  %3371 = vst [vmem:[#allocation3 + $0x20] sm:$0xff] %v8504_v60  ;;  %v3078_v20 = vrot.slane %v3045_v25, 6  ;;  %v3001_v53 = vadd.f32 %v2977_v10, %v2844_v29  ;;  %3747 = vmatmul.f32.gmra.mxu1 %v3676_v63  ;;  %v3677_v8 = vrot.slane %v8473_v35, 5  ;;  %v3518_v48 = vrot.slane %v8504_v60, 6  ;;  %v3841_v18 = vld [vmem:[#allocation12 + $0x2b8] sm:$0xff]  ;;  %v4073_v30 = vld [vmem:[#allocation12 + $0x3e8] sm:$0xff] }
 0x344   : > { %3372 = vst [vmem:[#allocation3 + $0xc8] sm:$0xff] %v8506_v46  ;;  %v2933_v33 = vpop.f32.mrf.mxu1  ;;  %v3520_v2 = vrot.slane %v8506_v46, 6  ;;  %v3679_v9 = vrot.slane %v8504_v60, 5  ;;  %v3681_v38 = vrot.slane %v8506_v46, 5  ;;  %3971 = vmatpush.msra.mxu0 %v3842_v6  ;;  %3926 = vmatpush.msra.mxu3 %v3824_v19  ;;  %v2846_v44 = vadd.f32 %v2823_v55, %v2689_v61  ;;  %v9732_v61 = vld [vmem:[#allocation70_spill] sm:$0xff] }
 0x345   : > { %3313 = vst [vmem:[#allocation1 + $0x22] ss:$4 sm:$0xff] %v3218_v4  ;;  %v3128_v17 = vsel %vm3082_vm0, %v3044_v39, %v3078_v20  ;;  %v3129_v0 = vsel %vm3084_vm2, %v3044_v39, %v3078_v20  ;;  %v3131_v45 = vsel %vm3087_vm3, %v3044_v39, %v3078_v20  ;;  %v3133_v62 = vsel %vm3090_vm4, %v3078_v20, %v3044_v39  ;;  %v4058_v4 = vld [vmem:[#allocation12 + $0x370] sm:$0xff]  ;;  %v4072_v20 = vld [vmem:[#allocation12 + $0x3e0] sm:$0xff] }
 0x346   : > { %3314 = vst [vmem:[#allocation1 + $0x23] ss:$4 sm:$0xff] %v3219_v36  ;;  %v3130_v29 = vrot.slane %v3129_v0, 2  ;;  %v3132_v13 = vrot.slane %v3131_v45, 4  ;;  %v3134_v11 = vrot.slane %v3133_v62, 6  ;;  %v3220_v3 = vsel %vm7720_vm15, %v3128_v17, 0.0  ;;  %3972 = vmatpush.msra.mxu0 %v3841_v18  ;;  %4161 = vmatpush.msra.mxu1 %v4058_v4 }
 0x347   : > { %3319 = vst [vmem:[#allocation1] ss:$4 sm:$0xff] %v3220_v3  ;;  %v3027_v16 = vadd.f32 %v8171_v37, %v3001_v53  ;;  %v3678_v49 = vsel %vm3656_vm1, %v3673_v31, %v3677_v8  ;;  %v3002_v26 = vadd.f32 %v2933_v33, %v2845_v59  ;;  %v3519_v5 = vsel %vm3082_vm0, %v3514_v58, %v3518_v48  ;;  %v4074_v31 = vld [vmem:[#allocation12 + $0x3f0] sm:$0xff] }
 0x348   : > { %v3221_v40 = vsel %vm7685_vm9, %v3130_v29, 0.0  ;;  %v3222_v22 = vsel %vm7691_vm10, %v3132_v13, 0.0  ;;  %v3223_v12 = vsel %vm7696_vm11, %v3134_v11, 0.0  ;;  %3794 = vmatmul.f32.gmra.mxu2 %v3678_v49  ;;  %v3521_v41 = vsel %vm3082_vm0, %v3516_v14, %v3520_v2  ;;  %v9730_v39 = vld [vmem:[#allocation69_spill] sm:$0xff]  ;;  %v9731_v14 = vld [vmem:[#allocation64_spill] sm:$0xff] }
 0x349   : > { %3320 = vst [vmem:[#allocation1 + $0x1] ss:$4 sm:$0xff] %v3221_v40  ;;  %v3047_v58 = vmax.f32 %v3027_v16, 0.0  ;;  %v3028_v51 = vadd.f32 %v8168_v15, %v3002_v26  ;;  %v3680_v57 = vsel %vm3656_vm1, %v3675_v7, %v3679_v9  ;;  %v2690_v36 = vadd.f32 %v9730_v39, %v8460_v52  ;;  %4208 = vmatpush.msrb.mxu2 %v4074_v31  ;;  %v4057_v7 = vld [vmem:[#allocation12 + $0x368] sm:$0xff]  ;;  %v3840_v3 = vld [vmem:[#allocation12 + $0x2b0] sm:$0xff]  ;;  %v3822_v40 = vld [vmem:[#allocation12 + $0x220] sm:$0xff] }
 0x34a   : > { %v2534_v25 = vadd.f32 %v9731_v14, %v8456_v42  ;;  %3321 = vst [vmem:[#allocation1 + $0x2] ss:$4 sm:$0xff] %v3222_v22  ;;  %v2980_v24 = vpop.f32.mrf.mxu2  ;;  %3589 = vmatmul.f32.gmra.mxu3 %v3519_v5  ;;  %v3046_v56 = vmax.f32 %v3026_v28, 0.0  ;;  %v3682_v42 = vsel %vm3656_vm1, %v3677_v8, %v3681_v38  ;;  %v2826_v28 = vpop.f32.mrf.mxu0  ;;  %4162 = vmatpush.msra.mxu1 %v4057_v7  ;;  %v3823_v11 = vld [vmem:[#allocation12 + $0x228] sm:$0xff]  ;;  %v4055_v14 = vld [vmem:[#allocation12 + $0x358] sm:$0xff] }
 0x34b   : > { %3636 = vmatmul.f32.gmra.mxu0 %v3521_v41  ;;  %3322 = vst [vmem:[#allocation1 + $0x3] ss:$4 sm:$0xff] %v3223_v12  ;;  %v3079_v23 = vrot.slane %v3047_v58, 6  ;;  %v3003_v50 = vadd.f32 %v2980_v24, %v2846_v44  ;;  %3750 = vmatmul.f32.gmra.mxu1 %v3680_v57  ;;  %v2847_v10 = vadd.f32 %v2779_v34, %v2690_v36  ;;  %v8560_v63 = vmax.f32 %v3028_v51, 0.0  ;;  %v4056_v34 = vld [vmem:[#allocation12 + $0x360] sm:$0xff]  ;;  %v3839_v58 = vld [vmem:[#allocation12 + $0x2a8] sm:$0xff] }
 0x34c   : > { %v2691_v59 = vadd.f32 %v9732_v61, %v2534_v25  ;;  %v2936_v52 = vpop.f32.mrf.mxu1  ;;  %4209 = vmatpush.msrb.mxu2 %v4073_v30  ;;  %3927 = vmatpush.msra.mxu3 %v3823_v11  ;;  %v4071_v25 = vld [vmem:[#allocation12 + $0x3d8] sm:$0xff]  ;;  %v4054_v61 = vld [vmem:[#allocation12 + $0x350] sm:$0xff]  ;;  %v4052_v11 = vld [vmem:[#allocation12 + $0x340] sm:$0xff] }
 0x34d   : > { %v8567_v53 = vld.sshfl [vmem:[#allocation1 + $0x20] sm:$0xff pattern:$0x73625140]  ;;  %v8569_v33 = vld.sshfl [vmem:[#allocation1 + $0x28] sm:$0xff pattern:$0x73625140]  ;;  %v3135_v47 = vsel %vm3082_vm0, %v3046_v56, %v3079_v23  ;;  %v3136_v55 = vsel %vm3084_vm2, %v3046_v56, %v3079_v23  ;;  %v3138_v17 = vsel %vm3087_vm3, %v3046_v56, %v3079_v23  ;;  %v3140_v0 = vsel %vm3090_vm4, %v3079_v23, %v3046_v56  ;;  %3973 = vmatpush.msra.mxu0 %v3840_v3 }
 0x34e   : > { %3373 = vst [vmem:[#allocation3 + $0xa0] sm:$0xff] %v8567_v53  ;;  %v3137_v8 = vrot.slane %v3136_v55, 2  ;;  %v3139_v45 = vrot.slane %v3138_v17, 4  ;;  %v3141_v62 = vrot.slane %v3140_v0, 6  ;;  %v3224_v6 = vsel %vm7703_vm12, %v3135_v47, 0.0  ;;  %4210 = vmatpush.msrb.mxu2 %v4072_v20  ;;  %3928 = vmatpush.msra.mxu3 %v3822_v40  ;;  %v4068_v3 = vld [vmem:[#allocation12 + $0x3c0] sm:$0xff] }
 0x34f   : > { %3374 = vst [vmem:[#allocation3 + $0x40] sm:$0xff] %v8569_v33  ;;  %v3029_v19 = vadd.f32 %v8171_v37, %v3003_v50  ;;  %v3004_v18 = vadd.f32 %v2936_v52, %v2847_v10  ;;  %v3522_v29 = vrot.slane %v8567_v53, 6  ;;  %v3524_v13 = vrot.slane %v8569_v33, 6  ;;  %4163 = vmatpush.msra.mxu1 %v4056_v34  ;;  %3974 = vmatpush.msra.mxu0 %v3839_v58  ;;  %v3821_v10 = vld [vmem:[#allocation12 + $0x218] sm:$0xff] }
 0x350   : > { %v2848_v16 = vadd.f32 %v2826_v28, %v2691_v59  ;;  %v3225_v49 = vsel %vm7720_vm15, %v3137_v8, 0.0  ;;  %v3226_v26 = vsel %vm7685_vm9, %v3139_v45, 0.0  ;;  %3323 = vst [vmem:[#allocation1 + $0x20] ss:$4 sm:$0xff] %v3224_v6  ;;  %3797 = vmatmul.f32.gmra.mxu2 %v3682_v42  ;;  %v3683_v5 = vrot.slane %v8567_v53, 5  ;;  %v4070_v59 = vld [vmem:[#allocation12 + $0x3d0] sm:$0xff]  ;;  %3929 = vmatpush.msra.mxu3 %v3821_v10 }
 0x351   : > { %v3227_v22 = vsel %vm7691_vm10, %v3141_v62, 0.0  ;;  %3324 = vst [vmem:[#allocation1 + $0x21] ss:$4 sm:$0xff] %v3225_v49  ;;  %v3049_v12 = vmax.f32 %v3029_v19, 0.0  ;;  %v3523_v41 = vsel %vm3082_vm0, %v3518_v48, %v3522_v29  ;;  %v3525_v31 = vsel %vm3082_vm0, %v3520_v2, %v3524_v13  ;;  %4164 = vmatpush.msra.mxu1 %v4055_v14  ;;  %4211 = vmatpush.msrb.mxu2 %v4071_v25  ;;  %v3838_v45 = vld [vmem:[#allocation12 + $0x2a0] sm:$0xff]  ;;  %v4053_v6 = vld [vmem:[#allocation12 + $0x348] sm:$0xff] }
 0x352   : > { %v8595_v51 = vld.sshfl [vmem:[#allocation1] sm:$0xff pattern:$0x73625140]  ;;  %v8597_v44 = vld.sshfl [vmem:[#allocation1 + $0x8] sm:$0xff pattern:$0x73625140]  ;;  %v2983_v57 = vpop.f32.mrf.mxu2  ;;  %3592 = vmatmul.f32.gmra.mxu3 %v3523_v41  ;;  %v3684_v4 = vsel %vm3656_vm1, %v3679_v9, %v3683_v5  ;;  %v3030_v39 = vadd.f32 %v8168_v15, %v3004_v18  ;;  %3975 = vmatpush.msra.mxu0 %v3838_v45 }
 0x353   : > { %3639 = vmatmul.f32.gmra.mxu0 %v3525_v31  ;;  %3375 = vst [vmem:[#allocation3 + $0xb0] sm:$0xff] %v8595_v51  ;;  %v3080_v48 = vrot.slane %v3049_v12, 6  ;;  %v3005_v2 = vadd.f32 %v2983_v57, %v2848_v16  ;;  %3753 = vmatmul.f32.gmra.mxu1 %v3684_v4  ;;  %v3685_v36 = vrot.slane %v8569_v33, 5  ;;  %v3526_v24 = vrot.slane %v8595_v51, 6  ;;  %v4069_v19 = vld [vmem:[#allocation12 + $0x3c8] sm:$0xff]  ;;  %v3820_v18 = vld [vmem:[#allocation12 + $0x210] sm:$0xff] }
 0x354   : > { %3376 = vst [vmem:[#allocation3 + $0x88] sm:$0xff] %v8597_v44  ;;  %v3528_v30 = vrot.slane %v8597_v44, 6  ;;  %v3687_v9 = vrot.slane %v8595_v51, 5  ;;  %v3689_v56 = vrot.slane %v8597_v44, 5  ;;  %4165 = vmatpush.msra.mxu1 %v4054_v61  ;;  %4212 = vmatpush.msrb.mxu2 %v4070_v59  ;;  %v4051_v49 = vld [vmem:[#allocation12 + $0x338] sm:$0xff]  ;;  %v4066_v10 = vld [vmem:[#allocation12 + $0x3b0] sm:$0xff] }
 0x355   : > { %3325 = vst [vmem:[#allocation1 + $0x22] ss:$4 sm:$0xff] %v3226_v26  ;;  %v3142_v15 = vsel %vm3082_vm0, %v8560_v63, %v3080_v48  ;;  %v3143_v23 = vsel %vm3084_vm2, %v8560_v63, %v3080_v48  ;;  %v3145_v50 = vsel %vm3087_vm3, %v8560_v63, %v3080_v48  ;;  %v3147_v7 = vsel %vm3090_vm4, %v3080_v48, %v8560_v63  ;;  %v3837_v26 = vld [vmem:[#allocation12 + $0x298] sm:$0xff] }
 0x356   : > { %3326 = vst [vmem:[#allocation1 + $0x23] ss:$4 sm:$0xff] %v3227_v22  ;;  %v3144_v42 = vrot.slane %v3143_v23, 2  ;;  %v3146_v52 = vrot.slane %v3145_v50, 4  ;;  %v3148_v20 = vrot.slane %v3147_v7, 6  ;;  %v3228_v28 = vsel %vm7696_vm11, %v3142_v15, 0.0  ;;  %4166 = vmatpush.msra.mxu1 %v4053_v6  ;;  %4213 = vmatpush.msrb.mxu2 %v4069_v19 }
 0x357   : > { %3331 = vst [vmem:[#allocation1] ss:$4 sm:$0xff] %v3228_v28  ;;  %v3031_v47 = vadd.f32 %v8171_v37, %v3005_v2  ;;  %v3686_v55 = vsel %vm3656_vm1, %v3681_v38, %v3685_v36  ;;  %v3527_v63 = vsel %vm3082_vm0, %v3522_v29, %v3526_v24  ;;  %v3529_v17 = vsel %vm3082_vm0, %v3524_v13, %v3528_v30  ;;  %v4067_v15 = vld [vmem:[#allocation12 + $0x3b8] sm:$0xff]  ;;  %v4050_v23 = vld [vmem:[#allocation12 + $0x330] sm:$0xff] }
 0x358   : > { %v3229_v0 = vsel %vm7703_vm12, %v3144_v42, 0.0  ;;  %v3230_v8 = vsel %vm7720_vm15, %v3146_v52, 0.0  ;;  %v3231_v37 = vsel %vm7685_vm9, %v3148_v20, 0.0  ;;  %3800 = vmatmul.f32.gmra.mxu2 %v3686_v55  ;;  %v3688_v38 = vsel %vm3656_vm1, %v3683_v5, %v3687_v9  ;;  %v3819_v5 = vld [vmem:[#allocation12 + $0x208] sm:$0xff]  ;;  %3930 = vmatpush.msra.mxu3 %v3820_v18  ;;  %v3836_v42 = vld [vmem:[#allocation12 + $0x290] sm:$0xff]  ;;  %v3818_v52 = vld [vmem:[#allocation12 + $0x200] sm:$0xff] }
 0x359   : > { %3332 = vst [vmem:[#allocation1 + $0x1] ss:$4 sm:$0xff] %v3229_v0  ;;  %v3051_v62 = vmax.f32 %v3031_v47, 0.0  ;;  %v3050_v29 = vmax.f32 %v3030_v39, 0.0  ;;  %v3690_v16 = vsel %vm3656_vm1, %v3685_v36, %v3689_v56  ;;  %4167 = vmatpush.msra.mxu1 %v4052_v11  ;;  %4214 = vmatpush.msrb.mxu2 %v4068_v3  ;;  %v3835_v47 = vld [vmem:[#allocation12 + $0x288] sm:$0xff]  ;;  %v4282_v55 = vld [vmem:[#allocation12 + $0x478] sm:$0xff] }
 0x35a   : > { %3333 = vst [vmem:[#allocation1 + $0x2] ss:$4 sm:$0xff] %v3230_v8  ;;  %3595 = vmatmul.f32.gmra.mxu3 %v3527_v63  ;;  %3976 = vmatpush.msra.mxu0 %v3837_v26  ;;  %v4064_v0 = vld [vmem:[#allocation12 + $0x3a0] sm:$0xff]  ;;  %v4063_v45 = vld [vmem:[#allocation12 + $0x398] sm:$0xff]  ;;  %v4046_v6 = vld [vmem:[#allocation12 + $0x310] sm:$0xff] }
 0x35b   : > { %3642 = vmatmul.f32.gmra.mxu0 %v3529_v17  ;;  %3334 = vst [vmem:[#allocation1 + $0x3] ss:$4 sm:$0xff] %v3231_v37  ;;  %v3081_v13 = vrot.slane %v3051_v62, 6  ;;  %3756 = vmatmul.f32.gmra.mxu1 %v3688_v38  ;;  %v4048_v17 = vld [vmem:[#allocation12 + $0x320] sm:$0xff]  ;;  %v4047_v37 = vld [vmem:[#allocation12 + $0x318] sm:$0xff]  ;;  %v4281_v38 = vld [vmem:[#allocation12 + $0x470] sm:$0xff] }
 0x35c   : > { %3931 = vmatpush.msra.mxu3 %v3819_v5  ;;  %4168 = vmatpush.msra.mxu1 %v4051_v49  ;;  %v3834_v8 = vld [vmem:[#allocation12 + $0x280] sm:$0xff]  ;;  %v4298_v62 = vld [vmem:[#allocation12 + $0x4f8] sm:$0xff]  ;;  %v4062_v19 = vld [vmem:[#allocation12 + $0x390] sm:$0xff] }
 0x35d   : > { %v8642_v40 = vld.sshfl [vmem:[#allocation1 + $0x20] sm:$0xff pattern:$0x73625140]  ;;  %v8644_v22 = vld.sshfl [vmem:[#allocation1 + $0x28] sm:$0xff pattern:$0x73625140]  ;;  %v3149_v12 = vsel %vm3082_vm0, %v3050_v29, %v3081_v13  ;;  %v3150_v41 = vsel %vm3084_vm2, %v3050_v29, %v3081_v13  ;;  %v3152_v31 = vsel %vm3087_vm3, %v3050_v29, %v3081_v13  ;;  %v3154_v34 = vsel %vm3090_vm4, %v3081_v13, %v3050_v29  ;;  %4215 = vmatpush.msrb.mxu2 %v4067_v15 }
 0x35e   : > { %3377 = vst [vmem:[#allocation3 + $0x78] sm:$0xff] %v8642_v40  ;;  %v3151_v58 = vrot.slane %v3150_v41, 2  ;;  %v3153_v57 = vrot.slane %v3152_v31, 4  ;;  %v3232_v4 = vsel %vm7691_vm10, %v3149_v12, 0.0  ;;  %v3155_v48 = vrot.slane %v3154_v34, 6  ;;  %4169 = vmatpush.msra.mxu1 %v4050_v23  ;;  %3977 = vmatpush.msra.mxu0 %v3836_v42  ;;  %v4297_v11 = vld [vmem:[#allocation12 + $0x4f0] sm:$0xff] }
 0x35f   : > { %3378 = vst [vmem:[#allocation3 + $0x80] sm:$0xff] %v8644_v22  ;;  %v3530_v39 = vrot.slane %v8642_v40, 6  ;;  %v3532_v2 = vrot.slane %v8644_v22, 6  ;;  %v3691_v36 = vrot.slane %v8642_v40, 5  ;;  %v3693_v25 = vrot.slane %v8644_v22, 5  ;;  %4216 = vmatpush.msrb.mxu2 %v4066_v10  ;;  %3932 = vmatpush.msra.mxu3 %v3818_v52  ;;  %v4045_v41 = vld [vmem:[#allocation12 + $0x308] sm:$0xff] }
 0x360   : > { %v3233_v14 = vsel %vm7696_vm11, %v3151_v58, 0.0  ;;  %3335 = vst [vmem:[#allocation1 + $0x20] ss:$4 sm:$0xff] %v3232_v4  ;;  %3803 = vmatmul.f32.gmra.mxu2 %v3690_v16  ;;  %v3234_v50 = vsel %vm7703_vm12, %v3153_v57, 0.0  ;;  %3978 = vmatpush.msra.mxu0 %v3835_v47  ;;  %v3813_v13 = vld [vmem:[#allocation3 + $0x90] sm:$0x80] }
 0x361   : > { %3336 = vst [vmem:[#allocation1 + $0x21] ss:$4 sm:$0xff] %v3233_v14  ;;  %v3531_v7 = vsel %vm3082_vm0, %v3526_v24, %v3530_v39  ;;  %v3533_v61 = vsel %vm3082_vm0, %v3528_v30, %v3532_v2  ;;  %v3692_v59 = vsel %vm3656_vm1, %v3687_v9, %v3691_v36  ;;  %v3235_v24 = vsel %vm7720_vm15, %v3155_v48, 0.0  ;;  %v4049_v30 = vld [vmem:[#allocation12 + $0x328] sm:$0xff]  ;;  %4299 = vmatpush.msrb.mxu3 %v4282_v55  ;;  %v4021_v34 = vld [vmem:[#allocation3 + $0xb8] sm:$0x80] }
 0x362   : > { %v8677_v20 = vld.sshfl [vmem:[#allocation1] sm:$0xff pattern:$0x73625140]  ;;  %v8679_v28 = vld.sshfl [vmem:[#allocation1 + $0x8] sm:$0xff pattern:$0x73625140]  ;;  %3598 = vmatmul.f32.gmra.mxu3 %v3531_v7  ;;  %v3694_v63 = vsel %vm3656_vm1, %v3689_v56, %v3693_v25  ;;  %4170 = vmatpush.msra.mxu1 %v4049_v30 }
 0x363   : > { %3645 = vmatmul.f32.gmra.mxu0 %v3533_v61  ;;  %3379 = vst [vmem:[#allocation3 + $0xc0] sm:$0xff] %v8677_v20  ;;  %3759 = vmatmul.f32.gmra.mxu1 %v3692_v59  ;;  %v4065_v9 = vld [vmem:[#allocation12 + $0x3a8] sm:$0xff]  ;;  %v4279_v58 = vld [vmem:[#allocation12 + $0x460] sm:$0xff]  ;;  %v4278_v59 = vld [vmem:[#allocation12 + $0x458] sm:$0xff]  ;;  %v4098_v30 = vrot.slane %v4021_v34, 7 }
 0x364   : > { %3380 = vst [vmem:[#allocation3 + $0x10] sm:$0xff] %v8679_v28  ;;  %4217 = vmatpush.msrb.mxu2 %v4065_v9  ;;  %4171 = vmatpush.msra.mxu1 %v4048_v17  ;;  %v4280_v56 = vld [vmem:[#allocation12 + $0x468] sm:$0xff]  ;;  %v4044_v7 = vld [vmem:[#allocation12 + $0x300] sm:$0xff]  ;;  %v4277_v55 = vld [vmem:[#allocation12 + $0x450] sm:$0xff] }
 0x365   : > { %3337 = vst [vmem:[#allocation1 + $0x22] ss:$4 sm:$0xff] %v3234_v50  ;;  %3979 = vmatpush.msra.mxu0 %v3834_v8  ;;  %4300 = vmatpush.msrb.mxu3 %v4281_v38  ;;  %v3814_v31 = vld [vmem:[#allocation3] sm:$0x80]  ;;  %v4060_v10 = vld [vmem:[#allocation12 + $0x380] sm:$0xff]  ;;  %v8732_v34 = vld [vmem:[#allocation3 + $0xb0] sm:$0xff] }
 0x366   : > { %3338 = vst [vmem:[#allocation1 + $0x23] ss:$4 sm:$0xff] %v3235_v24  ;;  %4218 = vmatpush.msrb.mxu2 %v4064_v0  ;;  %4172 = vmatpush.msra.mxu1 %v4047_v37  ;;  %v4061_v50 = vld [vmem:[#allocation12 + $0x388] sm:$0xff]  ;;  %v3858_v42 = vrot.slane %v3814_v31, 7  ;;  %v4022_v52 = vld [vmem:[#allocation3 + $0x18] sm:$0x80] }
 0x367   : > { %4346 = vmatpush.msrb.mxu0 %v4298_v62  ;;  %4301 = vmatpush.msrb.mxu3 %v4280_v56  ;;  %v4296_v61 = vld [vmem:[#allocation12 + $0x4e8] sm:$0xff]  ;;  %v4295_v9 = vld [vmem:[#allocation12 + $0x4e0] sm:$0xff]  ;;  %v4101_v17 = vrot.slane %v4022_v52, 7 }
 0x368   : > { %3806 = vmatmul.f32.gmra.mxu2 %v3694_v63  ;;  %4173 = vmatpush.msra.mxu1 %v4046_v6  ;;  %v4276_v37 = vld [vmem:[#allocation12 + $0x448] sm:$0xff]  ;;  %v8713_v62 = vld [vmem:[#allocation3 + $0x38] sm:$0xff] }
 0x369   : > { %4219 = vmatpush.msrb.mxu2 %v4063_v45  ;;  %4347 = vmatpush.msrb.mxu0 %v4297_v11  ;;  %v8711_v45 = vld [vmem:[#allocation3 + $0x8] sm:$0xff]  ;;  %v4294_v6 = vld [vmem:[#allocation12 + $0x4d8] sm:$0xff]  ;;  %v8716_v56 = vld [vmem:[#allocation3 + $0x60] sm:$0xff] }
 0x36a   : > { %v3439_v18 = vld [vmem:[#allocation3 + $0xc0] sm:$0x3f]  ;;  %4174 = vmatpush.msra.mxu1 %v4045_v41  ;;  %4302 = vmatpush.msrb.mxu3 %v4279_v58  ;;  %v8721_v11 = vld [vmem:[#allocation3 + $0xc8] sm:$0xff] }
 0x36b   : > { %v3403_v29 = vld [vmem:[#allocation3 + $0xc0] sm:$0x1f]  ;;  %v3534_v3 = vrot.slane %v3439_v18, 6  ;;  %v3440_v16 = vld [vmem:[#allocation3 + $0x10] sm:$0x3f]  ;;  %4220 = vmatpush.msrb.mxu2 %v4062_v19  ;;  %4348 = vmatpush.msrb.mxu0 %v4296_v61  ;;  %v3861_v18 = vrot.slane %v8716_v56, 7 }
 0x36c   : > { %v3695_v49 = vrot.slane %v3403_v29, 5  ;;  %v3404_v26 = vld [vmem:[#allocation3 + $0x10] sm:$0x1f]  ;;  %v3536_v5 = vrot.slane %v3440_v16, 6  ;;  %4175 = vmatpush.msra.mxu1 %v4044_v7  ;;  %4303 = vmatpush.msrb.mxu3 %v4278_v59  ;;  %v8730_v41 = vld [vmem:[#allocation3 + $0x40] sm:$0xff]  ;;  %v8734_v58 = vld [vmem:[#allocation3 + $0x88] sm:$0xff] }
 0x36d   : > { %v3697_v12 = vrot.slane %v3404_v26, 5  ;;  %v3341_v57 = vld.sshfl [vmem:[#allocation1 + $0x20] sm:$0xff pattern:$0x73625140]  ;;  %v3535_v48 = vsel %vm3082_vm0, %v3530_v39, %v3534_v3  ;;  %v8702_v39 = vld [vmem:[#allocation3 + $0x60] sm:$0xff]  ;;  %4221 = vmatpush.msrb.mxu2 %v4061_v50  ;;  %4349 = vmatpush.msrb.mxu0 %v4295_v9  ;;  %v9611_v26 = vrot.slane %v8713_v62, 7 }
 0x36e   : > { %v3342_v4 = vld.sshfl [vmem:[#allocation1 + $0x28] sm:$0xff pattern:$0x73625140]  ;;  %v3696_v14 = vsel %vm3656_vm1, %v3691_v36, %v3695_v49  ;;  %3381 = vst [vmem:[#allocation3 + $0xa8] sm:$0xff] %v3341_v57  ;;  %3601 = vmatmul.f32.gmra.mxu3 %v3535_v48  ;;  %v3537_v15 = vsel %vm3082_vm0, %v3532_v2, %v3536_v5  ;;  %v3855_v36 = vrot.slane %v3813_v13, 7  ;;  %v8704_v2 = vld [vmem:[#allocation3 + $0x68] sm:$0xff] }
 0x36f   : > { %3762 = vmatmul.f32.gmra.mxu1 %v3696_v14  ;;  %v3698_v23 = vsel %vm3656_vm1, %v3693_v25, %v3697_v12  ;;  %3382 = vst [vmem:[#allocation3 + $0x50] sm:$0xff] %v3342_v4  ;;  %3648 = vmatmul.f32.gmra.mxu0 %v3537_v15  ;;  %v6910_v25 = vld [vmem:[#allocation2] sm:$0xff]  ;;  %v4099_v47 = vrot.slane %v8702_v39, 7  ;;  %v4102_v0 = vrot.slane %v8704_v2, 7  ;;  %v8719_v13 = vld [vmem:[#allocation3 + $0x20] sm:$0xff]  ;;  %v8723_v3 = vld [vmem:[#allocation3 + $0x68] sm:$0xff] }
 0x370   : > { %3809 = vmatmul.f32.gmra.mxu2 %v3698_v23  ;;  %v3856_v24 = vrot.slane %v6910_v25, 7  ;;  %4304 = vmatpush.msrb.mxu3 %v4277_v55  ;;  %v4293_v29 = vld [vmem:[#allocation12 + $0x4d0] sm:$0xff]  ;;  %v3863_v16 = vrot.slane %v8723_v3, 7  ;;  %v4104_v49 = vrot.slane %v8711_v45, 7  ;;  %v4275_v5 = vld [vmem:[#allocation12 + $0x440] sm:$0xff]  ;;  %v4292_v31 = vld [vmem:[#allocation12 + $0x4c8] sm:$0xff] }
 0x371   : > { %4222 = vmatpush.msrb.mxu2 %v4060_v10  ;;  %v4100_v38 = vsel %vm3854_vm5, %v4098_v30, %v4099_v47  ;;  %v4103_v19 = vsel %vm3854_vm5, %v4101_v17, %v4102_v0  ;;  %4350 = vmatpush.msrb.mxu0 %v4294_v6  ;;  %v8728_v12 = vld [vmem:[#allocation3 + $0xa0] sm:$0xff]  ;;  %v8736_v57 = vld [vmem:[#allocation3 + $0xd8] sm:$0xff]  ;;  %v8738_v4 = vld [vmem:[#allocation3 + $0x70] sm:$0xff]  ;;  %v9609_v14 = vrot.slane %v8719_v13, 2  ;;  %v9608_v15 = vrot.slane %v8721_v11, 2 }
 0x372   : > { %v3857_v63 = vsel %vm3854_vm5, %v3855_v36, %v3856_v24  ;;  %v3860_v8 = vsel %vm3854_vm5, %v3858_v42, %v3856_v24  ;;  %4305 = vmatpush.msrb.mxu3 %v4276_v37  ;;  %9733 = vst [vmem:[#allocation49_spill] sm:$0xff] %v8738_v4  ;;  %v4651_v48 = vld [vmem:[#allocation3 + $0x58] sm:$0xff]  ;;  %v4945_v23 = vrot.slane %v8728_v12, 2  ;;  %v4947_v50 = vrot.slane %v8730_v41, 2 }
 0x373   : > { %4351 = vmatpush.msrb.mxu0 %v4293_v29  ;;  %v3862_v7 = vsel %vm3854_vm5, %v3856_v24, %v3861_v18  ;;  %v3864_v36 = vsel %vm3854_vm5, %v3856_v24, %v3863_v16  ;;  %v4105_v61 = vsel %vm3854_vm5, %v4099_v47, %v4104_v49  ;;  %v4107_v59 = vsel %vm3854_vm5, %v4102_v0, %v9611_v26  ;;  %v4652_v10 = vld [vmem:[#allocation3 + $0x98] sm:$0xff] }
 0x374   : > { %4306 = vmatpush.msrb.mxu3 %v4275_v5  ;;  %v8759_v42 = vsel %vm3090_vm4, %v9609_v14, %v4945_v23  ;;  %v8764_v52 = vsel %vm3090_vm4, %v9608_v15, %v4947_v50  ;;  %v4949_v25 = vrot.slane %v8732_v34, 2  ;;  %v4951_v24 = vrot.slane %v8734_v58, 2  ;;  %v8768_v30 = vld [vmem:[#allocation3 + $0xd8] sm:$0xff]  ;;  %v4273_v5 = vld [vmem:[#allocation12 + $0x430] sm:$0xff]  ;;  %v8803_v14 = vld [vmem:[#allocation3 + $0x80] sm:$0xff] }
 0x375   : > { %4352 = vmatpush.msrb.mxu0 %v4292_v31  ;;  %v9607_v47 = vrot.slane %v8736_v57, 3  ;;  %v9610_v9 = vrot.slane %v8738_v4, 3  ;;  %v5145_v55 = vrot.slane %v4651_v48, 3  ;;  %v5149_v37 = vrot.slane %v8719_v13, 3  ;;  %v4291_v29 = vld [vmem:[#allocation12 + $0x4c0] sm:$0xff] }
 0x376   : > { %3933 = vmatmul.f32.vlgmr.msra.gmra.mxu3 %v3857_v63  ;;  %v8772_v63 = vld [vmem:[#allocation3 + $0x70] sm:$0xff]  ;;  %v8775_v17 = vsel %vm3090_vm4, %v4945_v23, %v4949_v25  ;;  %v8778_v0 = vsel %vm3090_vm4, %v4947_v50, %v4951_v24  ;;  %v5151_v48 = vrot.slane %v8721_v11, 3  ;;  %v5153_v23 = vrot.slane %v8728_v12, 3  ;;  %v8801_v15 = vld [vmem:[#allocation3 + $0x78] sm:$0xff] }
 0x377   : > { %4176 = vmatmul.f32.vlgmr.msra.gmra.mxu1 %v4100_v38  ;;  %3980 = vmatmul.f32.vlgmr.msra.gmra.mxu0 %v3860_v8  ;;  %v5147_v8 = vrot.slane %v4652_v10, 3  ;;  %v8781_v38 = vld [vmem:[#allocation3 + $0x8] sm:$0xff]  ;;  %v8787_v31 = vsel %vm5138_vm6, %v9607_v47, %v5145_v55  ;;  %v4108_v50 = vrot.slane %v8768_v30, 7  ;;  %v6914_v10 = vld [vmem:[#allocation3 + $0x38] sm:$0xff]  ;;  %v4955_v26 = vrot.slane %v8803_v14, 2 }
 0x378   : > { %4223 = vmatmul.f32.vlgmr.msrb.gmra.mxu2 %v4103_v19  ;;  %v9612_v6 = vrot.slane %v8781_v38, 7  ;;  %v4274_v19 = vld [vmem:[#allocation12 + $0x438] sm:$0xff]  ;;  %9734 = vst [vmem:[#allocation71_spill] sm:$0xff] %v8787_v31  ;;  %4353 = vmatpush.msrb.mxu0 %v4291_v29  ;;  %v3867_v47 = vrot.slane %v6914_v10, 7  ;;  %v8809_v29 = vsel %vm5138_vm6, %v5149_v37, %v5153_v23  ;;  %v5157_v56 = vrot.slane %v8732_v34, 3 }
 0x379   : > { %4307 = vmatpush.msrb.mxu3 %v4274_v19  ;;  %v8806_v19 = vsel %vm5138_vm6, %v5147_v8, %v5151_v48  ;;  %9738 = vst [vmem:[#allocation29_spill] sm:$0xff] %v8809_v29  ;;  %v8841_v3 = vsel %vm3090_vm4, %v4951_v24, %v4955_v26  ;;  %v4289_v24 = vld [vmem:[#allocation12 + $0x4b0] sm:$0xff]  ;;  %v4271_v29 = vld [vmem:[#allocation12 + $0x420] sm:$0xff] }
 0x37a   : > { %9737 = vst [vmem:[#allocation36_spill] sm:$0xff] %v8806_v19  ;;  %v3866_v10 = vsel %vm3854_vm5, %v3861_v18, %v9612_v6  ;;  %v5159_v18 = vrot.slane %v8734_v58, 3  ;;  %v8835_v6 = vld [vmem:[#allocation3 + $0x98] sm:$0xff]  ;;  %v8844_v21 = vsel %vm5138_vm6, %v5153_v23, %v5157_v56  ;;  %v4439_v23 = vld [vmem:[#allocation12 + $0x568] sm:$0xff] }
 0x37b   : > { %4308 = vmatpush.msrb.mxu3 %v4273_v5  ;;  %v3868_v5 = vsel %vm3854_vm5, %v3863_v16, %v3867_v47  ;;  %v4441_v16 = vld [vmem:[#allocation12 + $0x578] sm:$0xff]  ;;  %9741 = vst [vmem:[#allocation35_spill] sm:$0xff] %v8844_v21  ;;  %v4455_v21 = vld [vmem:[#allocation12 + $0x5e8] sm:$0xff] }
 0x37c   : > { %4543 = vmatpush.msrb.mxu1 %v4441_v16  ;;  %v8856_v16 = vld [vmem:[#allocation3 + $0x10] sm:$0xff] }
 0x37d   : > { %4309 = vmatpush.msrb.mxu3 %v4272_v1 }
 0x37e   : > { %3936 = vmatmul.f32.gmra.mxu3 %v3862_v7  ;;  %v4290_v7 = vld [vmem:[#allocation12 + $0x4b8] sm:$0xff]  ;;  %4544 = vmatpush.msrb.mxu1 %v4440_v32 }
 0x37f   : > { %4179 = vmatmul.f32.gmra.mxu1 %v4105_v61  ;;  %3983 = vmatmul.f32.gmra.mxu0 %v3864_v36  ;;  %v8795_v36 = vsel %vm5138_vm6, %v9610_v9, %v5147_v8  ;;  %v8798_v61 = vsel %vm5138_vm6, %v5145_v55, %v5149_v37  ;;  %v4110_v9 = vrot.slane %v8772_v63, 7  ;;  %v4109_v8 = vsel %vm3854_vm5, %v4104_v49, %v4108_v50 }
 0x380   : > { %4226 = vmatmul.f32.gmra.mxu2 %v4107_v59  ;;  %9735 = vst [vmem:[#allocation28_spill] sm:$0xff] %v8795_v36  ;;  %v5155_v59 = vrot.slane %v8730_v41, 3  ;;  %4354 = vmatpush.msrb.mxu0 %v4290_v7  ;;  %v4953_v37 = vrot.slane %v8801_v15, 2  ;;  %v9740_v7 = vrot.slane %v8713_v62, 7 }
 0x381   : > { %9736 = vst [vmem:[#allocation31_spill] sm:$0xff] %v8798_v61  ;;  %4310 = vmatpush.msrb.mxu3 %v4271_v29  ;;  %4545 = vmatpush.msrb.mxu1 %v4439_v23  ;;  %v4454_v29 = vld [vmem:[#allocation12 + $0x5e0] sm:$0xff]  ;;  %v5163_v61 = vrot.slane %v8803_v14, 3  ;;  %v4453_v23 = vld [vmem:[#allocation12 + $0x5d8] sm:$0xff] }
 0x382   : > { %v8813_v55 = vsel %vm5138_vm6, %v5151_v48, %v5155_v59  ;;  %v8828_v48 = vld [vmem:[#allocation3 + $0x58] sm:$0xff]  ;;  %v4111_v49 = vsel %vm3854_vm5, %v9740_v7, %v4110_v9  ;;  %v3869_v7 = vrot.slane %v8849_v54, 7  ;;  %4355 = vmatpush.msrb.mxu0 %v4289_v24  ;;  %v9622_v24 = vrot.slane %v8856_v16, 2 }
 0x383   : > { %9739 = vst [vmem:[#allocation33_spill] sm:$0xff] %v8813_v55  ;;  %v3871_v55 = vrot.slane %v6916_v27, 7  ;;  %v4438_v54 = vld [vmem:[#allocation12 + $0x560] sm:$0xff] }
 0x384   : > { %4546 = vmatpush.msrb.mxu1 %v4438_v54  ;;  %v3873_v54 = vrot.slane %v8471_v43, 7 }
 0x385   : > { %v3872_v32 = vsel %vm3854_vm5, %v3867_v47, %v3871_v55  ;;  %v8876_v47 = vsel %vm3090_vm4, %v4955_v26, %v9622_v24  ;;  %v4287_v26 = vld [vmem:[#allocation12 + $0x4a0] sm:$0xff]  ;;  %v4699_v24 = vld [vmem:[#allocation12 + $0x6e8] sm:$0xff] }
 0x386   : > { %3939 = vmatmul.f32.gmra.mxu3 %v3866_v10  ;;  %v8838_v10 = vsel %vm3090_vm4, %v4949_v25, %v4953_v37  ;;  %v4112_v25 = vrot.slane %v8828_v48, 7  ;;  %v3874_v43 = vsel %vm3854_vm5, %v3869_v7, %v3873_v54 }
 0x387   : > { %4182 = vmatmul.f32.gmra.mxu1 %v4109_v8  ;;  %3986 = vmatmul.f32.gmra.mxu0 %v3868_v5  ;;  %v4457_v8 = vld [vmem:[#allocation12 + $0x5f8] sm:$0xff]  ;;  %v8847_v5 = vsel %vm5138_vm6, %v5155_v59, %v5159_v18  ;;  %v4114_v59 = vrot.slane %v8835_v6, 7 }
 0x388   : > { %4229 = vmatmul.f32.gmra.mxu2 %v4111_v49  ;;  %9742 = vst [vmem:[#allocation30_spill] sm:$0xff] %v8847_v5  ;;  %v4456_v49 = vld [vmem:[#allocation12 + $0x5f0] sm:$0xff]  ;;  %v8854_v5 = vld [vmem:[#allocation3 + $0xc0] sm:$0xff]  ;;  %v4113_v27 = vsel %vm3854_vm5, %v4108_v50, %v4112_v25 }
 0x389   : > { %4590 = vmatpush.msra.mxu2 %v4457_v8  ;;  %v9743_v8 = vrot.slane %v8781_v38, 7  ;;  %v9619_v1 = vrot.slane %v8854_v5, 2  ;;  %v4115_v38 = vsel %vm3854_vm5, %v4110_v9, %v4114_v59  ;;  %v4288_v50 = vld [vmem:[#allocation12 + $0x4a8] sm:$0xff]  ;;  %v8882_v9 = vsel %vm5138_vm6, %v5159_v18, %v5163_v61 }
 0x38a   : > { %9745 = vst [vmem:[#allocation44_spill] sm:$0xff] %v8882_v9  ;;  %4356 = vmatpush.msrb.mxu0 %v4288_v50  ;;  %v4435_v18 = vld [vmem:[#allocation12 + $0x548] sm:$0xff]  ;;  %v4434_v50 = vld [vmem:[#allocation12 + $0x540] sm:$0xff] }
 0x38b   : > { %4591 = vmatpush.msra.mxu2 %v4456_v49  ;;  %v3870_v19 = vsel %vm3854_vm5, %v9743_v8, %v3869_v7  ;;  %v5161_v49 = vrot.slane %v8801_v15, 3  ;;  %v4120_v7 = vrot.slane %v8567_v53, 7 }
 0x38c   : > { %4357 = vmatpush.msrb.mxu0 %v4287_v26  ;;  %v4122_v26 = vrot.slane %v8569_v33, 7  ;;  %v4431_v33 = vld [vmem:[#allocation12 + $0x528] sm:$0xff] }
 0x38d   : > { %4592 = vmatpush.msra.mxu2 %v4455_v21  ;;  %v8871_v21 = vsel %vm3090_vm4, %v4953_v37, %v9619_v1  ;;  %v8879_v8 = vsel %vm5138_vm6, %v5157_v56, %v5161_v49  ;;  %v4116_v37 = vrot.slane %v8504_v60, 7  ;;  %v4452_v1 = vld [vmem:[#allocation12 + $0x5d0] sm:$0xff]  ;;  %v4118_v56 = vrot.slane %v8506_v46, 7 }
 0x38e   : > { %3942 = vmatmul.f32.gmra.mxu3 %v3870_v19  ;;  %v4437_v19 = vld [vmem:[#allocation12 + $0x558] sm:$0xff]  ;;  %9744 = vst [vmem:[#allocation42_spill] sm:$0xff] %v8879_v8  ;;  %v9621_v46 = vrot.slane %v8854_v5, 3 }
 0x38f   : > { %4185 = vmatmul.f32.gmra.mxu1 %v4113_v27  ;;  %3989 = vmatmul.f32.gmra.mxu0 %v3872_v32  ;;  %v4436_v27 = vld [vmem:[#allocation12 + $0x550] sm:$0xff]  ;;  %v4270_v32 = vld [vmem:[#allocation12 + $0x418] sm:$0xff]  ;;  %v4117_v60 = vsel %vm3854_vm5, %v4112_v25, %v4116_v37 }
 0x390   : > { %4232 = vmatmul.f32.gmra.mxu2 %v4115_v38  ;;  %v3875_v38 = vrot.slane %v8473_v35, 7  ;;  %4547 = vmatpush.msrb.mxu1 %v4437_v19  ;;  %v4451_v35 = vld [vmem:[#allocation12 + $0x5c8] sm:$0xff]  ;;  %v4119_v19 = vsel %vm3854_vm5, %v4114_v59, %v4118_v56  ;;  %v4286_v25 = vld [vmem:[#allocation12 + $0x498] sm:$0xff] }
 0x391   : > { %4593 = vmatpush.msra.mxu2 %v4454_v29  ;;  %4311 = vmatpush.msrb.mxu3 %v4270_v32  ;;  %v4433_v32 = vld [vmem:[#allocation12 + $0x538] sm:$0xff] }
 0x392   : > { %4548 = vmatpush.msrb.mxu1 %v4436_v27  ;;  %v3876_v29 = vsel %vm3854_vm5, %v3871_v55, %v3875_v38  ;;  %v4269_v27 = vld [vmem:[#allocation12 + $0x410] sm:$0xff]  ;;  %v8897_v55 = vsel %vm5138_vm6, %v5161_v49, %v9621_v46  ;;  %v4449_v59 = vld [vmem:[#allocation12 + $0x5b8] sm:$0xff]  ;;  %4358 = vmatpush.msrb.mxu0 %v4286_v25  ;;  %v8915_v25 = vpop.f32.mrf.mxu3 }
 0x393   : > { %4594 = vmatpush.msra.mxu2 %v4453_v23  ;;  %v4450_v23 = vld [vmem:[#allocation12 + $0x5c0] sm:$0xff]  ;;  %9746 = vst [vmem:[#allocation32_spill] sm:$0xff] %v8897_v55  ;;  %4312 = vmatpush.msrb.mxu3 %v4269_v27  ;;  %v4432_v49 = vld [vmem:[#allocation12 + $0x530] sm:$0xff] }
 0x394   : > { %4549 = vmatpush.msrb.mxu1 %v4435_v18  ;;  %v8901_v18 = vpop.f32.mrf.mxu0  ;;  %v4285_v27 = vld [vmem:[#allocation12 + $0x490] sm:$0xff] }
 0x395   : > { %4595 = vmatpush.msra.mxu2 %v4452_v1  ;;  %v9620_v1 = vrot.slane %v8856_v16, 3  ;;  %4359 = vmatpush.msrb.mxu0 %v4285_v27  ;;  %v8924_v27 = vpop.f32.mrf.mxu2  ;;  %v4042_v46 = vld [vmem:[#allocation3 + $0x50] sm:$0x7f] }
 0x396   : > { %3945 = vmatmul.f32.gmra.mxu3 %v3874_v43  ;;  %4550 = vmatpush.msrb.mxu1 %v4434_v50  ;;  %v8908_v43 = vpop.f32.mrf.mxu1  ;;  %v3880_v50 = vsel %vm3854_vm5, %v3875_v38, %v4118_v56  ;;  %v4445_v38 = vld [vmem:[#allocation12 + $0x598] sm:$0xff] }
 0x397   : > { %4188 = vmatmul.f32.gmra.mxu1 %v4117_v60  ;;  %3992 = vmatmul.f32.gmra.mxu0 %v3876_v29  ;;  %v8906_v53 = vsel %vm5138_vm6, %v5163_v61, %v9620_v1  ;;  %v4448_v60 = vld [vmem:[#allocation12 + $0x5b0] sm:$0xff]  ;;  %v3878_v29 = vsel %vm3854_vm5, %v3873_v54, %v4116_v37  ;;  %v4123_v61 = vsel %vm3854_vm5, %v4118_v56, %v4122_v26  ;;  %v4446_v54 = vld [vmem:[#allocation12 + $0x5a0] sm:$0xff] }
 0x398   : > { %4235 = vmatmul.f32.gmra.mxu2 %v4119_v19  ;;  %4551 = vmatpush.msrb.mxu1 %v4433_v32  ;;  %9747 = vst [vmem:[#allocation45_spill] sm:$0xff] %v8906_v53  ;;  %v4447_v19 = vld [vmem:[#allocation12 + $0x5a8] sm:$0xff]  ;;  %v4430_v32 = vld [vmem:[#allocation12 + $0x520] sm:$0xff] }
 0x399   : > { %4596 = vmatpush.msra.mxu2 %v4451_v35  ;;  %v4121_v35 = vsel %vm3854_vm5, %v4116_v37, %v4120_v7  ;;  %v4124_v37 = vrot.slane %v8595_v51, 7  ;;  %v4267_v56 = vld [vmem:[#allocation12 + $0x400] sm:$0xff]  ;;  %v4284_v51 = vld [vmem:[#allocation12 + $0x488] sm:$0xff] }
 0x39a   : > { %4552 = vmatpush.msrb.mxu1 %v4432_v49  ;;  %v4126_v49 = vrot.slane %v8597_v44, 7  ;;  %4360 = vmatpush.msrb.mxu0 %v4284_v51  ;;  %v4701_v51 = vld [vmem:[#allocation12 + $0x6f8] sm:$0xff] }
 0x39b   : > { %4597 = vmatpush.msra.mxu2 %v4450_v23  ;;  %v4268_v23 = vld [vmem:[#allocation12 + $0x408] sm:$0xff] }
 0x39c   : > { %4553 = vmatpush.msrb.mxu1 %v4431_v33  ;;  %4313 = vmatpush.msrb.mxu3 %v4268_v23  ;;  %v4427_v23 = vld [vmem:[#allocation12 + $0x508] sm:$0xff]  ;;  %v4127_v44 = vsel %vm3854_vm5, %v4122_v26, %v4126_v49  ;;  %v4684_v26 = vld [vmem:[#allocation12 + $0x670] sm:$0xff] }
 0x39d   : > { %4598 = vmatpush.msra.mxu2 %v4449_v59  ;;  %v4429_v59 = vld [vmem:[#allocation12 + $0x518] sm:$0xff] }
 0x39e   : > { %3948 = vmatmul.f32.gmra.mxu3 %v3878_v29  ;;  %4554 = vmatpush.msrb.mxu1 %v4430_v32  ;;  %v4125_v29 = vsel %vm3854_vm5, %v4120_v7, %v4124_v37  ;;  %v4283_v32 = vld [vmem:[#allocation12 + $0x480] sm:$0xff]  ;;  %v4443_v7 = vld [vmem:[#allocation12 + $0x588] sm:$0xff] }
 0x39f   : > { %4191 = vmatmul.f32.gmra.mxu1 %v4121_v35  ;;  %3995 = vmatmul.f32.gmra.mxu0 %v3880_v50 }
 0x3a0   : > { %4599 = vmatpush.msra.mxu2 %v4448_v60  ;;  %4555 = vmatpush.msrb.mxu1 %v4429_v59  ;;  %v4428_v60 = vld [vmem:[#allocation12 + $0x510] sm:$0xff]  ;;  %v4685_v59 = vld [vmem:[#allocation12 + $0x678] sm:$0xff] }
 0x3a1   : > { %4238 = vmatmul.f32.gmra.mxu2 %v4123_v61  ;;  %4314 = vmatpush.msrb.mxu3 %v4267_v56 }
 0x3a2   : > { %4600 = vmatpush.msra.mxu2 %v4447_v19  ;;  %v4444_v19 = vld [vmem:[#allocation12 + $0x590] sm:$0xff]  ;;  %4556 = vmatpush.msrb.mxu1 %v4428_v60 }
 0x3a3   : > { %v8919_v33 = vpop.f32.mrf.mxu0  ;;  %4361 = vmatpush.msrb.mxu0 %v4283_v32  ;;  %4786 = vmatpush.msra.mxu3 %v4685_v59  ;;  %v4682_v59 = vld [vmem:[#allocation12 + $0x660] sm:$0xff] }
 0x3a4   : > { %4601 = vmatpush.msra.mxu2 %v4446_v54  ;;  %v8921_v50 = vpop.f32.mrf.mxu1  ;;  %v4426_v54 = vld [vmem:[#allocation12 + $0x500] sm:$0xff]  ;;  %4557 = vmatpush.msrb.mxu1 %v4427_v23 }
 0x3a5   : > { %4787 = vmatpush.msra.mxu3 %v4684_v26  ;;  %4833 = vmatpush.msra.mxu0 %v4701_v51  ;;  %v4041_v26 = vld [vmem:[#allocation3 + $0xa8] sm:$0x7f] }
 0x3a6   : > { %4602 = vmatpush.msra.mxu2 %v4445_v38  ;;  %3951 = vmatmul.f32.gmra.mxu3 %v4121_v35  ;;  %v4128_v38 = vrot.slane %v8642_v40, 7  ;;  %v4442_v35 = vld [vmem:[#allocation12 + $0x580] sm:$0xff]  ;;  %v4136_v55 = vrot.slane %v4041_v26, 7 }
 0x3a7   : > { %4194 = vmatmul.f32.gmra.mxu1 %v4125_v29  ;;  %3998 = vmatmul.f32.gmra.mxu0 %v4123_v61  ;;  %v4130_v61 = vrot.slane %v8644_v22, 7  ;;  %v4683_v22 = vld [vmem:[#allocation12 + $0x668] sm:$0xff] }
 0x3a8   : > { %4603 = vmatpush.msra.mxu2 %v4444_v19  ;;  %4558 = vmatpush.msrb.mxu1 %v4426_v54  ;;  %v4129_v60 = vsel %vm3854_vm5, %v4124_v37, %v4128_v38  ;;  %v4134_v37 = vrot.slane %v8679_v28, 7  ;;  %v4700_v54 = vld [vmem:[#allocation12 + $0x6f0] sm:$0xff] }
 0x3a9   : > { %4241 = vmatmul.f32.gmra.mxu2 %v4127_v44  ;;  %v8928_v56 = vpop.f32.mrf.mxu3  ;;  %v4131_v40 = vsel %vm3854_vm5, %v4126_v49, %v4130_v61  ;;  %4788 = vmatpush.msra.mxu3 %v4683_v22 }
 0x3aa   : > { %4604 = vmatpush.msra.mxu2 %v4443_v7  ;;  %v8932_v32 = vpop.f32.mrf.mxu2  ;;  %v4132_v7 = vrot.slane %v8677_v20, 7  ;;  %4834 = vmatpush.msra.mxu0 %v4700_v54  ;;  %v4135_v51 = vsel %vm3854_vm5, %v4130_v61, %v4134_v37  ;;  %v3816_v20 = vld [vmem:[#allocation3 + $0x10] sm:$0x7f] }
 0x3ab   : > { %4789 = vmatpush.msra.mxu3 %v4682_v59  ;;  %v3895_v54 = vrot.slane %v3816_v20, 7  ;;  %v4680_v20 = vld [vmem:[#allocation12 + $0x650] sm:$0xff] }
 0x3ac   : > { %4605 = vmatpush.msra.mxu2 %v4442_v35  ;;  %4835 = vmatpush.msra.mxu0 %v4699_v24  ;;  %v4137_v9 = vsel %vm3854_vm5, %v4132_v7, %v4136_v55  ;;  %v4482_v55 = vrot.slane %v8711_v45, 1 }
 0x3ae   : > { %3954 = vmatmul.f32.gmra.mxu3 %v4125_v29  ;;  %v4133_v29 = vsel %vm3854_vm5, %v4128_v38, %v4132_v7 }
 0x3af   : > { %4197 = vmatmul.f32.gmra.mxu1 %v4129_v60  ;;  %4001 = vmatmul.f32.gmra.mxu0 %v4127_v44  ;;  %v3628_v19 = vpop.f32.mrf.mxu0  ;;  %v3815_v44 = vld [vmem:[#allocation3 + $0xc0] sm:$0x7f] }
 0x3b0   : > { %v3742_v23 = vpop.f32.mrf.mxu1  ;;  %v3893_v53 = vrot.slane %v3815_v44, 7 }
 0x3b1   : > { %4244 = vmatmul.f32.gmra.mxu2 %v4131_v40 }
 0x3b5   : > { %v3581_v35 = vpop.f32.mrf.mxu3 }
 0x3b6   : > { %3957 = vmatmul.f32.gmra.mxu3 %v4129_v60  ;;  %v3629_v49 = vadd.f32 %v3628_v19, %v3581_v35  ;;  %v4138_v60 = vrot.slane %v4042_v46, 7  ;;  %v4681_v19 = vld [vmem:[#allocation12 + $0x658] sm:$0xff]  ;;  %v4698_v35 = vld [vmem:[#allocation12 + $0x6e0] sm:$0xff] }
 0x3b7   : > { %4200 = vmatmul.f32.gmra.mxu1 %v4133_v29  ;;  %4004 = vmatmul.f32.gmra.mxu0 %v4131_v40  ;;  %v3894_v40 = vsel %vm3854_vm5, %v4128_v38, %v3893_v53  ;;  %v4697_v53 = vld [vmem:[#allocation12 + $0x6d8] sm:$0xff]  ;;  %v4404_v38 = vld [vmem:[#allocation3 + $0x68] sm:$0xfe] }
 0x3b8   : > { %v3631_v1 = vpop.f32.mrf.mxu0  ;;  %v3743_v22 = vadd.f32 %v3742_v23, %v3629_v49  ;;  %v3745_v28 = vpop.f32.mrf.mxu1  ;;  %4790 = vmatpush.msra.mxu3 %v4681_v19  ;;  %4836 = vmatpush.msra.mxu0 %v4698_v35  ;;  %v3896_v23 = vsel %vm3854_vm5, %v4130_v61, %v3895_v54  ;;  %v4139_v24 = vsel %vm3854_vm5, %v4134_v37, %v4138_v60  ;;  %v4696_v37 = vld [vmem:[#allocation12 + $0x6d0] sm:$0xff] }
 0x3b9   : > { %4247 = vmatmul.f32.gmra.mxu2 %v4135_v51  ;;  %v4403_v51 = vld [vmem:[#allocation3 + $0x60] sm:$0xfe] }
 0x3ba   : > { %4791 = vmatpush.msra.mxu3 %v4680_v20  ;;  %4837 = vmatpush.msra.mxu0 %v4697_v53  ;;  %v4481_v61 = vrot.slane %v4403_v51, 1  ;;  %v4678_v51 = vld [vmem:[#allocation12 + $0x640] sm:$0xff]  ;;  %v4695_v20 = vld [vmem:[#allocation12 + $0x6c8] sm:$0xff] }
 0x3bb   : > { %v3789_v59 = vpop.f32.mrf.mxu2 }
 0x3bc   : > { %v8938_v29 = vadd.f32 %v3789_v59, %v3743_v22  ;;  %v4483_v22 = vsel %vm4480_vm7, %v4481_v61, %v4482_v55  ;;  %4838 = vmatpush.msra.mxu0 %v4696_v37  ;;  %v4677_v61 = vld [vmem:[#allocation12 + $0x638] sm:$0xff]  ;;  %v4491_v37 = vrot.slane %v8828_v48, 1 }
 0x3bd   : > { %v3584_v8 = vpop.f32.mrf.mxu3 }
 0x3be   : > { %3960 = vmatmul.f32.gmra.mxu3 %v3894_v40  ;;  %v3632_v49 = vadd.f32 %v3631_v1, %v3584_v8  ;;  %v4485_v8 = vrot.slane %v8713_v62, 1  ;;  %v4679_v1 = vld [vmem:[#allocation12 + $0x648] sm:$0xff]  ;;  %4839 = vmatpush.msra.mxu0 %v4695_v20 }
 0x3bf   : > { %4203 = vmatmul.f32.gmra.mxu1 %v4137_v9  ;;  %4007 = vmatmul.f32.gmra.mxu0 %v3896_v23  ;;  %v4487_v23 = vrot.slane %v8768_v30, 1 }
 0x3c0   : > { %v3634_v46 = vpop.f32.mrf.mxu0  ;;  %v3746_v44 = vadd.f32 %v3745_v28, %v3632_v49  ;;  %v3748_v26 = vpop.f32.mrf.mxu1  ;;  %v4484_v28 = vrot.slane %v4404_v38, 1  ;;  %4792 = vmatpush.msra.mxu3 %v4679_v1  ;;  %v4694_v1 = vld [vmem:[#allocation12 + $0x6c0] sm:$0xff] }
 0x3c1   : > { %4250 = vmatmul.f32.gmra.mxu2 %v4139_v24  ;;  %v4489_v24 = vrot.slane %v8772_v63, 1  ;;  %4840 = vmatpush.msra.mxu0 %v4694_v1  ;;  %v4674_v1 = vld [vmem:[#allocation12 + $0x620] sm:$0xff] }
 0x3c2   : > { %v4486_v60 = vsel %vm4480_vm7, %v4484_v28, %v4485_v8  ;;  %4793 = vmatpush.msra.mxu3 %v4678_v51  ;;  %v4492_v28 = vsel %vm4480_vm7, %v4487_v23, %v4491_v37 }
 0x3c3   : > { %v3792_v7 = vpop.f32.mrf.mxu2 }
 0x3c4   : > { %v8946_v9 = vadd.f32 %v3792_v7, %v3746_v44  ;;  %4794 = vmatpush.msra.mxu3 %v4677_v61  ;;  %v4908_v61 = vld [vmem:[#allocation12 + $0x768] sm:$0xff] }
 0x3c5   : > { %v3587_v54 = vpop.f32.mrf.mxu3 }
 0x3c6   : > { %4315 = vmatmul.f32.vlgmr.msrb.gmra.mxu3 %v8702_v39  ;;  %v3635_v59 = vadd.f32 %v3634_v46, %v3587_v54  ;;  %v4488_v39 = vsel %vm4480_vm7, %v4482_v55, %v4487_v23  ;;  %v4676_v54 = vld [vmem:[#allocation12 + $0x630] sm:$0xff]  ;;  %v8969_v23 = vrot.slane %v8719_v13, 1 }
 0x3c7   : > { %4559 = vmatmul.f32.vlgmr.msrb.gmra.mxu1 %v4483_v22  ;;  %4362 = vmatmul.f32.vlgmr.msrb.gmra.mxu0 %v8704_v2  ;;  %v4493_v22 = vrot.slane %v8835_v6, 1 }
 0x3c8   : > { %v3637_v19 = vpop.f32.mrf.mxu0  ;;  %v3749_v35 = vadd.f32 %v3748_v26, %v3635_v59  ;;  %v3751_v40 = vpop.f32.mrf.mxu1  ;;  %v4490_v26 = vsel %vm4480_vm7, %v4485_v8, %v4489_v24  ;;  %v4693_v59 = vld [vmem:[#allocation12 + $0x6b8] sm:$0xff]  ;;  %4795 = vmatpush.msra.mxu3 %v4676_v54 }
 0x3c9   : > { %4606 = vmatmul.f32.vlgmr.msra.gmra.mxu2 %v4486_v60  ;;  %v4494_v60 = vsel %vm4480_vm7, %v4489_v24, %v4493_v22  ;;  %4841 = vmatpush.msra.mxu0 %v4693_v59 }
 0x3cb   : > { %v3795_v49 = vpop.f32.mrf.mxu2 }
 0x3cc   : > { %v8954_v44 = vadd.f32 %v3795_v49, %v3749_v35  ;;  %v4910_v35 = vld [vmem:[#allocation12 + $0x778] sm:$0xff]  ;;  %v4675_v49 = vld [vmem:[#allocation12 + $0x628] sm:$0xff] }
 0x3cd   : > { %v3590_v46 = vpop.f32.mrf.mxu3  ;;  %4993 = vmatpush.msra.mxu1 %v4910_v35  ;;  %4796 = vmatpush.msra.mxu3 %v4675_v49  ;;  %v4922_v35 = vld [vmem:[#allocation12 + $0x7d8] sm:$0xff]  ;;  %v6917_v49 = vld [vmem:[#allocation3 + $0x20] sm:$0xff] }
 0x3ce   : > { %4318 = vmatmul.f32.gmra.mxu3 %v8711_v45  ;;  %v3638_v2 = vadd.f32 %v3637_v19, %v3590_v46 }
 0x3cf   : > { %4562 = vmatmul.f32.gmra.mxu1 %v4488_v39  ;;  %4365 = vmatmul.f32.gmra.mxu0 %v8713_v62  ;;  %v4496_v39 = vsel %vm4480_vm7, %v4491_v37, %v8969_v23  ;;  %v4924_v37 = vld [vmem:[#allocation12 + $0x7e8] sm:$0xff] }
 0x3d0   : > { %v3752_v53 = vadd.f32 %v3751_v40, %v3638_v2  ;;  %v3640_v38 = vpop.f32.mrf.mxu0  ;;  %v3754_v7 = vpop.f32.mrf.mxu1  ;;  %v4926_v40 = vld [vmem:[#allocation12 + $0x7f8] sm:$0xff]  ;;  %4797 = vmatpush.msra.mxu3 %v4674_v1  ;;  %v4903_v1 = vld [vmem:[#allocation12 + $0x740] sm:$0xff] }
 0x3d1   : > { %4609 = vmatmul.f32.gmra.mxu2 %v4490_v26  ;;  %v4692_v26 = vld [vmem:[#allocation12 + $0x6b0] sm:$0xff] }
 0x3d2   : > { %5040 = vmatpush.msrb.mxu2 %v4926_v40  ;;  %4842 = vmatpush.msra.mxu0 %v4692_v26  ;;  %v4904_v26 = vld [vmem:[#allocation12 + $0x748] sm:$0xff] }
 0x3d3   : > { %v3798_v55 = vpop.f32.mrf.mxu2 }
 0x3d4   : > { %v8962_v45 = vadd.f32 %v3798_v55, %v3752_v53  ;;  %v4909_v53 = vld [vmem:[#allocation12 + $0x770] sm:$0xff] }
 0x3d5   : > { %v3593_v62 = vpop.f32.mrf.mxu3  ;;  %4994 = vmatpush.msra.mxu1 %v4909_v53 }
 0x3d6   : > { %4321 = vmatmul.f32.gmra.mxu3 %v8768_v30  ;;  %v3641_v8 = vadd.f32 %v3640_v38, %v3593_v62  ;;  %v4925_v38 = vld [vmem:[#allocation12 + $0x7f0] sm:$0xff]  ;;  %v4691_v62 = vld [vmem:[#allocation12 + $0x6a8] sm:$0xff] }
 0x3d7   : > { %4565 = vmatmul.f32.gmra.mxu1 %v4492_v28  ;;  %4368 = vmatmul.f32.gmra.mxu0 %v8772_v63  ;;  %v8972_v63 = vrot.slane %v8721_v11, 1  ;;  %v4907_v28 = vld [vmem:[#allocation12 + $0x760] sm:$0xff] }
 0x3d8   : > { %v3755_v19 = vadd.f32 %v3754_v7, %v3641_v8  ;;  %v3757_v51 = vpop.f32.mrf.mxu1  ;;  %v3643_v30 = vpop.f32.mrf.mxu0  ;;  %5041 = vmatpush.msrb.mxu2 %v4925_v38  ;;  %4995 = vmatpush.msra.mxu1 %v4908_v61  ;;  %v4923_v8 = vld [vmem:[#allocation12 + $0x7e0] sm:$0xff]  ;;  %v4920_v38 = vld [vmem:[#allocation12 + $0x7c8] sm:$0xff]  ;;  %v4503_v61 = vrot.slane %v8732_v34, 1 }
 0x3d9   : > { %4612 = vmatmul.f32.gmra.mxu2 %v4494_v60  ;;  %v4498_v7 = vsel %vm4480_vm7, %v4493_v22, %v8972_v63  ;;  %4843 = vmatpush.msra.mxu0 %v4691_v62  ;;  %v4501_v22 = vrot.slane %v8730_v41, 1  ;;  %v4921_v41 = vld [vmem:[#allocation12 + $0x7d0] sm:$0xff] }
 0x3da   : > { %5042 = vmatpush.msrb.mxu2 %v4924_v37  ;;  %4996 = vmatpush.msra.mxu1 %v4907_v28  ;;  %v4919_v37 = vld [vmem:[#allocation12 + $0x7c0] sm:$0xff] }
 0x3db   : > { %v3801_v20 = vpop.f32.mrf.mxu2 }
 0x3dc   : > { %v8974_v24 = vadd.f32 %v3801_v20, %v3755_v19  ;;  %5043 = vmatpush.msrb.mxu2 %v4923_v8  ;;  %v4673_v20 = vld [vmem:[#allocation12 + $0x618] sm:$0xff]  ;;  %v4505_v8 = vrot.slane %v8734_v58, 1 }
 0x3dd   : > { %v3596_v46 = vpop.f32.mrf.mxu3  ;;  %4798 = vmatpush.msra.mxu3 %v4673_v20 }
 0x3de   : > { %4324 = vmatmul.f32.gmra.mxu3 %v8828_v48  ;;  %v3644_v2 = vadd.f32 %v3643_v30, %v3596_v46  ;;  %v4499_v48 = vrot.slane %v8728_v12, 1  ;;  %v4905_v30 = vld [vmem:[#allocation12 + $0x750] sm:$0xff]  ;;  %v8993_v46 = vsel %vm4480_vm7, %v8972_v63, %v4501_v22  ;;  %5044 = vmatpush.msrb.mxu2 %v4922_v35  ;;  %v4918_v35 = vld [vmem:[#allocation12 + $0x7b8] sm:$0xff]  ;;  %v9005_v58 = vsel %vm4480_vm7, %v4501_v22, %v4505_v8  ;;  %v4899_v22 = vld [vmem:[#allocation12 + $0x720] sm:$0xff] }
 0x3df   : > { %4568 = vmatmul.f32.gmra.mxu1 %v4496_v39  ;;  %4371 = vmatmul.f32.gmra.mxu0 %v8835_v6  ;;  %v4906_v6 = vld [vmem:[#allocation12 + $0x758] sm:$0xff]  ;;  %v6918_v39 = vld [vmem:[#allocation3 + $0xc8] sm:$0xff] }
 0x3e0   : > { %v3758_v55 = vadd.f32 %v3757_v51, %v3644_v2  ;;  %v3760_v59 = vpop.f32.mrf.mxu1  ;;  %v3646_v19 = vpop.f32.mrf.mxu0  ;;  %v8988_v40 = vsel %vm4480_vm7, %v8969_v23, %v4499_v48  ;;  %4997 = vmatpush.msra.mxu1 %v4906_v6  ;;  %v4690_v2 = vld [vmem:[#allocation12 + $0x6a0] sm:$0xff]  ;;  %5045 = vmatpush.msrb.mxu2 %v4921_v41  ;;  %v9001_v34 = vsel %vm4480_vm7, %v4499_v48, %v4503_v61  ;;  %v4917_v41 = vld [vmem:[#allocation12 + $0x7b0] sm:$0xff]  ;;  %v4900_v48 = vld [vmem:[#allocation12 + $0x728] sm:$0xff] }
 0x3e1   : > { %4615 = vmatmul.f32.gmra.mxu2 %v4498_v7  ;;  %v4672_v7 = vld [vmem:[#allocation12 + $0x610] sm:$0xff]  ;;  %4844 = vmatpush.msra.mxu0 %v4690_v2  ;;  %v3623_v2 = vadd.f32 %v8901_v18, %v8915_v25 }
 0x3e2   : > { %4998 = vmatpush.msra.mxu1 %v4905_v30  ;;  %5046 = vmatpush.msrb.mxu2 %v4920_v38  ;;  %v4688_v30 = vld [vmem:[#allocation12 + $0x690] sm:$0xff] }
 0x3e3   : > { %v3804_v54 = vpop.f32.mrf.mxu2  ;;  %4799 = vmatpush.msra.mxu3 %v4672_v7  ;;  %v3737_v18 = vadd.f32 %v8908_v43, %v3623_v2  ;;  %v4913_v43 = vld [vmem:[#allocation12 + $0x790] sm:$0xff] }
 0x3e4   : > { %v8984_v60 = vadd.f32 %v3804_v54, %v3758_v55  ;;  %v4689_v55 = vld [vmem:[#allocation12 + $0x698] sm:$0xff]  ;;  %4999 = vmatpush.msra.mxu1 %v4904_v26  ;;  %5047 = vmatpush.msrb.mxu2 %v4919_v37 }
 0x3e5   : > { %v3599_v12 = vpop.f32.mrf.mxu3  ;;  %4845 = vmatpush.msra.mxu0 %v4689_v55  ;;  %v3784_v2 = vadd.f32 %v8924_v27, %v3737_v18  ;;  %v6923_v18 = vld [vmem:[#allocation3 + $0x78] sm:$0xff] }
 0x3e6   : > { %4327 = vmatmul.f32.gmra.mxu3 %v6917_v49  ;;  %v3647_v51 = vadd.f32 %v3646_v19, %v3599_v12  ;;  %5000 = vmatpush.msra.mxu1 %v4903_v1  ;;  %v6919_v19 = vld [vmem:[#allocation3 + $0xa0] sm:$0xff]  ;;  %v4901_v12 = vld [vmem:[#allocation12 + $0x730] sm:$0xff]  ;;  %v4509_v1 = vrot.slane %v8803_v14, 1 }
 0x3e7   : > { %4571 = vmatmul.f32.gmra.mxu1 %v8988_v40  ;;  %4374 = vmatmul.f32.gmra.mxu0 %v6918_v39  ;;  %v6920_v49 = vld [vmem:[#allocation3 + $0x40] sm:$0xff]  ;;  %v4507_v39 = vrot.slane %v8801_v15, 1 }
 0x3e8   : > { %v3761_v53 = vadd.f32 %v3760_v59, %v3647_v51  ;;  %v4902_v59 = vld [vmem:[#allocation12 + $0x738] sm:$0xff]  ;;  %v4671_v51 = vld [vmem:[#allocation12 + $0x608] sm:$0xff]  ;;  %5048 = vmatpush.msrb.mxu2 %v4918_v35  ;;  %4846 = vmatpush.msra.mxu0 %v4688_v30  ;;  %v4670_v35 = vld [vmem:[#allocation12 + $0x600] sm:$0xff]  ;;  %v4511_v30 = vrot.slane %v8854_v5, 1 }
 0x3e9   : > { %4618 = vmatmul.f32.gmra.mxu2 %v8993_v46  ;;  %5001 = vmatpush.msra.mxu1 %v4902_v59  ;;  %v9013_v15 = vsel %vm4480_vm7, %v4503_v61, %v4507_v39  ;;  %v4898_v59 = vld [vmem:[#allocation12 + $0x718] sm:$0xff]  ;;  %v9022_v61 = vsel %vm4480_vm7, %v4505_v8, %v4509_v1  ;;  %v3626_v8 = vadd.f32 %v8919_v33, %v8928_v56  ;;  %v9033_v33 = vld [vmem:[#allocation3 + $0xa8] sm:$0xff] }
 0x3ea   : > { %4800 = vmatpush.msra.mxu3 %v4671_v51  ;;  %5049 = vmatpush.msrb.mxu2 %v4917_v41  ;;  %v4896_v41 = vld [vmem:[#allocation12 + $0x708] sm:$0xff]  ;;  %v9031_v27 = vsel %vm4480_vm7, %v4507_v39, %v4511_v30 }
 0x3eb   : > { %v3807_v28 = vpop.f32.mrf.mxu2  ;;  %5002 = vmatpush.msra.mxu1 %v4901_v12  ;;  %v6922_v12 = vld [vmem:[#allocation3 + $0x88] sm:$0xff]  ;;  %v3740_v56 = vadd.f32 %v8921_v50, %v3626_v8  ;;  %v9045_v50 = vld [vmem:[#allocation3 + $0x50] sm:$0xff] }
 0x3ec   : > { %v3763_v62 = vpop.f32.mrf.mxu1  ;;  %v8998_v6 = vadd.f32 %v3807_v28, %v3761_v53  ;;  %v3649_v54 = vpop.f32.mrf.mxu0  ;;  %v4916_v53 = vld [vmem:[#allocation12 + $0x7a8] sm:$0xff]  ;;  %v4915_v28 = vld [vmem:[#allocation12 + $0x7a0] sm:$0xff]  ;;  %4801 = vmatpush.msra.mxu3 %v4670_v35 }
 0x3ed   : > { %5003 = vmatpush.msra.mxu1 %v4900_v48  ;;  %5050 = vmatpush.msrb.mxu2 %v4916_v53  ;;  %v4686_v48 = vld [vmem:[#allocation12 + $0x680] sm:$0xff]  ;;  %v4912_v53 = vld [vmem:[#allocation12 + $0x788] sm:$0xff] }
 0x3ee   : > { %4330 = vmatmul.f32.gmra.mxu3 %v6919_v19  ;;  %v4914_v19 = vld [vmem:[#allocation12 + $0x798] sm:$0xff]  ;;  %v4911_v35 = vld [vmem:[#allocation12 + $0x780] sm:$0xff] }
 0x3ef   : > { %4574 = vmatmul.f32.gmra.mxu1 %v9001_v34  ;;  %4377 = vmatmul.f32.gmra.mxu0 %v6920_v49  ;;  %v4687_v49 = vld [vmem:[#allocation12 + $0x688] sm:$0xff] }
 0x3f0   : > { %5004 = vmatpush.msra.mxu1 %v4899_v22  ;;  %5051 = vmatpush.msrb.mxu2 %v4915_v28 }
 0x3f1   : > { %4621 = vmatmul.f32.gmra.mxu2 %v9005_v58  ;;  %v3602_v20 = vpop.f32.mrf.mxu3  ;;  %4847 = vmatpush.msra.mxu0 %v4687_v49  ;;  %v5115_v49 = vld [vmem:[#allocation12 + $0x868] sm:$0xff] }
 0x3f2   : > { %v3650_v26 = vadd.f32 %v3649_v54, %v3602_v20  ;;  %v6921_v54 = vld [vmem:[#allocation3 + $0xb0] sm:$0xff]  ;;  %5005 = vmatpush.msra.mxu1 %v4898_v59  ;;  %5052 = vmatpush.msrb.mxu2 %v4914_v19  ;;  %v4895_v19 = vld [vmem:[#allocation12 + $0x700] sm:$0xff] }
 0x3f3   : > { %v3810_v38 = vpop.f32.mrf.mxu2  ;;  %v5117_v20 = vld [vmem:[#allocation12 + $0x878] sm:$0xff]  ;;  %4848 = vmatpush.msra.mxu0 %v4686_v48 }
 0x3f4   : > { %v4177_v7 = vpop.f32.mrf.mxu1  ;;  %v3764_v55 = vadd.f32 %v3763_v62, %v3650_v26  ;;  %v3981_v37 = vpop.f32.mrf.mxu0  ;;  %v4897_v62 = vld [vmem:[#allocation12 + $0x710] sm:$0xff]  ;;  %5053 = vmatpush.msrb.mxu2 %v4913_v43  ;;  %5201 = vmatpush.msrb.mxu3 %v5117_v20 }
 0x3f5   : > { %5006 = vmatpush.msra.mxu1 %v4897_v62  ;;  %v6924_v62 = vld [vmem:[#allocation3 + $0x80] sm:$0xff] }
 0x3f6   : > { %v9016_v25 = vadd.f32 %v3810_v38, %v3764_v55  ;;  %4333 = vmatmul.f32.gmra.mxu3 %v6921_v54  ;;  %v4513_v55 = vrot.slane %v8856_v16, 1  ;;  %5054 = vmatpush.msrb.mxu2 %v4912_v53 }
 0x3f7   : > { %4577 = vmatmul.f32.gmra.mxu1 %v9013_v15  ;;  %4380 = vmatmul.f32.gmra.mxu0 %v6922_v12  ;;  %v5133_v12 = vld [vmem:[#allocation12 + $0x8f8] sm:$0xff] }
 0x3f8   : > { %5007 = vmatpush.msra.mxu1 %v4896_v41  ;;  %v9042_v39 = vsel %vm4480_vm7, %v4509_v1, %v4513_v55  ;;  %5055 = vmatpush.msrb.mxu2 %v4911_v35  ;;  %v3787_v41 = vadd.f32 %v8932_v32, %v3740_v56  ;;  %v9052_v1 = vrot.slane %v9045_v50, 1  ;;  %v4423_v32 = vld [vmem:[#allocation3 + $0x30] sm:$0x1]  ;;  %v5131_v56 = vld [vmem:[#allocation12 + $0x8e8] sm:$0xff] }
 0x3f9   : > { %4624 = vmatmul.f32.gmra.mxu2 %v9022_v61  ;;  %v3934_v51 = vpop.f32.mrf.mxu3  ;;  %5248 = vmatpush.msrb.mxu0 %v5133_v12  ;;  %v4519_v35 = vrot.slane %v4423_v32, 1  ;;  %v5129_v32 = vld [vmem:[#allocation12 + $0x8d8] sm:$0xff] }
 0x3fa   : > { %v3982_v26 = vadd.f32 %v3981_v37, %v3934_v51  ;;  %5008 = vmatpush.msra.mxu1 %v4895_v19  ;;  %v9048_v51 = vrot.slane %v9033_v33, 1  ;;  %v6926_v19 = vld [vmem:[#allocation3 + $0x10] sm:$0xff] }
 0x3fb   : > { %v4224_v22 = vpop.f32.mrf.mxu2 }
 0x3fc   : > { %v4180_v38 = vpop.f32.mrf.mxu1  ;;  %v4011_v28 = vadd.f32 %v3982_v26, %v3784_v2  ;;  %v4225_v59 = vadd.f32 %v4224_v22, %v4177_v7  ;;  %v3984_v54 = vpop.f32.mrf.mxu0  ;;  %v5116_v7 = vld [vmem:[#allocation12 + $0x870] sm:$0xff]  ;;  %v9056_v53 = vsel %vm4480_vm7, %v4511_v30, %v9048_v51  ;;  %v4424_v30 = vld [vmem:[#allocation3 + $0x48] sm:$0x1] }
 0x3fd   : > { %5202 = vmatpush.msrb.mxu3 %v5116_v7 }
 0x3fe   : > { %v9036_v37 = vadd.f32 %v4225_v59, %v4011_v28  ;;  %4336 = vmatmul.f32.gmra.mxu3 %v6923_v18  ;;  %v6925_v28 = vld [vmem:[#allocation3 + $0xc0] sm:$0xff]  ;;  %v5132_v59 = vld [vmem:[#allocation12 + $0x8f0] sm:$0xff] }
 0x3ff   : > { %4580 = vmatmul.f32.gmra.mxu1 %v9031_v27  ;;  %4383 = vmatmul.f32.gmra.mxu0 %v6924_v62  ;;  %v4521_v62 = vrot.slane %v4424_v30, 1  ;;  %v4648_v30 = vld [vmem:[#allocation3 + $0x38] sm:$0xfe] }
 0x400   : > { %5203 = vmatpush.msrb.mxu3 %v5115_v49  ;;  %5249 = vmatpush.msrb.mxu0 %v5132_v59  ;;  %v4727_v36 = vrot.slane %v4648_v30, 1 }
 0x401   : > { %4627 = vmatmul.f32.gmra.mxu2 %v9042_v39  ;;  %v3937_v43 = vpop.f32.mrf.mxu3 }
 0x402   : > { %v3985_v48 = vadd.f32 %v3984_v54, %v3937_v43  ;;  %v5114_v54 = vld [vmem:[#allocation12 + $0x860] sm:$0xff]  ;;  %5250 = vmatpush.msrb.mxu0 %v5131_v56 }
 0x403   : > { %v4227_v14 = vpop.f32.mrf.mxu2  ;;  %5204 = vmatpush.msrb.mxu3 %v5114_v54  ;;  %v6927_v54 = vld [vmem:[#allocation3 + $0xd8] sm:$0xff] }
 0x404   : > { %v4012_v20 = vadd.f32 %v3985_v48, %v3787_v41  ;;  %v4228_v2 = vadd.f32 %v4227_v14, %v4180_v38  ;;  %v3987_v8 = vpop.f32.mrf.mxu0  ;;  %v4183_v26 = vpop.f32.mrf.mxu1  ;;  %v9063_v38 = vsel %vm4480_vm7, %v4513_v55, %v9052_v1  ;;  %v4520_v55 = vsel %vm4480_vm7, %v9048_v51, %v4519_v35  ;;  %v5113_v14 = vld [vmem:[#allocation12 + $0x858] sm:$0xff] }
 0x405   : > { %5205 = vmatpush.msrb.mxu3 %v5113_v14  ;;  %v4932_v56 = vrot.slane %v6927_v54, 2  ;;  %v6928_v35 = vld [vmem:[#allocation3 + $0x70] sm:$0xff] }
 0x406   : > { %v9058_v22 = vadd.f32 %v4228_v2, %v4012_v20  ;;  %4339 = vmatmul.f32.gmra.mxu3 %v6925_v28  ;;  %v5130_v20 = vld [vmem:[#allocation12 + $0x8e0] sm:$0xff]  ;;  %v4647_v28 = vld [vmem:[#allocation3 + $0x8] sm:$0xfe] }
 0x407   : > { %4583 = vmatmul.f32.gmra.mxu1 %v9056_v53  ;;  %4386 = vmatmul.f32.gmra.mxu0 %v6926_v19  ;;  %v4725_v19 = vrot.slane %v6927_v54, 1 }
 0x408   : > { %5251 = vmatpush.msrb.mxu0 %v5130_v20 }
 0x409   : > { %4630 = vmatmul.f32.gmra.mxu2 %v9063_v38  ;;  %v3940_v18 = vpop.f32.mrf.mxu3 }
 0x40a   : > { %v3988_v7 = vadd.f32 %v3987_v8, %v3940_v18  ;;  %v4522_v8 = vsel %vm4480_vm7, %v9052_v1, %v4521_v62  ;;  %5252 = vmatpush.msrb.mxu0 %v5129_v32  ;;  %v4724_v62 = vrot.slane %v4647_v28, 1  ;;  %v5111_v32 = vld [vmem:[#allocation12 + $0x848] sm:$0xff]  ;;  %v5128_v28 = vld [vmem:[#allocation12 + $0x8d0] sm:$0xff] }
 0x40b   : > { %v4230_v12 = vpop.f32.mrf.mxu2 }
 0x40c   : > { %v4013_v49 = vadd.f32 %v3988_v7, %v8938_v29  ;;  %v4231_v43 = vadd.f32 %v4230_v12, %v4183_v26  ;;  %v3990_v41 = vpop.f32.mrf.mxu0  ;;  %v4186_v2 = vpop.f32.mrf.mxu1  ;;  %v4890_v29 = vld [vmem:[#allocation3 + $0x8] sm:$0xfc]  ;;  %v4728_v7 = vrot.slane %v6928_v35, 1  ;;  %v4891_v12 = vld [vmem:[#allocation3 + $0x38] sm:$0xfc]  ;;  %v4726_v31 = vsel %vm4480_vm7, %v4724_v62, %v4725_v19  ;;  %5253 = vmatpush.msrb.mxu0 %v5128_v28 }
 0x40d   : > { %v5112_v26 = vld [vmem:[#allocation12 + $0x850] sm:$0xff]  ;;  %v4934_v54 = vrot.slane %v4891_v12, 2  ;;  %v6930_v12 = vld [vmem:[#allocation3 + $0x98] sm:$0xff] }
 0x40e   : > { %v9069_v48 = vadd.f32 %v4231_v43, %v4013_v49  ;;  %4342 = vmatmul.f32.gmra.mxu3 %v9033_v33  ;;  %v4931_v43 = vrot.slane %v4890_v29, 2  ;;  %v4939_v62 = vrot.slane %v6930_v12, 2 }
 0x40f   : > { %4586 = vmatmul.f32.gmra.mxu1 %v4520_v55  ;;  %4389 = vmatmul.f32.gmra.mxu0 %v9045_v50  ;;  %v4935_v55 = vrot.slane %v6928_v35, 2 }
 0x410   : > { %5206 = vmatpush.msrb.mxu3 %v5112_v26  ;;  %v4933_v4 = vsel %vm3090_vm4, %v4931_v43, %v4932_v56 }
 0x411   : > { %4633 = vmatmul.f32.gmra.mxu2 %v4522_v8  ;;  %v3943_v59 = vpop.f32.mrf.mxu3  ;;  %v4936_v29 = vsel %vm3090_vm4, %v4934_v54, %v4935_v55  ;;  %v4940_v28 = vsel %vm3090_vm4, %v4935_v55, %v4939_v62  ;;  %v9748_v55 = vrot.slane %v8719_v13, 2  ;;  %v5107_v13 = vld [vmem:[#allocation12 + $0x828] sm:$0xff] }
 0x412   : > { %v3991_v18 = vadd.f32 %v3990_v41, %v3943_v59  ;;  %v4729_v41 = vsel %vm4480_vm7, %v4727_v36, %v4728_v7  ;;  %5207 = vmatpush.msrb.mxu3 %v5111_v32  ;;  %v6929_v59 = vld [vmem:[#allocation3 + $0x58] sm:$0xff] }
 0x413   : > { %v4233_v49 = vpop.f32.mrf.mxu2  ;;  %v4730_v30 = vrot.slane %v6929_v59, 1  ;;  %v5110_v32 = vld [vmem:[#allocation12 + $0x840] sm:$0xff] }
 0x414   : > { %v4014_v14 = vadd.f32 %v3991_v18, %v8946_v9  ;;  %v4234_v20 = vadd.f32 %v4233_v49, %v4186_v2  ;;  %v3993_v8 = vpop.f32.mrf.mxu0  ;;  %v4189_v9 = vpop.f32.mrf.mxu1  ;;  %v4937_v18 = vrot.slane %v6929_v59, 2  ;;  %v4732_v49 = vrot.slane %v6930_v12, 1  ;;  %5208 = vmatpush.msrb.mxu3 %v5110_v32 }
 0x415   : > { %v4735_v12 = vsel %vm4480_vm7, %v4730_v30, %v8969_v23 }
 0x416   : > { %v9078_v26 = vadd.f32 %v4234_v20, %v4014_v14  ;;  %4802 = vmatmul.f32.vlgmr.msra.gmra.mxu3 %v4726_v31  ;;  %v4731_v14 = vsel %vm4480_vm7, %v4725_v19, %v4730_v30  ;;  %v4938_v20 = vsel %vm3090_vm4, %v4932_v56, %v4937_v18 }
 0x417   : > { %5009 = vmatmul.f32.vlgmr.msra.gmra.mxu1 %v4933_v4  ;;  %4849 = vmatmul.f32.vlgmr.msra.gmra.mxu0 %v4729_v41  ;;  %v4733_v41 = vsel %vm4480_vm7, %v4728_v7, %v4732_v49 }
 0x419   : > { %5056 = vmatmul.f32.vlgmr.msrb.gmra.mxu2 %v4936_v29  ;;  %v3946_v2 = vpop.f32.mrf.mxu3  ;;  %v5126_v29 = vld [vmem:[#allocation12 + $0x8c0] sm:$0xff] }
 0x41a   : > { %v3994_v35 = vadd.f32 %v3993_v8, %v3946_v2  ;;  %v5127_v8 = vld [vmem:[#allocation12 + $0x8c8] sm:$0xff] }
 0x41b   : > { %v4236_v31 = vpop.f32.mrf.mxu2  ;;  %5254 = vmatpush.msrb.mxu0 %v5127_v8 }
 0x41c   : > { %v4015_v4 = vadd.f32 %v3994_v35, %v8954_v44  ;;  %v4237_v36 = vadd.f32 %v4236_v31, %v4189_v9  ;;  %v3996_v43 = vpop.f32.mrf.mxu0  ;;  %v5109_v44 = vld [vmem:[#allocation12 + $0x838] sm:$0xff]  ;;  %v4192_v56 = vpop.f32.mrf.mxu1  ;;  %v4942_v31 = vsel %vm3090_vm4, %v4937_v18, %v9748_v55 }
 0x41d   : > { %5209 = vmatpush.msrb.mxu3 %v5109_v44  ;;  %5255 = vmatpush.msrb.mxu0 %v5126_v29 }
 0x41e   : > { %v9085_v54 = vadd.f32 %v4237_v36, %v4015_v4  ;;  %4805 = vmatmul.f32.gmra.mxu3 %v4731_v14  ;;  %v4737_v36 = vsel %vm4480_vm7, %v4732_v49, %v8972_v63  ;;  %v5125_v14 = vld [vmem:[#allocation12 + $0x8b8] sm:$0xff]  ;;  %v5124_v63 = vld [vmem:[#allocation12 + $0x8b0] sm:$0xff]  ;;  %v5106_v49 = vld [vmem:[#allocation12 + $0x820] sm:$0xff] }
 0x41f   : > { %5012 = vmatmul.f32.gmra.mxu1 %v4938_v20  ;;  %4852 = vmatmul.f32.gmra.mxu0 %v4733_v41 }
 0x420   : > { %5256 = vmatpush.msrb.mxu0 %v5125_v14 }
 0x421   : > { %5059 = vmatmul.f32.gmra.mxu2 %v4940_v28  ;;  %v3949_v9 = vpop.f32.mrf.mxu3 }
 0x422   : > { %v3997_v19 = vadd.f32 %v3996_v43, %v3949_v9  ;;  %v5108_v43 = vld [vmem:[#allocation12 + $0x830] sm:$0xff]  ;;  %5257 = vmatpush.msrb.mxu0 %v5124_v63  ;;  %v4893_v63 = vld [vmem:[#allocation3 + $0x28] sm:$0x3] }
 0x423   : > { %5210 = vmatpush.msrb.mxu3 %v5108_v43 }
 0x424   : > { %v4239_v2 = vpop.f32.mrf.mxu2  ;;  %v4016_v59 = vadd.f32 %v3997_v19, %v8962_v45  ;;  %v3999_v35 = vpop.f32.mrf.mxu0  ;;  %v9749_v45 = vrot.slane %v8721_v11, 2  ;;  %v5123_v11 = vld [vmem:[#allocation12 + $0x8a8] sm:$0xff] }
 0x425   : > { %v4240_v7 = vadd.f32 %v4239_v2, %v4192_v56  ;;  %5211 = vmatpush.msrb.mxu3 %v5107_v13  ;;  %5258 = vmatpush.msrb.mxu0 %v5123_v11  ;;  %v9128_v19 = vpop.f32.mrf.mxu1  ;;  %v4961_v56 = vrot.slane %v9033_v33, 2 }
 0x426   : > { %4808 = vmatmul.f32.gmra.mxu3 %v4735_v12  ;;  %v4944_v20 = vsel %vm3090_vm4, %v4939_v62, %v9749_v45  ;;  %v4667_v45 = vld [vmem:[#allocation3 + $0xd0] sm:$0x1] }
 0x427   : > { %v9095_v4 = vadd.f32 %v4240_v7, %v4016_v59  ;;  %5015 = vmatmul.f32.gmra.mxu1 %v4942_v31  ;;  %4855 = vmatmul.f32.gmra.mxu0 %v4737_v36 }
 0x428   : > { %5212 = vmatpush.msrb.mxu3 %v5106_v49 }
 0x429   : > { %5062 = vmatmul.f32.gmra.mxu2 %v4944_v20  ;;  %v3952_v23 = vpop.f32.mrf.mxu3  ;;  %v4892_v20 = vld [vmem:[#allocation3 + $0xd0] sm:$0x3] }
 0x42a   : > { %v4000_v30 = vadd.f32 %v3999_v35, %v3952_v23  ;;  %v4969_v11 = vrot.slane %v4892_v20, 2 }
 0x42c   : > { %v9103_v18 = vadd.f32 %v4000_v30, %v8974_v24  ;;  %v4002_v41 = vpop.f32.mrf.mxu0  ;;  %v4668_v30 = vld [vmem:[#allocation3 + $0x28] sm:$0x1] }
 0x42d   : > { %v9147_v12 = vpop.f32.mrf.mxu1 }
 0x42e   : > { %4811 = vmatmul.f32.gmra.mxu3 %v8988_v40  ;;  %v5122_v40 = vld [vmem:[#allocation12 + $0x8a0] sm:$0xff] }
 0x42f   : > { %5018 = vmatmul.f32.gmra.mxu1 %v8759_v42  ;;  %4858 = vmatmul.f32.gmra.mxu0 %v8993_v46  ;;  %v5105_v42 = vld [vmem:[#allocation12 + $0x818] sm:$0xff] }
 0x430   : > { %5213 = vmatpush.msrb.mxu3 %v5105_v42  ;;  %5259 = vmatpush.msrb.mxu0 %v5122_v40  ;;  %v5121_v46 = vld [vmem:[#allocation12 + $0x898] sm:$0xff] }
 0x431   : > { %5065 = vmatmul.f32.gmra.mxu2 %v8764_v52  ;;  %v3955_v62 = vpop.f32.mrf.mxu3  ;;  %v5104_v52 = vld [vmem:[#allocation12 + $0x810] sm:$0xff] }
 0x432   : > { %v4003_v32 = vadd.f32 %v4002_v41, %v3955_v62  ;;  %5214 = vmatpush.msrb.mxu3 %v5104_v52  ;;  %5260 = vmatpush.msrb.mxu0 %v5121_v46  ;;  %v4764_v62 = vrot.slane %v4668_v30, 1 }
 0x434   : > { %v9110_v24 = vadd.f32 %v4003_v32, %v8984_v60  ;;  %v4005_v8 = vpop.f32.mrf.mxu0 }
 0x436   : > { %4814 = vmatmul.f32.gmra.mxu3 %v9001_v34 }
 0x437   : > { %5021 = vmatmul.f32.gmra.mxu1 %v8775_v17  ;;  %4861 = vmatmul.f32.gmra.mxu0 %v9005_v58  ;;  %v5103_v17 = vld [vmem:[#allocation12 + $0x808] sm:$0xff]  ;;  %v5120_v58 = vld [vmem:[#allocation12 + $0x890] sm:$0xff] }
 0x438   : > { %5215 = vmatpush.msrb.mxu3 %v5103_v17  ;;  %5261 = vmatpush.msrb.mxu0 %v5120_v58  ;;  %v5097_v17 = vld [vmem:[#allocation3 + $0x8] sm:$0xf8] }
 0x439   : > { %5068 = vmatmul.f32.gmra.mxu2 %v8778_v0  ;;  %v3958_v28 = vpop.f32.mrf.mxu3 }
 0x43a   : > { %v4006_v44 = vadd.f32 %v4005_v8, %v3958_v28  ;;  %v4971_v8 = vrot.slane %v4893_v63, 2 }
 0x43c   : > { %v9117_v60 = vadd.f32 %v4006_v44, %v8998_v6  ;;  %v4008_v34 = vpop.f32.mrf.mxu0 }
 0x43e   : > { %9750 = vst [vmem:[#allocation46_spill] sm:$0xff] %v9117_v60  ;;  %4817 = vmatmul.f32.gmra.mxu3 %v9013_v15  ;;  %v5102_v15 = vld [vmem:[#allocation12 + $0x800] sm:$0xff] }
 0x43f   : > { %5024 = vmatmul.f32.gmra.mxu1 %v8838_v10  ;;  %4864 = vmatmul.f32.gmra.mxu0 %v9022_v61  ;;  %v5119_v10 = vld [vmem:[#allocation12 + $0x888] sm:$0xff]  ;;  %v5118_v61 = vld [vmem:[#allocation12 + $0x880] sm:$0xff] }
 0x440   : > { %5216 = vmatpush.msrb.mxu3 %v5102_v15  ;;  %5262 = vmatpush.msrb.mxu0 %v5119_v10 }
 0x441   : > { %5071 = vmatmul.f32.gmra.mxu2 %v8841_v3  ;;  %v3961_v0 = vpop.f32.mrf.mxu3  ;;  %v9131_v3 = vpop.f32.mrf.mxu2 }
 0x442   : > { %v4009_v29 = vadd.f32 %v4008_v34, %v3961_v0  ;;  %5263 = vmatpush.msrb.mxu0 %v5118_v61  ;;  %v5098_v0 = vld [vmem:[#allocation3 + $0x38] sm:$0xf8] }
 0x444   : > { %v9124_v9 = vadd.f32 %v4009_v29, %v9016_v25  ;;  %v4363_v6 = vpop.f32.mrf.mxu0 }
 0x446   : > { %9751 = vst [vmem:[#allocation48_spill] sm:$0xff] %v9124_v9  ;;  %4820 = vmatmul.f32.gmra.mxu3 %v9031_v27  ;;  %v5577_v9 = vld [vmem:[#allocation15 + $0x58] sm:$0xff] }
 0x447   : > { %5027 = vmatmul.f32.gmra.mxu1 %v8871_v21  ;;  %4867 = vmatmul.f32.gmra.mxu0 %v9042_v39  ;;  %v4963_v21 = vrot.slane %v9045_v50, 2  ;;  %v9752_v39 = vrot.slane %v8854_v5, 2 }
 0x449   : > { %5074 = vmatmul.f32.gmra.mxu2 %v8876_v47  ;;  %v4316_v25 = vpop.f32.mrf.mxu3  ;;  %v4962_v7 = vsel %vm3090_vm4, %v9752_v39, %v4961_v56  ;;  %v9753_v47 = vrot.slane %v8856_v16, 2  ;;  %v9153_v43 = vpop.f32.mrf.mxu2 }
 0x44a   : > { %v4364_v2 = vadd.f32 %v4363_v6, %v4316_v25  ;;  %v5139_v6 = vrot.slane %v5097_v17, 3  ;;  %v9757_v25 = vrot.slane %v8736_v57, 3  ;;  %v9762_v57 = vld [vmem:[#allocation28_spill] sm:$0xff]  ;;  %v5608_v17 = vld [vmem:[#allocation15 + $0xf8] sm:$0xff] }
 0x44b   : > { %v4964_v35 = vsel %vm3090_vm4, %v9753_v47, %v4963_v21  ;;  %5609 = vmatpush.msrb.mxu1 %v5608_v17 }
 0x44c   : > { %v9137_v27 = vadd.f32 %v4364_v2, %v9036_v37  ;;  %v4366_v59 = vpop.f32.mrf.mxu0  ;;  %v9149_v37 = vld [vmem:[#allocation2] sm:$0xff] }
 0x44d   : > { %v4758_v31 = vrot.slane %v9149_v37, 1  ;;  %v4965_v36 = vrot.slane %v9149_v37, 2 }
 0x44e   : > { %4823 = vmatmul.f32.gmra.mxu3 %v9056_v53 }
 0x44f   : > { %5030 = vmatmul.f32.gmra.mxu1 %v4962_v7  ;;  %4870 = vmatmul.f32.gmra.mxu0 %v9063_v38  ;;  %v4759_v13 = vsel %vm4480_vm7, %v9048_v51, %v4758_v31  ;;  %v4966_v23 = vsel %vm3090_vm4, %v4961_v56, %v4965_v36  ;;  %v4761_v41 = vsel %vm4480_vm7, %v9052_v1, %v4758_v31  ;;  %v9164_v51 = vpop.f32.mrf.mxu1 }
 0x450   : > { %v4968_v49 = vsel %vm3090_vm4, %v4963_v21, %v4965_v36  ;;  %9754 = vst [vmem:[#allocation37_spill] sm:$0xff] %v9164_v51  ;;  %v4970_v52 = vsel %vm3090_vm4, %v4965_v36, %v4969_v11  ;;  %v4765_v44 = vsel %vm4480_vm7, %v4758_v31, %v4764_v62  ;;  %v4972_v34 = vsel %vm3090_vm4, %v4965_v36, %v4971_v8  ;;  %v9759_v21 = vld [vmem:[#allocation49_spill] sm:$0xff]  ;;  %v9768_v8 = vld [vmem:[#allocation35_spill] sm:$0xff] }
 0x451   : > { %5077 = vmatmul.f32.gmra.mxu2 %v4964_v35  ;;  %v4319_v55 = vpop.f32.mrf.mxu3  ;;  %v9168_v46 = vpop.f32.mrf.mxu2  ;;  %v5141_v56 = vsel %vm5138_vm6, %v5139_v6, %v9757_v25  ;;  %v9775_v6 = vld [vmem:[#allocation32_spill] sm:$0xff] }
 0x452   : > { %v4367_v53 = vadd.f32 %v4366_v59, %v4319_v55  ;;  %9755 = vst [vmem:[#allocation34_spill] sm:$0xff] %v9168_v46  ;;  %v9760_v59 = vrot.slane %v9759_v21, 3  ;;  %v9761_v55 = vld [vmem:[#allocation71_spill] sm:$0xff] }
 0x453   : > { %v5570_v46 = vld [vmem:[#allocation15 + $0x20] sm:$0xff] }
 0x454   : > { %v9156_v14 = vadd.f32 %v4367_v53, %v9058_v22  ;;  %v4369_v38 = vpop.f32.mrf.mxu0  ;;  %v4762_v22 = vrot.slane %v4667_v45, 1 }
 0x456   : > { %4826 = vmatmul.f32.gmra.mxu3 %v4759_v13  ;;  %v4763_v40 = vsel %vm4480_vm7, %v4758_v31, %v4762_v22  ;;  %v9763_v13 = vld [vmem:[#allocation31_spill] sm:$0xff]  ;;  %v9766_v22 = vld [vmem:[#allocation33_spill] sm:$0xff] }
 0x457   : > { %5033 = vmatmul.f32.gmra.mxu1 %v4966_v23  ;;  %4873 = vmatmul.f32.gmra.mxu0 %v4761_v41  ;;  %v9178_v61 = vpop.f32.mrf.mxu1 }
 0x458   : > { %9756 = vst [vmem:[#allocation47_spill] sm:$0xff] %v9178_v61  ;;  %v5724_v61 = vld [vmem:[#allocation15 + $0x150] sm:$0xff] }
 0x459   : > { %5080 = vmatmul.f32.gmra.mxu2 %v4968_v49  ;;  %v4322_v32 = vpop.f32.mrf.mxu3  ;;  %v9183_v2 = vpop.f32.mrf.mxu2  ;;  %v9765_v49 = vld [vmem:[#allocation29_spill] sm:$0xff] }
 0x45a   : > { %v4370_v42 = vadd.f32 %v4369_v38, %v4322_v32  ;;  %9758 = vst [vmem:[#allocation51_spill] sm:$0xff] %v9183_v2  ;;  %v5597_v2 = vld [vmem:[#allocation15 + $0xa0] sm:$0xff] }
 0x45c   : > { %v9171_v1 = vadd.f32 %v4370_v42, %v9069_v48  ;;  %v4372_v28 = vpop.f32.mrf.mxu0  ;;  %v5142_v48 = vrot.slane %v5098_v0, 3  ;;  %v9769_v42 = vld [vmem:[#allocation30_spill] sm:$0xff] }
 0x45e   : > { %4829 = vmatmul.f32.gmra.mxu3 %v4763_v40  ;;  %v5144_v39 = vsel %vm5138_vm6, %v5142_v48, %v9760_v59  ;;  %v5606_v48 = vld [vmem:[#allocation15 + $0xe8] sm:$0xff] }
 0x45f   : > { %5036 = vmatmul.f32.gmra.mxu1 %v4970_v52  ;;  %4876 = vmatmul.f32.gmra.mxu0 %v4765_v44  ;;  %v9192_v31 = vpop.f32.mrf.mxu1 }
 0x461   : > { %5083 = vmatmul.f32.gmra.mxu2 %v4972_v34  ;;  %v4325_v58 = vpop.f32.mrf.mxu3  ;;  %v9195_v36 = vpop.f32.mrf.mxu2  ;;  %v9772_v34 = vld [vmem:[#allocation42_spill] sm:$0xff] }
 0x462   : > { %v4373_v29 = vadd.f32 %v4372_v28, %v4325_v58  ;;  %v9773_v58 = vld [vmem:[#allocation44_spill] sm:$0xff] }
 0x464   : > { %v9176_v15 = vadd.f32 %v4373_v29, %v9078_v26  ;;  %v4375_v10 = vpop.f32.mrf.mxu0 }
 0x466   : > { %5217 = vmatmul.f32.vlgmr.msrb.gmra.mxu3 %v5141_v56  ;;  %v9776_v56 = vld [vmem:[#allocation45_spill] sm:$0xff] }
 0x467   : > { %5264 = vmatmul.f32.vlgmr.msrb.gmra.mxu0 %v5144_v39  ;;  %v9204_v23 = vpop.f32.mrf.mxu1  ;;  %v5169_v39 = vrot.slane %v9033_v33, 3 }
 0x469   : > { %v4328_v7 = vpop.f32.mrf.mxu3  ;;  %v9208_v41 = vpop.f32.mrf.mxu2 }
 0x46a   : > { %v4376_v47 = vadd.f32 %v4375_v10, %v4328_v7  ;;  %v5607_v10 = vld [vmem:[#allocation15 + $0xf0] sm:$0xff]  ;;  %v5171_v7 = vrot.slane %v9045_v50, 3  ;;  %v5173_v50 = vrot.slane %v9149_v37, 3 }
 0x46b   : > { %5610 = vmatpush.msrb.mxu1 %v5607_v10 }
 0x46c   : > { %v9189_v26 = vadd.f32 %v4376_v47, %v9085_v54  ;;  %v4378_v35 = vpop.f32.mrf.mxu0  ;;  %v9764_v54 = vld [vmem:[#allocation36_spill] sm:$0xff] }
 0x46d   : > { %5611 = vmatpush.msrb.mxu1 %v5606_v48 }
 0x46e   : > { %5220 = vmatmul.f32.gmra.mxu3 %v9761_v55 }
 0x46f   : > { %5267 = vmatmul.f32.gmra.mxu0 %v9762_v57  ;;  %v9216_v11 = vpop.f32.mrf.mxu1  ;;  %v9778_v57 = vrot.slane %v8856_v16, 3  ;;  %v5176_v16 = vsel %vm5138_vm6, %v5171_v7, %v5173_v50 }
 0x471   : > { %v4331_v53 = vpop.f32.mrf.mxu3  ;;  %v9218_v62 = vpop.f32.mrf.mxu2 }
 0x472   : > { %v4379_v38 = vadd.f32 %v4378_v35, %v4331_v53  ;;  %v9777_v35 = vrot.slane %v8854_v5, 3  ;;  %v5172_v53 = vsel %vm5138_vm6, %v9778_v57, %v5171_v7  ;;  %v5099_v5 = vld [vmem:[#allocation3 + $0xd0] sm:$0x7]  ;;  %v5602_v7 = vld [vmem:[#allocation15 + $0xc8] sm:$0xff] }
 0x473   : > { %v5177_v17 = vrot.slane %v5099_v5, 3  ;;  %v5600_v5 = vld [vmem:[#allocation15 + $0xb8] sm:$0xff] }
 0x474   : > { %v9198_v45 = vadd.f32 %v4379_v38, %v9095_v4  ;;  %v9200_v20 = vpop.f32.mrf.mxu0  ;;  %v5170_v55 = vsel %vm5138_vm6, %v9777_v35, %v5169_v39  ;;  %v5605_v38 = vld [vmem:[#allocation15 + $0xe0] sm:$0xff] }
 0x475   : > { %5612 = vmatpush.msrb.mxu1 %v5605_v38  ;;  %v5178_v10 = vsel %vm5138_vm6, %v5173_v50, %v5177_v17  ;;  %v5601_v35 = vld [vmem:[#allocation15 + $0xc0] sm:$0xff] }
 0x476   : > { %5223 = vmatmul.f32.gmra.mxu3 %v9763_v13 }
 0x477   : > { %5270 = vmatmul.f32.gmra.mxu0 %v9764_v54  ;;  %v9228_v28 = vpop.f32.mrf.mxu1 }
 0x479   : > { %v9206_v30 = vpop.f32.mrf.mxu3  ;;  %v9230_v44 = vpop.f32.mrf.mxu2 }
 0x47c   : > { %v9210_v63 = vpop.f32.mrf.mxu0 }
 0x47e   : > { %5226 = vmatmul.f32.gmra.mxu3 %v9765_v49 }
 0x47f   : > { %5273 = vmatmul.f32.gmra.mxu0 %v9766_v22  ;;  %v9239_v25 = vpop.f32.mrf.mxu1  ;;  %v5174_v22 = vsel %vm5138_vm6, %v5169_v39, %v5173_v50 }
 0x481   : > { %v9214_v4 = vpop.f32.mrf.mxu3  ;;  %v9242_v21 = vpop.f32.mrf.mxu2 }
 0x484   : > { %v9220_v32 = vpop.f32.mrf.mxu0 }
 0x485   : > { %9767 = vst [vmem:[#allocation50_spill] sm:$0xff] %v9220_v32  ;;  %v5721_v32 = vld [vmem:[#allocation15 + $0x138] sm:$0xff] }
 0x486   : > { %5229 = vmatmul.f32.gmra.mxu3 %v9768_v8  ;;  %v5100_v8 = vld [vmem:[#allocation3 + $0x28] sm:$0x7] }
 0x487   : > { %5276 = vmatmul.f32.gmra.mxu0 %v9769_v42  ;;  %v9256_v13 = vpop.f32.mrf.mxu1  ;;  %v5604_v42 = vld [vmem:[#allocation15 + $0xd8] sm:$0xff] }
 0x488   : > { %5613 = vmatpush.msrb.mxu1 %v5604_v42  ;;  %v5580_v42 = vld [vmem:[#allocation15 + $0x70] sm:$0xff] }
 0x489   : > { %v9224_v40 = vpop.f32.mrf.mxu3  ;;  %v9261_v54 = vpop.f32.mrf.mxu2 }
 0x48a   : > { %9770 = vst [vmem:[#allocation53_spill] sm:$0xff] %v9224_v40 }
 0x48c   : > { %v9226_v52 = vpop.f32.mrf.mxu0 }
 0x48d   : > { %9771 = vst [vmem:[#allocation54_spill] sm:$0xff] %v9226_v52  ;;  %v5726_v52 = vld [vmem:[#allocation15 + $0x160] sm:$0xff] }
 0x48e   : > { %5232 = vmatmul.f32.gmra.mxu3 %v9772_v34  ;;  %v5603_v34 = vld [vmem:[#allocation15 + $0xd0] sm:$0xff] }
 0x48f   : > { %5279 = vmatmul.f32.gmra.mxu0 %v9773_v58  ;;  %v5179_v58 = vrot.slane %v5100_v8, 3  ;;  %5614 = vmatpush.msrb.mxu1 %v5603_v34  ;;  %v9269_v37 = vpop.f32.mrf.mxu1  ;;  %v5729_v34 = vld [vmem:[#allocation15 + $0x178] sm:$0xff] }
 0x490   : > { %5730 = vmatpush.msra.mxu3 %v5729_v34  ;;  %v5575_v34 = vld [vmem:[#allocation15 + $0x48] sm:$0xff] }
 0x491   : > { %v9234_v0 = vpop.f32.mrf.mxu3  ;;  %v9272_v48 = vpop.f32.mrf.mxu2  ;;  %v5180_v39 = vsel %vm5138_vm6, %v5173_v50, %v5179_v58  ;;  %5615 = vmatpush.msrb.mxu1 %v5602_v7  ;;  %v5579_v58 = vld [vmem:[#allocation15 + $0x68] sm:$0xff]  ;;  %v5578_v7 = vld [vmem:[#allocation15 + $0x60] sm:$0xff] }
 0x492   : > { %9774 = vst [vmem:[#allocation38_spill] sm:$0xff] %v9234_v0 }
 0x493   : > { %5616 = vmatpush.msrb.mxu1 %v5601_v35  ;;  %v5598_v35 = vld [vmem:[#allocation15 + $0xa8] sm:$0xff] }
 0x494   : > { %v9236_v29 = vpop.f32.mrf.mxu0 }
 0x495   : > { %5617 = vmatpush.msrb.mxu1 %v5600_v5 }
 0x496   : > { %5235 = vmatmul.f32.gmra.mxu3 %v9775_v6 }
 0x497   : > { %5282 = vmatmul.f32.gmra.mxu0 %v9776_v56 }
 0x499   : > { %v9244_v59 = vpop.f32.mrf.mxu3  ;;  %v9283_v38 = vpop.f32.mrf.mxu2 }
 0x49a   : > { %9779 = vst [vmem:[#allocation39_spill] sm:$0xff] %v9283_v38  ;;  %v4851_v51 = vadd.f32 %v9236_v29, %v9244_v59  ;;  %v9328_v59 = vld [vmem:[#allocation13] ss:$0 sm:$0xff] }
 0x49c   : > { %v9248_v47 = vpop.f32.mrf.mxu0 }
 0x49e   : > { %5238 = vmatmul.f32.gmra.mxu3 %v5170_v55 }
 0x49f   : > { %5285 = vmatmul.f32.gmra.mxu0 %v5172_v53  ;;  %v9281_v53 = vpop.f32.mrf.mxu1 }
 0x4a1   : > { %v9258_v33 = vpop.f32.mrf.mxu3 }
 0x4a4   : > { %v9263_v49 = vpop.f32.mrf.mxu0 }
 0x4a6   : > { %5241 = vmatmul.f32.gmra.mxu3 %v5174_v22  ;;  %v5581_v22 = vld [vmem:[#allocation15 + $0x78] sm:$0xff] }
 0x4a7   : > { %5288 = vmatmul.f32.gmra.mxu0 %v5176_v16  ;;  %5656 = vmatpush.msra.mxu2 %v5581_v22  ;;  %v5599_v16 = vld [vmem:[#allocation15 + $0xb0] sm:$0xff]  ;;  %v9289_v17 = vpop.f32.mrf.mxu1  ;;  %v5727_v22 = vld [vmem:[#allocation15 + $0x168] sm:$0xff] }
 0x4a8   : > { %9780 = vst [vmem:[#allocation56_spill] sm:$0xff] %v9289_v17  ;;  %5618 = vmatpush.msrb.mxu1 %v5599_v16  ;;  %v5576_v16 = vld [vmem:[#allocation15 + $0x50] sm:$0xff] }
 0x4a9   : > { %v9267_v6 = vpop.f32.mrf.mxu3  ;;  %5657 = vmatpush.msra.mxu2 %v5580_v42  ;;  %v5725_v42 = vld [vmem:[#allocation15 + $0x158] sm:$0xff] }
 0x4aa   : > { %5619 = vmatpush.msrb.mxu1 %v5598_v35 }
 0x4ab   : > { %5658 = vmatpush.msra.mxu2 %v5579_v58  ;;  %v5574_v58 = vld [vmem:[#allocation15 + $0x40] sm:$0xff] }
 0x4ac   : > { %v9274_v56 = vpop.f32.mrf.mxu0  ;;  %5620 = vmatpush.msrb.mxu1 %v5597_v2 }
 0x4ad   : > { %5659 = vmatpush.msra.mxu2 %v5578_v7 }
 0x4ae   : > { %5244 = vmatmul.f32.gmra.mxu3 %v5178_v10  ;;  %v5728_v10 = vld [vmem:[#allocation15 + $0x170] sm:$0xff] }
 0x4af   : > { %5291 = vmatmul.f32.gmra.mxu0 %v5180_v39  ;;  %v9291_v39 = vpop.f32.mrf.mxu2  ;;  %5731 = vmatpush.msra.mxu3 %v5728_v10  ;;  %v5812_v10 = vld [vmem:[#allocation15 + $0x1f0] sm:$0xff]  ;;  %v9297_v35 = vpop.f32.mrf.mxu1 }
 0x4b0   : > { %9781 = vst [vmem:[#allocation60_spill] sm:$0xff] %v9291_v39  ;;  %5660 = vmatpush.msra.mxu2 %v5577_v9  ;;  %v5813_v39 = vld [vmem:[#allocation15 + $0x1f8] sm:$0xff] }
 0x4b1   : > { %v9277_v55 = vpop.f32.mrf.mxu3  ;;  %5732 = vmatpush.msra.mxu3 %v5727_v22  ;;  %5814 = vmatpush.msra.mxu0 %v5813_v39  ;;  %9782 = vst [vmem:[#allocation52_spill] sm:$0xff] %v9297_v35  ;;  %v5723_v22 = vld [vmem:[#allocation15 + $0x148] sm:$0xff]  ;;  %v5573_v9 = vld [vmem:[#allocation15 + $0x38] sm:$0xff] }
 0x4b2   : > { %5661 = vmatpush.msra.mxu2 %v5576_v16 }
 0x4b3   : > { %5733 = vmatpush.msra.mxu3 %v5726_v52  ;;  %5815 = vmatpush.msra.mxu0 %v5812_v10  ;;  %v5722_v52 = vld [vmem:[#allocation15 + $0x140] sm:$0xff] }
 0x4b4   : > { %v9279_v57 = vpop.f32.mrf.mxu0  ;;  %5662 = vmatpush.msra.mxu2 %v5575_v34 }
 0x4b5   : > { %5734 = vmatpush.msra.mxu3 %v5725_v42 }
 0x4b6   : > { %5663 = vmatpush.msra.mxu2 %v5574_v58  ;;  %v5596_v58 = vld [vmem:[#allocation15 + $0x98] sm:$0xff] }
 0x4b7   : > { %v9301_v17 = vpop.f32.mrf.mxu2  ;;  %5735 = vmatpush.msra.mxu3 %v5724_v61  ;;  %v5010_v16 = vpop.f32.mrf.mxu1  ;;  %5621 = vmatpush.msrb.mxu1 %v5596_v58  ;;  %v5719_v58 = vld [vmem:[#allocation15 + $0x128] sm:$0xff] }
 0x4b8   : > { %9783 = vst [vmem:[#allocation58_spill] sm:$0xff] %v9301_v17  ;;  %5664 = vmatpush.msra.mxu2 %v5573_v9  ;;  %v5572_v17 = vld [vmem:[#allocation15 + $0x30] sm:$0xff]  ;;  %v5571_v9 = vld [vmem:[#allocation15 + $0x28] sm:$0xff] }
 0x4b9   : > { %v9285_v8 = vpop.f32.mrf.mxu3  ;;  %5736 = vmatpush.msra.mxu3 %v5723_v22  ;;  %v5811_v22 = vld [vmem:[#allocation15 + $0x1e8] sm:$0xff] }
 0x4ba   : > { %5665 = vmatpush.msra.mxu2 %v5572_v17  ;;  %5816 = vmatpush.msra.mxu0 %v5811_v22  ;;  %v5809_v17 = vld [vmem:[#allocation15 + $0x1d8] sm:$0xff]  ;;  %v5718_v22 = vld [vmem:[#allocation15 + $0x120] sm:$0xff] }
 0x4bb   : > { %5737 = vmatpush.msra.mxu3 %v5722_v52  ;;  %v5720_v52 = vld [vmem:[#allocation15 + $0x130] sm:$0xff] }
 0x4bc   : > { %v9287_v50 = vpop.f32.mrf.mxu0  ;;  %5666 = vmatpush.msra.mxu2 %v5571_v9 }
 0x4bd   : > { %5738 = vmatpush.msra.mxu3 %v5721_v32 }
 0x4be   : > { %5667 = vmatpush.msra.mxu2 %v5570_v46 }
 0x4bf   : > { %v5057_v42 = vpop.f32.mrf.mxu2  ;;  %v9313_v61 = vpop.f32.mrf.mxu1  ;;  %5739 = vmatpush.msra.mxu3 %v5720_v52  ;;  %v5594_v52 = vld [vmem:[#allocation15 + $0x88] sm:$0xff] }
 0x4c1   : > { %v9293_v5 = vpop.f32.mrf.mxu3  ;;  %5740 = vmatpush.msra.mxu3 %v5719_v58  ;;  %v5715_v58 = vld [vmem:[#allocation15 + $0x108] sm:$0xff] }
 0x4c3   : > { %5741 = vmatpush.msra.mxu3 %v5718_v22 }
 0x4c4   : > { %v9295_v0 = vpop.f32.mrf.mxu0 }
 0x4c7   : > { %v9315_v10 = vpop.f32.mrf.mxu2 }
 0x4c9   : > { %v9299_v7 = vpop.f32.mrf.mxu3 }
 0x4cc   : > { %v9303_v2 = vpop.f32.mrf.mxu0 }
 0x4cd   : > { %9784 = vst [vmem:[#allocation40_spill] sm:$0xff] %v9303_v2  ;;  %v5569_v2 = vld [vmem:[#allocation15 + $0x18] sm:$0xff] }
 0x4ce   : > { %5668 = vmatpush.msra.mxu2 %v5569_v2  ;;  %v4611_v2 = vadd.f32 %v9208_v41, %v9204_v23  ;;  %v5714_v23 = vld [vmem:[#allocation15 + $0x100] sm:$0xff] }
 0x4cf   : > { %v9326_v29 = vpop.f32.mrf.mxu2 }
 0x4d1   : > { %v9305_v39 = vpop.f32.mrf.mxu3 }
 0x4d2   : > { %9785 = vst [vmem:[#allocation57_spill] sm:$0xff] %v9305_v39  ;;  %v5808_v39 = vld [vmem:[#allocation15 + $0x1d0] sm:$0xff] }
 0x4d4   : > { %v9307_v35 = vpop.f32.mrf.mxu0 }
 0x4d5   : > { %9786 = vst [vmem:[#allocation41_spill] sm:$0xff] %v9307_v35  ;;  %v5810_v35 = vld [vmem:[#allocation15 + $0x1e0] sm:$0xff] }
 0x4d6   : > { %5817 = vmatpush.msra.mxu0 %v5810_v35 }
 0x4d8   : > { %5818 = vmatpush.msra.mxu0 %v5809_v17 }
 0x4d9   : > { %v9309_v34 = vpop.f32.mrf.mxu3 }
 0x4da   : > { %9787 = vst [vmem:[#allocation55_spill] sm:$0xff] %v9309_v34  ;;  %v5595_v34 = vld [vmem:[#allocation15 + $0x90] sm:$0xff]  ;;  %5819 = vmatpush.msra.mxu0 %v5808_v39  ;;  %v4854_v39 = vadd.f32 %v9248_v47, %v9258_v33 }
 0x4db   : > { %5622 = vmatpush.msrb.mxu1 %v5595_v34  ;;  %v5568_v34 = vld [vmem:[#allocation15 + $0x10] sm:$0xff] }
 0x4dc   : > { %v9311_v60 = vpop.f32.mrf.mxu0  ;;  %5669 = vmatpush.msra.mxu2 %v5568_v34  ;;  %v5804_v47 = vld [vmem:[#allocation15 + $0x1b0] sm:$0xff]  ;;  %v5582_v34 = vld [vmem:[#allocation4 + $0x6] sm:$0xff] }
 0x4dd   : > { %9788 = vst [vmem:[#allocation61_spill] sm:$0xff] %v9311_v60  ;;  %v4608_v60 = vadd.f32 %v9195_v36, %v9192_v31  ;;  %v9324_v31 = vpop.f32.mrf.mxu1  ;;  %v5058_v36 = vadd.f32 %v5057_v42, %v5010_v16  ;;  %5623 = vmatpush.msrb.mxu1 %v5594_v52  ;;  %v5806_v16 = vld [vmem:[#allocation15 + $0x1c0] sm:$0xff]  ;;  %v5703_v33 = vld [vmem:[#allocation4 + $0x7] sm:$0xff]  ;;  %v5061_v52 = vadd.f32 %v9315_v10, %v9313_v61 }
 0x4de   : > { %v5566_v42 = vld [vmem:[#allocation15] sm:$0xff] }
 0x4e1   : > { %v9317_v40 = vpop.f32.mrf.mxu3 }
 0x4e2   : > { %9789 = vst [vmem:[#allocation63_spill] sm:$0xff] %v9317_v40  ;;  %v4637_v40 = vadd.f32 %v4608_v60, %v9137_v27  ;;  %v5717_v60 = vld [vmem:[#allocation15 + $0x118] sm:$0xff]  ;;  %v5807_v27 = vld [vmem:[#allocation15 + $0x1c8] sm:$0xff] }
 0x4e3   : > { %5742 = vmatpush.msra.mxu3 %v5717_v60  ;;  %5820 = vmatpush.msra.mxu0 %v5807_v27  ;;  %v5897_v27 = vld [vmem:[#allocation15 + $0x278] sm:$0xff] }
 0x4e4   : > { %v5265_v32 = vpop.f32.mrf.mxu0  ;;  %v4880_v38 = vadd.f32 %v4851_v51, %v4637_v40  ;;  %v5567_v51 = vld [vmem:[#allocation15 + $0x8] sm:$0xff]  ;;  %v5716_v40 = vld [vmem:[#allocation15 + $0x110] sm:$0xff] }
 0x4e5   : > { %5670 = vmatpush.msra.mxu2 %v5567_v51  ;;  %5743 = vmatpush.msra.mxu3 %v5716_v40  ;;  %v4857_v51 = vadd.f32 %v9263_v49, %v9267_v6  ;;  %v9342_v40 = vpop.f32.mrf.mxu1  ;;  %v5895_v49 = vld [vmem:[#allocation15 + $0x268] sm:$0xff] }
 0x4e6   : > { %v5087_v46 = vadd.f32 %v5058_v36, %v4880_v38  ;;  %v5805_v38 = vld [vmem:[#allocation15 + $0x1b8] sm:$0xff]  ;;  %v5593_v36 = vld [vmem:[#allocation15 + $0x80] sm:$0xff]  ;;  %5821 = vmatpush.msra.mxu0 %v5806_v16  ;;  %v9344_v16 = vpop.f32.mrf.mxu2 }
 0x4e7   : > { %5624 = vmatpush.msrb.mxu1 %v5593_v36  ;;  %5671 = vmatpush.msra.mxu2 %v5566_v42 }
 0x4e8   : > { %5744 = vmatpush.msra.mxu3 %v5715_v58  ;;  %5822 = vmatpush.msra.mxu0 %v5805_v38  ;;  %v5968_v38 = vld [vmem:[#allocation15 + $0x290] sm:$0xff] }
 0x4e9   : > { %v5218_v35 = vpop.f32.mrf.mxu3  ;;  %5625 = vmatmul.f32.vlgmr.msrb.gmra.mxu1 %v5582_v34  ;;  %v5801_v34 = vld [vmem:[#allocation15 + $0x198] sm:$0xff] }
 0x4ea   : > { %v5266_v9 = vadd.f32 %v5265_v32, %v5218_v35  ;;  %v5556_v32 = vld [vmem:[#allocation4 + $0x5] sm:$0xff]  ;;  %v4638_v35 = vadd.f32 %v4611_v2, %v9156_v14  ;;  %5745 = vmatpush.msra.mxu3 %v5714_v23  ;;  %v4614_v14 = vadd.f32 %v9218_v62, %v9216_v11  ;;  %5823 = vmatpush.msra.mxu0 %v5804_v47 }
 0x4eb   : > { %5672 = vmatmul.f32.vlgmr.msra.gmra.mxu2 %v5556_v32  ;;  %5746 = vmatmul.f32.vlgmr.msra.gmra.mxu3 %v5703_v33  ;;  %v5802_v62 = vld [vmem:[#allocation15 + $0x1a0] sm:$0xff] }
 0x4ec   : > { %v5295_v17 = vadd.f32 %v5266_v9, %v5087_v46  ;;  %v5268_v22 = vpop.f32.mrf.mxu0  ;;  %v4881_v60 = vadd.f32 %v4854_v39, %v4638_v35  ;;  %v5803_v9 = vld [vmem:[#allocation15 + $0x1a8] sm:$0xff]  ;;  %v5896_v39 = vld [vmem:[#allocation15 + $0x270] sm:$0xff]  ;;  %5898 = vmatpush.msra.mxu1 %v5897_v27  ;;  %v4639_v6 = vadd.f32 %v4614_v14, %v9171_v1  ;;  %v6138_v32 = vld [vmem:[#allocation15 + $0x3a0] sm:$0xff] }
 0x4ed   : > { %5824 = vmatpush.msra.mxu0 %v5803_v9  ;;  %v5064_v9 = vadd.f32 %v9326_v29, %v9324_v31  ;;  %v5799_v14 = vld [vmem:[#allocation15 + $0x188] sm:$0xff]  ;;  %v6050_v35 = vld [vmem:[#allocation15 + $0x300] sm:$0xff] }
 0x4ee   : > { %v5309_v41 = vadd.f32 %v9328_v59, %v5295_v17  ;;  %v5088_v61 = vadd.f32 %v5061_v52, %v4881_v60  ;;  %5899 = vmatpush.msra.mxu1 %v5896_v39  ;;  %v4882_v27 = vadd.f32 %v4857_v51, %v4639_v6  ;;  %v4617_v39 = vadd.f32 %v9230_v44, %v9228_v28  ;;  %v5069_v29 = vpop.f32.mrf.mxu2 }
 0x4ef   : > { %5825 = vmatpush.msra.mxu0 %v5802_v62  ;;  %v4860_v51 = vadd.f32 %v9274_v56, %v9277_v55  ;;  %v5893_v55 = vld [vmem:[#allocation15 + $0x258] sm:$0xff] }
 0x4f0   : > { %v5319_v46 = vmax.f32 %v5309_v41, 0.0  ;;  %5900 = vmatpush.msra.mxu1 %v5895_v49  ;;  %v4640_v28 = vadd.f32 %v4617_v39, %v9176_v15  ;;  %v6137_v41 = vld [vmem:[#allocation15 + $0x398] sm:$0xff]  ;;  %v6136_v49 = vld [vmem:[#allocation15 + $0x390] sm:$0xff] }
 0x4f1   : > { %v5221_v2 = vpop.f32.mrf.mxu3  ;;  %5826 = vmatpush.msra.mxu0 %v5801_v34 }
 0x4f2   : > { %v5339_v42 = vrot.slane %v5319_v46, 2  ;;  %v5340_v58 = vrot.slane %v5319_v46, 4  ;;  %v5341_v17 = vrot.slane %v5319_v46, 6  ;;  %v5399_v11 = vsel %vm7685_vm9, %v5319_v46, 0.0  ;;  %v5800_v46 = vld [vmem:[#allocation15 + $0x190] sm:$0xff] }
 0x4f3   : > { %5479 = vst [vmem:[#allocation1] ss:$4 sm:$0xff] %v5399_v11  ;;  %v5269_v10 = vadd.f32 %v5268_v22, %v5221_v2  ;;  %v5894_v22 = vld [vmem:[#allocation15 + $0x260] sm:$0xff]  ;;  %5827 = vmatpush.msra.mxu0 %v5800_v46  ;;  %v5022_v11 = vpop.f32.mrf.mxu1  ;;  %v4863_v46 = vadd.f32 %v9279_v57, %v9285_v8 }
 0x4f4   : > { %v5400_v36 = vsel %vm7691_vm10, %v5339_v42, 0.0  ;;  %v5401_v23 = vsel %vm7696_vm11, %v5340_v58, 0.0  ;;  %v5402_v47 = vsel %vm7703_vm12, %v5341_v17, 0.0  ;;  %v5271_v33 = vpop.f32.mrf.mxu0  ;;  %5901 = vmatpush.msra.mxu1 %v5894_v22  ;;  %v5089_v42 = vadd.f32 %v5064_v9, %v4882_v27  ;;  %v5798_v17 = vld [vmem:[#allocation15 + $0x180] sm:$0xff] }
 0x4f5   : > { %5481 = vst [vmem:[#allocation1 + $0x1] ss:$4 sm:$0xff] %v5400_v36  ;;  %v5296_v60 = vadd.f32 %v5269_v10, %v5088_v61  ;;  %5828 = vmatpush.msra.mxu0 %v5799_v14  ;;  %v4620_v22 = vadd.f32 %v9242_v21, %v9239_v25  ;;  %v5067_v27 = vadd.f32 %v9344_v16, %v9342_v40  ;;  %v5891_v40 = vld [vmem:[#allocation15 + $0x248] sm:$0xff] }
 0x4f6   : > { %5483 = vst [vmem:[#allocation1 + $0x2] ss:$4 sm:$0xff] %v5401_v23  ;;  %v5892_v23 = vld [vmem:[#allocation15 + $0x250] sm:$0xff]  ;;  %5902 = vmatpush.msra.mxu1 %v5893_v55  ;;  %v4623_v55 = vadd.f32 %v9261_v54, %v9256_v13 }
 0x4f7   : > { %5485 = vst [vmem:[#allocation1 + $0x3] ss:$4 sm:$0xff] %v5402_v47  ;;  %v5310_v1 = vadd.f32 %v9328_v59, %v5296_v60  ;;  %5829 = vmatpush.msra.mxu0 %v5798_v17  ;;  %v4883_v60 = vadd.f32 %v4860_v51, %v4640_v28  ;;  %v4641_v51 = vadd.f32 %v4620_v22, %v9189_v26 }
 0x4f8   : > { %5903 = vmatpush.msra.mxu1 %v5892_v23  ;;  %v4243_v22 = vadd.f32 %v9131_v3, %v9128_v19  ;;  %v4642_v54 = vadd.f32 %v4623_v55, %v9198_v45  ;;  %v5980_v55 = vld [vmem:[#allocation15 + $0x2f0] sm:$0xff] }
 0x4f9   : > { %v5320_v52 = vmax.f32 %v5310_v1, 0.0  ;;  %v5224_v2 = vpop.f32.mrf.mxu3  ;;  %v5090_v39 = vadd.f32 %v5067_v27, %v4883_v60  ;;  %v4884_v17 = vadd.f32 %v4863_v46, %v4641_v51  ;;  %v4382_v27 = vadd.f32 %v9200_v20, %v9206_v30 }
 0x4fa   : > { %v5272_v58 = vadd.f32 %v5271_v33, %v5224_v2  ;;  %5904 = vmatpush.msra.mxu1 %v5891_v40  ;;  %v4260_v19 = vadd.f32 %v4243_v22, %v9103_v18 }
 0x4fb   : > { %v5342_v62 = vrot.slane %v5320_v52, 2  ;;  %v5343_v61 = vrot.slane %v5320_v52, 4  ;;  %v5344_v10 = vrot.slane %v5320_v52, 6  ;;  %v5403_v31 = vsel %vm7720_vm15, %v5320_v52, 0.0 }
 0x4fc   : > { %5487 = vst [vmem:[#allocation1 + $0x20] ss:$4 sm:$0xff] %v5403_v31  ;;  %v5297_v6 = vadd.f32 %v5272_v58, %v5089_v42  ;;  %v5274_v36 = vpop.f32.mrf.mxu0  ;;  %v5890_v58 = vld [vmem:[#allocation15 + $0x240] sm:$0xff]  ;;  %v4399_v45 = vadd.f32 %v4382_v27, %v4260_v19 }
 0x4fd   : > { %v5404_v44 = vsel %vm7685_vm9, %v5342_v62, 0.0  ;;  %v5405_v56 = vsel %vm7691_vm10, %v5343_v61, 0.0  ;;  %v5406_v33 = vsel %vm7696_vm11, %v5344_v10, 0.0  ;;  %v5025_v62 = vpop.f32.mrf.mxu1  ;;  %v5072_v61 = vpop.f32.mrf.mxu2  ;;  %5905 = vmatpush.msra.mxu1 %v5890_v58 }
 0x4fe   : > { %v9369_v47 = vld.sshfl [vmem:[#allocation1] sm:$0xff pattern:$0x73625140]  ;;  %5489 = vst [vmem:[#allocation1 + $0x21] ss:$4 sm:$0xff] %v5404_v44  ;;  %v5311_v34 = vadd.f32 %v9328_v59, %v5297_v6  ;;  %v5073_v18 = vadd.f32 %v5072_v61, %v5025_v62 }
 0x4ff   : > { %5546 = vst [vmem:[#allocation4 + $0x10] sm:$0xff] %v9369_v47  ;;  %v5888_v61 = vld [vmem:[#allocation15 + $0x230] sm:$0xff] }
 0x500   : > { %5491 = vst [vmem:[#allocation1 + $0x22] ss:$4 sm:$0xff] %v5405_v56  ;;  %v5321_v15 = vmax.f32 %v5311_v34, 0.0 }
 0x501   : > { %5493 = vst [vmem:[#allocation1 + $0x23] ss:$4 sm:$0xff] %v5406_v33  ;;  %v5227_v1 = vpop.f32.mrf.mxu3  ;;  %v4866_v33 = vadd.f32 %v9287_v50, %v9293_v5 }
 0x502   : > { %v5345_v9 = vrot.slane %v5321_v15, 2  ;;  %v5346_v14 = vrot.slane %v5321_v15, 4  ;;  %v5347_v52 = vrot.slane %v5321_v15, 6  ;;  %v5407_v2 = vsel %vm7703_vm12, %v5321_v15, 0.0 }
 0x503   : > { %5496 = vst [vmem:[#allocation1] ss:$4 sm:$0xff] %v5407_v2  ;;  %v5275_v42 = vadd.f32 %v5274_v36, %v5227_v1  ;;  %v5070_v36 = vadd.f32 %v5069_v29, %v5022_v11  ;;  %v4885_v30 = vadd.f32 %v4866_v33, %v4642_v54  ;;  %v9796_v54 = vld [vmem:[#allocation57_spill] sm:$0xff] }
 0x504   : > { %v5408_v25 = vsel %vm7720_vm15, %v5345_v9, 0.0  ;;  %v5409_v21 = vsel %vm7685_vm9, %v5346_v14, 0.0  ;;  %v5410_v57 = vsel %vm7691_vm10, %v5347_v52, 0.0  ;;  %v5277_v8 = vpop.f32.mrf.mxu0  ;;  %v5889_v9 = vld [vmem:[#allocation15 + $0x238] sm:$0xff] }
 0x505   : > { %5497 = vst [vmem:[#allocation1 + $0x1] ss:$4 sm:$0xff] %v5408_v25  ;;  %v5298_v16 = vadd.f32 %v5275_v42, %v5090_v39  ;;  %v5091_v23 = vadd.f32 %v5070_v36, %v4884_v17  ;;  %5906 = vmatpush.msra.mxu1 %v5889_v9  ;;  %v5028_v14 = vpop.f32.mrf.mxu1  ;;  %v5075_v52 = vpop.f32.mrf.mxu2  ;;  %v4626_v25 = vadd.f32 %v9272_v48, %v9269_v37 }
 0x506   : > { %5498 = vst [vmem:[#allocation1 + $0x2] ss:$4 sm:$0xff] %v5409_v21  ;;  %v5583_v26 = vld [vmem:[#allocation4 + $0xe] sm:$0xff]  ;;  %v4869_v21 = vadd.f32 %v9295_v0, %v9299_v7  ;;  %v5092_v17 = vadd.f32 %v5073_v18, %v4885_v30  ;;  %v4385_v36 = vadd.f32 %v9210_v63, %v9214_v4 }
 0x507   : > { %v5557_v10 = vld [vmem:[#allocation4 + $0xd] sm:$0xff]  ;;  %5499 = vst [vmem:[#allocation1 + $0x3] ss:$4 sm:$0xff] %v5410_v57  ;;  %v5312_v6 = vadd.f32 %v9328_v59, %v5298_v16  ;;  %5628 = vmatmul.f32.gmra.mxu1 %v5583_v26  ;;  %v4643_v37 = vadd.f32 %v4626_v25, %v4399_v45 }
 0x508   : > { %v5704_v31 = vld [vmem:[#allocation4 + $0xf] sm:$0xff]  ;;  %5675 = vmatmul.f32.gmra.mxu2 %v5557_v10  ;;  %5907 = vmatpush.msra.mxu1 %v5888_v61 }
 0x509   : > { %v9391_v28 = vld.sshfl [vmem:[#allocation1 + $0x20] sm:$0xff pattern:$0x73625140]  ;;  %5749 = vmatmul.f32.gmra.mxu3 %v5704_v31  ;;  %5830 = vmatmul.f32.vlgmr.msra.gmra.mxu0 %v5704_v31  ;;  %v5322_v44 = vmax.f32 %v5312_v6, 0.0  ;;  %v5230_v56 = vpop.f32.mrf.mxu3  ;;  %v5981_v10 = vld [vmem:[#allocation15 + $0x2f8] sm:$0xff]  ;;  %v4246_v6 = vadd.f32 %v9153_v43, %v9147_v12  ;;  %v4886_v33 = vadd.f32 %v4869_v21, %v4643_v37  ;;  %v5076_v12 = vadd.f32 %v5075_v52, %v5028_v14 }
 0x50a   : > { %5547 = vst [vmem:[#allocation4 + $0x18] sm:$0xff] %v9391_v28  ;;  %v5278_v34 = vadd.f32 %v5277_v8, %v5230_v56  ;;  %v6065_v31 = vld [vmem:[#allocation15 + $0x378] sm:$0xff]  ;;  %5982 = vmatpush.msrb.mxu2 %v5981_v10  ;;  %v5887_v56 = vld [vmem:[#allocation15 + $0x228] sm:$0xff] }
 0x50b   : > { %v5348_v60 = vrot.slane %v5322_v44, 2  ;;  %v5349_v15 = vrot.slane %v5322_v44, 4  ;;  %v5350_v11 = vrot.slane %v5322_v44, 6  ;;  %v5411_v29 = vsel %vm7696_vm11, %v5322_v44, 0.0  ;;  %6066 = vmatpush.msrb.mxu3 %v6065_v31  ;;  %5908 = vmatpush.msra.mxu1 %v5887_v56  ;;  %v9799_v14 = vld [vmem:[#allocation34_spill] sm:$0xff]  ;;  %v9803_v56 = vld [vmem:[#allocation56_spill] sm:$0xff] }
 0x50c   : > { %5500 = vst [vmem:[#allocation1 + $0x20] ss:$4 sm:$0xff] %v5411_v29  ;;  %v5299_v46 = vadd.f32 %v5278_v34, %v5091_v23  ;;  %v5280_v13 = vpop.f32.mrf.mxu0  ;;  %v6064_v23 = vld [vmem:[#allocation15 + $0x370] sm:$0xff]  ;;  %v4261_v34 = vadd.f32 %v4246_v6, %v9110_v24  ;;  %5983 = vmatpush.msrb.mxu2 %v5980_v55  ;;  %v9795_v29 = vld [vmem:[#allocation39_spill] sm:$0xff] }
 0x50d   : > { %v5412_v50 = vsel %vm7703_vm12, %v5348_v60, 0.0  ;;  %v5413_v5 = vsel %vm7720_vm15, %v5349_v15, 0.0  ;;  %v5414_v1 = vsel %vm7685_vm9, %v5350_v11, 0.0  ;;  %6067 = vmatpush.msrb.mxu3 %v6064_v23  ;;  %v4629_v22 = vadd.f32 %v9795_v29, %v9281_v53  ;;  %v9798_v53 = vld [vmem:[#allocation37_spill] sm:$0xff]  ;;  %v9804_v55 = vld [vmem:[#allocation60_spill] sm:$0xff] }
 0x50e   : > { %5501 = vst [vmem:[#allocation1 + $0x21] ss:$4 sm:$0xff] %v5412_v50  ;;  %v5313_v3 = vadd.f32 %v9328_v59, %v5299_v46  ;;  %v9413_v20 = vld.sshfl [vmem:[#allocation1] sm:$0xff pattern:$0x73625140]  ;;  %v4400_v11 = vadd.f32 %v4385_v36, %v4261_v34  ;;  %v5093_v46 = vadd.f32 %v5076_v12, %v4886_v33  ;;  %v4249_v52 = vadd.f32 %v9799_v14, %v9798_v53  ;;  %v6062_v36 = vld [vmem:[#allocation15 + $0x360] sm:$0xff] }
 0x50f   : > { %5502 = vst [vmem:[#allocation1 + $0x22] ss:$4 sm:$0xff] %v5413_v5  ;;  %v9797_v50 = vld [vmem:[#allocation40_spill] sm:$0xff]  ;;  %v4632_v23 = vadd.f32 %v9804_v55, %v9803_v56  ;;  %v9805_v34 = vld [vmem:[#allocation55_spill] sm:$0xff] }
 0x510   : > { %5503 = vst [vmem:[#allocation1 + $0x23] ss:$4 sm:$0xff] %v5414_v1  ;;  %v5323_v2 = vmax.f32 %v5313_v3, 0.0  ;;  %v4872_v5 = vadd.f32 %v9797_v50, %v9796_v54  ;;  %v5078_v1 = vpop.f32.mrf.mxu2  ;;  %v4644_v25 = vadd.f32 %v4629_v22, %v4400_v11  ;;  %v6148_v50 = vld [vmem:[#allocation15 + $0x3f0] sm:$0xff]  ;;  %v5975_v53 = vld [vmem:[#allocation15 + $0x2c8] sm:$0xff]  ;;  %v6146_v55 = vld [vmem:[#allocation15 + $0x3e0] sm:$0xff] }
 0x511   : > { %v5584_v39 = vld [vmem:[#allocation4 + $0x16] sm:$0xff]  ;;  %v5233_v57 = vpop.f32.mrf.mxu3  ;;  %5548 = vst [vmem:[#allocation4 + $0x20] sm:$0xff] %v9413_v20  ;;  %v9807_v14 = vld [vmem:[#allocation47_spill] sm:$0xff] }
 0x512   : > { %v5558_v42 = vld [vmem:[#allocation4 + $0x15] sm:$0xff]  ;;  %5631 = vmatmul.f32.gmra.mxu1 %v5584_v39  ;;  %v5351_v8 = vrot.slane %v5323_v2, 2  ;;  %v5352_v40 = vrot.slane %v5323_v2, 4  ;;  %v5353_v16 = vrot.slane %v5323_v2, 6  ;;  %v5415_v58 = vsel %vm7691_vm10, %v5323_v2, 0.0 }
 0x513   : > { %v5705_v51 = vld [vmem:[#allocation4 + $0x17] sm:$0xff]  ;;  %5678 = vmatmul.f32.gmra.mxu2 %v5558_v42  ;;  %v5281_v26 = vadd.f32 %v5280_v13, %v5233_v57  ;;  %5506 = vst [vmem:[#allocation1] ss:$4 sm:$0xff] %v5415_v58  ;;  %v5031_v13 = vpop.f32.mrf.mxu1 }
 0x514   : > { %5752 = vmatmul.f32.gmra.mxu3 %v5705_v51  ;;  %5833 = vmatmul.f32.gmra.mxu0 %v5705_v51  ;;  %v5416_v0 = vsel %vm7696_vm11, %v5351_v8, 0.0  ;;  %v5417_v48 = vsel %vm7703_vm12, %v5352_v40, 0.0  ;;  %v5418_v7 = vsel %vm7720_vm15, %v5353_v16, 0.0  ;;  %v5283_v62 = vpop.f32.mrf.mxu0  ;;  %v9800_v2 = vld [vmem:[#allocation53_spill] sm:$0xff]  ;;  %v9801_v39 = vld [vmem:[#allocation50_spill] sm:$0xff]  ;;  %v5979_v8 = vld [vmem:[#allocation15 + $0x2e8] sm:$0xff]  ;;  %v5079_v33 = vadd.f32 %v5078_v1, %v5031_v13 }
 0x515   : > { %v5300_v44 = vadd.f32 %v5281_v26, %v5092_v17  ;;  %5507 = vst [vmem:[#allocation1 + $0x1] ss:$4 sm:$0xff] %v5416_v0  ;;  %v4388_v42 = vadd.f32 %v9801_v39, %v9800_v2  ;;  %v6063_v40 = vld [vmem:[#allocation15 + $0x368] sm:$0xff]  ;;  %v5886_v16 = vld [vmem:[#allocation15 + $0x220] sm:$0xff]  ;;  %5984 = vmatpush.msrb.mxu2 %v5979_v8 }
 0x516   : > { %5508 = vst [vmem:[#allocation1 + $0x2] ss:$4 sm:$0xff] %v5417_v48  ;;  %v9802_v58 = vld [vmem:[#allocation46_spill] sm:$0xff]  ;;  %6068 = vmatpush.msrb.mxu3 %v6063_v40  ;;  %5909 = vmatpush.msra.mxu1 %v5886_v16  ;;  %v6059_v8 = vld [vmem:[#allocation15 + $0x348] sm:$0xff] }
 0x517   : > { %v5314_v60 = vadd.f32 %v9328_v59, %v5300_v44  ;;  %5509 = vst [vmem:[#allocation1 + $0x3] ss:$4 sm:$0xff] %v5418_v7  ;;  %v9434_v15 = vld.sshfl [vmem:[#allocation1 + $0x20] sm:$0xff pattern:$0x73625140]  ;;  %v4262_v17 = vadd.f32 %v4249_v52, %v9802_v58  ;;  %v5978_v48 = vld [vmem:[#allocation15 + $0x2e0] sm:$0xff]  ;;  %v4887_v7 = vadd.f32 %v4872_v5, %v4644_v25 }
 0x518   : > { %v5585_v43 = vld [vmem:[#allocation4 + $0x1e] sm:$0xff]  ;;  %5549 = vst [vmem:[#allocation4 + $0x28] sm:$0xff] %v9434_v15  ;;  %5985 = vmatpush.msrb.mxu2 %v5978_v48  ;;  %v5977_v44 = vld [vmem:[#allocation15 + $0x2d8] sm:$0xff]  ;;  %6069 = vmatpush.msrb.mxu3 %v6062_v36  ;;  %v9811_v40 = vld [vmem:[#allocation48_spill] sm:$0xff] }
 0x519   : > { %v5559_v63 = vld [vmem:[#allocation4 + $0x1d] sm:$0xff]  ;;  %v5324_v27 = vmax.f32 %v5314_v60, 0.0  ;;  %v5236_v24 = vpop.f32.mrf.mxu3  ;;  %v4401_v31 = vadd.f32 %v4388_v42, %v4262_v17  ;;  %v9806_v60 = vld [vmem:[#allocation41_spill] sm:$0xff]  ;;  %v5094_v13 = vadd.f32 %v5079_v33, %v4887_v7 }
 0x51a   : > { %v5706_v4 = vld [vmem:[#allocation4 + $0x1f] sm:$0xff]  ;;  %5634 = vmatmul.f32.gmra.mxu1 %v5585_v43  ;;  %v5284_v9 = vadd.f32 %v5283_v62, %v5236_v24  ;;  %v4875_v12 = vadd.f32 %v9806_v60, %v9805_v34  ;;  %v5976_v24 = vld [vmem:[#allocation15 + $0x2d0] sm:$0xff]  ;;  %5986 = vmatpush.msrb.mxu2 %v5977_v44 }
 0x51b   : > { %5681 = vmatmul.f32.gmra.mxu2 %v5559_v63  ;;  %v5354_v19 = vrot.slane %v5324_v27, 2  ;;  %v5355_v3 = vrot.slane %v5324_v27, 4  ;;  %v5356_v30 = vrot.slane %v5324_v27, 6  ;;  %v5419_v45 = vsel %vm7685_vm9, %v5324_v27, 0.0  ;;  %v6061_v63 = vld [vmem:[#allocation15 + $0x358] sm:$0xff]  ;;  %v5034_v1 = vpop.f32.mrf.mxu1  ;;  %v9808_v52 = vld [vmem:[#allocation51_spill] sm:$0xff] }
 0x51c   : > { %5755 = vmatmul.f32.gmra.mxu3 %v5706_v4  ;;  %5836 = vmatmul.f32.gmra.mxu0 %v5706_v4  ;;  %v5301_v51 = vadd.f32 %v5284_v9, %v5093_v46  ;;  %5510 = vst [vmem:[#allocation1 + $0x20] ss:$4 sm:$0xff] %v5419_v45  ;;  %v5286_v37 = vpop.f32.mrf.mxu0  ;;  %v6149_v4 = vld [vmem:[#allocation15 + $0x3f8] sm:$0xff]  ;;  %v4645_v5 = vadd.f32 %v4632_v23, %v4401_v31  ;;  %v5081_v9 = vpop.f32.mrf.mxu2  ;;  %v6060_v45 = vld [vmem:[#allocation15 + $0x350] sm:$0xff]  ;;  %v9814_v33 = vld [vmem:[#allocation63_spill] sm:$0xff] }
 0x51d   : > { %v5420_v18 = vsel %vm7691_vm10, %v5354_v19, 0.0  ;;  %v5421_v21 = vsel %vm7696_vm11, %v5355_v3, 0.0  ;;  %v5422_v57 = vsel %vm7703_vm12, %v5356_v30, 0.0  ;;  %v5885_v46 = vld [vmem:[#allocation15 + $0x218] sm:$0xff]  ;;  %6150 = vmatpush.msrb.mxu0 %v6149_v4  ;;  %v4252_v2 = vadd.f32 %v9808_v52, %v9807_v14  ;;  %6070 = vmatpush.msrb.mxu3 %v6061_v63  ;;  %v9812_v31 = vld [vmem:[#allocation52_spill] sm:$0xff] }
 0x51e   : > { %v5315_v26 = vadd.f32 %v9328_v59, %v5301_v51  ;;  %5511 = vst [vmem:[#allocation1 + $0x21] ss:$4 sm:$0xff] %v5420_v18  ;;  %v9455_v0 = vld.sshfl [vmem:[#allocation1] sm:$0xff pattern:$0x73625140]  ;;  %5910 = vmatpush.msra.mxu1 %v5885_v46  ;;  %v9809_v39 = vld [vmem:[#allocation38_spill] sm:$0xff]  ;;  %5987 = vmatpush.msrb.mxu2 %v5976_v24 }
 0x51f   : > { %v5586_v62 = vld [vmem:[#allocation4 + $0x26] sm:$0xff]  ;;  %5512 = vst [vmem:[#allocation1 + $0x22] ss:$4 sm:$0xff] %v5421_v21  ;;  %v9810_v42 = vld [vmem:[#allocation54_spill] sm:$0xff]  ;;  %v5884_v21 = vld [vmem:[#allocation15 + $0x210] sm:$0xff]  ;;  %6151 = vmatpush.msrb.mxu0 %v6148_v50  ;;  %v4263_v16 = vadd.f32 %v4252_v2, %v9811_v40  ;;  %6071 = vmatpush.msrb.mxu3 %v6060_v45 }
 0x520   : > { %v5560_v61 = vld [vmem:[#allocation4 + $0x25] sm:$0xff]  ;;  %v5325_v6 = vmax.f32 %v5315_v26, 0.0  ;;  %5513 = vst [vmem:[#allocation1 + $0x23] ss:$4 sm:$0xff] %v5422_v57  ;;  %v4391_v51 = vadd.f32 %v9810_v42, %v9809_v39  ;;  %v4888_v57 = vadd.f32 %v4875_v12, %v4645_v5  ;;  %5911 = vmatpush.msra.mxu1 %v5884_v21  ;;  %5988 = vmatpush.msrb.mxu2 %v5975_v53  ;;  %v9815_v34 = vld [vmem:[#allocation61_spill] sm:$0xff] }
 0x521   : > { %v5707_v10 = vld [vmem:[#allocation4 + $0x27] sm:$0xff]  ;;  %v5239_v43 = vpop.f32.mrf.mxu3  ;;  %5550 = vst [vmem:[#allocation4 + $0x30] sm:$0xff] %v9455_v0  ;;  %v5974_v26 = vld [vmem:[#allocation15 + $0x2c0] sm:$0xff]  ;;  %v4878_v60 = vadd.f32 %v9815_v34, %v9814_v33  ;;  %v5973_v63 = vld [vmem:[#allocation15 + $0x2b8] sm:$0xff]  ;;  %6072 = vmatpush.msrb.mxu3 %v6059_v8 }
 0x522   : > { %5637 = vmatmul.f32.gmra.mxu1 %v5586_v62  ;;  %v5357_v11 = vrot.slane %v5325_v6, 2  ;;  %v5358_v29 = vrot.slane %v5325_v6, 4  ;;  %v5359_v22 = vrot.slane %v5325_v6, 6  ;;  %v5423_v27 = vsel %vm7720_vm15, %v5325_v6, 0.0  ;;  %v6147_v18 = vld [vmem:[#allocation15 + $0x3e8] sm:$0xff]  ;;  %v9813_v6 = vld [vmem:[#allocation58_spill] sm:$0xff]  ;;  %5989 = vmatpush.msrb.mxu2 %v5974_v26 }
 0x523   : > { %5684 = vmatmul.f32.gmra.mxu2 %v5560_v61  ;;  %v5287_v54 = vadd.f32 %v5286_v37, %v5239_v43  ;;  %5516 = vst [vmem:[#allocation1] ss:$4 sm:$0xff] %v5423_v27  ;;  %v5082_v37 = vadd.f32 %v5081_v9, %v5034_v1  ;;  %6152 = vmatpush.msrb.mxu0 %v6147_v18  ;;  %v6058_v43 = vld [vmem:[#allocation15 + $0x340] sm:$0xff]  ;;  %v5883_v4 = vld [vmem:[#allocation15 + $0x208] sm:$0xff]  ;;  %v6145_v24 = vld [vmem:[#allocation15 + $0x3d8] sm:$0xff]  ;;  %v5037_v46 = vpop.f32.mrf.mxu1 }
 0x524   : > { %5758 = vmatmul.f32.gmra.mxu3 %v5707_v10  ;;  %5839 = vmatmul.f32.gmra.mxu0 %v5707_v10  ;;  %v5424_v19 = vsel %vm7685_vm9, %v5357_v11, 0.0  ;;  %v5425_v3 = vsel %vm7691_vm10, %v5358_v29, 0.0  ;;  %v5426_v30 = vsel %vm7696_vm11, %v5359_v22, 0.0  ;;  %v5289_v48 = vpop.f32.mrf.mxu0  ;;  %v4402_v10 = vadd.f32 %v4391_v51, %v4263_v16  ;;  %v6057_v50 = vld [vmem:[#allocation15 + $0x338] sm:$0xff]  ;;  %v5972_v5 = vld [vmem:[#allocation15 + $0x2b0] sm:$0xff]  ;;  %v5882_v1 = vld [vmem:[#allocation15 + $0x200] sm:$0xff] }
 0x525   : > { %v5302_v25 = vadd.f32 %v5287_v54, %v5094_v13  ;;  %5517 = vst [vmem:[#allocation1 + $0x1] ss:$4 sm:$0xff] %v5424_v19  ;;  %v4635_v36 = vadd.f32 %v9813_v6, %v9812_v31  ;;  %v5095_v23 = vadd.f32 %v5082_v37, %v4888_v57  ;;  %v5084_v13 = vpop.f32.mrf.mxu2  ;;  %6153 = vmatpush.msrb.mxu0 %v6146_v55  ;;  %v6144_v45 = vld [vmem:[#allocation15 + $0x3d0] sm:$0xff]  ;;  %v5971_v57 = vld [vmem:[#allocation15 + $0x2a8] sm:$0xff]  ;;  %v6233_v31 = vld [vmem:[#allocation15 + $0x478] sm:$0xff] }
 0x526   : > { %5518 = vst [vmem:[#allocation1 + $0x2] ss:$4 sm:$0xff] %v5425_v3  ;;  %5912 = vmatpush.msra.mxu1 %v5883_v4  ;;  %6073 = vmatpush.msrb.mxu3 %v6058_v43  ;;  %v5085_v2 = vadd.f32 %v5084_v13, %v5037_v46  ;;  %v6056_v21 = vld [vmem:[#allocation15 + $0x330] sm:$0xff]  ;;  %v6143_v40 = vld [vmem:[#allocation15 + $0x3c8] sm:$0xff]  ;;  %v5969_v55 = vld [vmem:[#allocation15 + $0x298] sm:$0xff] }
 0x527   : > { %v5316_v58 = vadd.f32 %v9328_v59, %v5302_v25  ;;  %5519 = vst [vmem:[#allocation1 + $0x3] ss:$4 sm:$0xff] %v5426_v30  ;;  %v9476_v17 = vld.sshfl [vmem:[#allocation1 + $0x20] sm:$0xff pattern:$0x73625140]  ;;  %v4646_v9 = vadd.f32 %v4635_v36, %v4402_v10  ;;  %5990 = vmatpush.msrb.mxu2 %v5973_v63  ;;  %6154 = vmatpush.msrb.mxu0 %v6145_v24  ;;  %v6142_v10 = vld [vmem:[#allocation15 + $0x3c0] sm:$0xff] }
 0x528   : > { %v5587_v7 = vld [vmem:[#allocation4 + $0x2e] sm:$0xff]  ;;  %5551 = vst [vmem:[#allocation4 + $0x38] sm:$0xff] %v9476_v17  ;;  %5913 = vmatpush.msra.mxu1 %v5882_v1  ;;  %6074 = vmatpush.msrb.mxu3 %v6057_v50  ;;  %v6141_v34 = vld [vmem:[#allocation15 + $0x3b8] sm:$0xff]  ;;  %v6231_v24 = vld [vmem:[#allocation15 + $0x468] sm:$0xff] }
 0x529   : > { %v5561_v62 = vld [vmem:[#allocation4 + $0x2d] sm:$0xff]  ;;  %v5326_v44 = vmax.f32 %v5316_v58, 0.0  ;;  %v5242_v56 = vpop.f32.mrf.mxu3  ;;  %v4889_v52 = vadd.f32 %v4878_v60, %v4646_v9  ;;  %5991 = vmatpush.msrb.mxu2 %v5972_v5  ;;  %6155 = vmatpush.msrb.mxu0 %v6144_v45  ;;  %v6053_v60 = vld [vmem:[#allocation15 + $0x318] sm:$0xff]  ;;  %v6230_v1 = vld [vmem:[#allocation15 + $0x460] sm:$0xff] }
 0x52a   : > { %v5708_v61 = vld [vmem:[#allocation4 + $0x2f] sm:$0xff]  ;;  %5640 = vmatmul.f32.gmra.mxu1 %v5587_v7  ;;  %v5290_v12 = vadd.f32 %v5289_v48, %v5242_v56  ;;  %v6055_v48 = vld [vmem:[#allocation15 + $0x328] sm:$0xff]  ;;  %v5970_v7 = vld [vmem:[#allocation15 + $0x2a0] sm:$0xff]  ;;  %6075 = vmatpush.msrb.mxu3 %v6056_v21 }
 0x52b   : > { %5687 = vmatmul.f32.gmra.mxu2 %v5561_v62  ;;  %v5360_v11 = vrot.slane %v5326_v44, 2  ;;  %v5361_v29 = vrot.slane %v5326_v44, 4  ;;  %v5362_v22 = vrot.slane %v5326_v44, 6  ;;  %v5427_v27 = vsel %vm7703_vm12, %v5326_v44, 0.0  ;;  %6156 = vmatpush.msrb.mxu0 %v6143_v40  ;;  %v6054_v56 = vld [vmem:[#allocation15 + $0x320] sm:$0xff]  ;;  %v6139_v5 = vld [vmem:[#allocation15 + $0x3a8] sm:$0xff] }
 0x52c   : > { %5761 = vmatmul.f32.gmra.mxu3 %v5708_v61  ;;  %5842 = vmatmul.f32.gmra.mxu0 %v5708_v61  ;;  %v5303_v54 = vadd.f32 %v5290_v12, %v5095_v23  ;;  %5520 = vst [vmem:[#allocation1 + $0x20] ss:$4 sm:$0xff] %v5427_v27  ;;  %v5292_v18 = vpop.f32.mrf.mxu0  ;;  %v5096_v62 = vadd.f32 %v5085_v2, %v4889_v52  ;;  %v6232_v23 = vld [vmem:[#allocation15 + $0x470] sm:$0xff]  ;;  %v6051_v9 = vld [vmem:[#allocation15 + $0x308] sm:$0xff] }
 0x52d   : > { %v5428_v19 = vsel %vm7720_vm15, %v5360_v11, 0.0  ;;  %v5429_v3 = vsel %vm7685_vm9, %v5361_v29, 0.0  ;;  %v5430_v30 = vsel %vm7691_vm10, %v5362_v22, 0.0  ;;  %5992 = vmatpush.msrb.mxu2 %v5971_v57  ;;  %6234 = vmatpush.msrb.mxu1 %v6233_v31  ;;  %v6140_v22 = vld [vmem:[#allocation15 + $0x3b0] sm:$0xff]  ;;  %v6124_v31 = vld [vmem:[#allocation4 + $0x22] sm:$0xff] }
 0x52e   : > { %v5317_v53 = vadd.f32 %v9328_v59, %v5303_v54  ;;  %5521 = vst [vmem:[#allocation1 + $0x21] ss:$4 sm:$0xff] %v5428_v19  ;;  %v9492_v14 = vld.sshfl [vmem:[#allocation1] sm:$0xff pattern:$0x73625140]  ;;  %6076 = vmatpush.msrb.mxu3 %v6055_v48  ;;  %6157 = vmatpush.msrb.mxu0 %v6142_v10  ;;  %v5966_v19 = vld [vmem:[#allocation15 + $0x280] sm:$0xff] }
 0x52f   : > { %v5588_v39 = vld [vmem:[#allocation4 + $0x36] sm:$0xff]  ;;  %5522 = vst [vmem:[#allocation1 + $0x22] ss:$4 sm:$0xff] %v5429_v3  ;;  %5993 = vmatpush.msrb.mxu2 %v5970_v7  ;;  %6235 = vmatpush.msrb.mxu1 %v6232_v23  ;;  %v6052_v27 = vld [vmem:[#allocation15 + $0x310] sm:$0xff]  ;;  %v6226_v48 = vld [vmem:[#allocation15 + $0x440] sm:$0xff] }
 0x530   : > { %v5562_v42 = vld [vmem:[#allocation4 + $0x35] sm:$0xff]  ;;  %v5327_v25 = vmax.f32 %v5317_v53, 0.0  ;;  %5523 = vst [vmem:[#allocation1 + $0x23] ss:$4 sm:$0xff] %v5430_v30  ;;  %6077 = vmatpush.msrb.mxu3 %v6054_v56  ;;  %6158 = vmatpush.msrb.mxu0 %v6141_v34  ;;  %v6040_v7 = vld [vmem:[#allocation4 + $0x21] sm:$0xff] }
 0x531   : > { %v5709_v51 = vld [vmem:[#allocation4 + $0x37] sm:$0xff]  ;;  %v5245_v8 = vpop.f32.mrf.mxu3  ;;  %5552 = vst [vmem:[#allocation4 + $0x40] sm:$0xff] %v9492_v14  ;;  %5994 = vmatpush.msrb.mxu2 %v5969_v55  ;;  %6236 = vmatpush.msrb.mxu1 %v6231_v24  ;;  %v6228_v40 = vld [vmem:[#allocation15 + $0x450] sm:$0xff] }
 0x532   : > { %5643 = vmatmul.f32.gmra.mxu1 %v5588_v39  ;;  %v5363_v16 = vrot.slane %v5327_v25, 2  ;;  %v5364_v58 = vrot.slane %v5327_v25, 4  ;;  %v5365_v26 = vrot.slane %v5327_v25, 6  ;;  %v5431_v37 = vsel %vm7696_vm11, %v5327_v25, 0.0  ;;  %6078 = vmatpush.msrb.mxu3 %v6053_v60  ;;  %v6224_v10 = vld [vmem:[#allocation15 + $0x430] sm:$0xff]  ;;  %v6221_v56 = vld [vmem:[#allocation15 + $0x418] sm:$0xff] }
 0x533   : > { %5690 = vmatmul.f32.gmra.mxu2 %v5562_v42  ;;  %v5293_v61 = vadd.f32 %v5292_v18, %v5245_v8  ;;  %5526 = vst [vmem:[#allocation1] ss:$4 sm:$0xff] %v5431_v37  ;;  %6159 = vmatpush.msrb.mxu0 %v6140_v22  ;;  %v6229_v42 = vld [vmem:[#allocation15 + $0x458] sm:$0xff]  ;;  %v6134_v18 = vld [vmem:[#allocation15 + $0x380] sm:$0xff]  ;;  %v6220_v34 = vld [vmem:[#allocation15 + $0x410] sm:$0xff] }
 0x534   : > { %5764 = vmatmul.f32.gmra.mxu3 %v5709_v51  ;;  %5845 = vmatmul.f32.gmra.mxu0 %v5709_v51  ;;  %v5432_v6 = vsel %vm7703_vm12, %v5363_v16, 0.0  ;;  %v5433_v36 = vsel %vm7720_vm15, %v5364_v58, 0.0  ;;  %v5434_v44 = vsel %vm7685_vm9, %v5365_v26, 0.0  ;;  %v6135_v51 = vld [vmem:[#allocation15 + $0x388] sm:$0xff]  ;;  %v5955_v26 = vld [vmem:[#allocation4 + $0x11] sm:$0xff]  ;;  %v6039_v37 = vld [vmem:[#allocation4 + $0x19] sm:$0xff] }
 0x535   : > { %v5304_v33 = vadd.f32 %v5293_v61, %v5096_v62  ;;  %5527 = vst [vmem:[#allocation1 + $0x1] ss:$4 sm:$0xff] %v5432_v6  ;;  %5995 = vmatpush.msrb.mxu2 %v5968_v38  ;;  %6079 = vmatpush.msrb.mxu3 %v6052_v27  ;;  %v6227_v16 = vld [vmem:[#allocation15 + $0x448] sm:$0xff]  ;;  %v6123_v62 = vld [vmem:[#allocation4 + $0x1a] sm:$0xff]  ;;  %v6126_v23 = vld [vmem:[#allocation4 + $0x32] sm:$0xff] }
 0x536   : > { %5528 = vst [vmem:[#allocation1 + $0x2] ss:$4 sm:$0xff] %v5433_v36  ;;  %6160 = vmatpush.msrb.mxu0 %v6139_v5  ;;  %6237 = vmatpush.msrb.mxu1 %v6230_v1  ;;  %v6225_v61 = vld [vmem:[#allocation15 + $0x438] sm:$0xff]  ;;  %v6223_v6 = vld [vmem:[#allocation15 + $0x428] sm:$0xff]  ;;  %v6222_v36 = vld [vmem:[#allocation15 + $0x420] sm:$0xff] }
 0x537   : > { %v5318_v12 = vadd.f32 %v9328_v59, %v5304_v33  ;;  %5529 = vst [vmem:[#allocation1 + $0x3] ss:$4 sm:$0xff] %v5434_v44  ;;  %v9504_v43 = vld.sshfl [vmem:[#allocation1 + $0x20] sm:$0xff pattern:$0x73625140]  ;;  %6080 = vmatpush.msrb.mxu3 %v6051_v9 }
 0x538   : > { %v5589_v63 = vld [vmem:[#allocation4 + $0x3e] sm:$0xff]  ;;  %5553 = vst [vmem:[#allocation4 + $0x48] sm:$0xff] %v9504_v43  ;;  %v5967_v59 = vld [vmem:[#allocation15 + $0x288] sm:$0xff]  ;;  %6161 = vmatpush.msrb.mxu0 %v6138_v32  ;;  %6238 = vmatpush.msrb.mxu1 %v6229_v42 }
 0x539   : > { %v5563_v4 = vld [vmem:[#allocation4 + $0x3d] sm:$0xff]  ;;  %v5328_v29 = vmax.f32 %v5318_v12, 0.0  ;;  %5996 = vmatpush.msrb.mxu2 %v5967_v59  ;;  %6081 = vmatpush.msrb.mxu3 %v6050_v35  ;;  %v6125_v44 = vld [vmem:[#allocation4 + $0x2a] sm:$0xff] }
 0x53a   : > { %v5710_v11 = vld [vmem:[#allocation4 + $0x3f] sm:$0xff]  ;;  %5646 = vmatmul.f32.gmra.mxu1 %v5589_v63  ;;  %6162 = vmatpush.msrb.mxu0 %v6137_v41 }
 0x53b   : > { %5693 = vmatmul.f32.gmra.mxu2 %v5563_v4  ;;  %v5366_v46 = vrot.slane %v5328_v29, 2  ;;  %v5367_v13 = vrot.slane %v5328_v29, 4  ;;  %v5368_v54 = vrot.slane %v5328_v29, 6  ;;  %v5435_v50 = vsel %vm7691_vm10, %v5328_v29, 0.0  ;;  %6239 = vmatpush.msrb.mxu1 %v6228_v40  ;;  %v6127_v63 = vld [vmem:[#allocation4 + $0x3a] sm:$0xff]  ;;  %v6219_v4 = vld [vmem:[#allocation15 + $0x408] sm:$0xff] }
 0x53c   : > { %5767 = vmatmul.f32.gmra.mxu3 %v5710_v11  ;;  %5848 = vmatmul.f32.gmra.mxu0 %v5710_v11  ;;  %5530 = vst [vmem:[#allocation1 + $0x20] ss:$4 sm:$0xff] %v5435_v50 }
 0x53d   : > { %v5436_v3 = vsel %vm7696_vm11, %v5366_v46, 0.0  ;;  %v5437_v30 = vsel %vm7703_vm12, %v5367_v13, 0.0  ;;  %v5438_v45 = vsel %vm7720_vm15, %v5368_v54, 0.0  ;;  %5997 = vmatpush.msrb.mxu2 %v5966_v19  ;;  %6163 = vmatpush.msrb.mxu0 %v6136_v49 }
 0x53e   : > { %5531 = vst [vmem:[#allocation1 + $0x21] ss:$4 sm:$0xff] %v5436_v3  ;;  %v9515_v53 = vld.sshfl [vmem:[#allocation1] sm:$0xff pattern:$0x73625140]  ;;  %6240 = vmatpush.msrb.mxu1 %v6227_v16 }
 0x53f   : > { %v5590_v52 = vld [vmem:[#allocation4 + $0x46] sm:$0xff]  ;;  %5532 = vst [vmem:[#allocation1 + $0x22] ss:$4 sm:$0xff] %v5437_v30  ;;  %6164 = vmatpush.msrb.mxu0 %v6135_v51 }
 0x540   : > { %v5564_v2 = vld [vmem:[#allocation4 + $0x45] sm:$0xff]  ;;  %5533 = vst [vmem:[#allocation1 + $0x23] ss:$4 sm:$0xff] %v5438_v45  ;;  %6241 = vmatpush.msrb.mxu1 %v6226_v48 }
 0x541   : > { %v5711_v39 = vld [vmem:[#allocation4 + $0x47] sm:$0xff]  ;;  %5554 = vst [vmem:[#allocation4 + $0x50] sm:$0xff] %v9515_v53  ;;  %6165 = vmatpush.msrb.mxu0 %v6134_v18 }
 0x542   : > { %5649 = vmatmul.f32.gmra.mxu1 %v5590_v52  ;;  %v6044_v38 = vld [vmem:[#allocation4 + $0x41] sm:$0xff] }
 0x543   : > { %5696 = vmatmul.f32.gmra.mxu2 %v5564_v2  ;;  %6242 = vmatpush.msrb.mxu1 %v6225_v61  ;;  %v6128_v29 = vld [vmem:[#allocation4 + $0x42] sm:$0xff] }
 0x544   : > { %5770 = vmatmul.f32.gmra.mxu3 %v5711_v39  ;;  %5851 = vmatmul.f32.gmra.mxu0 %v5711_v39  ;;  %v6048_v2 = vld [vmem:[#allocation4 + $0x61] sm:$0xff] }
 0x545   : > { %6243 = vmatpush.msrb.mxu1 %v6224_v10  ;;  %v6208_v48 = vld [vmem:[#allocation4 + $0x23] sm:$0xff] }
 0x547   : > { %v9518_v25 = vld.sshfl [vmem:[#allocation1 + $0x20] sm:$0xff pattern:$0x73625140]  ;;  %6244 = vmatpush.msrb.mxu1 %v6223_v6 }
 0x548   : > { %v5591_v21 = vld [vmem:[#allocation4 + $0x4e] sm:$0xff]  ;;  %5555 = vst [vmem:[#allocation4 + $0x58] sm:$0xff] %v9518_v25 }
 0x549   : > { %v5565_v57 = vld [vmem:[#allocation4 + $0x4d] sm:$0xff]  ;;  %6245 = vmatpush.msrb.mxu1 %v6222_v36 }
 0x54a   : > { %v5712_v8 = vld [vmem:[#allocation4 + $0x4f] sm:$0xff]  ;;  %5652 = vmatmul.f32.gmra.mxu1 %v5591_v21  ;;  %v6132_v21 = vld [vmem:[#allocation4 + $0x62] sm:$0xff] }
 0x54b   : > { %5699 = vmatmul.f32.gmra.mxu2 %v5565_v57  ;;  %6246 = vmatpush.msrb.mxu1 %v6221_v56  ;;  %v6045_v11 = vld [vmem:[#allocation4 + $0x49] sm:$0xff]  ;;  %v6207_v57 = vld [vmem:[#allocation4 + $0x1b] sm:$0xff] }
 0x54c   : > { %5773 = vmatmul.f32.gmra.mxu3 %v5712_v8  ;;  %5854 = vmatmul.f32.gmra.mxu0 %v5712_v8  ;;  %v6129_v24 = vld [vmem:[#allocation4 + $0x4a] sm:$0xff] }
 0x54d   : > { %6247 = vmatpush.msrb.mxu1 %v6220_v34  ;;  %v6209_v36 = vld [vmem:[#allocation4 + $0x2b] sm:$0xff]  ;;  %v6210_v34 = vld [vmem:[#allocation4 + $0x33] sm:$0xff] }
 0x54f   : > { %v5796_v58 = vld [vmem:[#allocation4 + $0x57] sm:$0xff]  ;;  %6248 = vmatpush.msrb.mxu1 %v6219_v4 }
 0x550   : > { %v6047_v9 = vld [vmem:[#allocation4 + $0x59] sm:$0xff] }
 0x551   : > { %v6130_v19 = vld [vmem:[#allocation4 + $0x52] sm:$0xff]  ;;  %v6131_v35 = vld [vmem:[#allocation4 + $0x5a] sm:$0xff] }
 0x552   : > { %5914 = vmatmul.f32.vlgmr.msra.gmra.mxu1 %v9369_v47  ;;  %v6041_v47 = vld [vmem:[#allocation4 + $0x29] sm:$0xff] }
 0x553   : > { %5998 = vmatmul.f32.vlgmr.msrb.gmra.mxu2 %v5955_v26 }
 0x554   : > { %5857 = vmatmul.f32.gmra.mxu0 %v5796_v58  ;;  %6082 = vmatmul.f32.vlgmr.msrb.gmra.mxu3 %v6039_v37 }
 0x55a   : > { %5917 = vmatmul.f32.gmra.mxu1 %v9391_v28  ;;  %v6042_v28 = vld [vmem:[#allocation4 + $0x31] sm:$0xff] }
 0x55b   : > { %6001 = vmatmul.f32.gmra.mxu2 %v6039_v37 }
 0x55c   : > { %6085 = vmatmul.f32.gmra.mxu3 %v6040_v7  ;;  %6166 = vmatmul.f32.vlgmr.msrb.gmra.mxu0 %v6123_v62 }
 0x562   : > { %5920 = vmatmul.f32.gmra.mxu1 %v9413_v20  ;;  %v6043_v20 = vld [vmem:[#allocation4 + $0x39] sm:$0xff] }
 0x563   : > { %6004 = vmatmul.f32.gmra.mxu2 %v6040_v7 }
 0x564   : > { %6088 = vmatmul.f32.gmra.mxu3 %v6041_v47  ;;  %6169 = vmatmul.f32.gmra.mxu0 %v6124_v31 }
 0x566   : > { %v5626_v55 = vpop.f32.mrf.mxu1 }
 0x56a   : > { %5923 = vmatmul.f32.gmra.mxu1 %v9434_v15 }
 0x56b   : > { %6007 = vmatmul.f32.gmra.mxu2 %v6041_v47 }
 0x56c   : > { %6091 = vmatmul.f32.gmra.mxu3 %v6042_v28  ;;  %6172 = vmatmul.f32.gmra.mxu0 %v6125_v44 }
 0x56e   : > { %v5673_v33 = vpop.f32.mrf.mxu2  ;;  %v5747_v15 = vpop.f32.mrf.mxu3 }
 0x56f   : > { %v5674_v60 = vadd.f32 %v5673_v33, %v5626_v55 }
 0x571   : > { %v5777_v12 = vadd.f32 %v5747_v15, %v5674_v60 }
 0x572   : > { %5926 = vmatmul.f32.gmra.mxu1 %v9455_v0  ;;  %v6218_v0 = vld [vmem:[#allocation15 + $0x400] sm:$0xff] }
 0x573   : > { %6010 = vmatmul.f32.gmra.mxu2 %v6042_v28  ;;  %6249 = vmatpush.msrb.mxu1 %v6218_v0 }
 0x574   : > { %6094 = vmatmul.f32.gmra.mxu3 %v6043_v20  ;;  %6175 = vmatmul.f32.gmra.mxu0 %v6126_v23 }
 0x57a   : > { %5929 = vmatmul.f32.gmra.mxu1 %v9476_v17  ;;  %v6046_v17 = vld [vmem:[#allocation4 + $0x51] sm:$0xff] }
 0x57b   : > { %6013 = vmatmul.f32.gmra.mxu2 %v6043_v20 }
 0x57c   : > { %6097 = vmatmul.f32.gmra.mxu3 %v6044_v38  ;;  %6178 = vmatmul.f32.gmra.mxu0 %v6127_v63 }
 0x582   : > { %5932 = vmatmul.f32.gmra.mxu1 %v9492_v14 }
 0x583   : > { %6016 = vmatmul.f32.gmra.mxu2 %v6044_v38 }
 0x584   : > { %6100 = vmatmul.f32.gmra.mxu3 %v6045_v11  ;;  %6181 = vmatmul.f32.gmra.mxu0 %v6128_v29  ;;  %v5629_v22 = vpop.f32.mrf.mxu1 }
 0x586   : > { %v5831_v27 = vpop.f32.mrf.mxu0 }
 0x587   : > { %v9528_v59 = vadd.f32 %v5831_v27, %v5777_v12 }
 0x58a   : > { %5935 = vmatmul.f32.gmra.mxu1 %v9504_v43 }
 0x58b   : > { %6019 = vmatmul.f32.gmra.mxu2 %v6045_v11  ;;  %v5676_v46 = vpop.f32.mrf.mxu2  ;;  %v6211_v11 = vld [vmem:[#allocation4 + $0x3b] sm:$0xff] }
 0x58c   : > { %6103 = vmatmul.f32.gmra.mxu3 %v6046_v17  ;;  %6184 = vmatmul.f32.gmra.mxu0 %v6129_v24  ;;  %v5677_v13 = vadd.f32 %v5676_v46, %v5629_v22  ;;  %v5750_v54 = vpop.f32.mrf.mxu3 }
 0x58e   : > { %v5778_v14 = vadd.f32 %v5750_v54, %v5677_v13  ;;  %v6212_v54 = vld [vmem:[#allocation4 + $0x43] sm:$0xff] }
 0x58f   : > { %v5632_v50 = vpop.f32.mrf.mxu1 }
 0x591   : > { %v5834_v5 = vpop.f32.mrf.mxu0 }
 0x592   : > { %v9531_v1 = vadd.f32 %v5834_v5, %v5778_v14  ;;  %5938 = vmatmul.f32.gmra.mxu1 %v9515_v53 }
 0x593   : > { %6022 = vmatmul.f32.gmra.mxu2 %v6046_v17 }
 0x594   : > { %6106 = vmatmul.f32.gmra.mxu3 %v6047_v9  ;;  %6187 = vmatmul.f32.gmra.mxu0 %v6130_v19 }
 0x596   : > { %v5679_v43 = vpop.f32.mrf.mxu2 }
 0x597   : > { %v5680_v3 = vadd.f32 %v5679_v43, %v5632_v50  ;;  %v5753_v30 = vpop.f32.mrf.mxu3  ;;  %v5635_v45 = vpop.f32.mrf.mxu1 }
 0x599   : > { %v5779_v32 = vadd.f32 %v5753_v30, %v5680_v3  ;;  %v5837_v52 = vpop.f32.mrf.mxu0 }
 0x59a   : > { %5941 = vmatmul.f32.gmra.mxu1 %v9518_v25 }
 0x59b   : > { %v9534_v39 = vadd.f32 %v5837_v52, %v5779_v32  ;;  %6025 = vmatmul.f32.gmra.mxu2 %v6047_v9 }
 0x59c   : > { %6190 = vmatmul.f32.gmra.mxu0 %v6131_v35  ;;  %6109 = vmatmul.f32.gmra.mxu3 %v6048_v2  ;;  %v6214_v35 = vld [vmem:[#allocation4 + $0x53] sm:$0xff] }
 0x59e   : > { %v5682_v53 = vpop.f32.mrf.mxu2 }
 0x59f   : > { %v5683_v41 = vadd.f32 %v5682_v53, %v5635_v45  ;;  %v5756_v49 = vpop.f32.mrf.mxu3  ;;  %v5638_v42 = vpop.f32.mrf.mxu1  ;;  %v6213_v45 = vld [vmem:[#allocation4 + $0x4b] sm:$0xff] }
 0x5a1   : > { %v5780_v51 = vadd.f32 %v5756_v49, %v5683_v41  ;;  %v5840_v18 = vpop.f32.mrf.mxu0  ;;  %v6215_v49 = vld [vmem:[#allocation4 + $0x5b] sm:$0xff] }
 0x5a2   : > { %6250 = vmatmul.f32.vlgmr.msrb.gmra.mxu1 %v6207_v57 }
 0x5a3   : > { %v9537_v8 = vadd.f32 %v5840_v18, %v5780_v51  ;;  %v6216_v51 = vld [vmem:[#allocation4 + $0x63] sm:$0xff] }
 0x5a4   : > { %6193 = vmatmul.f32.gmra.mxu0 %v6132_v21 }
 0x5a6   : > { %v5685_v40 = vpop.f32.mrf.mxu2 }
 0x5a7   : > { %v5686_v16 = vadd.f32 %v5685_v40, %v5638_v42  ;;  %v5759_v58 = vpop.f32.mrf.mxu3  ;;  %v5641_v25 = vpop.f32.mrf.mxu1 }
 0x5a9   : > { %v5781_v26 = vadd.f32 %v5759_v58, %v5686_v16  ;;  %v5843_v37 = vpop.f32.mrf.mxu0 }
 0x5aa   : > { %6253 = vmatmul.f32.gmra.mxu1 %v6208_v48 }
 0x5ab   : > { %v5865_v7 = vadd.f32 %v5843_v37, %v5781_v26 }
 0x5ae   : > { %v5688_v62 = vpop.f32.mrf.mxu2 }
 0x5af   : > { %v5689_v61 = vadd.f32 %v5688_v62, %v5641_v25  ;;  %v5762_v10 = vpop.f32.mrf.mxu3  ;;  %v5644_v47 = vpop.f32.mrf.mxu1 }
 0x5b1   : > { %v5782_v31 = vadd.f32 %v5762_v10, %v5689_v61  ;;  %v5846_v6 = vpop.f32.mrf.mxu0 }
 0x5b2   : > { %6256 = vmatmul.f32.gmra.mxu1 %v6209_v36 }
 0x5b3   : > { %v5866_v28 = vadd.f32 %v5846_v6, %v5782_v31 }
 0x5b6   : > { %v5691_v44 = vpop.f32.mrf.mxu2 }
 0x5b7   : > { %v5692_v56 = vadd.f32 %v5691_v44, %v5644_v47  ;;  %v5765_v55 = vpop.f32.mrf.mxu3  ;;  %v5647_v20 = vpop.f32.mrf.mxu1 }
 0x5b9   : > { %v5783_v23 = vadd.f32 %v5765_v55, %v5692_v56  ;;  %v5849_v33 = vpop.f32.mrf.mxu0 }
 0x5ba   : > { %6259 = vmatmul.f32.gmra.mxu1 %v6210_v34 }
 0x5bb   : > { %v5867_v60 = vadd.f32 %v5849_v33, %v5783_v23  ;;  %v9553_v23 = vld [vmem:[#allocation16] ss:$0 sm:$0xff] }
 0x5be   : > { %v5694_v15 = vpop.f32.mrf.mxu2 }
 0x5bf   : > { %v5695_v12 = vadd.f32 %v5694_v15, %v5647_v20  ;;  %v5768_v38 = vpop.f32.mrf.mxu3  ;;  %v5650_v63 = vpop.f32.mrf.mxu1 }
 0x5c1   : > { %v5784_v4 = vadd.f32 %v5768_v38, %v5695_v12  ;;  %v5852_v0 = vpop.f32.mrf.mxu0 }
 0x5c2   : > { %6262 = vmatmul.f32.gmra.mxu1 %v6211_v11 }
 0x5c3   : > { %v5868_v29 = vadd.f32 %v5852_v0, %v5784_v4 }
 0x5c6   : > { %v5697_v22 = vpop.f32.mrf.mxu2 }
 0x5c7   : > { %v5698_v27 = vadd.f32 %v5697_v22, %v5650_v63  ;;  %v5771_v17 = vpop.f32.mrf.mxu3  ;;  %v5653_v24 = vpop.f32.mrf.mxu1 }
 0x5c9   : > { %v5785_v46 = vadd.f32 %v5771_v17, %v5698_v27  ;;  %v5855_v13 = vpop.f32.mrf.mxu0 }
 0x5ca   : > { %6265 = vmatmul.f32.gmra.mxu1 %v6212_v54 }
 0x5cb   : > { %v5869_v14 = vadd.f32 %v5855_v13, %v5785_v46 }
 0x5ce   : > { %v5700_v50 = vpop.f32.mrf.mxu2 }
 0x5cf   : > { %v5701_v5 = vadd.f32 %v5700_v50, %v5653_v24  ;;  %v5774_v9 = vpop.f32.mrf.mxu3  ;;  %v5915_v19 = vpop.f32.mrf.mxu1 }
 0x5d0   : > { %v5945_v3 = vadd.f32 %v5915_v19, %v9528_v59 }
 0x5d1   : > { %v5786_v43 = vadd.f32 %v5774_v9, %v5701_v5  ;;  %v5858_v30 = vpop.f32.mrf.mxu0 }
 0x5d2   : > { %6268 = vmatmul.f32.gmra.mxu1 %v6213_v45 }
 0x5d3   : > { %v5870_v32 = vadd.f32 %v5858_v30, %v5786_v43 }
 0x5d6   : > { %v5999_v58 = vpop.f32.mrf.mxu2 }
 0x5d7   : > { %v5918_v52 = vpop.f32.mrf.mxu1  ;;  %v6083_v25 = vpop.f32.mrf.mxu3 }
 0x5d8   : > { %v5946_v2 = vadd.f32 %v5918_v52, %v9531_v1 }
 0x5da   : > { %6271 = vmatmul.f32.gmra.mxu1 %v6214_v35 }
 0x5de   : > { %v6002_v48 = vpop.f32.mrf.mxu2 }
 0x5df   : > { %v5921_v53 = vpop.f32.mrf.mxu1  ;;  %v6086_v61 = vpop.f32.mrf.mxu3  ;;  %v6030_v56 = vadd.f32 %v6002_v48, %v5946_v2 }
 0x5e0   : > { %v5947_v41 = vadd.f32 %v5921_v53, %v9534_v39  ;;  %v6167_v39 = vpop.f32.mrf.mxu0 }
 0x5e2   : > { %6274 = vmatmul.f32.gmra.mxu1 %v6215_v49 }
 0x5e6   : > { %v6005_v47 = vpop.f32.mrf.mxu2 }
 0x5e7   : > { %v5924_v42 = vpop.f32.mrf.mxu1  ;;  %v6031_v4 = vadd.f32 %v6005_v47, %v5947_v41 }
 0x5e8   : > { %v5948_v18 = vadd.f32 %v5924_v42, %v9537_v8  ;;  %v6170_v8 = vpop.f32.mrf.mxu0 }
 0x5ea   : > { %6277 = vmatmul.f32.gmra.mxu1 %v6216_v51 }
 0x5ee   : > { %v6008_v20 = vpop.f32.mrf.mxu2 }
 0x5ef   : > { %v5927_v59 = vpop.f32.mrf.mxu1 }
 0x5f0   : > { %v5949_v21 = vadd.f32 %v5927_v59, %v5865_v7  ;;  %v6029_v7 = vadd.f32 %v5999_v58, %v5945_v3  ;;  %v6173_v55 = vpop.f32.mrf.mxu0 }
 0x5f2   : > { %v6113_v36 = vadd.f32 %v6083_v25, %v6029_v7 }
 0x5f4   : > { %v6197_v44 = vadd.f32 %v6167_v39, %v6113_v36 }
 0x5f7   : > { %v5930_v57 = vpop.f32.mrf.mxu1 }
 0x5f8   : > { %v9543_v40 = vadd.f32 %v5930_v57, %v5866_v28  ;;  %v6089_v28 = vpop.f32.mrf.mxu3  ;;  %v6176_v11 = vpop.f32.mrf.mxu0 }
 0x5f9   : > { %v6115_v27 = vadd.f32 %v6089_v28, %v6031_v4 }
 0x5fb   : > { %v6199_v54 = vadd.f32 %v6173_v55, %v6115_v27 }
 0x5ff   : > { %v5933_v16 = vpop.f32.mrf.mxu1 }
 0x600   : > { %v9545_v1 = vadd.f32 %v5933_v16, %v5867_v60  ;;  %v6114_v60 = vadd.f32 %v6086_v61, %v6030_v56  ;;  %v6092_v12 = vpop.f32.mrf.mxu3  ;;  %v6179_v43 = vpop.f32.mrf.mxu0 }
 0x602   : > { %v6198_v63 = vadd.f32 %v6170_v8, %v6114_v60 }
 0x607   : > { %v5936_v26 = vpop.f32.mrf.mxu1 }
 0x608   : > { %v9547_v37 = vadd.f32 %v5936_v26, %v5868_v29  ;;  %v6011_v29 = vpop.f32.mrf.mxu2  ;;  %v6095_v50 = vpop.f32.mrf.mxu3 }
 0x609   : > { %v6033_v2 = vadd.f32 %v6011_v29, %v5949_v21  ;;  %v6182_v39 = vpop.f32.mrf.mxu0 }
 0x60b   : > { %v6117_v59 = vadd.f32 %v6095_v50, %v6033_v2 }
 0x60d   : > { %v6201_v8 = vadd.f32 %v6179_v43, %v6117_v59 }
 0x60f   : > { %v5939_v62 = vpop.f32.mrf.mxu1 }
 0x610   : > { %v9549_v10 = vadd.f32 %v5939_v62, %v5869_v14  ;;  %v6032_v14 = vadd.f32 %v6008_v20, %v5948_v18  ;;  %v6014_v3 = vpop.f32.mrf.mxu2  ;;  %v6098_v42 = vpop.f32.mrf.mxu3 }
 0x611   : > { %v6034_v47 = vadd.f32 %v6014_v3, %v9543_v40 }
 0x612   : > { %v6116_v19 = vadd.f32 %v6092_v12, %v6032_v14 }
 0x613   : > { %v6118_v40 = vadd.f32 %v6098_v42, %v6034_v47 }
 0x614   : > { %v6200_v53 = vadd.f32 %v6176_v11, %v6116_v19 }
 0x615   : > { %v6202_v11 = vadd.f32 %v6182_v39, %v6118_v40 }
 0x617   : > { %v5942_v31 = vpop.f32.mrf.mxu1 }
 0x618   : > { %v9551_v6 = vadd.f32 %v5942_v31, %v5870_v32  ;;  %v6017_v21 = vpop.f32.mrf.mxu2 }
 0x619   : > { %v6035_v29 = vadd.f32 %v6017_v21, %v9545_v1 }
 0x61f   : > { %v6251_v33 = vpop.f32.mrf.mxu1 }
 0x620   : > { %v6281_v34 = vadd.f32 %v6251_v33, %v6197_v44 }
 0x622   : > { %v6295_v15 = vadd.f32 %v9553_v23, %v6281_v34  ;;  %v6101_v34 = vpop.f32.mrf.mxu3 }
 0x624   : > { %v6752_v38 = vmul.f32 -1.442695, %v6295_v15 }
 0x626   : > { %6869 = vpow2.f32 %v6752_v38 }
 0x627   : > { %v6254_v0 = vpop.f32.mrf.mxu1 }
 0x628   : > { %v6282_v22 = vadd.f32 %v6254_v0, %v6198_v63 }
 0x62a   : > { %v6296_v17 = vadd.f32 %v9553_v23, %v6282_v22 }
 0x62c   : > { %v6870_v24 = vpop.eup %6869  ;;  %v6753_v46 = vmul.f32 -1.442695, %v6296_v17  ;;  %v6185_v17 = vpop.f32.mrf.mxu0 }
 0x62d   : > { %v6335_v13 = vadd.f32 1.0, %v6870_v24  ;;  %v6020_v24 = vpop.f32.mrf.mxu2 }
 0x62e   : > { %6871 = vpow2.f32 %v6753_v46 }
 0x62f   : > { %6873 = vrcp.f32 %v6335_v13  ;;  %v6257_v5 = vpop.f32.mrf.mxu1  ;;  %v6356_v57 = vand.u32 2147483648, %v6335_v13  ;;  %v6354_v58 = vand.u32 2147483647, %v6335_v13  ;;  %vm6350_vm9 = vweird.f32 %v6335_v13 }
 0x630   : > { %v6283_v9 = vadd.f32 %v6257_v5, %v6199_v54 }
 0x631   : > { %v6357_v7 = vor.u32 1.1754944e-38, %v6356_v57  ;;  %vm6355_vm11 = vcmp.eq.f32.partialorder %v6354_v58, 8.507059e+37 }
 0x632   : > { %v6297_v30 = vadd.f32 %v9553_v23, %v6283_v9  ;;  %v6119_v9 = vadd.f32 %v6101_v34, %v6035_v29 }
 0x634   : > { %v6872_v45 = vpop.eup %6871  ;;  %v6754_v32 = vmul.f32 -1.442695, %v6297_v30  ;;  %v6188_v57 = vpop.f32.mrf.mxu0 }
 0x635   : > { %v6874_v52 = vpop.eup %6873  ;;  %v6336_v35 = vadd.f32 1.0, %v6872_v45  ;;  %v6104_v45 = vpop.f32.mrf.mxu3 }
 0x636   : > { %v6346_v41 = vmul.f32 %v6874_v52, %v6335_v13  ;;  %6875 = vpow2.f32 %v6754_v32  ;;  %vm6351_vm8 = vweird.f32 %v6874_v52 }
 0x637   : > { %6877 = vrcp.f32 %v6336_v35  ;;  %v6260_v49 = vpop.f32.mrf.mxu1  ;;  %vm6352_vm10 = vmor %vm6350_vm9, %vm6351_vm8  ;;  %v6371_v33 = vand.u32 2147483648, %v6336_v35  ;;  %v6369_v15 = vand.u32 2147483647, %v6336_v35  ;;  %vm6365_vm13 = vweird.f32 %v6336_v35 }
 0x638   : > { %v6347_v51 = vsub.f32 1.0, %v6346_v41  ;;  %v6284_v18 = vadd.f32 %v6260_v49, %v6200_v53  ;;  %v6036_v53 = vadd.f32 %v6020_v24, %v9547_v37 }
 0x639   : > { %v6372_v22 = vor.u32 1.1754944e-38, %v6371_v33  ;;  %vm6370_vm15 = vcmp.eq.f32.partialorder %v6369_v15, 8.507059e+37 }
 0x63a   : > { %v6348_v16 = vmul.f32 %v6874_v52, %v6347_v51  ;;  %v6298_v25 = vadd.f32 %v9553_v23, %v6284_v18 }
 0x63c   : > { %v6876_v26 = vpop.eup %6875  ;;  %v6349_v48 = vadd.f32 %v6874_v52, %v6348_v16  ;;  %v6755_v62 = vmul.f32 -1.442695, %v6298_v25  ;;  %v6023_v16 = vpop.f32.mrf.mxu2 }
 0x63d   : > { %v6878_v61 = vpop.eup %6877  ;;  %v6337_v31 = vadd.f32 1.0, %v6876_v26  ;;  %v6120_v26 = vadd.f32 %v6104_v45, %v6036_v53 }
 0x63e   : > { %v6353_v36 = vsel %vm6352_vm10, %v6874_v52, %v6349_v48  ;;  %v6361_v28 = vmul.f32 %v6878_v61, %v6336_v35  ;;  %6879 = vpow2.f32 %v6755_v62  ;;  %vm6366_vm12 = vweird.f32 %v6878_v61 }
 0x63f   : > { %v6358_v44 = vsel %vm6355_vm11, %v6357_v7, %v6353_v36  ;;  %6881 = vrcp.f32 %v6337_v31  ;;  %v6263_v56 = vpop.f32.mrf.mxu1  ;;  %vm6367_vm14 = vmor %vm6365_vm13, %vm6366_vm12  ;;  %v6386_v19 = vand.u32 2147483648, %v6337_v31  ;;  %v6384_v1 = vand.u32 2147483647, %v6337_v31 }
 0x640   : > { %6495 = vst [vmem:[%s9564_s13] sm:$0xff] %v6358_v44  ;;  %v6362_v55 = vsub.f32 1.0, %v6361_v28  ;;  %v6285_v20 = vadd.f32 %v6263_v56, %v6201_v8  ;;  %vm6380_vm1 = vweird.f32 %v6337_v31  ;;  %v6203_v35 = vadd.f32 %v6185_v17, %v6119_v9  ;;  %v6107_v44 = vpop.f32.mrf.mxu3 }
 0x641   : > { %v6387_v41 = vor.u32 1.1754944e-38, %v6386_v19  ;;  %vm6385_vm3 = vcmp.eq.f32.partialorder %v6384_v1, 8.507059e+37  ;;  %v6204_v7 = vadd.f32 %v6188_v57, %v6120_v26 }
 0x642   : > { %v6363_v60 = vmul.f32 %v6878_v61, %v6362_v55  ;;  %v6299_v12 = vadd.f32 %v9553_v23, %v6285_v20 }
 0x644   : > { %v6880_v38 = vpop.eup %6879  ;;  %v6364_v63 = vadd.f32 %v6878_v61, %v6363_v60  ;;  %v6756_v4 = vmul.f32 -1.442695, %v6299_v12  ;;  %v6191_v12 = vpop.f32.mrf.mxu0 }
 0x645   : > { %v6882_v0 = vpop.eup %6881  ;;  %v6338_v27 = vadd.f32 1.0, %v6880_v38  ;;  %v6026_v38 = vpop.f32.mrf.mxu2 }
 0x646   : > { %v6368_v46 = vsel %vm6367_vm14, %v6878_v61, %v6364_v63  ;;  %v6376_v13 = vmul.f32 %v6882_v0, %v6337_v31  ;;  %6883 = vpow2.f32 %v6756_v4  ;;  %vm6381_vm0 = vweird.f32 %v6882_v0 }
 0x647   : > { %v6373_v54 = vsel %vm6370_vm15, %v6372_v22, %v6368_v46  ;;  %6885 = vrcp.f32 %v6338_v27  ;;  %v6266_v14 = vpop.f32.mrf.mxu1  ;;  %vm6382_vm2 = vmor %vm6380_vm1, %vm6381_vm0  ;;  %v6401_v39 = vand.u32 2147483648, %v6338_v27  ;;  %v6399_v37 = vand.u32 2147483647, %v6338_v27 }
 0x648   : > { %6496 = vst [vmem:[%s9564_s13 + $0x8] sm:$0xff] %v6373_v54  ;;  %v6377_v50 = vsub.f32 1.0, %v6376_v13  ;;  %v6286_v5 = vadd.f32 %v6266_v14, %v6202_v11  ;;  %vm6395_vm5 = vweird.f32 %v6338_v27  ;;  %v6037_v31 = vadd.f32 %v6023_v16, %v9549_v10  ;;  %v6110_v13 = vpop.f32.mrf.mxu3 }
 0x649   : > { %v6402_v36 = vor.u32 1.1754944e-38, %v6401_v39  ;;  %vm6400_vm7 = vcmp.eq.f32.partialorder %v6399_v37, 8.507059e+37  ;;  %v6038_v17 = vadd.f32 %v6026_v38, %v9551_v6 }
 0x64a   : > { %v6378_v43 = vmul.f32 %v6882_v0, %v6377_v50  ;;  %v6300_v3 = vadd.f32 %v9553_v23, %v6286_v5  ;;  %v6121_v60 = vadd.f32 %v6107_v44, %v6037_v31 }
 0x64c   : > { %v6884_v30 = vpop.eup %6883  ;;  %v6379_v32 = vadd.f32 %v6882_v0, %v6378_v43  ;;  %v6757_v52 = vmul.f32 -1.442695, %v6300_v3  ;;  %v6122_v43 = vadd.f32 %v6110_v13, %v6038_v17  ;;  %v6194_v3 = vpop.f32.mrf.mxu0 }
 0x64d   : > { %v6886_v2 = vpop.eup %6885  ;;  %v6339_v49 = vadd.f32 1.0, %v6884_v30 }
 0x64e   : > { %v6383_v42 = vsel %vm6382_vm2, %v6882_v0, %v6379_v32  ;;  %v6391_v51 = vmul.f32 %v6886_v2, %v6338_v27  ;;  %6887 = vpow2.f32 %v6757_v52  ;;  %vm6396_vm4 = vweird.f32 %v6886_v2 }
 0x64f   : > { %v6388_v18 = vsel %vm6385_vm3, %v6387_v41, %v6383_v42  ;;  %6889 = vrcp.f32 %v6339_v49  ;;  %v6269_v59 = vpop.f32.mrf.mxu1  ;;  %vm6397_vm6 = vmor %vm6395_vm5, %vm6396_vm4  ;;  %v6416_v15 = vand.u32 2147483648, %v6339_v49  ;;  %v6414_v10 = vand.u32 2147483647, %v6339_v49 }
 0x650   : > { %6497 = vst [vmem:[%s9564_s13 + $0x10] sm:$0xff] %v6388_v18  ;;  %v6392_v58 = vsub.f32 1.0, %v6391_v51  ;;  %v6287_v25 = vadd.f32 %v6269_v59, %v6203_v35  ;;  %vm6410_vm9 = vweird.f32 %v6339_v49  ;;  %v6205_v27 = vadd.f32 %v6191_v12, %v6121_v60 }
 0x651   : > { %v6417_v24 = vor.u32 1.1754944e-38, %v6416_v15  ;;  %vm6415_vm11 = vcmp.eq.f32.partialorder %v6414_v10, 8.507059e+37  ;;  %v6206_v53 = vadd.f32 %v6194_v3, %v6122_v43 }
 0x652   : > { %v6393_v21 = vmul.f32 %v6886_v2, %v6392_v58  ;;  %v6301_v48 = vadd.f32 %v9553_v23, %v6287_v25 }
 0x654   : > { %v6888_v62 = vpop.eup %6887  ;;  %v6394_v61 = vadd.f32 %v6886_v2, %v6393_v21  ;;  %v6758_v8 = vmul.f32 -1.442695, %v6301_v48 }
 0x655   : > { %v6890_v47 = vpop.eup %6889  ;;  %v6340_v28 = vadd.f32 1.0, %v6888_v62 }
 0x656   : > { %v6398_v56 = vsel %vm6397_vm6, %v6886_v2, %v6394_v61  ;;  %v6406_v55 = vmul.f32 %v6890_v47, %v6339_v49  ;;  %6891 = vpow2.f32 %v6758_v8  ;;  %vm6411_vm8 = vweird.f32 %v6890_v47 }
 0x657   : > { %v6403_v20 = vsel %vm6400_vm7, %v6402_v36, %v6398_v56  ;;  %6893 = vrcp.f32 %v6340_v28  ;;  %v6272_v40 = vpop.f32.mrf.mxu1  ;;  %vm6412_vm10 = vmor %vm6410_vm9, %vm6411_vm8  ;;  %v6431_v1 = vand.u32 2147483648, %v6340_v28  ;;  %v6429_v6 = vand.u32 2147483647, %v6340_v28 }
 0x658   : > { %6498 = vst [vmem:[%s9564_s13 + $0x18] sm:$0xff] %v6403_v20  ;;  %v6407_v33 = vsub.f32 1.0, %v6406_v55  ;;  %v6288_v34 = vadd.f32 %v6272_v40, %v6204_v7  ;;  %vm6425_vm13 = vweird.f32 %v6340_v28 }
 0x659   : > { %v6432_v41 = vor.u32 1.1754944e-38, %v6431_v1  ;;  %vm6430_vm15 = vcmp.eq.f32.partialorder %v6429_v6, 8.507059e+37 }
 0x65a   : > { %v6408_v63 = vmul.f32 %v6890_v47, %v6407_v33  ;;  %v6302_v4 = vadd.f32 %v9553_v23, %v6288_v34 }
 0x65c   : > { %v6892_v0 = vpop.eup %6891  ;;  %v6409_v11 = vadd.f32 %v6890_v47, %v6408_v63  ;;  %v6759_v29 = vmul.f32 -1.442695, %v6302_v4 }
 0x65d   : > { %v6894_v22 = vpop.eup %6893  ;;  %v6341_v46 = vadd.f32 1.0, %v6892_v0 }
 0x65e   : > { %v6413_v54 = vsel %vm6412_vm10, %v6890_v47, %v6409_v11  ;;  %v6421_v14 = vmul.f32 %v6894_v22, %v6340_v28  ;;  %6895 = vpow2.f32 %v6759_v29  ;;  %vm6426_vm12 = vweird.f32 %v6894_v22 }
 0x65f   : > { %v6418_v50 = vsel %vm6415_vm11, %v6417_v24, %v6413_v54  ;;  %6897 = vrcp.f32 %v6341_v46  ;;  %v6275_v5 = vpop.f32.mrf.mxu1  ;;  %vm6427_vm14 = vmor %vm6425_vm13, %vm6426_vm12  ;;  %v6446_v58 = vand.u32 2147483648, %v6341_v46  ;;  %v6444_v26 = vand.u32 2147483647, %v6341_v46 }
 0x660   : > { %6499 = vst [vmem:[%s9564_s13 + $0x20] sm:$0xff] %v6418_v50  ;;  %v6422_v9 = vsub.f32 1.0, %v6421_v14  ;;  %v6289_v19 = vadd.f32 %v6275_v5, %v6205_v27  ;;  %vm6440_vm1 = vweird.f32 %v6341_v46 }
 0x661   : > { %v6447_v61 = vor.u32 1.1754944e-38, %v6446_v58  ;;  %vm6445_vm3 = vcmp.eq.f32.partialorder %v6444_v26, 8.507059e+37 }
 0x662   : > { %v6423_v30 = vmul.f32 %v6894_v22, %v6422_v9  ;;  %v6303_v45 = vadd.f32 %v9553_v23, %v6289_v19 }
 0x664   : > { %v6896_v32 = vpop.eup %6895  ;;  %v6424_v52 = vadd.f32 %v6894_v22, %v6423_v30  ;;  %v6760_v2 = vmul.f32 -1.442695, %v6303_v45 }
 0x665   : > { %v6898_v35 = vpop.eup %6897  ;;  %v6342_v49 = vadd.f32 1.0, %v6896_v32 }
 0x666   : > { %v6428_v42 = vsel %vm6427_vm14, %v6894_v22, %v6424_v52  ;;  %v6436_v51 = vmul.f32 %v6898_v35, %v6341_v46  ;;  %6899 = vpow2.f32 %v6760_v2  ;;  %vm6441_vm0 = vweird.f32 %v6898_v35 }
 0x667   : > { %v6433_v18 = vsel %vm6430_vm15, %v6432_v41, %v6428_v42  ;;  %6901 = vrcp.f32 %v6342_v49  ;;  %v6278_v59 = vpop.f32.mrf.mxu1  ;;  %vm6442_vm2 = vmor %vm6440_vm1, %vm6441_vm0  ;;  %v6461_v28 = vand.u32 2147483648, %v6342_v49  ;;  %vm6455_vm5 = vweird.f32 %v6342_v49 }
 0x668   : > { %6500 = vst [vmem:[%s9564_s13 + $0x28] sm:$0xff] %v6433_v18  ;;  %v6437_v57 = vsub.f32 1.0, %v6436_v51  ;;  %v6290_v16 = vadd.f32 %v6278_v59, %v6206_v53 }
 0x669   : > { %v6462_v40 = vor.u32 1.1754944e-38, %v6461_v28 }
 0x66a   : > { %v6438_v25 = vmul.f32 %v6898_v35, %v6437_v57  ;;  %v6304_v39 = vadd.f32 %v9553_v23, %v6290_v16  ;;  %v6459_v23 = vand.u32 2147483647, %v6342_v49 }
 0x66c   : > { %v6900_v21 = vpop.eup %6899  ;;  %v6439_v37 = vadd.f32 %v6898_v35, %v6438_v25  ;;  %v6761_v48 = vmul.f32 -1.442695, %v6304_v39  ;;  %vm6460_vm7 = vcmp.eq.f32.partialorder %v6459_v23, 8.507059e+37 }
 0x66d   : > { %v6902_v62 = vpop.eup %6901  ;;  %v6343_v8 = vadd.f32 1.0, %v6900_v21 }
 0x66e   : > { %v6443_v47 = vsel %vm6442_vm2, %v6898_v35, %v6439_v37  ;;  %v6451_v7 = vmul.f32 %v6902_v62, %v6342_v49  ;;  %6903 = vpow2.f32 %v6761_v48  ;;  %vm6456_vm4 = vweird.f32 %v6902_v62 }
 0x66f   : > { %v6448_v31 = vsel %vm6445_vm3, %v6447_v61, %v6443_v47  ;;  %6905 = vrcp.f32 %v6343_v8  ;;  %vm6457_vm6 = vmor %vm6455_vm5, %vm6456_vm4  ;;  %v6476_v38 = vand.u32 2147483648, %v6343_v8  ;;  %v6474_v10 = vand.u32 2147483647, %v6343_v8 }
 0x670   : > { %6501 = vst [vmem:[%s9564_s13 + $0x30] sm:$0xff] %v6448_v31  ;;  %v6452_v36 = vsub.f32 1.0, %v6451_v7  ;;  %vm6470_vm9 = vweird.f32 %v6343_v8 }
 0x671   : > { %v6477_v11 = vor.u32 1.1754944e-38, %v6476_v38  ;;  %vm6475_vm11 = vcmp.eq.f32.partialorder %v6474_v10, 8.507059e+37 }
 0x672   : > { %v6453_v44 = vmul.f32 %v6902_v62, %v6452_v36 }
 0x674   : > { %v6904_v56 = vpop.eup %6903  ;;  %v6454_v55 = vadd.f32 %v6902_v62, %v6453_v44 }
 0x675   : > { %v6906_v20 = vpop.eup %6905  ;;  %v6344_v33 = vadd.f32 1.0, %v6904_v56 }
 0x676   : > { %v6458_v34 = vsel %vm6457_vm6, %v6902_v62, %v6454_v55  ;;  %v6466_v60 = vmul.f32 %v6906_v20, %v6343_v8  ;;  %vm6471_vm8 = vweird.f32 %v6906_v20 }
 0x677   : > { %v6463_v15 = vsel %vm6460_vm7, %v6462_v40, %v6458_v34  ;;  %6907 = vrcp.f32 %v6344_v33  ;;  %vm6472_vm10 = vmor %vm6470_vm9, %vm6471_vm8  ;;  %v6491_v24 = vand.u32 2147483648, %v6344_v33  ;;  %v6489_v13 = vand.u32 2147483647, %v6344_v33 }
 0x678   : > { %6502 = vst [vmem:[%s9564_s13 + $0x38] sm:$0xff] %v6463_v15  ;;  %v6467_v12 = vsub.f32 1.0, %v6466_v60  ;;  %vm6485_vm13 = vweird.f32 %v6344_v33 }
 0x679   : > { %v6492_v14 = vor.u32 1.1754944e-38, %v6491_v24  ;;  %vm6490_vm15 = vcmp.eq.f32.partialorder %v6489_v13, 8.507059e+37 }
 0x67a   : > { %v6468_v63 = vmul.f32 %v6906_v20, %v6467_v12 }
 0x67c   : > { %v6469_v4 = vadd.f32 %v6906_v20, %v6468_v63 }
 0x67d   : > { %v6908_v0 = vpop.eup %6907 }
 0x67e   : > { %v6473_v29 = vsel %vm6472_vm10, %v6906_v20, %v6469_v4  ;;  %v6481_v22 = vmul.f32 %v6908_v0, %v6344_v33  ;;  %vm6486_vm12 = vweird.f32 %v6908_v0 }
 0x67f   : > { %v6478_v27 = vsel %vm6475_vm11, %v6477_v11, %v6473_v29  ;;  %vm6487_vm14 = vmor %vm6485_vm13, %vm6486_vm12 }
 0x680   : > { %6503 = vst [vmem:[%s9564_s13 + $0x40] sm:$0xff] %v6478_v27  ;;  %v6482_v17 = vsub.f32 1.0, %v6481_v22 }
 0x682   : > { %v6483_v46 = vmul.f32 %v6908_v0, %v6482_v17 }
 0x684   : > { %v6484_v54 = vadd.f32 %v6908_v0, %v6483_v46 }
 0x686   : > { %v6488_v50 = vsel %vm6487_vm14, %v6908_v0, %v6484_v54 }
 0x687   : > { %v6493_v5 = vsel %vm6490_vm15, %v6492_v14, %v6488_v50 }
 0x688   : > { %6504 = vst [vmem:[%s9564_s13 + $0x48] sm:$0xff] %v6493_v5 }
 0x689 PF: > { %s24_s30 = sadd.s32 1, %s7198_s30  }
 0x68a   : > { %p21_p7 = scmp.ge.s32.totalorder %s24_s30, 4  }
 0x68c   :  { %23 = sbr.rel (!%p21_p7) target bundleno = 5 (0x5), region = 172 }
 0x691   :  { %6526 = vsyncpa [#allocation6], 1 }
 0x692   :  { %6528 = vsyncpa [#allocation6 + $0x1], 1 }
 0x693   :  { %6529 = vsyncpa [#allocation8], 1 }
 0x694   :  { %6530 = vsyncpa [#allocation11], 1 }
 0x695   :  { %6531 = vsyncpa [#allocation14], 1 }
 0x696   :  { %6532 = vsyncpa [#allocation17], 1 }

</bundles_post_ra>
